<compile_context>
chip_gen: v6e
topology: v6e:2x2x1
jax: 0.10.0
libtpu: 0.0.40
codegen_flags: <defaults>
</compile_context>

<pallas_src>
import math

import jax
import jax.numpy as jnp
import numpy as np
from jax.experimental import pallas as pl
from jax.experimental.pallas import tpu as pltpu


# ---------------------------------------------------------------------------
# Constant spatial operators (numpy, built once at trace time)
# ---------------------------------------------------------------------------
def _shift_mats_T(H, W, stride):
    """ST[t, p_in, p_out] = 1 iff input pixel p_in feeds tap t of output pixel
    p_out for a 3x3 / pad-1 / given-stride conv on an HxW map (row-major)."""
    Ho = (H + 2 - 3) // stride + 1
    Wo = (W + 2 - 3) // stride + 1
    st = np.zeros((9, H * W, Ho * Wo), np.float32)
    for t in range(9):
        di, dj = divmod(t, 3)
        for oi in range(Ho):
            ii = oi * stride + di - 1
            if not (0 <= ii < H):
                continue
            for oj in range(Wo):
                jj = oj * stride + dj - 1
                if 0 <= jj < W:
                    st[t, ii * W + jj, oi * Wo + oj] = 1.0
    return st


def _upsample_mat_T(H, W):
    """UT[p_small, p_big] = 1 iff big pixel p_big (on 2H x 2W) has nearest-
    neighbour parent p_small (on H x W)."""
    ut = np.zeros((H * W, 4 * H * W), np.float32)
    for bi in range(2 * H):
        for bj in range(2 * W):
            ut[(bi // 2) * W + (bj // 2), bi * (2 * W) + bj] = 1.0
    return ut


# ---------------------------------------------------------------------------
# Fused forward kernel (one grid step = one image, everything in VMEM)
# ---------------------------------------------------------------------------
def _ladder_kernel(x_ref,
                   st16_ref, st168_ref, st8_ref, st84_ref, ut48_ref, ut816_ref,
                   w1_ref, b1_ref, w2_ref, b2_ref, w3_ref, b3_ref,
                   p0w_ref, p0b_ref, c0w_ref, c0b_ref,
                   p1w_ref, p1b_ref, c1w_ref, c1b_ref,
                   hw_ref, hb_ref,
                   o_ref):
    f32 = jnp.float32

    def conv3x3_relu(a, st_ref, w_ref, b_ref):
        # a: (Cin, Pin) f32, st_ref: (9, Pin, Pout) bf16 (0/1), w_ref: (9, Cout, Cin) f32
        def tap(t):
            shifted = jnp.dot(a, st_ref[t].astype(f32),
                              preferred_element_type=f32)          # (Cin, Pout)
            return jnp.dot(w_ref[t], shifted,
                           preferred_element_type=f32)             # (Cout, Pout)
        acc = tap(0)
        for t in range(1, 9):
            acc = acc + tap(t)
        return jnp.maximum(acc + b_ref[...], 0.0)

    x = x_ref[0]                                                    # (4, 256)

    # ---- backbone (laterals f1, f2; context ctx) ----
    f1 = conv3x3_relu(x, st16_ref, w1_ref, b1_ref)                  # (8, 256)  16x16
    f2 = conv3x3_relu(f1, st168_ref, w2_ref, b2_ref)                # (16, 64)  8x8
    ctx = conv3x3_relu(f2, st84_ref, w3_ref, b3_ref)                # (32, 16)  4x4

    # ---- decoder stage 0: up2x(ctx) + proj(f2) -> 3x3 blend (8x8) ----
    lat0 = jnp.dot(p0w_ref[...], f2, preferred_element_type=f32) + p0b_ref[...]   # (32, 64)
    y = jnp.dot(ctx, ut48_ref[...].astype(f32), preferred_element_type=f32)       # (32, 64)
    y = conv3x3_relu(y + lat0, st8_ref, c0w_ref, c0b_ref)           # (32, 64)

    # ---- decoder stage 1: up2x(y) + proj(f1) -> 3x3 blend (16x16) ----
    lat1 = jnp.dot(p1w_ref[...], f1, preferred_element_type=f32) + p1b_ref[...]   # (32, 256)
    y = jnp.dot(y, ut816_ref[...].astype(f32), preferred_element_type=f32)        # (32, 256)
    y = conv3x3_relu(y + lat1, st16_ref, c1w_ref, c1b_ref)          # (32, 256)

    # ---- head: 1x1, no ReLU ----
    logits = jnp.dot(hw_ref[...], y, preferred_element_type=f32) + hb_ref[...]    # (5, 256)
    o_ref[0] = logits.astype(o_ref.dtype)


# ---------------------------------------------------------------------------
# Wrapper
# ---------------------------------------------------------------------------
@jax.jit
def ladder_model_forward(x_nchw, params):
    N, Cin, H, W = x_nchw.shape
    assert (Cin, H, W) == (4, 16, 16)
    P = H * W

    # Channels-first (C, H*W) layout is NCHW-native: pure reshape, no transpose.
    x2 = x_nchw.reshape(N, Cin, P)

    # Constant 0/1 spatial operators (exact in bf16 -> half the DMA bytes).
    st16 = jnp.asarray(_shift_mats_T(16, 16, 1), jnp.bfloat16)    # (9, 256, 256)
    st168 = jnp.asarray(_shift_mats_T(16, 16, 2), jnp.bfloat16)   # (9, 256, 64)
    st8 = jnp.asarray(_shift_mats_T(8, 8, 1), jnp.bfloat16)       # (9, 64, 64)
    st84 = jnp.asarray(_shift_mats_T(8, 8, 2), jnp.bfloat16)      # (9, 64, 16)
    ut48 = jnp.asarray(_upsample_mat_T(4, 4), jnp.bfloat16)       # (16, 64)
    ut816 = jnp.asarray(_upsample_mat_T(8, 8), jnp.bfloat16)      # (64, 256)

    def wt(w):   # (3,3,Cin,Cout) -> (9, Cout, Cin), tap t = 3*di + dj
        return jnp.transpose(w, (0, 1, 3, 2)).reshape(9, w.shape[3], w.shape[2])

    def pt(w):   # (1,1,Cin,Cout) -> (Cout, Cin)
        return jnp.transpose(w[0, 0], (1, 0))

    def bt(b):   # (C,) -> (C, 1) (broadcasts along the lane/pixel axis)
        return b.reshape(-1, 1)

    args = [
        x2,
        st16, st168, st8, st84, ut48, ut816,
        wt(params["b1_w"]), bt(params["b1_b"]),
        wt(params["b2_w"]), bt(params["b2_b"]),
        wt(params["b3_w"]), bt(params["b3_b"]),
        pt(params["proj0_w"]), bt(params["proj0_b"]),
        wt(params["blend0_w"]), bt(params["blend0_b"]),
        pt(params["proj1_w"]), bt(params["proj1_b"]),
        wt(params["blend1_w"]), bt(params["blend1_b"]),
        pt(params["head_w"]), bt(params["head_b"]),
    ]

    def full_spec(a):
        nd = a.ndim
        return pl.BlockSpec(tuple(a.shape), lambda n, _nd=nd: (0,) * _nd)

    in_specs = [pl.BlockSpec((1, Cin, P), lambda n: (n, 0, 0))]
    in_specs += [full_spec(a) for a in args[1:]]

    out = pl.pallas_call(
        _ladder_kernel,
        out_shape=jax.ShapeDtypeStruct((N, 5, P), jnp.float32),
        grid=(N,),
        in_specs=in_specs,
        out_specs=pl.BlockSpec((1, 5, P), lambda n: (n, 0, 0)),
        compiler_params=pltpu.CompilerParams(
            dimension_semantics=("parallel",)),
    )(*args)

    return out.reshape(N, 5, H, W)


# ---------------------------------------------------------------------------
# Pure-JAX reference (lax.conv) for correctness
# ---------------------------------------------------------------------------
def _ref_conv(x, w, b, *, stride, padding, relu):
    out = jax.lax.conv_general_dilated(
        x, w, window_strides=(stride, stride),
        padding=[(padding, padding), (padding, padding)],
        dimension_numbers=("NHWC", "HWIO", "NHWC"),
        precision=jax.lax.Precision.HIGHEST,
    ) + b.reshape(1, 1, 1, -1)
    return jnp.maximum(out, 0.0) if relu else out


def ladder_model_reference(x_nchw, params):
    x = jnp.transpose(x_nchw, (0, 2, 3, 1))
    f1 = _ref_conv(x, params["b1_w"], params["b1_b"], stride=1, padding=1, relu=True)
    f2 = _ref_conv(f1, params["b2_w"], params["b2_b"], stride=2, padding=1, relu=True)
    ctx = _ref_conv(f2, params["b3_w"], params["b3_b"], stride=2, padding=1, relu=True)
    y = ctx
    for idx, lat in enumerate([f2, f1]):
        lat_p = _ref_conv(lat, params[f"proj{idx}_w"], params[f"proj{idx}_b"],
                          stride=1, padding=0, relu=False)
        y_up = jnp.repeat(jnp.repeat(y, 2, axis=1), 2, axis=2)
        y = _ref_conv(y_up + lat_p, params[f"blend{idx}_w"], params[f"blend{idx}_b"],
                      stride=1, padding=1, relu=True)
    logits = _ref_conv(y, params["head_w"], params["head_b"], stride=1, padding=0, relu=False)
    return jnp.transpose(logits, (0, 3, 1, 2))


# ---------------------------------------------------------------------------
# Deterministic parameter init
# ---------------------------------------------------------------------------
def init_params(key):
    def conv_p(key, k, cin, cout):
        kw, kb = jax.random.split(key)
        fan_in = k * k * cin
        w = jax.random.normal(kw, (k, k, cin, cout), jnp.float32) / math.sqrt(fan_in)
        b = 0.01 * jax.random.normal(kb, (cout,), jnp.float32)
        return w, b

    keys = jax.random.split(key, 8)
    p = {}
    p["b1_w"], p["b1_b"] = conv_p(keys[0], 3, 4, 8)
    p["b2_w"], p["b2_b"] = conv_p(keys[1], 3, 8, 16)
    p["b3_w"], p["b3_b"] = conv_p(keys[2], 3, 16, 32)
    p["proj0_w"], p["proj0_b"] = conv_p(keys[3], 1, 16, 32)   # project lateral f2
    p["blend0_w"], p["blend0_b"] = conv_p(keys[4], 3, 32, 32)
    p["proj1_w"], p["proj1_b"] = conv_p(keys[5], 1, 8, 32)    # project lateral f1
    p["blend1_w"], p["blend1_b"] = conv_p(keys[6], 3, 32, 32)
    p["head_w"], p["head_b"] = conv_p(keys[7], 1, 32, 5)
    return p


if __name__ == "__main__":
    key = jax.random.PRNGKey(0)
    kx, kp = jax.random.split(key)
    x = jax.random.normal(kx, (2, 4, 16, 16), jnp.float32)   # NCHW input
    params = init_params(kp)

    out = jax.block_until_ready(ladder_model_forward(x, params))
    assert out.shape == (2, 5, 16, 16), out.shape

    ref = jax.block_until_ready(ladder_model_reference(x, params))
    # Tolerance is intentional: in-kernel f32 matmuls use the MXU default
    # (reduced-pass) precision while the reference conv uses Precision.HIGHEST.
    np.testing.assert_allclose(np.asarray(out), np.asarray(ref), atol=2e-3, rtol=2e-3)

    print("KERNEL_OK")
</pallas_src>

<mosaic_0001>
module attributes {stable_mosaic.version = 11 : i64} {
  func.func @_ladder_kernel(%arg0: i32, %arg1: memref<1x4x256xf32, #tpu.memory_space<vmem>>, %arg2: memref<9x256x256xbf16, #tpu.memory_space<vmem>>, %arg3: memref<9x256x64xbf16, #tpu.memory_space<vmem>>, %arg4: memref<9x64x64xbf16, #tpu.memory_space<vmem>>, %arg5: memref<9x64x16xbf16, #tpu.memory_space<vmem>>, %arg6: memref<16x64xbf16, #tpu.memory_space<vmem>>, %arg7: memref<64x256xbf16, #tpu.memory_space<vmem>>, %arg8: memref<9x8x4xf32, #tpu.memory_space<vmem>>, %arg9: memref<8x1xf32, #tpu.memory_space<vmem>>, %arg10: memref<9x16x8xf32, #tpu.memory_space<vmem>>, %arg11: memref<16x1xf32, #tpu.memory_space<vmem>>, %arg12: memref<9x32x16xf32, #tpu.memory_space<vmem>>, %arg13: memref<32x1xf32, #tpu.memory_space<vmem>>, %arg14: memref<32x16xf32, #tpu.memory_space<vmem>>, %arg15: memref<32x1xf32, #tpu.memory_space<vmem>>, %arg16: memref<9x32x32xf32, #tpu.memory_space<vmem>>, %arg17: memref<32x1xf32, #tpu.memory_space<vmem>>, %arg18: memref<32x8xf32, #tpu.memory_space<vmem>>, %arg19: memref<32x1xf32, #tpu.memory_space<vmem>>, %arg20: memref<9x32x32xf32, #tpu.memory_space<vmem>>, %arg21: memref<32x1xf32, #tpu.memory_space<vmem>>, %arg22: memref<5x32xf32, #tpu.memory_space<vmem>>, %arg23: memref<5x1xf32, #tpu.memory_space<vmem>>, %arg24: memref<1x5x256xf32, #tpu.memory_space<vmem>>) attributes {dimension_semantics = [#tpu.dimension_semantics<parallel>], iteration_bounds = array<i64: 2>, scalar_prefetch = 0 : i64, scratch_operands = 0 : i64, tpu.core_type = #tpu.core_type<tc>, window_params = [{transform_indices = @transform_0, window_bounds = array<i64: 1, 4, 256>}, {pipeline_mode = #tpu.pipeline_mode<synchronous>, transform_indices = @transform_1, window_bounds = array<i64: 9, 256, 256>}, {pipeline_mode = #tpu.pipeline_mode<synchronous>, transform_indices = @transform_2, window_bounds = array<i64: 9, 256, 64>}, {pipeline_mode = #tpu.pipeline_mode<synchronous>, transform_indices = @transform_3, window_bounds = array<i64: 9, 64, 64>}, {pipeline_mode = #tpu.pipeline_mode<synchronous>, transform_indices = @transform_4, window_bounds = array<i64: 9, 64, 16>}, {pipeline_mode = #tpu.pipeline_mode<synchronous>, transform_indices = @transform_5, window_bounds = array<i64: 16, 64>}, {pipeline_mode = #tpu.pipeline_mode<synchronous>, transform_indices = @transform_6, window_bounds = array<i64: 64, 256>}, {pipeline_mode = #tpu.pipeline_mode<synchronous>, transform_indices = @transform_7, window_bounds = array<i64: 9, 8, 4>}, {pipeline_mode = #tpu.pipeline_mode<synchronous>, transform_indices = @transform_8, window_bounds = array<i64: 8, 1>}, {pipeline_mode = #tpu.pipeline_mode<synchronous>, transform_indices = @transform_9, window_bounds = array<i64: 9, 16, 8>}, {pipeline_mode = #tpu.pipeline_mode<synchronous>, transform_indices = @transform_10, window_bounds = array<i64: 16, 1>}, {pipeline_mode = #tpu.pipeline_mode<synchronous>, transform_indices = @transform_11, window_bounds = array<i64: 9, 32, 16>}, {pipeline_mode = #tpu.pipeline_mode<synchronous>, transform_indices = @transform_12, window_bounds = array<i64: 32, 1>}, {pipeline_mode = #tpu.pipeline_mode<synchronous>, transform_indices = @transform_13, window_bounds = array<i64: 32, 16>}, {pipeline_mode = #tpu.pipeline_mode<synchronous>, transform_indices = @transform_14, window_bounds = array<i64: 32, 1>}, {pipeline_mode = #tpu.pipeline_mode<synchronous>, transform_indices = @transform_15, window_bounds = array<i64: 9, 32, 32>}, {pipeline_mode = #tpu.pipeline_mode<synchronous>, transform_indices = @transform_16, window_bounds = array<i64: 32, 1>}, {pipeline_mode = #tpu.pipeline_mode<synchronous>, transform_indices = @transform_17, window_bounds = array<i64: 32, 8>}, {pipeline_mode = #tpu.pipeline_mode<synchronous>, transform_indices = @transform_18, window_bounds = array<i64: 32, 1>}, {pipeline_mode = #tpu.pipeline_mode<synchronous>, transform_indices = @transform_19, window_bounds = array<i64: 9, 32, 32>}, {pipeline_mode = #tpu.pipeline_mode<synchronous>, transform_indices = @transform_20, window_bounds = array<i64: 32, 1>}, {pipeline_mode = #tpu.pipeline_mode<synchronous>, transform_indices = @transform_21, window_bounds = array<i64: 5, 32>}, {pipeline_mode = #tpu.pipeline_mode<synchronous>, transform_indices = @transform_22, window_bounds = array<i64: 5, 1>}, {transform_indices = @transform_23, window_bounds = array<i64: 1, 5, 256>}]} {
    %c0 = arith.constant 0 : index
    %c0_0 = arith.constant 0 : index
    %c0_1 = arith.constant 0 : index
    %0 = vector.load %arg1[%c0, %c0_0, %c0_1] : memref<1x4x256xf32, #tpu.memory_space<vmem>>, vector<1x4x256xf32>
    %1 = vector.shape_cast %0 : vector<1x4x256xf32> to vector<4x256xf32>
    %c0_2 = arith.constant 0 : index
    %c0_3 = arith.constant 0 : index
    %c0_4 = arith.constant 0 : index
    %2 = vector.load %arg2[%c0_2, %c0_3, %c0_4] : memref<9x256x256xbf16, #tpu.memory_space<vmem>>, vector<1x256x256xbf16>
    %3 = vector.shape_cast %2 : vector<1x256x256xbf16> to vector<256x256xbf16>
    %4 = arith.extf %3 : vector<256x256xbf16> to vector<256x256xf32>
    %cst = arith.constant dense<0.000000e+00> : vector<4x256xf32>
    %5 = tpu.matmul %1, %4, %cst {dimension_numbers = #tpu.dot_dimension_numbers<[1], [0], [0], [1], [0, 0, 1, 1], [], []>} : vector<4x256xf32>, vector<256x256xf32>, vector<4x256xf32> -> vector<4x256xf32>
    %c0_5 = arith.constant 0 : index
    %c0_6 = arith.constant 0 : index
    %c0_7 = arith.constant 0 : index
    %6 = vector.load %arg8[%c0_5, %c0_6, %c0_7] : memref<9x8x4xf32, #tpu.memory_space<vmem>>, vector<1x8x4xf32>
    %7 = vector.shape_cast %6 : vector<1x8x4xf32> to vector<8x4xf32>
    %cst_8 = arith.constant dense<0.000000e+00> : vector<8x256xf32>
    %8 = tpu.matmul %7, %5, %cst_8 {dimension_numbers = #tpu.dot_dimension_numbers<[1], [0], [0], [1], [0, 0, 1, 1], [], []>} : vector<8x4xf32>, vector<4x256xf32>, vector<8x256xf32> -> vector<8x256xf32>
    %c1 = arith.constant 1 : index
    %c0_9 = arith.constant 0 : index
    %c0_10 = arith.constant 0 : index
    %9 = vector.load %arg2[%c1, %c0_9, %c0_10] : memref<9x256x256xbf16, #tpu.memory_space<vmem>>, vector<1x256x256xbf16>
    %10 = vector.shape_cast %9 : vector<1x256x256xbf16> to vector<256x256xbf16>
    %11 = arith.extf %10 : vector<256x256xbf16> to vector<256x256xf32>
    %cst_11 = arith.constant dense<0.000000e+00> : vector<4x256xf32>
    %12 = tpu.matmul %1, %11, %cst_11 {dimension_numbers = #tpu.dot_dimension_numbers<[1], [0], [0], [1], [0, 0, 1, 1], [], []>} : vector<4x256xf32>, vector<256x256xf32>, vector<4x256xf32> -> vector<4x256xf32>
    %c1_12 = arith.constant 1 : index
    %c0_13 = arith.constant 0 : index
    %c0_14 = arith.constant 0 : index
    %13 = vector.load %arg8[%c1_12, %c0_13, %c0_14] : memref<9x8x4xf32, #tpu.memory_space<vmem>>, vector<1x8x4xf32>
    %14 = vector.shape_cast %13 : vector<1x8x4xf32> to vector<8x4xf32>
    %cst_15 = arith.constant dense<0.000000e+00> : vector<8x256xf32>
    %15 = tpu.matmul %14, %12, %cst_15 {dimension_numbers = #tpu.dot_dimension_numbers<[1], [0], [0], [1], [0, 0, 1, 1], [], []>} : vector<8x4xf32>, vector<4x256xf32>, vector<8x256xf32> -> vector<8x256xf32>
    %16 = arith.addf %8, %15 : vector<8x256xf32>
    %c2 = arith.constant 2 : index
    %c0_16 = arith.constant 0 : index
    %c0_17 = arith.constant 0 : index
    %17 = vector.load %arg2[%c2, %c0_16, %c0_17] : memref<9x256x256xbf16, #tpu.memory_space<vmem>>, vector<1x256x256xbf16>
    %18 = vector.shape_cast %17 : vector<1x256x256xbf16> to vector<256x256xbf16>
    %19 = arith.extf %18 : vector<256x256xbf16> to vector<256x256xf32>
    %cst_18 = arith.constant dense<0.000000e+00> : vector<4x256xf32>
    %20 = tpu.matmul %1, %19, %cst_18 {dimension_numbers = #tpu.dot_dimension_numbers<[1], [0], [0], [1], [0, 0, 1, 1], [], []>} : vector<4x256xf32>, vector<256x256xf32>, vector<4x256xf32> -> vector<4x256xf32>
    %c2_19 = arith.constant 2 : index
    %c0_20 = arith.constant 0 : index
    %c0_21 = arith.constant 0 : index
    %21 = vector.load %arg8[%c2_19, %c0_20, %c0_21] : memref<9x8x4xf32, #tpu.memory_space<vmem>>, vector<1x8x4xf32>
    %22 = vector.shape_cast %21 : vector<1x8x4xf32> to vector<8x4xf32>
    %cst_22 = arith.constant dense<0.000000e+00> : vector<8x256xf32>
    %23 = tpu.matmul %22, %20, %cst_22 {dimension_numbers = #tpu.dot_dimension_numbers<[1], [0], [0], [1], [0, 0, 1, 1], [], []>} : vector<8x4xf32>, vector<4x256xf32>, vector<8x256xf32> -> vector<8x256xf32>
    %24 = arith.addf %16, %23 : vector<8x256xf32>
    %c3 = arith.constant 3 : index
    %c0_23 = arith.constant 0 : index
    %c0_24 = arith.constant 0 : index
    %25 = vector.load %arg2[%c3, %c0_23, %c0_24] : memref<9x256x256xbf16, #tpu.memory_space<vmem>>, vector<1x256x256xbf16>
    %26 = vector.shape_cast %25 : vector<1x256x256xbf16> to vector<256x256xbf16>
    %27 = arith.extf %26 : vector<256x256xbf16> to vector<256x256xf32>
    %cst_25 = arith.constant dense<0.000000e+00> : vector<4x256xf32>
    %28 = tpu.matmul %1, %27, %cst_25 {dimension_numbers = #tpu.dot_dimension_numbers<[1], [0], [0], [1], [0, 0, 1, 1], [], []>} : vector<4x256xf32>, vector<256x256xf32>, vector<4x256xf32> -> vector<4x256xf32>
    %c3_26 = arith.constant 3 : index
    %c0_27 = arith.constant 0 : index
    %c0_28 = arith.constant 0 : index
    %29 = vector.load %arg8[%c3_26, %c0_27, %c0_28] : memref<9x8x4xf32, #tpu.memory_space<vmem>>, vector<1x8x4xf32>
    %30 = vector.shape_cast %29 : vector<1x8x4xf32> to vector<8x4xf32>
    %cst_29 = arith.constant dense<0.000000e+00> : vector<8x256xf32>
    %31 = tpu.matmul %30, %28, %cst_29 {dimension_numbers = #tpu.dot_dimension_numbers<[1], [0], [0], [1], [0, 0, 1, 1], [], []>} : vector<8x4xf32>, vector<4x256xf32>, vector<8x256xf32> -> vector<8x256xf32>
    %32 = arith.addf %24, %31 : vector<8x256xf32>
    %c4 = arith.constant 4 : index
    %c0_30 = arith.constant 0 : index
    %c0_31 = arith.constant 0 : index
    %33 = vector.load %arg2[%c4, %c0_30, %c0_31] : memref<9x256x256xbf16, #tpu.memory_space<vmem>>, vector<1x256x256xbf16>
    %34 = vector.shape_cast %33 : vector<1x256x256xbf16> to vector<256x256xbf16>
    %35 = arith.extf %34 : vector<256x256xbf16> to vector<256x256xf32>
    %cst_32 = arith.constant dense<0.000000e+00> : vector<4x256xf32>
    %36 = tpu.matmul %1, %35, %cst_32 {dimension_numbers = #tpu.dot_dimension_numbers<[1], [0], [0], [1], [0, 0, 1, 1], [], []>} : vector<4x256xf32>, vector<256x256xf32>, vector<4x256xf32> -> vector<4x256xf32>
    %c4_33 = arith.constant 4 : index
    %c0_34 = arith.constant 0 : index
    %c0_35 = arith.constant 0 : index
    %37 = vector.load %arg8[%c4_33, %c0_34, %c0_35] : memref<9x8x4xf32, #tpu.memory_space<vmem>>, vector<1x8x4xf32>
    %38 = vector.shape_cast %37 : vector<1x8x4xf32> to vector<8x4xf32>
    %cst_36 = arith.constant dense<0.000000e+00> : vector<8x256xf32>
    %39 = tpu.matmul %38, %36, %cst_36 {dimension_numbers = #tpu.dot_dimension_numbers<[1], [0], [0], [1], [0, 0, 1, 1], [], []>} : vector<8x4xf32>, vector<4x256xf32>, vector<8x256xf32> -> vector<8x256xf32>
    %40 = arith.addf %32, %39 : vector<8x256xf32>
    %c5 = arith.constant 5 : index
    %c0_37 = arith.constant 0 : index
    %c0_38 = arith.constant 0 : index
    %41 = vector.load %arg2[%c5, %c0_37, %c0_38] : memref<9x256x256xbf16, #tpu.memory_space<vmem>>, vector<1x256x256xbf16>
    %42 = vector.shape_cast %41 : vector<1x256x256xbf16> to vector<256x256xbf16>
    %43 = arith.extf %42 : vector<256x256xbf16> to vector<256x256xf32>
    %cst_39 = arith.constant dense<0.000000e+00> : vector<4x256xf32>
    %44 = tpu.matmul %1, %43, %cst_39 {dimension_numbers = #tpu.dot_dimension_numbers<[1], [0], [0], [1], [0, 0, 1, 1], [], []>} : vector<4x256xf32>, vector<256x256xf32>, vector<4x256xf32> -> vector<4x256xf32>
    %c5_40 = arith.constant 5 : index
    %c0_41 = arith.constant 0 : index
    %c0_42 = arith.constant 0 : index
    %45 = vector.load %arg8[%c5_40, %c0_41, %c0_42] : memref<9x8x4xf32, #tpu.memory_space<vmem>>, vector<1x8x4xf32>
    %46 = vector.shape_cast %45 : vector<1x8x4xf32> to vector<8x4xf32>
    %cst_43 = arith.constant dense<0.000000e+00> : vector<8x256xf32>
    %47 = tpu.matmul %46, %44, %cst_43 {dimension_numbers = #tpu.dot_dimension_numbers<[1], [0], [0], [1], [0, 0, 1, 1], [], []>} : vector<8x4xf32>, vector<4x256xf32>, vector<8x256xf32> -> vector<8x256xf32>
    %48 = arith.addf %40, %47 : vector<8x256xf32>
    %c6 = arith.constant 6 : index
    %c0_44 = arith.constant 0 : index
    %c0_45 = arith.constant 0 : index
    %49 = vector.load %arg2[%c6, %c0_44, %c0_45] : memref<9x256x256xbf16, #tpu.memory_space<vmem>>, vector<1x256x256xbf16>
    %50 = vector.shape_cast %49 : vector<1x256x256xbf16> to vector<256x256xbf16>
    %51 = arith.extf %50 : vector<256x256xbf16> to vector<256x256xf32>
    %cst_46 = arith.constant dense<0.000000e+00> : vector<4x256xf32>
    %52 = tpu.matmul %1, %51, %cst_46 {dimension_numbers = #tpu.dot_dimension_numbers<[1], [0], [0], [1], [0, 0, 1, 1], [], []>} : vector<4x256xf32>, vector<256x256xf32>, vector<4x256xf32> -> vector<4x256xf32>
    %c6_47 = arith.constant 6 : index
    %c0_48 = arith.constant 0 : index
    %c0_49 = arith.constant 0 : index
    %53 = vector.load %arg8[%c6_47, %c0_48, %c0_49] : memref<9x8x4xf32, #tpu.memory_space<vmem>>, vector<1x8x4xf32>
    %54 = vector.shape_cast %53 : vector<1x8x4xf32> to vector<8x4xf32>
    %cst_50 = arith.constant dense<0.000000e+00> : vector<8x256xf32>
    %55 = tpu.matmul %54, %52, %cst_50 {dimension_numbers = #tpu.dot_dimension_numbers<[1], [0], [0], [1], [0, 0, 1, 1], [], []>} : vector<8x4xf32>, vector<4x256xf32>, vector<8x256xf32> -> vector<8x256xf32>
    %56 = arith.addf %48, %55 : vector<8x256xf32>
    %c7 = arith.constant 7 : index
    %c0_51 = arith.constant 0 : index
    %c0_52 = arith.constant 0 : index
    %57 = vector.load %arg2[%c7, %c0_51, %c0_52] : memref<9x256x256xbf16, #tpu.memory_space<vmem>>, vector<1x256x256xbf16>
    %58 = vector.shape_cast %57 : vector<1x256x256xbf16> to vector<256x256xbf16>
    %59 = arith.extf %58 : vector<256x256xbf16> to vector<256x256xf32>
    %cst_53 = arith.constant dense<0.000000e+00> : vector<4x256xf32>
    %60 = tpu.matmul %1, %59, %cst_53 {dimension_numbers = #tpu.dot_dimension_numbers<[1], [0], [0], [1], [0, 0, 1, 1], [], []>} : vector<4x256xf32>, vector<256x256xf32>, vector<4x256xf32> -> vector<4x256xf32>
    %c7_54 = arith.constant 7 : index
    %c0_55 = arith.constant 0 : index
    %c0_56 = arith.constant 0 : index
    %61 = vector.load %arg8[%c7_54, %c0_55, %c0_56] : memref<9x8x4xf32, #tpu.memory_space<vmem>>, vector<1x8x4xf32>
    %62 = vector.shape_cast %61 : vector<1x8x4xf32> to vector<8x4xf32>
    %cst_57 = arith.constant dense<0.000000e+00> : vector<8x256xf32>
    %63 = tpu.matmul %62, %60, %cst_57 {dimension_numbers = #tpu.dot_dimension_numbers<[1], [0], [0], [1], [0, 0, 1, 1], [], []>} : vector<8x4xf32>, vector<4x256xf32>, vector<8x256xf32> -> vector<8x256xf32>
    %64 = arith.addf %56, %63 : vector<8x256xf32>
    %c8 = arith.constant 8 : index
    %c0_58 = arith.constant 0 : index
    %c0_59 = arith.constant 0 : index
    %65 = vector.load %arg2[%c8, %c0_58, %c0_59] : memref<9x256x256xbf16, #tpu.memory_space<vmem>>, vector<1x256x256xbf16>
    %66 = vector.shape_cast %65 : vector<1x256x256xbf16> to vector<256x256xbf16>
    %67 = arith.extf %66 : vector<256x256xbf16> to vector<256x256xf32>
    %cst_60 = arith.constant dense<0.000000e+00> : vector<4x256xf32>
    %68 = tpu.matmul %1, %67, %cst_60 {dimension_numbers = #tpu.dot_dimension_numbers<[1], [0], [0], [1], [0, 0, 1, 1], [], []>} : vector<4x256xf32>, vector<256x256xf32>, vector<4x256xf32> -> vector<4x256xf32>
    %c8_61 = arith.constant 8 : index
    %c0_62 = arith.constant 0 : index
    %c0_63 = arith.constant 0 : index
    %69 = vector.load %arg8[%c8_61, %c0_62, %c0_63] : memref<9x8x4xf32, #tpu.memory_space<vmem>>, vector<1x8x4xf32>
    %70 = vector.shape_cast %69 : vector<1x8x4xf32> to vector<8x4xf32>
    %cst_64 = arith.constant dense<0.000000e+00> : vector<8x256xf32>
    %71 = tpu.matmul %70, %68, %cst_64 {dimension_numbers = #tpu.dot_dimension_numbers<[1], [0], [0], [1], [0, 0, 1, 1], [], []>} : vector<8x4xf32>, vector<4x256xf32>, vector<8x256xf32> -> vector<8x256xf32>
    %72 = arith.addf %64, %71 : vector<8x256xf32>
    %c0_65 = arith.constant 0 : index
    %c0_66 = arith.constant 0 : index
    %73 = vector.load %arg9[%c0_65, %c0_66] : memref<8x1xf32, #tpu.memory_space<vmem>>, vector<8x1xf32>
    %74 = vector.broadcast %73 : vector<8x1xf32> to vector<8x256xf32>
    %75 = arith.addf %72, %74 : vector<8x256xf32>
    %cst_67 = arith.constant 0.000000e+00 : f32
    %76 = vector.broadcast %cst_67 : f32 to vector<8x256xf32>
    %77 = arith.maximumf %75, %76 : vector<8x256xf32>
    %c0_68 = arith.constant 0 : index
    %c0_69 = arith.constant 0 : index
    %c0_70 = arith.constant 0 : index
    %78 = vector.load %arg3[%c0_68, %c0_69, %c0_70] : memref<9x256x64xbf16, #tpu.memory_space<vmem>>, vector<1x256x64xbf16>
    %79 = vector.shape_cast %78 : vector<1x256x64xbf16> to vector<256x64xbf16>
    %80 = arith.extf %79 : vector<256x64xbf16> to vector<256x64xf32>
    %cst_71 = arith.constant dense<0.000000e+00> : vector<8x64xf32>
    %81 = tpu.matmul %77, %80, %cst_71 {dimension_numbers = #tpu.dot_dimension_numbers<[1], [0], [0], [1], [0, 0, 1, 1], [], []>} : vector<8x256xf32>, vector<256x64xf32>, vector<8x64xf32> -> vector<8x64xf32>
    %c0_72 = arith.constant 0 : index
    %c0_73 = arith.constant 0 : index
    %c0_74 = arith.constant 0 : index
    %82 = vector.load %arg10[%c0_72, %c0_73, %c0_74] : memref<9x16x8xf32, #tpu.memory_space<vmem>>, vector<1x16x8xf32>
    %83 = vector.shape_cast %82 : vector<1x16x8xf32> to vector<16x8xf32>
    %cst_75 = arith.constant dense<0.000000e+00> : vector<16x64xf32>
    %84 = tpu.matmul %83, %81, %cst_75 {dimension_numbers = #tpu.dot_dimension_numbers<[1], [0], [0], [1], [0, 0, 1, 1], [], []>} : vector<16x8xf32>, vector<8x64xf32>, vector<16x64xf32> -> vector<16x64xf32>
    %c1_76 = arith.constant 1 : index
    %c0_77 = arith.constant 0 : index
    %c0_78 = arith.constant 0 : index
    %85 = vector.load %arg3[%c1_76, %c0_77, %c0_78] : memref<9x256x64xbf16, #tpu.memory_space<vmem>>, vector<1x256x64xbf16>
    %86 = vector.shape_cast %85 : vector<1x256x64xbf16> to vector<256x64xbf16>
    %87 = arith.extf %86 : vector<256x64xbf16> to vector<256x64xf32>
    %cst_79 = arith.constant dense<0.000000e+00> : vector<8x64xf32>
    %88 = tpu.matmul %77, %87, %cst_79 {dimension_numbers = #tpu.dot_dimension_numbers<[1], [0], [0], [1], [0, 0, 1, 1], [], []>} : vector<8x256xf32>, vector<256x64xf32>, vector<8x64xf32> -> vector<8x64xf32>
    %c1_80 = arith.constant 1 : index
    %c0_81 = arith.constant 0 : index
    %c0_82 = arith.constant 0 : index
    %89 = vector.load %arg10[%c1_80, %c0_81, %c0_82] : memref<9x16x8xf32, #tpu.memory_space<vmem>>, vector<1x16x8xf32>
    %90 = vector.shape_cast %89 : vector<1x16x8xf32> to vector<16x8xf32>
    %cst_83 = arith.constant dense<0.000000e+00> : vector<16x64xf32>
    %91 = tpu.matmul %90, %88, %cst_83 {dimension_numbers = #tpu.dot_dimension_numbers<[1], [0], [0], [1], [0, 0, 1, 1], [], []>} : vector<16x8xf32>, vector<8x64xf32>, vector<16x64xf32> -> vector<16x64xf32>
    %92 = arith.addf %84, %91 : vector<16x64xf32>
    %c2_84 = arith.constant 2 : index
    %c0_85 = arith.constant 0 : index
    %c0_86 = arith.constant 0 : index
    %93 = vector.load %arg3[%c2_84, %c0_85, %c0_86] : memref<9x256x64xbf16, #tpu.memory_space<vmem>>, vector<1x256x64xbf16>
    %94 = vector.shape_cast %93 : vector<1x256x64xbf16> to vector<256x64xbf16>
    %95 = arith.extf %94 : vector<256x64xbf16> to vector<256x64xf32>
    %cst_87 = arith.constant dense<0.000000e+00> : vector<8x64xf32>
    %96 = tpu.matmul %77, %95, %cst_87 {dimension_numbers = #tpu.dot_dimension_numbers<[1], [0], [0], [1], [0, 0, 1, 1], [], []>} : vector<8x256xf32>, vector<256x64xf32>, vector<8x64xf32> -> vector<8x64xf32>
    %c2_88 = arith.constant 2 : index
    %c0_89 = arith.constant 0 : index
    %c0_90 = arith.constant 0 : index
    %97 = vector.load %arg10[%c2_88, %c0_89, %c0_90] : memref<9x16x8xf32, #tpu.memory_space<vmem>>, vector<1x16x8xf32>
    %98 = vector.shape_cast %97 : vector<1x16x8xf32> to vector<16x8xf32>
    %cst_91 = arith.constant dense<0.000000e+00> : vector<16x64xf32>
    %99 = tpu.matmul %98, %96, %cst_91 {dimension_numbers = #tpu.dot_dimension_numbers<[1], [0], [0], [1], [0, 0, 1, 1], [], []>} : vector<16x8xf32>, vector<8x64xf32>, vector<16x64xf32> -> vector<16x64xf32>
    %100 = arith.addf %92, %99 : vector<16x64xf32>
    %c3_92 = arith.constant 3 : index
    %c0_93 = arith.constant 0 : index
    %c0_94 = arith.constant 0 : index
    %101 = vector.load %arg3[%c3_92, %c0_93, %c0_94] : memref<9x256x64xbf16, #tpu.memory_space<vmem>>, vector<1x256x64xbf16>
    %102 = vector.shape_cast %101 : vector<1x256x64xbf16> to vector<256x64xbf16>
    %103 = arith.extf %102 : vector<256x64xbf16> to vector<256x64xf32>
    %cst_95 = arith.constant dense<0.000000e+00> : vector<8x64xf32>
    %104 = tpu.matmul %77, %103, %cst_95 {dimension_numbers = #tpu.dot_dimension_numbers<[1], [0], [0], [1], [0, 0, 1, 1], [], []>} : vector<8x256xf32>, vector<256x64xf32>, vector<8x64xf32> -> vector<8x64xf32>
    %c3_96 = arith.constant 3 : index
    %c0_97 = arith.constant 0 : index
    %c0_98 = arith.constant 0 : index
    %105 = vector.load %arg10[%c3_96, %c0_97, %c0_98] : memref<9x16x8xf32, #tpu.memory_space<vmem>>, vector<1x16x8xf32>
    %106 = vector.shape_cast %105 : vector<1x16x8xf32> to vector<16x8xf32>
    %cst_99 = arith.constant dense<0.000000e+00> : vector<16x64xf32>
    %107 = tpu.matmul %106, %104, %cst_99 {dimension_numbers = #tpu.dot_dimension_numbers<[1], [0], [0], [1], [0, 0, 1, 1], [], []>} : vector<16x8xf32>, vector<8x64xf32>, vector<16x64xf32> -> vector<16x64xf32>
    %108 = arith.addf %100, %107 : vector<16x64xf32>
    %c4_100 = arith.constant 4 : index
    %c0_101 = arith.constant 0 : index
    %c0_102 = arith.constant 0 : index
    %109 = vector.load %arg3[%c4_100, %c0_101, %c0_102] : memref<9x256x64xbf16, #tpu.memory_space<vmem>>, vector<1x256x64xbf16>
    %110 = vector.shape_cast %109 : vector<1x256x64xbf16> to vector<256x64xbf16>
    %111 = arith.extf %110 : vector<256x64xbf16> to vector<256x64xf32>
    %cst_103 = arith.constant dense<0.000000e+00> : vector<8x64xf32>
    %112 = tpu.matmul %77, %111, %cst_103 {dimension_numbers = #tpu.dot_dimension_numbers<[1], [0], [0], [1], [0, 0, 1, 1], [], []>} : vector<8x256xf32>, vector<256x64xf32>, vector<8x64xf32> -> vector<8x64xf32>
    %c4_104 = arith.constant 4 : index
    %c0_105 = arith.constant 0 : index
    %c0_106 = arith.constant 0 : index
    %113 = vector.load %arg10[%c4_104, %c0_105, %c0_106] : memref<9x16x8xf32, #tpu.memory_space<vmem>>, vector<1x16x8xf32>
    %114 = vector.shape_cast %113 : vector<1x16x8xf32> to vector<16x8xf32>
    %cst_107 = arith.constant dense<0.000000e+00> : vector<16x64xf32>
    %115 = tpu.matmul %114, %112, %cst_107 {dimension_numbers = #tpu.dot_dimension_numbers<[1], [0], [0], [1], [0, 0, 1, 1], [], []>} : vector<16x8xf32>, vector<8x64xf32>, vector<16x64xf32> -> vector<16x64xf32>
    %116 = arith.addf %108, %115 : vector<16x64xf32>
    %c5_108 = arith.constant 5 : index
    %c0_109 = arith.constant 0 : index
    %c0_110 = arith.constant 0 : index
    %117 = vector.load %arg3[%c5_108, %c0_109, %c0_110] : memref<9x256x64xbf16, #tpu.memory_space<vmem>>, vector<1x256x64xbf16>
    %118 = vector.shape_cast %117 : vector<1x256x64xbf16> to vector<256x64xbf16>
    %119 = arith.extf %118 : vector<256x64xbf16> to vector<256x64xf32>
    %cst_111 = arith.constant dense<0.000000e+00> : vector<8x64xf32>
    %120 = tpu.matmul %77, %119, %cst_111 {dimension_numbers = #tpu.dot_dimension_numbers<[1], [0], [0], [1], [0, 0, 1, 1], [], []>} : vector<8x256xf32>, vector<256x64xf32>, vector<8x64xf32> -> vector<8x64xf32>
    %c5_112 = arith.constant 5 : index
    %c0_113 = arith.constant 0 : index
    %c0_114 = arith.constant 0 : index
    %121 = vector.load %arg10[%c5_112, %c0_113, %c0_114] : memref<9x16x8xf32, #tpu.memory_space<vmem>>, vector<1x16x8xf32>
    %122 = vector.shape_cast %121 : vector<1x16x8xf32> to vector<16x8xf32>
    %cst_115 = arith.constant dense<0.000000e+00> : vector<16x64xf32>
    %123 = tpu.matmul %122, %120, %cst_115 {dimension_numbers = #tpu.dot_dimension_numbers<[1], [0], [0], [1], [0, 0, 1, 1], [], []>} : vector<16x8xf32>, vector<8x64xf32>, vector<16x64xf32> -> vector<16x64xf32>
    %124 = arith.addf %116, %123 : vector<16x64xf32>
    %c6_116 = arith.constant 6 : index
    %c0_117 = arith.constant 0 : index
    %c0_118 = arith.constant 0 : index
    %125 = vector.load %arg3[%c6_116, %c0_117, %c0_118] : memref<9x256x64xbf16, #tpu.memory_space<vmem>>, vector<1x256x64xbf16>
    %126 = vector.shape_cast %125 : vector<1x256x64xbf16> to vector<256x64xbf16>
    %127 = arith.extf %126 : vector<256x64xbf16> to vector<256x64xf32>
    %cst_119 = arith.constant dense<0.000000e+00> : vector<8x64xf32>
    %128 = tpu.matmul %77, %127, %cst_119 {dimension_numbers = #tpu.dot_dimension_numbers<[1], [0], [0], [1], [0, 0, 1, 1], [], []>} : vector<8x256xf32>, vector<256x64xf32>, vector<8x64xf32> -> vector<8x64xf32>
    %c6_120 = arith.constant 6 : index
    %c0_121 = arith.constant 0 : index
    %c0_122 = arith.constant 0 : index
    %129 = vector.load %arg10[%c6_120, %c0_121, %c0_122] : memref<9x16x8xf32, #tpu.memory_space<vmem>>, vector<1x16x8xf32>
    %130 = vector.shape_cast %129 : vector<1x16x8xf32> to vector<16x8xf32>
    %cst_123 = arith.constant dense<0.000000e+00> : vector<16x64xf32>
    %131 = tpu.matmul %130, %128, %cst_123 {dimension_numbers = #tpu.dot_dimension_numbers<[1], [0], [0], [1], [0, 0, 1, 1], [], []>} : vector<16x8xf32>, vector<8x64xf32>, vector<16x64xf32> -> vector<16x64xf32>
    %132 = arith.addf %124, %131 : vector<16x64xf32>
    %c7_124 = arith.constant 7 : index
    %c0_125 = arith.constant 0 : index
    %c0_126 = arith.constant 0 : index
    %133 = vector.load %arg3[%c7_124, %c0_125, %c0_126] : memref<9x256x64xbf16, #tpu.memory_space<vmem>>, vector<1x256x64xbf16>
    %134 = vector.shape_cast %133 : vector<1x256x64xbf16> to vector<256x64xbf16>
    %135 = arith.extf %134 : vector<256x64xbf16> to vector<256x64xf32>
    %cst_127 = arith.constant dense<0.000000e+00> : vector<8x64xf32>
    %136 = tpu.matmul %77, %135, %cst_127 {dimension_numbers = #tpu.dot_dimension_numbers<[1], [0], [0], [1], [0, 0, 1, 1], [], []>} : vector<8x256xf32>, vector<256x64xf32>, vector<8x64xf32> -> vector<8x64xf32>
    %c7_128 = arith.constant 7 : index
    %c0_129 = arith.constant 0 : index
    %c0_130 = arith.constant 0 : index
    %137 = vector.load %arg10[%c7_128, %c0_129, %c0_130] : memref<9x16x8xf32, #tpu.memory_space<vmem>>, vector<1x16x8xf32>
    %138 = vector.shape_cast %137 : vector<1x16x8xf32> to vector<16x8xf32>
    %cst_131 = arith.constant dense<0.000000e+00> : vector<16x64xf32>
    %139 = tpu.matmul %138, %136, %cst_131 {dimension_numbers = #tpu.dot_dimension_numbers<[1], [0], [0], [1], [0, 0, 1, 1], [], []>} : vector<16x8xf32>, vector<8x64xf32>, vector<16x64xf32> -> vector<16x64xf32>
    %140 = arith.addf %132, %139 : vector<16x64xf32>
    %c8_132 = arith.constant 8 : index
    %c0_133 = arith.constant 0 : index
    %c0_134 = arith.constant 0 : index
    %141 = vector.load %arg3[%c8_132, %c0_133, %c0_134] : memref<9x256x64xbf16, #tpu.memory_space<vmem>>, vector<1x256x64xbf16>
    %142 = vector.shape_cast %141 : vector<1x256x64xbf16> to vector<256x64xbf16>
    %143 = arith.extf %142 : vector<256x64xbf16> to vector<256x64xf32>
    %cst_135 = arith.constant dense<0.000000e+00> : vector<8x64xf32>
    %144 = tpu.matmul %77, %143, %cst_135 {dimension_numbers = #tpu.dot_dimension_numbers<[1], [0], [0], [1], [0, 0, 1, 1], [], []>} : vector<8x256xf32>, vector<256x64xf32>, vector<8x64xf32> -> vector<8x64xf32>
    %c8_136 = arith.constant 8 : index
    %c0_137 = arith.constant 0 : index
    %c0_138 = arith.constant 0 : index
    %145 = vector.load %arg10[%c8_136, %c0_137, %c0_138] : memref<9x16x8xf32, #tpu.memory_space<vmem>>, vector<1x16x8xf32>
    %146 = vector.shape_cast %145 : vector<1x16x8xf32> to vector<16x8xf32>
    %cst_139 = arith.constant dense<0.000000e+00> : vector<16x64xf32>
    %147 = tpu.matmul %146, %144, %cst_139 {dimension_numbers = #tpu.dot_dimension_numbers<[1], [0], [0], [1], [0, 0, 1, 1], [], []>} : vector<16x8xf32>, vector<8x64xf32>, vector<16x64xf32> -> vector<16x64xf32>
    %148 = arith.addf %140, %147 : vector<16x64xf32>
    %c0_140 = arith.constant 0 : index
    %c0_141 = arith.constant 0 : index
    %149 = vector.load %arg11[%c0_140, %c0_141] : memref<16x1xf32, #tpu.memory_space<vmem>>, vector<16x1xf32>
    %150 = vector.broadcast %149 : vector<16x1xf32> to vector<16x64xf32>
    %151 = arith.addf %148, %150 : vector<16x64xf32>
    %cst_142 = arith.constant 0.000000e+00 : f32
    %152 = vector.broadcast %cst_142 : f32 to vector<16x64xf32>
    %153 = arith.maximumf %151, %152 : vector<16x64xf32>
    %c0_143 = arith.constant 0 : index
    %c0_144 = arith.constant 0 : index
    %c0_145 = arith.constant 0 : index
    %154 = vector.load %arg5[%c0_143, %c0_144, %c0_145] : memref<9x64x16xbf16, #tpu.memory_space<vmem>>, vector<1x64x16xbf16>
    %155 = vector.shape_cast %154 : vector<1x64x16xbf16> to vector<64x16xbf16>
    %156 = arith.extf %155 : vector<64x16xbf16> to vector<64x16xf32>
    %cst_146 = arith.constant dense<0.000000e+00> : vector<16x16xf32>
    %157 = tpu.matmul %153, %156, %cst_146 {dimension_numbers = #tpu.dot_dimension_numbers<[1], [0], [0], [1], [0, 0, 1, 1], [], []>} : vector<16x64xf32>, vector<64x16xf32>, vector<16x16xf32> -> vector<16x16xf32>
    %c0_147 = arith.constant 0 : index
    %c0_148 = arith.constant 0 : index
    %c0_149 = arith.constant 0 : index
    %158 = vector.load %arg12[%c0_147, %c0_148, %c0_149] : memref<9x32x16xf32, #tpu.memory_space<vmem>>, vector<1x32x16xf32>
    %159 = vector.shape_cast %158 : vector<1x32x16xf32> to vector<32x16xf32>
    %cst_150 = arith.constant dense<0.000000e+00> : vector<32x16xf32>
    %160 = tpu.matmul %159, %157, %cst_150 {dimension_numbers = #tpu.dot_dimension_numbers<[1], [0], [0], [1], [0, 0, 1, 1], [], []>} : vector<32x16xf32>, vector<16x16xf32>, vector<32x16xf32> -> vector<32x16xf32>
    %c1_151 = arith.constant 1 : index
    %c0_152 = arith.constant 0 : index
    %c0_153 = arith.constant 0 : index
    %161 = vector.load %arg5[%c1_151, %c0_152, %c0_153] : memref<9x64x16xbf16, #tpu.memory_space<vmem>>, vector<1x64x16xbf16>
    %162 = vector.shape_cast %161 : vector<1x64x16xbf16> to vector<64x16xbf16>
    %163 = arith.extf %162 : vector<64x16xbf16> to vector<64x16xf32>
    %cst_154 = arith.constant dense<0.000000e+00> : vector<16x16xf32>
    %164 = tpu.matmul %153, %163, %cst_154 {dimension_numbers = #tpu.dot_dimension_numbers<[1], [0], [0], [1], [0, 0, 1, 1], [], []>} : vector<16x64xf32>, vector<64x16xf32>, vector<16x16xf32> -> vector<16x16xf32>
    %c1_155 = arith.constant 1 : index
    %c0_156 = arith.constant 0 : index
    %c0_157 = arith.constant 0 : index
    %165 = vector.load %arg12[%c1_155, %c0_156, %c0_157] : memref<9x32x16xf32, #tpu.memory_space<vmem>>, vector<1x32x16xf32>
    %166 = vector.shape_cast %165 : vector<1x32x16xf32> to vector<32x16xf32>
    %cst_158 = arith.constant dense<0.000000e+00> : vector<32x16xf32>
    %167 = tpu.matmul %166, %164, %cst_158 {dimension_numbers = #tpu.dot_dimension_numbers<[1], [0], [0], [1], [0, 0, 1, 1], [], []>} : vector<32x16xf32>, vector<16x16xf32>, vector<32x16xf32> -> vector<32x16xf32>
    %168 = arith.addf %160, %167 : vector<32x16xf32>
    %c2_159 = arith.constant 2 : index
    %c0_160 = arith.constant 0 : index
    %c0_161 = arith.constant 0 : index
    %169 = vector.load %arg5[%c2_159, %c0_160, %c0_161] : memref<9x64x16xbf16, #tpu.memory_space<vmem>>, vector<1x64x16xbf16>
    %170 = vector.shape_cast %169 : vector<1x64x16xbf16> to vector<64x16xbf16>
    %171 = arith.extf %170 : vector<64x16xbf16> to vector<64x16xf32>
    %cst_162 = arith.constant dense<0.000000e+00> : vector<16x16xf32>
    %172 = tpu.matmul %153, %171, %cst_162 {dimension_numbers = #tpu.dot_dimension_numbers<[1], [0], [0], [1], [0, 0, 1, 1], [], []>} : vector<16x64xf32>, vector<64x16xf32>, vector<16x16xf32> -> vector<16x16xf32>
    %c2_163 = arith.constant 2 : index
    %c0_164 = arith.constant 0 : index
    %c0_165 = arith.constant 0 : index
    %173 = vector.load %arg12[%c2_163, %c0_164, %c0_165] : memref<9x32x16xf32, #tpu.memory_space<vmem>>, vector<1x32x16xf32>
    %174 = vector.shape_cast %173 : vector<1x32x16xf32> to vector<32x16xf32>
    %cst_166 = arith.constant dense<0.000000e+00> : vector<32x16xf32>
    %175 = tpu.matmul %174, %172, %cst_166 {dimension_numbers = #tpu.dot_dimension_numbers<[1], [0], [0], [1], [0, 0, 1, 1], [], []>} : vector<32x16xf32>, vector<16x16xf32>, vector<32x16xf32> -> vector<32x16xf32>
    %176 = arith.addf %168, %175 : vector<32x16xf32>
    %c3_167 = arith.constant 3 : index
    %c0_168 = arith.constant 0 : index
    %c0_169 = arith.constant 0 : index
    %177 = vector.load %arg5[%c3_167, %c0_168, %c0_169] : memref<9x64x16xbf16, #tpu.memory_space<vmem>>, vector<1x64x16xbf16>
    %178 = vector.shape_cast %177 : vector<1x64x16xbf16> to vector<64x16xbf16>
    %179 = arith.extf %178 : vector<64x16xbf16> to vector<64x16xf32>
    %cst_170 = arith.constant dense<0.000000e+00> : vector<16x16xf32>
    %180 = tpu.matmul %153, %179, %cst_170 {dimension_numbers = #tpu.dot_dimension_numbers<[1], [0], [0], [1], [0, 0, 1, 1], [], []>} : vector<16x64xf32>, vector<64x16xf32>, vector<16x16xf32> -> vector<16x16xf32>
    %c3_171 = arith.constant 3 : index
    %c0_172 = arith.constant 0 : index
    %c0_173 = arith.constant 0 : index
    %181 = vector.load %arg12[%c3_171, %c0_172, %c0_173] : memref<9x32x16xf32, #tpu.memory_space<vmem>>, vector<1x32x16xf32>
    %182 = vector.shape_cast %181 : vector<1x32x16xf32> to vector<32x16xf32>
    %cst_174 = arith.constant dense<0.000000e+00> : vector<32x16xf32>
    %183 = tpu.matmul %182, %180, %cst_174 {dimension_numbers = #tpu.dot_dimension_numbers<[1], [0], [0], [1], [0, 0, 1, 1], [], []>} : vector<32x16xf32>, vector<16x16xf32>, vector<32x16xf32> -> vector<32x16xf32>
    %184 = arith.addf %176, %183 : vector<32x16xf32>
    %c4_175 = arith.constant 4 : index
    %c0_176 = arith.constant 0 : index
    %c0_177 = arith.constant 0 : index
    %185 = vector.load %arg5[%c4_175, %c0_176, %c0_177] : memref<9x64x16xbf16, #tpu.memory_space<vmem>>, vector<1x64x16xbf16>
    %186 = vector.shape_cast %185 : vector<1x64x16xbf16> to vector<64x16xbf16>
    %187 = arith.extf %186 : vector<64x16xbf16> to vector<64x16xf32>
    %cst_178 = arith.constant dense<0.000000e+00> : vector<16x16xf32>
    %188 = tpu.matmul %153, %187, %cst_178 {dimension_numbers = #tpu.dot_dimension_numbers<[1], [0], [0], [1], [0, 0, 1, 1], [], []>} : vector<16x64xf32>, vector<64x16xf32>, vector<16x16xf32> -> vector<16x16xf32>
    %c4_179 = arith.constant 4 : index
    %c0_180 = arith.constant 0 : index
    %c0_181 = arith.constant 0 : index
    %189 = vector.load %arg12[%c4_179, %c0_180, %c0_181] : memref<9x32x16xf32, #tpu.memory_space<vmem>>, vector<1x32x16xf32>
    %190 = vector.shape_cast %189 : vector<1x32x16xf32> to vector<32x16xf32>
    %cst_182 = arith.constant dense<0.000000e+00> : vector<32x16xf32>
    %191 = tpu.matmul %190, %188, %cst_182 {dimension_numbers = #tpu.dot_dimension_numbers<[1], [0], [0], [1], [0, 0, 1, 1], [], []>} : vector<32x16xf32>, vector<16x16xf32>, vector<32x16xf32> -> vector<32x16xf32>
    %192 = arith.addf %184, %191 : vector<32x16xf32>
    %c5_183 = arith.constant 5 : index
    %c0_184 = arith.constant 0 : index
    %c0_185 = arith.constant 0 : index
    %193 = vector.load %arg5[%c5_183, %c0_184, %c0_185] : memref<9x64x16xbf16, #tpu.memory_space<vmem>>, vector<1x64x16xbf16>
    %194 = vector.shape_cast %193 : vector<1x64x16xbf16> to vector<64x16xbf16>
    %195 = arith.extf %194 : vector<64x16xbf16> to vector<64x16xf32>
    %cst_186 = arith.constant dense<0.000000e+00> : vector<16x16xf32>
    %196 = tpu.matmul %153, %195, %cst_186 {dimension_numbers = #tpu.dot_dimension_numbers<[1], [0], [0], [1], [0, 0, 1, 1], [], []>} : vector<16x64xf32>, vector<64x16xf32>, vector<16x16xf32> -> vector<16x16xf32>
    %c5_187 = arith.constant 5 : index
    %c0_188 = arith.constant 0 : index
    %c0_189 = arith.constant 0 : index
    %197 = vector.load %arg12[%c5_187, %c0_188, %c0_189] : memref<9x32x16xf32, #tpu.memory_space<vmem>>, vector<1x32x16xf32>
    %198 = vector.shape_cast %197 : vector<1x32x16xf32> to vector<32x16xf32>
    %cst_190 = arith.constant dense<0.000000e+00> : vector<32x16xf32>
    %199 = tpu.matmul %198, %196, %cst_190 {dimension_numbers = #tpu.dot_dimension_numbers<[1], [0], [0], [1], [0, 0, 1, 1], [], []>} : vector<32x16xf32>, vector<16x16xf32>, vector<32x16xf32> -> vector<32x16xf32>
    %200 = arith.addf %192, %199 : vector<32x16xf32>
    %c6_191 = arith.constant 6 : index
    %c0_192 = arith.constant 0 : index
    %c0_193 = arith.constant 0 : index
    %201 = vector.load %arg5[%c6_191, %c0_192, %c0_193] : memref<9x64x16xbf16, #tpu.memory_space<vmem>>, vector<1x64x16xbf16>
    %202 = vector.shape_cast %201 : vector<1x64x16xbf16> to vector<64x16xbf16>
    %203 = arith.extf %202 : vector<64x16xbf16> to vector<64x16xf32>
    %cst_194 = arith.constant dense<0.000000e+00> : vector<16x16xf32>
    %204 = tpu.matmul %153, %203, %cst_194 {dimension_numbers = #tpu.dot_dimension_numbers<[1], [0], [0], [1], [0, 0, 1, 1], [], []>} : vector<16x64xf32>, vector<64x16xf32>, vector<16x16xf32> -> vector<16x16xf32>
    %c6_195 = arith.constant 6 : index
    %c0_196 = arith.constant 0 : index
    %c0_197 = arith.constant 0 : index
    %205 = vector.load %arg12[%c6_195, %c0_196, %c0_197] : memref<9x32x16xf32, #tpu.memory_space<vmem>>, vector<1x32x16xf32>
    %206 = vector.shape_cast %205 : vector<1x32x16xf32> to vector<32x16xf32>
    %cst_198 = arith.constant dense<0.000000e+00> : vector<32x16xf32>
    %207 = tpu.matmul %206, %204, %cst_198 {dimension_numbers = #tpu.dot_dimension_numbers<[1], [0], [0], [1], [0, 0, 1, 1], [], []>} : vector<32x16xf32>, vector<16x16xf32>, vector<32x16xf32> -> vector<32x16xf32>
    %208 = arith.addf %200, %207 : vector<32x16xf32>
    %c7_199 = arith.constant 7 : index
    %c0_200 = arith.constant 0 : index
    %c0_201 = arith.constant 0 : index
    %209 = vector.load %arg5[%c7_199, %c0_200, %c0_201] : memref<9x64x16xbf16, #tpu.memory_space<vmem>>, vector<1x64x16xbf16>
    %210 = vector.shape_cast %209 : vector<1x64x16xbf16> to vector<64x16xbf16>
    %211 = arith.extf %210 : vector<64x16xbf16> to vector<64x16xf32>
    %cst_202 = arith.constant dense<0.000000e+00> : vector<16x16xf32>
    %212 = tpu.matmul %153, %211, %cst_202 {dimension_numbers = #tpu.dot_dimension_numbers<[1], [0], [0], [1], [0, 0, 1, 1], [], []>} : vector<16x64xf32>, vector<64x16xf32>, vector<16x16xf32> -> vector<16x16xf32>
    %c7_203 = arith.constant 7 : index
    %c0_204 = arith.constant 0 : index
    %c0_205 = arith.constant 0 : index
    %213 = vector.load %arg12[%c7_203, %c0_204, %c0_205] : memref<9x32x16xf32, #tpu.memory_space<vmem>>, vector<1x32x16xf32>
    %214 = vector.shape_cast %213 : vector<1x32x16xf32> to vector<32x16xf32>
    %cst_206 = arith.constant dense<0.000000e+00> : vector<32x16xf32>
    %215 = tpu.matmul %214, %212, %cst_206 {dimension_numbers = #tpu.dot_dimension_numbers<[1], [0], [0], [1], [0, 0, 1, 1], [], []>} : vector<32x16xf32>, vector<16x16xf32>, vector<32x16xf32> -> vector<32x16xf32>
    %216 = arith.addf %208, %215 : vector<32x16xf32>
    %c8_207 = arith.constant 8 : index
    %c0_208 = arith.constant 0 : index
    %c0_209 = arith.constant 0 : index
    %217 = vector.load %arg5[%c8_207, %c0_208, %c0_209] : memref<9x64x16xbf16, #tpu.memory_space<vmem>>, vector<1x64x16xbf16>
    %218 = vector.shape_cast %217 : vector<1x64x16xbf16> to vector<64x16xbf16>
    %219 = arith.extf %218 : vector<64x16xbf16> to vector<64x16xf32>
    %cst_210 = arith.constant dense<0.000000e+00> : vector<16x16xf32>
    %220 = tpu.matmul %153, %219, %cst_210 {dimension_numbers = #tpu.dot_dimension_numbers<[1], [0], [0], [1], [0, 0, 1, 1], [], []>} : vector<16x64xf32>, vector<64x16xf32>, vector<16x16xf32> -> vector<16x16xf32>
    %c8_211 = arith.constant 8 : index
    %c0_212 = arith.constant 0 : index
    %c0_213 = arith.constant 0 : index
    %221 = vector.load %arg12[%c8_211, %c0_212, %c0_213] : memref<9x32x16xf32, #tpu.memory_space<vmem>>, vector<1x32x16xf32>
    %222 = vector.shape_cast %221 : vector<1x32x16xf32> to vector<32x16xf32>
    %cst_214 = arith.constant dense<0.000000e+00> : vector<32x16xf32>
    %223 = tpu.matmul %222, %220, %cst_214 {dimension_numbers = #tpu.dot_dimension_numbers<[1], [0], [0], [1], [0, 0, 1, 1], [], []>} : vector<32x16xf32>, vector<16x16xf32>, vector<32x16xf32> -> vector<32x16xf32>
    %224 = arith.addf %216, %223 : vector<32x16xf32>
    %c0_215 = arith.constant 0 : index
    %c0_216 = arith.constant 0 : index
    %225 = vector.load %arg13[%c0_215, %c0_216] : memref<32x1xf32, #tpu.memory_space<vmem>>, vector<32x1xf32>
    %226 = vector.broadcast %225 : vector<32x1xf32> to vector<32x16xf32>
    %227 = arith.addf %224, %226 : vector<32x16xf32>
    %cst_217 = arith.constant 0.000000e+00 : f32
    %228 = vector.broadcast %cst_217 : f32 to vector<32x16xf32>
    %229 = arith.maximumf %227, %228 : vector<32x16xf32>
    %c0_218 = arith.constant 0 : index
    %c0_219 = arith.constant 0 : index
    %230 = vector.load %arg14[%c0_218, %c0_219] : memref<32x16xf32, #tpu.memory_space<vmem>>, vector<32x16xf32>
    %cst_220 = arith.constant dense<0.000000e+00> : vector<32x64xf32>
    %231 = tpu.matmul %230, %153, %cst_220 {dimension_numbers = #tpu.dot_dimension_numbers<[1], [0], [0], [1], [0, 0, 1, 1], [], []>} : vector<32x16xf32>, vector<16x64xf32>, vector<32x64xf32> -> vector<32x64xf32>
    %c0_221 = arith.constant 0 : index
    %c0_222 = arith.constant 0 : index
    %232 = vector.load %arg15[%c0_221, %c0_222] : memref<32x1xf32, #tpu.memory_space<vmem>>, vector<32x1xf32>
    %233 = vector.broadcast %232 : vector<32x1xf32> to vector<32x64xf32>
    %234 = arith.addf %231, %233 : vector<32x64xf32>
    %c0_223 = arith.constant 0 : index
    %c0_224 = arith.constant 0 : index
    %235 = vector.load %arg6[%c0_223, %c0_224] : memref<16x64xbf16, #tpu.memory_space<vmem>>, vector<16x64xbf16>
    %236 = arith.extf %235 : vector<16x64xbf16> to vector<16x64xf32>
    %cst_225 = arith.constant dense<0.000000e+00> : vector<32x64xf32>
    %237 = tpu.matmul %229, %236, %cst_225 {dimension_numbers = #tpu.dot_dimension_numbers<[1], [0], [0], [1], [0, 0, 1, 1], [], []>} : vector<32x16xf32>, vector<16x64xf32>, vector<32x64xf32> -> vector<32x64xf32>
    %238 = arith.addf %237, %234 : vector<32x64xf32>
    %c0_226 = arith.constant 0 : index
    %c0_227 = arith.constant 0 : index
    %c0_228 = arith.constant 0 : index
    %239 = vector.load %arg4[%c0_226, %c0_227, %c0_228] : memref<9x64x64xbf16, #tpu.memory_space<vmem>>, vector<1x64x64xbf16>
    %240 = vector.shape_cast %239 : vector<1x64x64xbf16> to vector<64x64xbf16>
    %241 = arith.extf %240 : vector<64x64xbf16> to vector<64x64xf32>
    %cst_229 = arith.constant dense<0.000000e+00> : vector<32x64xf32>
    %242 = tpu.matmul %238, %241, %cst_229 {dimension_numbers = #tpu.dot_dimension_numbers<[1], [0], [0], [1], [0, 0, 1, 1], [], []>} : vector<32x64xf32>, vector<64x64xf32>, vector<32x64xf32> -> vector<32x64xf32>
    %c0_230 = arith.constant 0 : index
    %c0_231 = arith.constant 0 : index
    %c0_232 = arith.constant 0 : index
    %243 = vector.load %arg16[%c0_230, %c0_231, %c0_232] : memref<9x32x32xf32, #tpu.memory_space<vmem>>, vector<1x32x32xf32>
    %244 = vector.shape_cast %243 : vector<1x32x32xf32> to vector<32x32xf32>
    %cst_233 = arith.constant dense<0.000000e+00> : vector<32x64xf32>
    %245 = tpu.matmul %244, %242, %cst_233 {dimension_numbers = #tpu.dot_dimension_numbers<[1], [0], [0], [1], [0, 0, 1, 1], [], []>} : vector<32x32xf32>, vector<32x64xf32>, vector<32x64xf32> -> vector<32x64xf32>
    %c1_234 = arith.constant 1 : index
    %c0_235 = arith.constant 0 : index
    %c0_236 = arith.constant 0 : index
    %246 = vector.load %arg4[%c1_234, %c0_235, %c0_236] : memref<9x64x64xbf16, #tpu.memory_space<vmem>>, vector<1x64x64xbf16>
    %247 = vector.shape_cast %246 : vector<1x64x64xbf16> to vector<64x64xbf16>
    %248 = arith.extf %247 : vector<64x64xbf16> to vector<64x64xf32>
    %cst_237 = arith.constant dense<0.000000e+00> : vector<32x64xf32>
    %249 = tpu.matmul %238, %248, %cst_237 {dimension_numbers = #tpu.dot_dimension_numbers<[1], [0], [0], [1], [0, 0, 1, 1], [], []>} : vector<32x64xf32>, vector<64x64xf32>, vector<32x64xf32> -> vector<32x64xf32>
    %c1_238 = arith.constant 1 : index
    %c0_239 = arith.constant 0 : index
    %c0_240 = arith.constant 0 : index
    %250 = vector.load %arg16[%c1_238, %c0_239, %c0_240] : memref<9x32x32xf32, #tpu.memory_space<vmem>>, vector<1x32x32xf32>
    %251 = vector.shape_cast %250 : vector<1x32x32xf32> to vector<32x32xf32>
    %cst_241 = arith.constant dense<0.000000e+00> : vector<32x64xf32>
    %252 = tpu.matmul %251, %249, %cst_241 {dimension_numbers = #tpu.dot_dimension_numbers<[1], [0], [0], [1], [0, 0, 1, 1], [], []>} : vector<32x32xf32>, vector<32x64xf32>, vector<32x64xf32> -> vector<32x64xf32>
    %253 = arith.addf %245, %252 : vector<32x64xf32>
    %c2_242 = arith.constant 2 : index
    %c0_243 = arith.constant 0 : index
    %c0_244 = arith.constant 0 : index
    %254 = vector.load %arg4[%c2_242, %c0_243, %c0_244] : memref<9x64x64xbf16, #tpu.memory_space<vmem>>, vector<1x64x64xbf16>
    %255 = vector.shape_cast %254 : vector<1x64x64xbf16> to vector<64x64xbf16>
    %256 = arith.extf %255 : vector<64x64xbf16> to vector<64x64xf32>
    %cst_245 = arith.constant dense<0.000000e+00> : vector<32x64xf32>
    %257 = tpu.matmul %238, %256, %cst_245 {dimension_numbers = #tpu.dot_dimension_numbers<[1], [0], [0], [1], [0, 0, 1, 1], [], []>} : vector<32x64xf32>, vector<64x64xf32>, vector<32x64xf32> -> vector<32x64xf32>
    %c2_246 = arith.constant 2 : index
    %c0_247 = arith.constant 0 : index
    %c0_248 = arith.constant 0 : index
    %258 = vector.load %arg16[%c2_246, %c0_247, %c0_248] : memref<9x32x32xf32, #tpu.memory_space<vmem>>, vector<1x32x32xf32>
    %259 = vector.shape_cast %258 : vector<1x32x32xf32> to vector<32x32xf32>
    %cst_249 = arith.constant dense<0.000000e+00> : vector<32x64xf32>
    %260 = tpu.matmul %259, %257, %cst_249 {dimension_numbers = #tpu.dot_dimension_numbers<[1], [0], [0], [1], [0, 0, 1, 1], [], []>} : vector<32x32xf32>, vector<32x64xf32>, vector<32x64xf32> -> vector<32x64xf32>
    %261 = arith.addf %253, %260 : vector<32x64xf32>
    %c3_250 = arith.constant 3 : index
    %c0_251 = arith.constant 0 : index
    %c0_252 = arith.constant 0 : index
    %262 = vector.load %arg4[%c3_250, %c0_251, %c0_252] : memref<9x64x64xbf16, #tpu.memory_space<vmem>>, vector<1x64x64xbf16>
    %263 = vector.shape_cast %262 : vector<1x64x64xbf16> to vector<64x64xbf16>
    %264 = arith.extf %263 : vector<64x64xbf16> to vector<64x64xf32>
    %cst_253 = arith.constant dense<0.000000e+00> : vector<32x64xf32>
    %265 = tpu.matmul %238, %264, %cst_253 {dimension_numbers = #tpu.dot_dimension_numbers<[1], [0], [0], [1], [0, 0, 1, 1], [], []>} : vector<32x64xf32>, vector<64x64xf32>, vector<32x64xf32> -> vector<32x64xf32>
    %c3_254 = arith.constant 3 : index
    %c0_255 = arith.constant 0 : index
    %c0_256 = arith.constant 0 : index
    %266 = vector.load %arg16[%c3_254, %c0_255, %c0_256] : memref<9x32x32xf32, #tpu.memory_space<vmem>>, vector<1x32x32xf32>
    %267 = vector.shape_cast %266 : vector<1x32x32xf32> to vector<32x32xf32>
    %cst_257 = arith.constant dense<0.000000e+00> : vector<32x64xf32>
    %268 = tpu.matmul %267, %265, %cst_257 {dimension_numbers = #tpu.dot_dimension_numbers<[1], [0], [0], [1], [0, 0, 1, 1], [], []>} : vector<32x32xf32>, vector<32x64xf32>, vector<32x64xf32> -> vector<32x64xf32>
    %269 = arith.addf %261, %268 : vector<32x64xf32>
    %c4_258 = arith.constant 4 : index
    %c0_259 = arith.constant 0 : index
    %c0_260 = arith.constant 0 : index
    %270 = vector.load %arg4[%c4_258, %c0_259, %c0_260] : memref<9x64x64xbf16, #tpu.memory_space<vmem>>, vector<1x64x64xbf16>
    %271 = vector.shape_cast %270 : vector<1x64x64xbf16> to vector<64x64xbf16>
    %272 = arith.extf %271 : vector<64x64xbf16> to vector<64x64xf32>
    %cst_261 = arith.constant dense<0.000000e+00> : vector<32x64xf32>
    %273 = tpu.matmul %238, %272, %cst_261 {dimension_numbers = #tpu.dot_dimension_numbers<[1], [0], [0], [1], [0, 0, 1, 1], [], []>} : vector<32x64xf32>, vector<64x64xf32>, vector<32x64xf32> -> vector<32x64xf32>
    %c4_262 = arith.constant 4 : index
    %c0_263 = arith.constant 0 : index
    %c0_264 = arith.constant 0 : index
    %274 = vector.load %arg16[%c4_262, %c0_263, %c0_264] : memref<9x32x32xf32, #tpu.memory_space<vmem>>, vector<1x32x32xf32>
    %275 = vector.shape_cast %274 : vector<1x32x32xf32> to vector<32x32xf32>
    %cst_265 = arith.constant dense<0.000000e+00> : vector<32x64xf32>
    %276 = tpu.matmul %275, %273, %cst_265 {dimension_numbers = #tpu.dot_dimension_numbers<[1], [0], [0], [1], [0, 0, 1, 1], [], []>} : vector<32x32xf32>, vector<32x64xf32>, vector<32x64xf32> -> vector<32x64xf32>
    %277 = arith.addf %269, %276 : vector<32x64xf32>
    %c5_266 = arith.constant 5 : index
    %c0_267 = arith.constant 0 : index
    %c0_268 = arith.constant 0 : index
    %278 = vector.load %arg4[%c5_266, %c0_267, %c0_268] : memref<9x64x64xbf16, #tpu.memory_space<vmem>>, vector<1x64x64xbf16>
    %279 = vector.shape_cast %278 : vector<1x64x64xbf16> to vector<64x64xbf16>
    %280 = arith.extf %279 : vector<64x64xbf16> to vector<64x64xf32>
    %cst_269 = arith.constant dense<0.000000e+00> : vector<32x64xf32>
    %281 = tpu.matmul %238, %280, %cst_269 {dimension_numbers = #tpu.dot_dimension_numbers<[1], [0], [0], [1], [0, 0, 1, 1], [], []>} : vector<32x64xf32>, vector<64x64xf32>, vector<32x64xf32> -> vector<32x64xf32>
    %c5_270 = arith.constant 5 : index
    %c0_271 = arith.constant 0 : index
    %c0_272 = arith.constant 0 : index
    %282 = vector.load %arg16[%c5_270, %c0_271, %c0_272] : memref<9x32x32xf32, #tpu.memory_space<vmem>>, vector<1x32x32xf32>
    %283 = vector.shape_cast %282 : vector<1x32x32xf32> to vector<32x32xf32>
    %cst_273 = arith.constant dense<0.000000e+00> : vector<32x64xf32>
    %284 = tpu.matmul %283, %281, %cst_273 {dimension_numbers = #tpu.dot_dimension_numbers<[1], [0], [0], [1], [0, 0, 1, 1], [], []>} : vector<32x32xf32>, vector<32x64xf32>, vector<32x64xf32> -> vector<32x64xf32>
    %285 = arith.addf %277, %284 : vector<32x64xf32>
    %c6_274 = arith.constant 6 : index
    %c0_275 = arith.constant 0 : index
    %c0_276 = arith.constant 0 : index
    %286 = vector.load %arg4[%c6_274, %c0_275, %c0_276] : memref<9x64x64xbf16, #tpu.memory_space<vmem>>, vector<1x64x64xbf16>
    %287 = vector.shape_cast %286 : vector<1x64x64xbf16> to vector<64x64xbf16>
    %288 = arith.extf %287 : vector<64x64xbf16> to vector<64x64xf32>
    %cst_277 = arith.constant dense<0.000000e+00> : vector<32x64xf32>
    %289 = tpu.matmul %238, %288, %cst_277 {dimension_numbers = #tpu.dot_dimension_numbers<[1], [0], [0], [1], [0, 0, 1, 1], [], []>} : vector<32x64xf32>, vector<64x64xf32>, vector<32x64xf32> -> vector<32x64xf32>
    %c6_278 = arith.constant 6 : index
    %c0_279 = arith.constant 0 : index
    %c0_280 = arith.constant 0 : index
    %290 = vector.load %arg16[%c6_278, %c0_279, %c0_280] : memref<9x32x32xf32, #tpu.memory_space<vmem>>, vector<1x32x32xf32>
    %291 = vector.shape_cast %290 : vector<1x32x32xf32> to vector<32x32xf32>
    %cst_281 = arith.constant dense<0.000000e+00> : vector<32x64xf32>
    %292 = tpu.matmul %291, %289, %cst_281 {dimension_numbers = #tpu.dot_dimension_numbers<[1], [0], [0], [1], [0, 0, 1, 1], [], []>} : vector<32x32xf32>, vector<32x64xf32>, vector<32x64xf32> -> vector<32x64xf32>
    %293 = arith.addf %285, %292 : vector<32x64xf32>
    %c7_282 = arith.constant 7 : index
    %c0_283 = arith.constant 0 : index
    %c0_284 = arith.constant 0 : index
    %294 = vector.load %arg4[%c7_282, %c0_283, %c0_284] : memref<9x64x64xbf16, #tpu.memory_space<vmem>>, vector<1x64x64xbf16>
    %295 = vector.shape_cast %294 : vector<1x64x64xbf16> to vector<64x64xbf16>
    %296 = arith.extf %295 : vector<64x64xbf16> to vector<64x64xf32>
    %cst_285 = arith.constant dense<0.000000e+00> : vector<32x64xf32>
    %297 = tpu.matmul %238, %296, %cst_285 {dimension_numbers = #tpu.dot_dimension_numbers<[1], [0], [0], [1], [0, 0, 1, 1], [], []>} : vector<32x64xf32>, vector<64x64xf32>, vector<32x64xf32> -> vector<32x64xf32>
    %c7_286 = arith.constant 7 : index
    %c0_287 = arith.constant 0 : index
    %c0_288 = arith.constant 0 : index
    %298 = vector.load %arg16[%c7_286, %c0_287, %c0_288] : memref<9x32x32xf32, #tpu.memory_space<vmem>>, vector<1x32x32xf32>
    %299 = vector.shape_cast %298 : vector<1x32x32xf32> to vector<32x32xf32>
    %cst_289 = arith.constant dense<0.000000e+00> : vector<32x64xf32>
    %300 = tpu.matmul %299, %297, %cst_289 {dimension_numbers = #tpu.dot_dimension_numbers<[1], [0], [0], [1], [0, 0, 1, 1], [], []>} : vector<32x32xf32>, vector<32x64xf32>, vector<32x64xf32> -> vector<32x64xf32>
    %301 = arith.addf %293, %300 : vector<32x64xf32>
    %c8_290 = arith.constant 8 : index
    %c0_291 = arith.constant 0 : index
    %c0_292 = arith.constant 0 : index
    %302 = vector.load %arg4[%c8_290, %c0_291, %c0_292] : memref<9x64x64xbf16, #tpu.memory_space<vmem>>, vector<1x64x64xbf16>
    %303 = vector.shape_cast %302 : vector<1x64x64xbf16> to vector<64x64xbf16>
    %304 = arith.extf %303 : vector<64x64xbf16> to vector<64x64xf32>
    %cst_293 = arith.constant dense<0.000000e+00> : vector<32x64xf32>
    %305 = tpu.matmul %238, %304, %cst_293 {dimension_numbers = #tpu.dot_dimension_numbers<[1], [0], [0], [1], [0, 0, 1, 1], [], []>} : vector<32x64xf32>, vector<64x64xf32>, vector<32x64xf32> -> vector<32x64xf32>
    %c8_294 = arith.constant 8 : index
    %c0_295 = arith.constant 0 : index
    %c0_296 = arith.constant 0 : index
    %306 = vector.load %arg16[%c8_294, %c0_295, %c0_296] : memref<9x32x32xf32, #tpu.memory_space<vmem>>, vector<1x32x32xf32>
    %307 = vector.shape_cast %306 : vector<1x32x32xf32> to vector<32x32xf32>
    %cst_297 = arith.constant dense<0.000000e+00> : vector<32x64xf32>
    %308 = tpu.matmul %307, %305, %cst_297 {dimension_numbers = #tpu.dot_dimension_numbers<[1], [0], [0], [1], [0, 0, 1, 1], [], []>} : vector<32x32xf32>, vector<32x64xf32>, vector<32x64xf32> -> vector<32x64xf32>
    %309 = arith.addf %301, %308 : vector<32x64xf32>
    %c0_298 = arith.constant 0 : index
    %c0_299 = arith.constant 0 : index
    %310 = vector.load %arg17[%c0_298, %c0_299] : memref<32x1xf32, #tpu.memory_space<vmem>>, vector<32x1xf32>
    %311 = vector.broadcast %310 : vector<32x1xf32> to vector<32x64xf32>
    %312 = arith.addf %309, %311 : vector<32x64xf32>
    %cst_300 = arith.constant 0.000000e+00 : f32
    %313 = vector.broadcast %cst_300 : f32 to vector<32x64xf32>
    %314 = arith.maximumf %312, %313 : vector<32x64xf32>
    %c0_301 = arith.constant 0 : index
    %c0_302 = arith.constant 0 : index
    %315 = vector.load %arg18[%c0_301, %c0_302] : memref<32x8xf32, #tpu.memory_space<vmem>>, vector<32x8xf32>
    %cst_303 = arith.constant dense<0.000000e+00> : vector<32x256xf32>
    %316 = tpu.matmul %315, %77, %cst_303 {dimension_numbers = #tpu.dot_dimension_numbers<[1], [0], [0], [1], [0, 0, 1, 1], [], []>} : vector<32x8xf32>, vector<8x256xf32>, vector<32x256xf32> -> vector<32x256xf32>
    %c0_304 = arith.constant 0 : index
    %c0_305 = arith.constant 0 : index
    %317 = vector.load %arg19[%c0_304, %c0_305] : memref<32x1xf32, #tpu.memory_space<vmem>>, vector<32x1xf32>
    %318 = vector.broadcast %317 : vector<32x1xf32> to vector<32x256xf32>
    %319 = arith.addf %316, %318 : vector<32x256xf32>
    %c0_306 = arith.constant 0 : index
    %c0_307 = arith.constant 0 : index
    %320 = vector.load %arg7[%c0_306, %c0_307] : memref<64x256xbf16, #tpu.memory_space<vmem>>, vector<64x256xbf16>
    %321 = arith.extf %320 : vector<64x256xbf16> to vector<64x256xf32>
    %cst_308 = arith.constant dense<0.000000e+00> : vector<32x256xf32>
    %322 = tpu.matmul %314, %321, %cst_308 {dimension_numbers = #tpu.dot_dimension_numbers<[1], [0], [0], [1], [0, 0, 1, 1], [], []>} : vector<32x64xf32>, vector<64x256xf32>, vector<32x256xf32> -> vector<32x256xf32>
    %323 = arith.addf %322, %319 : vector<32x256xf32>
    %c0_309 = arith.constant 0 : index
    %c0_310 = arith.constant 0 : index
    %c0_311 = arith.constant 0 : index
    %324 = vector.load %arg2[%c0_309, %c0_310, %c0_311] : memref<9x256x256xbf16, #tpu.memory_space<vmem>>, vector<1x256x256xbf16>
    %325 = vector.shape_cast %324 : vector<1x256x256xbf16> to vector<256x256xbf16>
    %326 = arith.extf %325 : vector<256x256xbf16> to vector<256x256xf32>
    %cst_312 = arith.constant dense<0.000000e+00> : vector<32x256xf32>
    %327 = tpu.matmul %323, %326, %cst_312 {dimension_numbers = #tpu.dot_dimension_numbers<[1], [0], [0], [1], [0, 0, 1, 1], [], []>} : vector<32x256xf32>, vector<256x256xf32>, vector<32x256xf32> -> vector<32x256xf32>
    %c0_313 = arith.constant 0 : index
    %c0_314 = arith.constant 0 : index
    %c0_315 = arith.constant 0 : index
    %328 = vector.load %arg20[%c0_313, %c0_314, %c0_315] : memref<9x32x32xf32, #tpu.memory_space<vmem>>, vector<1x32x32xf32>
    %329 = vector.shape_cast %328 : vector<1x32x32xf32> to vector<32x32xf32>
    %cst_316 = arith.constant dense<0.000000e+00> : vector<32x256xf32>
    %330 = tpu.matmul %329, %327, %cst_316 {dimension_numbers = #tpu.dot_dimension_numbers<[1], [0], [0], [1], [0, 0, 1, 1], [], []>} : vector<32x32xf32>, vector<32x256xf32>, vector<32x256xf32> -> vector<32x256xf32>
    %c1_317 = arith.constant 1 : index
    %c0_318 = arith.constant 0 : index
    %c0_319 = arith.constant 0 : index
    %331 = vector.load %arg2[%c1_317, %c0_318, %c0_319] : memref<9x256x256xbf16, #tpu.memory_space<vmem>>, vector<1x256x256xbf16>
    %332 = vector.shape_cast %331 : vector<1x256x256xbf16> to vector<256x256xbf16>
    %333 = arith.extf %332 : vector<256x256xbf16> to vector<256x256xf32>
    %cst_320 = arith.constant dense<0.000000e+00> : vector<32x256xf32>
    %334 = tpu.matmul %323, %333, %cst_320 {dimension_numbers = #tpu.dot_dimension_numbers<[1], [0], [0], [1], [0, 0, 1, 1], [], []>} : vector<32x256xf32>, vector<256x256xf32>, vector<32x256xf32> -> vector<32x256xf32>
    %c1_321 = arith.constant 1 : index
    %c0_322 = arith.constant 0 : index
    %c0_323 = arith.constant 0 : index
    %335 = vector.load %arg20[%c1_321, %c0_322, %c0_323] : memref<9x32x32xf32, #tpu.memory_space<vmem>>, vector<1x32x32xf32>
    %336 = vector.shape_cast %335 : vector<1x32x32xf32> to vector<32x32xf32>
    %cst_324 = arith.constant dense<0.000000e+00> : vector<32x256xf32>
    %337 = tpu.matmul %336, %334, %cst_324 {dimension_numbers = #tpu.dot_dimension_numbers<[1], [0], [0], [1], [0, 0, 1, 1], [], []>} : vector<32x32xf32>, vector<32x256xf32>, vector<32x256xf32> -> vector<32x256xf32>
    %338 = arith.addf %330, %337 : vector<32x256xf32>
    %c2_325 = arith.constant 2 : index
    %c0_326 = arith.constant 0 : index
    %c0_327 = arith.constant 0 : index
    %339 = vector.load %arg2[%c2_325, %c0_326, %c0_327] : memref<9x256x256xbf16, #tpu.memory_space<vmem>>, vector<1x256x256xbf16>
    %340 = vector.shape_cast %339 : vector<1x256x256xbf16> to vector<256x256xbf16>
    %341 = arith.extf %340 : vector<256x256xbf16> to vector<256x256xf32>
    %cst_328 = arith.constant dense<0.000000e+00> : vector<32x256xf32>
    %342 = tpu.matmul %323, %341, %cst_328 {dimension_numbers = #tpu.dot_dimension_numbers<[1], [0], [0], [1], [0, 0, 1, 1], [], []>} : vector<32x256xf32>, vector<256x256xf32>, vector<32x256xf32> -> vector<32x256xf32>
    %c2_329 = arith.constant 2 : index
    %c0_330 = arith.constant 0 : index
    %c0_331 = arith.constant 0 : index
    %343 = vector.load %arg20[%c2_329, %c0_330, %c0_331] : memref<9x32x32xf32, #tpu.memory_space<vmem>>, vector<1x32x32xf32>
    %344 = vector.shape_cast %343 : vector<1x32x32xf32> to vector<32x32xf32>
    %cst_332 = arith.constant dense<0.000000e+00> : vector<32x256xf32>
    %345 = tpu.matmul %344, %342, %cst_332 {dimension_numbers = #tpu.dot_dimension_numbers<[1], [0], [0], [1], [0, 0, 1, 1], [], []>} : vector<32x32xf32>, vector<32x256xf32>, vector<32x256xf32> -> vector<32x256xf32>
    %346 = arith.addf %338, %345 : vector<32x256xf32>
    %c3_333 = arith.constant 3 : index
    %c0_334 = arith.constant 0 : index
    %c0_335 = arith.constant 0 : index
    %347 = vector.load %arg2[%c3_333, %c0_334, %c0_335] : memref<9x256x256xbf16, #tpu.memory_space<vmem>>, vector<1x256x256xbf16>
    %348 = vector.shape_cast %347 : vector<1x256x256xbf16> to vector<256x256xbf16>
    %349 = arith.extf %348 : vector<256x256xbf16> to vector<256x256xf32>
    %cst_336 = arith.constant dense<0.000000e+00> : vector<32x256xf32>
    %350 = tpu.matmul %323, %349, %cst_336 {dimension_numbers = #tpu.dot_dimension_numbers<[1], [0], [0], [1], [0, 0, 1, 1], [], []>} : vector<32x256xf32>, vector<256x256xf32>, vector<32x256xf32> -> vector<32x256xf32>
    %c3_337 = arith.constant 3 : index
    %c0_338 = arith.constant 0 : index
    %c0_339 = arith.constant 0 : index
    %351 = vector.load %arg20[%c3_337, %c0_338, %c0_339] : memref<9x32x32xf32, #tpu.memory_space<vmem>>, vector<1x32x32xf32>
    %352 = vector.shape_cast %351 : vector<1x32x32xf32> to vector<32x32xf32>
    %cst_340 = arith.constant dense<0.000000e+00> : vector<32x256xf32>
    %353 = tpu.matmul %352, %350, %cst_340 {dimension_numbers = #tpu.dot_dimension_numbers<[1], [0], [0], [1], [0, 0, 1, 1], [], []>} : vector<32x32xf32>, vector<32x256xf32>, vector<32x256xf32> -> vector<32x256xf32>
    %354 = arith.addf %346, %353 : vector<32x256xf32>
    %c4_341 = arith.constant 4 : index
    %c0_342 = arith.constant 0 : index
    %c0_343 = arith.constant 0 : index
    %355 = vector.load %arg2[%c4_341, %c0_342, %c0_343] : memref<9x256x256xbf16, #tpu.memory_space<vmem>>, vector<1x256x256xbf16>
    %356 = vector.shape_cast %355 : vector<1x256x256xbf16> to vector<256x256xbf16>
    %357 = arith.extf %356 : vector<256x256xbf16> to vector<256x256xf32>
    %cst_344 = arith.constant dense<0.000000e+00> : vector<32x256xf32>
    %358 = tpu.matmul %323, %357, %cst_344 {dimension_numbers = #tpu.dot_dimension_numbers<[1], [0], [0], [1], [0, 0, 1, 1], [], []>} : vector<32x256xf32>, vector<256x256xf32>, vector<32x256xf32> -> vector<32x256xf32>
    %c4_345 = arith.constant 4 : index
    %c0_346 = arith.constant 0 : index
    %c0_347 = arith.constant 0 : index
    %359 = vector.load %arg20[%c4_345, %c0_346, %c0_347] : memref<9x32x32xf32, #tpu.memory_space<vmem>>, vector<1x32x32xf32>
    %360 = vector.shape_cast %359 : vector<1x32x32xf32> to vector<32x32xf32>
    %cst_348 = arith.constant dense<0.000000e+00> : vector<32x256xf32>
    %361 = tpu.matmul %360, %358, %cst_348 {dimension_numbers = #tpu.dot_dimension_numbers<[1], [0], [0], [1], [0, 0, 1, 1], [], []>} : vector<32x32xf32>, vector<32x256xf32>, vector<32x256xf32> -> vector<32x256xf32>
    %362 = arith.addf %354, %361 : vector<32x256xf32>
    %c5_349 = arith.constant 5 : index
    %c0_350 = arith.constant 0 : index
    %c0_351 = arith.constant 0 : index
    %363 = vector.load %arg2[%c5_349, %c0_350, %c0_351] : memref<9x256x256xbf16, #tpu.memory_space<vmem>>, vector<1x256x256xbf16>
    %364 = vector.shape_cast %363 : vector<1x256x256xbf16> to vector<256x256xbf16>
    %365 = arith.extf %364 : vector<256x256xbf16> to vector<256x256xf32>
    %cst_352 = arith.constant dense<0.000000e+00> : vector<32x256xf32>
    %366 = tpu.matmul %323, %365, %cst_352 {dimension_numbers = #tpu.dot_dimension_numbers<[1], [0], [0], [1], [0, 0, 1, 1], [], []>} : vector<32x256xf32>, vector<256x256xf32>, vector<32x256xf32> -> vector<32x256xf32>
    %c5_353 = arith.constant 5 : index
    %c0_354 = arith.constant 0 : index
    %c0_355 = arith.constant 0 : index
    %367 = vector.load %arg20[%c5_353, %c0_354, %c0_355] : memref<9x32x32xf32, #tpu.memory_space<vmem>>, vector<1x32x32xf32>
    %368 = vector.shape_cast %367 : vector<1x32x32xf32> to vector<32x32xf32>
    %cst_356 = arith.constant dense<0.000000e+00> : vector<32x256xf32>
    %369 = tpu.matmul %368, %366, %cst_356 {dimension_numbers = #tpu.dot_dimension_numbers<[1], [0], [0], [1], [0, 0, 1, 1], [], []>} : vector<32x32xf32>, vector<32x256xf32>, vector<32x256xf32> -> vector<32x256xf32>
    %370 = arith.addf %362, %369 : vector<32x256xf32>
    %c6_357 = arith.constant 6 : index
    %c0_358 = arith.constant 0 : index
    %c0_359 = arith.constant 0 : index
    %371 = vector.load %arg2[%c6_357, %c0_358, %c0_359] : memref<9x256x256xbf16, #tpu.memory_space<vmem>>, vector<1x256x256xbf16>
    %372 = vector.shape_cast %371 : vector<1x256x256xbf16> to vector<256x256xbf16>
    %373 = arith.extf %372 : vector<256x256xbf16> to vector<256x256xf32>
    %cst_360 = arith.constant dense<0.000000e+00> : vector<32x256xf32>
    %374 = tpu.matmul %323, %373, %cst_360 {dimension_numbers = #tpu.dot_dimension_numbers<[1], [0], [0], [1], [0, 0, 1, 1], [], []>} : vector<32x256xf32>, vector<256x256xf32>, vector<32x256xf32> -> vector<32x256xf32>
    %c6_361 = arith.constant 6 : index
    %c0_362 = arith.constant 0 : index
    %c0_363 = arith.constant 0 : index
    %375 = vector.load %arg20[%c6_361, %c0_362, %c0_363] : memref<9x32x32xf32, #tpu.memory_space<vmem>>, vector<1x32x32xf32>
    %376 = vector.shape_cast %375 : vector<1x32x32xf32> to vector<32x32xf32>
    %cst_364 = arith.constant dense<0.000000e+00> : vector<32x256xf32>
    %377 = tpu.matmul %376, %374, %cst_364 {dimension_numbers = #tpu.dot_dimension_numbers<[1], [0], [0], [1], [0, 0, 1, 1], [], []>} : vector<32x32xf32>, vector<32x256xf32>, vector<32x256xf32> -> vector<32x256xf32>
    %378 = arith.addf %370, %377 : vector<32x256xf32>
    %c7_365 = arith.constant 7 : index
    %c0_366 = arith.constant 0 : index
    %c0_367 = arith.constant 0 : index
    %379 = vector.load %arg2[%c7_365, %c0_366, %c0_367] : memref<9x256x256xbf16, #tpu.memory_space<vmem>>, vector<1x256x256xbf16>
    %380 = vector.shape_cast %379 : vector<1x256x256xbf16> to vector<256x256xbf16>
    %381 = arith.extf %380 : vector<256x256xbf16> to vector<256x256xf32>
    %cst_368 = arith.constant dense<0.000000e+00> : vector<32x256xf32>
    %382 = tpu.matmul %323, %381, %cst_368 {dimension_numbers = #tpu.dot_dimension_numbers<[1], [0], [0], [1], [0, 0, 1, 1], [], []>} : vector<32x256xf32>, vector<256x256xf32>, vector<32x256xf32> -> vector<32x256xf32>
    %c7_369 = arith.constant 7 : index
    %c0_370 = arith.constant 0 : index
    %c0_371 = arith.constant 0 : index
    %383 = vector.load %arg20[%c7_369, %c0_370, %c0_371] : memref<9x32x32xf32, #tpu.memory_space<vmem>>, vector<1x32x32xf32>
    %384 = vector.shape_cast %383 : vector<1x32x32xf32> to vector<32x32xf32>
    %cst_372 = arith.constant dense<0.000000e+00> : vector<32x256xf32>
    %385 = tpu.matmul %384, %382, %cst_372 {dimension_numbers = #tpu.dot_dimension_numbers<[1], [0], [0], [1], [0, 0, 1, 1], [], []>} : vector<32x32xf32>, vector<32x256xf32>, vector<32x256xf32> -> vector<32x256xf32>
    %386 = arith.addf %378, %385 : vector<32x256xf32>
    %c8_373 = arith.constant 8 : index
    %c0_374 = arith.constant 0 : index
    %c0_375 = arith.constant 0 : index
    %387 = vector.load %arg2[%c8_373, %c0_374, %c0_375] : memref<9x256x256xbf16, #tpu.memory_space<vmem>>, vector<1x256x256xbf16>
    %388 = vector.shape_cast %387 : vector<1x256x256xbf16> to vector<256x256xbf16>
    %389 = arith.extf %388 : vector<256x256xbf16> to vector<256x256xf32>
    %cst_376 = arith.constant dense<0.000000e+00> : vector<32x256xf32>
    %390 = tpu.matmul %323, %389, %cst_376 {dimension_numbers = #tpu.dot_dimension_numbers<[1], [0], [0], [1], [0, 0, 1, 1], [], []>} : vector<32x256xf32>, vector<256x256xf32>, vector<32x256xf32> -> vector<32x256xf32>
    %c8_377 = arith.constant 8 : index
    %c0_378 = arith.constant 0 : index
    %c0_379 = arith.constant 0 : index
    %391 = vector.load %arg20[%c8_377, %c0_378, %c0_379] : memref<9x32x32xf32, #tpu.memory_space<vmem>>, vector<1x32x32xf32>
    %392 = vector.shape_cast %391 : vector<1x32x32xf32> to vector<32x32xf32>
    %cst_380 = arith.constant dense<0.000000e+00> : vector<32x256xf32>
    %393 = tpu.matmul %392, %390, %cst_380 {dimension_numbers = #tpu.dot_dimension_numbers<[1], [0], [0], [1], [0, 0, 1, 1], [], []>} : vector<32x32xf32>, vector<32x256xf32>, vector<32x256xf32> -> vector<32x256xf32>
    %394 = arith.addf %386, %393 : vector<32x256xf32>
    %c0_381 = arith.constant 0 : index
    %c0_382 = arith.constant 0 : index
    %395 = vector.load %arg21[%c0_381, %c0_382] : memref<32x1xf32, #tpu.memory_space<vmem>>, vector<32x1xf32>
    %396 = vector.broadcast %395 : vector<32x1xf32> to vector<32x256xf32>
    %397 = arith.addf %394, %396 : vector<32x256xf32>
    %cst_383 = arith.constant 0.000000e+00 : f32
    %398 = vector.broadcast %cst_383 : f32 to vector<32x256xf32>
    %399 = arith.maximumf %397, %398 : vector<32x256xf32>
    %c0_384 = arith.constant 0 : index
    %c0_385 = arith.constant 0 : index
    %400 = vector.load %arg22[%c0_384, %c0_385] : memref<5x32xf32, #tpu.memory_space<vmem>>, vector<5x32xf32>
    %cst_386 = arith.constant dense<0.000000e+00> : vector<5x256xf32>
    %401 = tpu.matmul %400, %399, %cst_386 {dimension_numbers = #tpu.dot_dimension_numbers<[1], [0], [0], [1], [0, 0, 1, 1], [], []>} : vector<5x32xf32>, vector<32x256xf32>, vector<5x256xf32> -> vector<5x256xf32>
    %c0_387 = arith.constant 0 : index
    %c0_388 = arith.constant 0 : index
    %402 = vector.load %arg23[%c0_387, %c0_388] : memref<5x1xf32, #tpu.memory_space<vmem>>, vector<5x1xf32>
    %403 = vector.broadcast %402 : vector<5x1xf32> to vector<5x256xf32>
    %404 = arith.addf %401, %403 : vector<5x256xf32>
    %c0_389 = arith.constant 0 : index
    %c0_390 = arith.constant 0 : index
    %c0_391 = arith.constant 0 : index
    %405 = vector.load %arg24[%c0_389, %c0_390, %c0_391] : memref<1x5x256xf32, #tpu.memory_space<vmem>>, vector<1x5x256xf32>
    %406 = vector.shape_cast %405 : vector<1x5x256xf32> to vector<5x256xf32>
    %407 = vector.shape_cast %404 : vector<5x256xf32> to vector<1x5x256xf32>
    tpu.vector_store %arg24[%c0_389, %c0_390, %c0_391], %407 {strides = array<i32>} : memref<1x5x256xf32, #tpu.memory_space<vmem>>, vector<1x5x256xf32>,
    return
  }
  func.func @transform_0(%arg0: i32) -> (i32, i32, i32) {
    %c0_i32 = arith.constant 0 : i32
    %c0_i32_0 = arith.constant 0 : i32
    %c0_i32_1 = arith.constant 0 : i32
    return %arg0, %c0_i32, %c0_i32_0 : i32, i32, i32
  }
  func.func @transform_1(%arg0: i32) -> (i32, i32, i32) {
    %c0_i32 = arith.constant 0 : i32
    %c0_i32_0 = arith.constant 0 : i32
    %c0_i32_1 = arith.constant 0 : i32
    %c0_i32_2 = arith.constant 0 : i32
    return %c0_i32, %c0_i32_0, %c0_i32_1 : i32, i32, i32
  }
  func.func @transform_2(%arg0: i32) -> (i32, i32, i32) {
    %c0_i32 = arith.constant 0 : i32
    %c0_i32_0 = arith.constant 0 : i32
    %c0_i32_1 = arith.constant 0 : i32
    %c0_i32_2 = arith.constant 0 : i32
    return %c0_i32, %c0_i32_0, %c0_i32_1 : i32, i32, i32
  }
  func.func @transform_3(%arg0: i32) -> (i32, i32, i32) {
    %c0_i32 = arith.constant 0 : i32
    %c0_i32_0 = arith.constant 0 : i32
    %c0_i32_1 = arith.constant 0 : i32
    %c0_i32_2 = arith.constant 0 : i32
    return %c0_i32, %c0_i32_0, %c0_i32_1 : i32, i32, i32
  }
  func.func @transform_4(%arg0: i32) -> (i32, i32, i32) {
    %c0_i32 = arith.constant 0 : i32
    %c0_i32_0 = arith.constant 0 : i32
    %c0_i32_1 = arith.constant 0 : i32
    %c0_i32_2 = arith.constant 0 : i32
    return %c0_i32, %c0_i32_0, %c0_i32_1 : i32, i32, i32
  }
  func.func @transform_5(%arg0: i32) -> (i32, i32) {
    %c0_i32 = arith.constant 0 : i32
    %c0_i32_0 = arith.constant 0 : i32
    %c0_i32_1 = arith.constant 0 : i32
    return %c0_i32, %c0_i32_0 : i32, i32
  }
  func.func @transform_6(%arg0: i32) -> (i32, i32) {
    %c0_i32 = arith.constant 0 : i32
    %c0_i32_0 = arith.constant 0 : i32
    %c0_i32_1 = arith.constant 0 : i32
    return %c0_i32, %c0_i32_0 : i32, i32
  }
  func.func @transform_7(%arg0: i32) -> (i32, i32, i32) {
    %c0_i32 = arith.constant 0 : i32
    %c0_i32_0 = arith.constant 0 : i32
    %c0_i32_1 = arith.constant 0 : i32
    %c0_i32_2 = arith.constant 0 : i32
    return %c0_i32, %c0_i32_0, %c0_i32_1 : i32, i32, i32
  }
  func.func @transform_8(%arg0: i32) -> (i32, i32) {
    %c0_i32 = arith.constant 0 : i32
    %c0_i32_0 = arith.constant 0 : i32
    %c0_i32_1 = arith.constant 0 : i32
    return %c0_i32, %c0_i32_0 : i32, i32
  }
  func.func @transform_9(%arg0: i32) -> (i32, i32, i32) {
    %c0_i32 = arith.constant 0 : i32
    %c0_i32_0 = arith.constant 0 : i32
    %c0_i32_1 = arith.constant 0 : i32
    %c0_i32_2 = arith.constant 0 : i32
    return %c0_i32, %c0_i32_0, %c0_i32_1 : i32, i32, i32
  }
  func.func @transform_10(%arg0: i32) -> (i32, i32) {
    %c0_i32 = arith.constant 0 : i32
    %c0_i32_0 = arith.constant 0 : i32
    %c0_i32_1 = arith.constant 0 : i32
    return %c0_i32, %c0_i32_0 : i32, i32
  }
  func.func @transform_11(%arg0: i32) -> (i32, i32, i32) {
    %c0_i32 = arith.constant 0 : i32
    %c0_i32_0 = arith.constant 0 : i32
    %c0_i32_1 = arith.constant 0 : i32
    %c0_i32_2 = arith.constant 0 : i32
    return %c0_i32, %c0_i32_0, %c0_i32_1 : i32, i32, i32
  }
  func.func @transform_12(%arg0: i32) -> (i32, i32) {
    %c0_i32 = arith.constant 0 : i32
    %c0_i32_0 = arith.constant 0 : i32
    %c0_i32_1 = arith.constant 0 : i32
    return %c0_i32, %c0_i32_0 : i32, i32
  }
  func.func @transform_13(%arg0: i32) -> (i32, i32) {
    %c0_i32 = arith.constant 0 : i32
    %c0_i32_0 = arith.constant 0 : i32
    %c0_i32_1 = arith.constant 0 : i32
    return %c0_i32, %c0_i32_0 : i32, i32
  }
  func.func @transform_14(%arg0: i32) -> (i32, i32) {
    %c0_i32 = arith.constant 0 : i32
    %c0_i32_0 = arith.constant 0 : i32
    %c0_i32_1 = arith.constant 0 : i32
    return %c0_i32, %c0_i32_0 : i32, i32
  }
  func.func @transform_15(%arg0: i32) -> (i32, i32, i32) {
    %c0_i32 = arith.constant 0 : i32
    %c0_i32_0 = arith.constant 0 : i32
    %c0_i32_1 = arith.constant 0 : i32
    %c0_i32_2 = arith.constant 0 : i32
    return %c0_i32, %c0_i32_0, %c0_i32_1 : i32, i32, i32
  }
  func.func @transform_16(%arg0: i32) -> (i32, i32) {
    %c0_i32 = arith.constant 0 : i32
    %c0_i32_0 = arith.constant 0 : i32
    %c0_i32_1 = arith.constant 0 : i32
    return %c0_i32, %c0_i32_0 : i32, i32
  }
  func.func @transform_17(%arg0: i32) -> (i32, i32) {
    %c0_i32 = arith.constant 0 : i32
    %c0_i32_0 = arith.constant 0 : i32
    %c0_i32_1 = arith.constant 0 : i32
    return %c0_i32, %c0_i32_0 : i32, i32
  }
  func.func @transform_18(%arg0: i32) -> (i32, i32) {
    %c0_i32 = arith.constant 0 : i32
    %c0_i32_0 = arith.constant 0 : i32
    %c0_i32_1 = arith.constant 0 : i32
    return %c0_i32, %c0_i32_0 : i32, i32
  }
  func.func @transform_19(%arg0: i32) -> (i32, i32, i32) {
    %c0_i32 = arith.constant 0 : i32
    %c0_i32_0 = arith.constant 0 : i32
    %c0_i32_1 = arith.constant 0 : i32
    %c0_i32_2 = arith.constant 0 : i32
    return %c0_i32, %c0_i32_0, %c0_i32_1 : i32, i32, i32
  }
  func.func @transform_20(%arg0: i32) -> (i32, i32) {
    %c0_i32 = arith.constant 0 : i32
    %c0_i32_0 = arith.constant 0 : i32
    %c0_i32_1 = arith.constant 0 : i32
    return %c0_i32, %c0_i32_0 : i32, i32
  }
  func.func @transform_21(%arg0: i32) -> (i32, i32) {
    %c0_i32 = arith.constant 0 : i32
    %c0_i32_0 = arith.constant 0 : i32
    %c0_i32_1 = arith.constant 0 : i32
    return %c0_i32, %c0_i32_0 : i32, i32
  }
  func.func @transform_22(%arg0: i32) -> (i32, i32) {
    %c0_i32 = arith.constant 0 : i32
    %c0_i32_0 = arith.constant 0 : i32
    %c0_i32_1 = arith.constant 0 : i32
    return %c0_i32, %c0_i32_0 : i32, i32
  }
  func.func @transform_23(%arg0: i32) -> (i32, i32, i32) {
    %c0_i32 = arith.constant 0 : i32
    %c0_i32_0 = arith.constant 0 : i32
    %c0_i32_1 = arith.constant 0 : i32
    return %arg0, %c0_i32, %c0_i32_0 : i32, i32, i32
  }
}

</mosaic_0001>

<bundles_post_ra>
// kernel: ladder_model_forward.1
= control target key start
LH: loop header
LB: loop body
LE: loop exit
PB: predicated region body
PF: predicated region fallthrough
CT: control target
= control target key end

     0   :  { %s20256_s0 = inlined_call_operand.vmem [shape: f32[2,4,256], index: 0, kind: input, shape index: {}]   ;;  %s20257_s1 = inlined_call_operand.vmem [shape: bf16[9,256,256], index: 1, kind: input, shape index: {}]   ;;  %s20258_s2 = inlined_call_operand.hbm [shape: bf16[9,256,64], index: 2, kind: input, shape index: {}]   ;;  %s20259_s3 = inlined_call_operand.hbm [shape: bf16[9,64,64], index: 3, kind: input, shape index: {}]   ;;  %s20260_s4 = inlined_call_operand.hbm [shape: bf16[9,64,16], index: 4, kind: input, shape index: {}]   ;;  %s20261_s5 = inlined_call_operand.vmem [shape: bf16[16,64], index: 5, kind: input, shape index: {}]   ;;  %s20262_s6 = inlined_call_operand.vmem [shape: bf16[64,256], index: 6, kind: input, shape index: {}]   ;;  %s20263_s7 = inlined_call_operand.vmem [shape: f32[9,8,4], index: 7, kind: input, shape index: {}]   ;;  %s20264_s8 = inlined_call_operand.vmem [shape: f32[8,1], index: 8, kind: input, shape index: {}]   ;;  %s20265_s9 = inlined_call_operand.vmem [shape: f32[9,16,8], index: 9, kind: input, shape index: {}]   ;;  %s20266_s10 = inlined_call_operand.vmem [shape: f32[16,1], index: 10, kind: input, shape index: {}]   ;;  %s20267_s11 = inlined_call_operand.vmem [shape: f32[9,32,16], index: 11, kind: input, shape index: {}]   ;;  %s20268_s12 = inlined_call_operand.vmem [shape: f32[32,1], index: 12, kind: input, shape index: {}]   ;;  %s20269_s13 = inlined_call_operand.vmem [shape: f32[32,16], index: 13, kind: input, shape index: {}]   ;;  %s20270_s14 = inlined_call_operand.vmem [shape: f32[32,1], index: 14, kind: input, shape index: {}]   ;;  %s20271_s15 = inlined_call_operand.vmem [shape: f32[9,32,32], index: 15, kind: input, shape index: {}]   ;;  %s20272_s16 = inlined_call_operand.vmem [shape: f32[32,1], index: 16, kind: input, shape index: {}]   ;;  %s20273_s17 = inlined_call_operand.vmem [shape: f32[32,8], index: 17, kind: input, shape index: {}]   ;;  %s20274_s18 = inlined_call_operand.vmem [shape: f32[32,1], index: 18, kind: input, shape index: {}]   ;;  %s20275_s19 = inlined_call_operand.vmem [shape: f32[9,32,32], index: 19, kind: input, shape index: {}]   ;;  %s20276_s20 = inlined_call_operand.vmem [shape: f32[32,1], index: 20, kind: input, shape index: {}]   ;;  %s20277_s21 = inlined_call_operand.vmem [shape: f32[5,32], index: 21, kind: input, shape index: {}]   ;;  %s20278_s22 = inlined_call_operand.vmem [shape: f32[5,1], index: 22, kind: input, shape index: {}]   ;;  %s20279_s23 = inlined_call_operand.vmem [shape: f32[2,5,256], index: 23, kind: output, shape index: {}]  }
   0x1   :  { %21131 = sst [smem:[#allocation268_spill]] %s20256_s0 }
   0x2   :  { %21132 = sst [smem:[#allocation269_spill]] %s20257_s1 }
   0x3   :  { %21133 = sst [smem:[#allocation270_spill]] %s20258_s2 }
   0x4   :  { %21134 = sst [smem:[#allocation271_spill]] %s20259_s3 }
   0x5   :  { %21135 = sst [smem:[#allocation272_spill]] %s20260_s4 }
   0x6   :  { %21136 = sst [smem:[#allocation273_spill]] %s20261_s5 }
   0x7   :  { %21137 = sst [smem:[#allocation274_spill]] %s20262_s6 }
   0x8   :  { %21138 = sst [smem:[#allocation275_spill]] %s20263_s7 }
   0x9   :  { %28 = vsyncpa [#allocation3], 0 }
   0xa   :  { %29 = vsyncpa [#allocation5], 0  ;;  %s14524_s4 = smov 0  }
   0xb LB: > { %21139 = sst [smem:[#allocation9_spill]] %s14395_s4  ;;  %s14530_s30 = sadd.s32 4294967295, %s14395_s4   ;;  %s14395_s4 = sphi %s14524_s4, %s35_s4  }
   0xc   : > { %p11253_p0 = scmp.ge.s32.totalorder %s14395_s4, 1  ;;  %p554_p1 = scmp.lt.s32.totalorder %s14395_s4, 3 }
   0xd   : > { %p14277_p2 = scmp.eq.s32.totalorder %s14530_s30, 0  ;;  %s14397_s25 = smov [#allocation4]  }
   0xe   : > { %p14535_p3 = pnand %p11253_p0, %p554_p1  ;;  %s582_s5 = sshll.u32 %s14397_s25, 4  ;;  %s583_s5 = int_to_ptr.vmem [resolvable:$true] %s582_s5 }
   0xf   : > { %s14398_s1 = smov [#allocation2]   ;;  %s14399_s6 = smov [#allocation6]  }
  0x10   : > { %p14267_p4 = pneg %p14535_p3  ;;  %s569_s26 = sshll.u32 %s14398_s1, 4  ;;  %s570_s26 = int_to_ptr.vmem [resolvable:$true] %s569_s26 }
  0x11   : > { %s595_s27 = sshll.u32 %s14399_s6, 4  ;;  %s14314_s7 = scalar_lea.vmem %s583_s5, 4608  ;;  %s14547_s27 = int_to_ptr.vmem [resolvable:$true] %s595_s27 }
  0x12   : > { %p14543_p5 = pnand %p14277_p2, %p14267_p4  ;;  %p14315_p7 = scmp.ne.s32.totalorder %s583_s5, %s14314_s7 }
  0x13   : > { %p14322_p10 = scmp.lt.s32.totalorder %s583_s5, %s583_s5  ;;  %p14323_p11 = scmp.lt.s32.totalorder %s14314_s7, %s14314_s7 }
  0x14   : > { %p14305_p6 = pneg %p14543_p5 }
  0x15   : > { %p14324_p12 = por %p14323_p11, %p14322_p10 }
  0x16   : > { %p14317_p8 = pnand %p14315_p7, %p14305_p6 }
  0x18   : > { %p14318_p9 = pneg %p14317_p8 }
  0x1a   : > { %p14325_p13 = pnand %p14324_p12, %p14318_p9 }
  0x1c   : > { %14328 = shalt.err (!%p14325_p13)
}
  0x1d   : > { %s14400_s28 = smov 64   ;;  %s14401_s29 = smov 4  }
  0x1e   : > { %s21142_s25 = sld [smem:[#allocation271_spill]]  ;;  %s14340_s1 = scalar_lea.vmem %s570_s26, 18432 }
  0x1f   : > { %p14341_p0 = scmp.ne.s32.totalorder %s570_s26, %s14340_s1  ;;  %p14348_p7 = scmp.lt.s32.totalorder %s570_s26, %s570_s26 }
  0x20   : > { %p14349_p8 = scmp.lt.s32.totalorder %s14340_s1, %s14340_s1 }
  0x21   : > { %p14343_p1 = pnand %p14341_p0, %p14305_p6 }
  0x22   : > { %p14350_p10 = por %p14349_p8, %p14348_p7 }
  0x23   : > { %p14344_p4 = pneg %p14343_p1 }
  0x24   : > { %14273 = dma.hbm_to_vmem [thread:$0]  (!%p14543_p5), %s21142_s25, 4608, %s583_s5, [#allocation5], %s14400_s28, %s14400_s28, %s14401_s29  }
  0x25   : > { %p14351_p9 = pnand %p14350_p10, %p14344_p4 }
  0x27   : > { %14354 = shalt.err (!%p14351_p9)
}
  0x28   : > { %s21143_s4 = sld [smem:[#allocation270_spill]]  ;;  %s14366_s5 = scalar_lea.vmem %s14547_s27, 4608 }
  0x29   : > { %p14367_p11 = scmp.ne.s32.totalorder %s14547_s27, %s14366_s5  ;;  %p14374_p0 = scmp.lt.s32.totalorder %s14547_s27, %s14547_s27 }
  0x2a   : > { %p14375_p1 = scmp.lt.s32.totalorder %s14366_s5, %s14366_s5 }
  0x2b   : > { %p14369_p12 = pnand %p14367_p11, %p14305_p6 }
  0x2c   : > { %p14376_p4 = por %p14375_p1, %p14374_p0 }
  0x2d   : > { %p14370_p13 = pneg %p14369_p12 }
  0x2e   : > { %14270 = dma.hbm_to_vmem [thread:$0]  (!%p14543_p5), %s21143_s4, 18432, %s570_s26, [#allocation3], %s14400_s28, %s14400_s28, %s14401_s29  }
  0x2f   : > { %p14377_p7 = pnand %p14376_p4, %p14370_p13 }
  0x31   : > { %14380 = shalt.err (!%p14377_p7)
}
  0x32   : > { %s21144_s25 = sld [smem:[#allocation272_spill]] }
  0x34   : > { %673 = sbr.rel (%p14535_p3) target bundleno = 11041 (0x2b21), region = 112 }
  0x38   : > { %14276 = dma.hbm_to_vmem [thread:$0]  (!%p14543_p5), %s21144_s25, 4608, %s14547_s27, [#allocation5], %s14400_s28, %s14400_s28, %s14401_s29  }
  0x39   : > { %14386 = dma.done.wait (%p14277_p2), [#allocation3], 18432  }
  0x3a   : > { %14388 = vsyncadd (%p14277_p2), [#allocation3], 4294948864 }
  0x3b   : > { %14390 = dma.done.wait (%p14277_p2), [#allocation5], 9216  }
  0x3c   : > { %14392 = vsyncadd (%p14277_p2), [#allocation5], 4294958080  ;;  %s21145_s2 = sld [smem:[#allocation269_spill]]  ;;  %p745_p2 = scmp.lt.s32.totalorder %s14530_s30, 1  ;;  %vm1101_vm0 = vcmask 1043456   ;;  %vm1097_vm1 = vcmask 31744  }
  0x3d   : > { %s21187_s3 = sld [smem:[#allocation268_spill]]  ;;  %vm3307_vm2 = vcmask 64512   ;;  %vm5049_vm3 = vcmask 523264   ;;  %vm5232_vm4 = vcmask 130048   ;;  %vm7295_vm5 = vcmask 261120  }
  0x3e   : > { %s22492_s30 = smov (!%p745_p2, %s14530_s30), 1  ;;  %s21208_s5 = sld [smem:[#allocation275_spill]] }
  0x3f   : > { %s11868_s25 = sshll.u32 %s22492_s30, 3  ;;  %s21655_s7 = sld [smem:[#allocation274_spill]] }
  0x40   : > { %s11869_s4 = sshll.u32 %s22492_s30, 4 }
  0x41   : > { %s754_s24 = scalar_lea.vmem %s20279_s23, %s11869_s4 }
  0x42   : > { %v14593_v0 = vld [vmem:[%s21145_s2 + $0x78] sm:$0xff]  ;;  %v14603_v2 = vld [vmem:[%s21145_s2 + $0x70] sm:$0xff]  ;;  %v14617_v8 = vld [vmem:[%s21145_s2 + $0x68] sm:$0xff] }
  0x43   : > { %v14598_v1 = vld [vmem:[%s21145_s2 + $0x178] sm:$0xff]  ;;  %v20371_v3 = vunpack.c.h.bf16 %v14593_v0  ;;  %v20370_v5 = vunpack.c.l.bf16 %v14593_v0  ;;  %v14612_v7 = vld [vmem:[%s21145_s2 + $0x170] sm:$0xff]  ;;  %v14622_v9 = vld [vmem:[%s21145_s2 + $0x168] sm:$0xff]  ;;  %v20365_v10 = vunpack.c.h.bf16 %v14603_v2  ;;  %v20364_v12 = vunpack.c.l.bf16 %v14603_v2  ;;  %s15242_s0 = scalar_lea.vmem %s21187_s3, %s11868_s25  ;;  %s21654_s25 = sld [smem:[#allocation273_spill]] }
  0x44   : > { %21146 = vst [vmem:[#allocation10_spill] sm:$0xff] %v14598_v1  ;;  %v20305_v4 = vunpack.c.h.bf16 %v14598_v1  ;;  %v20304_v6 = vunpack.c.l.bf16 %v14598_v1  ;;  %21147 = vst [vmem:[#allocation11_spill] sm:$0xff] %v14612_v7  ;;  %v20303_v11 = vunpack.c.h.bf16 %v14612_v7  ;;  %v20300_v13 = vunpack.c.l.bf16 %v14612_v7  ;;  %v14631_v14 = vld [vmem:[%s21145_s2 + $0x60] sm:$0xff]  ;;  %v14653_v20 = vld [vmem:[%s21145_s2 + $0x58] sm:$0xff] }
  0x45   : > { %21148 = vst [vmem:[#allocation12_spill] sm:$0xff] %v14622_v9  ;;  %v14636_v15 = vld [vmem:[%s21145_s2 + $0x160] sm:$0xff]  ;;  %855 = vmatprep.subr.mxu0 %v20371_v3  ;;  %v20359_v16 = vunpack.c.h.bf16 %v14617_v8  ;;  %v20299_v17 = vunpack.c.h.bf16 %v14622_v9  ;;  %v20358_v18 = vunpack.c.l.bf16 %v14617_v8  ;;  %v20298_v19 = vunpack.c.l.bf16 %v14622_v9  ;;  %v14658_v21 = vld [vmem:[%s21145_s2 + $0x158] sm:$0xff]  ;;  %v14675_v26 = vld [vmem:[%s21145_s2 + $0x50] sm:$0xff] }
  0x46   : > { %21149 = vst [vmem:[#allocation13_spill] sm:$0xff] %v14636_v15  ;;  %1024 = vmatprep.subr.mxu1 %v20305_v4  ;;  %856 = vmatpush1.msra.mxu0 %v20370_v5  ;;  %21150 = vst [vmem:[#allocation14_spill] sm:$0xff] %v14658_v21  ;;  %v20353_v22 = vunpack.c.h.bf16 %v14631_v14  ;;  %v20297_v23 = vunpack.c.h.bf16 %v14636_v15  ;;  %v20352_v24 = vunpack.c.l.bf16 %v14631_v14  ;;  %v20294_v25 = vunpack.c.l.bf16 %v14636_v15  ;;  %v14680_v27 = vld [vmem:[%s21145_s2 + $0x150] sm:$0xff]  ;;  %v14697_v32 = vld [vmem:[%s21145_s2 + $0x48] sm:$0xff] }
  0x47   : > { %1025 = vmatpush1.msra.mxu1 %v20304_v6  ;;  %857 = vmatprep.subr.mxu0 %v20365_v10  ;;  %21151 = vst [vmem:[#allocation15_spill] sm:$0xff] %v14680_v27  ;;  %v20347_v28 = vunpack.c.h.bf16 %v14653_v20  ;;  %v20293_v29 = vunpack.c.h.bf16 %v14658_v21  ;;  %v20346_v30 = vunpack.c.l.bf16 %v14653_v20  ;;  %v20292_v31 = vunpack.c.l.bf16 %v14658_v21  ;;  %v14702_v33 = vld [vmem:[%s21145_s2 + $0x148] sm:$0xff]  ;;  %v14719_v38 = vld [vmem:[%s21145_s2 + $0x40] sm:$0xff]  ;;  %v14741_v44 = vld [vmem:[%s21145_s2 + $0x38] sm:$0xff] }
  0x48   : > { %1026 = vmatprep.subr.mxu1 %v20303_v11  ;;  %858 = vmatpush1.msra.mxu0 %v20364_v12  ;;  %21152 = vst [vmem:[#allocation16_spill] sm:$0xff] %v14702_v33  ;;  %v20341_v34 = vunpack.c.h.bf16 %v14675_v26  ;;  %v20291_v35 = vunpack.c.h.bf16 %v14680_v27  ;;  %v20340_v36 = vunpack.c.l.bf16 %v14675_v26  ;;  %v20288_v37 = vunpack.c.l.bf16 %v14680_v27  ;;  %v14724_v39 = vld [vmem:[%s21145_s2 + $0x140] sm:$0xff]  ;;  %v14746_v45 = vld [vmem:[%s21145_s2 + $0x138] sm:$0xff]  ;;  %v14763_v50 = vld [vmem:[%s21145_s2 + $0x30] sm:$0xff] }
  0x49   : > { %1027 = vmatpush1.msra.mxu1 %v20300_v13  ;;  %859 = vmatprep.subr.mxu0 %v20359_v16  ;;  %21153 = vst [vmem:[#allocation17_spill] sm:$0xff] %v14724_v39  ;;  %v20335_v40 = vunpack.c.h.bf16 %v14697_v32  ;;  %v20287_v41 = vunpack.c.h.bf16 %v14702_v33  ;;  %v20334_v42 = vunpack.c.l.bf16 %v14697_v32  ;;  %v20286_v43 = vunpack.c.l.bf16 %v14702_v33  ;;  %21154 = vst [vmem:[#allocation18_spill] sm:$0xff] %v14746_v45  ;;  %v14768_v51 = vld [vmem:[%s21145_s2 + $0x130] sm:$0xff]  ;;  %v14785_v56 = vld [vmem:[%s21145_s2 + $0x28] sm:$0xff] }
  0x4a   : > { %1028 = vmatprep.subr.mxu1 %v20299_v17  ;;  %860 = vmatpush1.msra.mxu0 %v20358_v18  ;;  %v20329_v46 = vunpack.c.h.bf16 %v14719_v38  ;;  %v20285_v47 = vunpack.c.h.bf16 %v14724_v39  ;;  %v20328_v48 = vunpack.c.l.bf16 %v14719_v38  ;;  %v20284_v49 = vunpack.c.l.bf16 %v14724_v39  ;;  %21155 = vst [vmem:[#allocation19_spill] sm:$0xff] %v14768_v51  ;;  %v14790_v57 = vld [vmem:[%s21145_s2 + $0x128] sm:$0xff]  ;;  %v14807_v62 = vld [vmem:[%s21145_s2 + $0x20] sm:$0xff]  ;;  %v12748_v15 = vld [vmem:[#allocation2 + $0x58] sm:$0xff]  }
  0x4b   : > { %1029 = vmatpush1.msra.mxu1 %v20298_v19  ;;  %861 = vmatprep.subr.mxu0 %v20353_v22  ;;  %v20323_v52 = vunpack.c.h.bf16 %v14741_v44  ;;  %v20289_v53 = vunpack.c.h.bf16 %v14746_v45  ;;  %v20322_v54 = vunpack.c.l.bf16 %v14741_v44  ;;  %v20290_v55 = vunpack.c.l.bf16 %v14746_v45  ;;  %21156 = vst [vmem:[#allocation20_spill] sm:$0xff] %v14790_v57  ;;  %v14812_v63 = vld [vmem:[%s21145_s2 + $0x120] sm:$0xff]  ;;  %v14873_v13 = vld [vmem:[%s21145_s2 + $0x8] sm:$0xff]  ;;  %v12868_v9 = vld [vmem:[#allocation2 + $0x458] sm:$0xff]  }
  0x4c   : > { %1030 = vmatprep.subr.mxu1 %v20297_v23  ;;  %862 = vmatpush1.msra.mxu0 %v20352_v24  ;;  %v20317_v58 = vunpack.c.h.bf16 %v14763_v50  ;;  %v20295_v59 = vunpack.c.h.bf16 %v14768_v51  ;;  %v20316_v60 = vunpack.c.l.bf16 %v14763_v50  ;;  %v20296_v61 = vunpack.c.l.bf16 %v14768_v51  ;;  %21157 = vst [vmem:[#allocation21_spill] sm:$0xff] %v14812_v63  ;;  %v12750_v45 = vld [vmem:[#allocation2 + $0x68] sm:$0xff]   ;;  %v12898_v1 = vld [vmem:[#allocation6 + $0x110] sm:$0xff]  }
  0x4d   : > { %1031 = vmatpush1.msra.mxu1 %v20294_v25  ;;  %863 = vmatprep.subr.mxu0 %v20347_v28  ;;  %v14851_v25 = vld [vmem:[%s21145_s2 + $0x10] sm:$0xff]  ;;  %v12742_v33 = vld [vmem:[#allocation2 + $0x28] sm:$0xff]   ;;  %v11925_v21 = vunpack.c.h.bf16 %v12750_v45 }
  0x4e   : > { %1032 = vmatprep.subr.mxu1 %v20293_v29  ;;  %864 = vmatpush1.msra.mxu0 %v20346_v30  ;;  %v20308_v29 = vunpack.c.l.bf16 %v14812_v63  ;;  %v20321_v6 = vunpack.c.l.bf16 %v14851_v25  ;;  %v11660_v7 = vld [vmem:[%s20267_s11 + $0xe8] sm:$0xff] }
  0x4f   : > { %1033 = vmatpush1.msra.mxu1 %v20292_v31  ;;  %865 = vmatprep.subr.mxu0 %v20341_v34  ;;  %v20309_v31 = vunpack.c.l.bf16 %v14807_v62 }
  0x50   : > { %1034 = vmatprep.subr.mxu1 %v20291_v35  ;;  %866 = vmatpush1.msra.mxu0 %v20340_v36  ;;  %v20307_v35 = vunpack.c.h.bf16 %v14812_v63 }
  0x51   : > { %1035 = vmatpush1.msra.mxu1 %v20288_v37  ;;  %867 = vmatprep.subr.mxu0 %v20335_v40  ;;  %v14829_v37 = vld [vmem:[%s21145_s2 + $0x18] sm:$0xff] }
  0x52   : > { %1036 = vmatprep.subr.mxu1 %v20287_v41  ;;  %868 = vmatpush1.msra.mxu0 %v20334_v42  ;;  %v20302_v41 = vunpack.c.l.bf16 %v14790_v57  ;;  %v20315_v19 = vunpack.c.l.bf16 %v14829_v37 }
  0x53   : > { %1037 = vmatpush1.msra.mxu1 %v20286_v43  ;;  %869 = vmatprep.subr.mxu0 %v20329_v46  ;;  %v20310_v43 = vunpack.c.l.bf16 %v14785_v56 }
  0x54   : > { %1038 = vmatprep.subr.mxu1 %v20285_v47  ;;  %870 = vmatpush1.msra.mxu0 %v20328_v48  ;;  %v20301_v47 = vunpack.c.h.bf16 %v14790_v57 }
  0x55   : > { %1039 = vmatpush1.msra.mxu1 %v20284_v49  ;;  %871 = vmatprep.subr.mxu0 %v20323_v52  ;;  %v20311_v49 = vunpack.c.h.bf16 %v14785_v56 }
  0x56   : > { %1040 = vmatprep.subr.mxu1 %v20289_v53  ;;  %872 = vmatpush1.msra.mxu0 %v20322_v54  ;;  %v14834_v53 = vld [vmem:[%s21145_s2 + $0x118] sm:$0xff] }
  0x57   : > { %1041 = vmatpush1.msra.mxu1 %v20290_v55  ;;  %21158 = vst [vmem:[#allocation22_spill] sm:$0xff] %v14834_v53  ;;  %873 = vmatprep.subr.mxu0 %v20317_v58  ;;  %v20306_v55 = vunpack.c.h.bf16 %v14807_v62  ;;  %v20313_v23 = vunpack.c.h.bf16 %v14834_v53  ;;  %v20314_v17 = vunpack.c.l.bf16 %v14834_v53 }
  0x58   : > { %1042 = vmatprep.subr.mxu1 %v20295_v59  ;;  %874 = vmatpush1.msra.mxu0 %v20316_v60  ;;  %v14856_v59 = vld [vmem:[%s21145_s2 + $0x110] sm:$0xff] }
  0x59   : > { %1043 = vmatpush1.msra.mxu1 %v20296_v61  ;;  %21159 = vst [vmem:[#allocation23_spill] sm:$0xff] %v14856_v59  ;;  %875 = vmatprep.subr.mxu0 %v20311_v49  ;;  %v20312_v61 = vunpack.c.h.bf16 %v14829_v37  ;;  %v20319_v11 = vunpack.c.h.bf16 %v14856_v59  ;;  %v20320_v4 = vunpack.c.l.bf16 %v14856_v59 }
  0x5a   : > { %1044 = vmatprep.subr.mxu1 %v20301_v47  ;;  %876 = vmatpush1.msra.mxu0 %v20310_v43  ;;  %v14878_v47 = vld [vmem:[%s21145_s2 + $0x108] sm:$0xff]  ;;  %v20327_v43 = vunpack.c.l.bf16 %v14873_v13 }
  0x5b   : > { %1045 = vmatpush1.msra.mxu1 %v20302_v41  ;;  %21160 = vst [vmem:[#allocation24_spill] sm:$0xff] %v14878_v47  ;;  %877 = vmatprep.subr.mxu0 %v20306_v55  ;;  %v20318_v41 = vunpack.c.h.bf16 %v14851_v25  ;;  %v14895_v55 = vld [vmem:[%s21145_s2] sm:$0xff]  ;;  %v20326_v49 = vunpack.c.l.bf16 %v14878_v47 }
  0x5c   : > { %1046 = vmatprep.subr.mxu1 %v20307_v35  ;;  %878 = vmatpush1.msra.mxu0 %v20309_v31  ;;  %v14900_v35 = vld [vmem:[%s21145_s2 + $0x100] sm:$0xff]  ;;  %v20325_v31 = vunpack.c.h.bf16 %v14878_v47  ;;  %v20333_v60 = vunpack.c.l.bf16 %v14895_v55 }
  0x5d   : > { %1047 = vmatpush1.msra.mxu1 %v20308_v29  ;;  %21161 = vst [vmem:[#allocation25_spill] sm:$0xff] %v14900_v35  ;;  %879 = vmatprep.subr.mxu0 %v20312_v61  ;;  %v20324_v29 = vunpack.c.h.bf16 %v14873_v13  ;;  %v14917_v61 = vld [vmem:[%s21145_s2 + $0xf8] sm:$0xff]  ;;  %v20332_v58 = vunpack.c.l.bf16 %v14900_v35 }
  0x5e   : > { %1048 = vmatprep.subr.mxu1 %v20313_v23  ;;  %880 = vmatpush1.msra.mxu0 %v20315_v19  ;;  %v14922_v23 = vld [vmem:[%s21145_s2 + $0x1f8] sm:$0xff]  ;;  %v20331_v19 = vunpack.c.h.bf16 %v14900_v35  ;;  %v20339_v54 = vunpack.c.l.bf16 %v14917_v61 }
  0x5f   : > { %1049 = vmatpush1.msra.mxu1 %v20314_v17  ;;  %21162 = vst [vmem:[#allocation26_spill] sm:$0xff] %v14922_v23  ;;  %881 = vmatprep.subr.mxu0 %v20318_v41  ;;  %v20330_v17 = vunpack.c.h.bf16 %v14895_v55  ;;  %v14939_v41 = vld [vmem:[%s21145_s2 + $0xf0] sm:$0xff]  ;;  %v20338_v52 = vunpack.c.l.bf16 %v14922_v23 }
  0x60   : > { %1050 = vmatprep.subr.mxu1 %v20319_v11  ;;  %882 = vmatpush1.msra.mxu0 %v20321_v6  ;;  %v14944_v11 = vld [vmem:[%s21145_s2 + $0x1f0] sm:$0xff]  ;;  %v20337_v6 = vunpack.c.h.bf16 %v14922_v23  ;;  %v20345_v48 = vunpack.c.l.bf16 %v14939_v41 }
  0x61   : > { %1051 = vmatpush1.msra.mxu1 %v20320_v4  ;;  %21163 = vst [vmem:[#allocation27_spill] sm:$0xff] %v14944_v11  ;;  %883 = vmatprep.subr.mxu0 %v20324_v29  ;;  %v20336_v4 = vunpack.c.h.bf16 %v14917_v61  ;;  %v14961_v29 = vld [vmem:[%s21145_s2 + $0xe8] sm:$0xff]  ;;  %v20344_v46 = vunpack.c.l.bf16 %v14944_v11 }
  0x62   : > { %1052 = vmatprep.subr.mxu1 %v20325_v31  ;;  %884 = vmatpush1.msra.mxu0 %v20327_v43  ;;  %v14966_v31 = vld [vmem:[%s21145_s2 + $0x1e8] sm:$0xff]  ;;  %v20343_v43 = vunpack.c.h.bf16 %v14944_v11  ;;  %v20351_v42 = vunpack.c.l.bf16 %v14961_v29 }
  0x63   : > { %1053 = vmatpush1.msra.mxu1 %v20326_v49  ;;  %21164 = vst [vmem:[#allocation28_spill] sm:$0xff] %v14966_v31  ;;  %885 = vmatprep.subr.mxu0 %v20330_v17  ;;  %v20342_v49 = vunpack.c.h.bf16 %v14939_v41  ;;  %v14983_v17 = vld [vmem:[%s21145_s2 + $0xe0] sm:$0xff]  ;;  %v20350_v40 = vunpack.c.l.bf16 %v14966_v31 }
  0x64   : > { %1054 = vmatprep.subr.mxu1 %v20331_v19  ;;  %886 = vmatpush1.msra.mxu0 %v20333_v60  ;;  %v14988_v19 = vld [vmem:[%s21145_s2 + $0x1e0] sm:$0xff]  ;;  %v20349_v60 = vunpack.c.h.bf16 %v14966_v31  ;;  %v20357_v36 = vunpack.c.l.bf16 %v14983_v17 }
  0x65   : > { %1055 = vmatpush1.msra.mxu1 %v20332_v58  ;;  %21165 = vst [vmem:[#allocation29_spill] sm:$0xff] %v14988_v19  ;;  %887 = vmatprep.subr.mxu0 %v20336_v4  ;;  %v20348_v58 = vunpack.c.h.bf16 %v14961_v29  ;;  %v15005_v4 = vld [vmem:[%s21145_s2 + $0xd8] sm:$0xff]  ;;  %v20356_v34 = vunpack.c.l.bf16 %v14988_v19 }
  0x66   : > { %1056 = vmatprep.subr.mxu1 %v20337_v6  ;;  %888 = vmatpush2.msra.mxu0 %v20339_v54  ;;  %v15010_v6 = vld [vmem:[%s21145_s2 + $0x1d8] sm:$0xff]  ;;  %v20355_v54 = vunpack.c.h.bf16 %v14988_v19  ;;  %v20363_v30 = vunpack.c.l.bf16 %v15005_v4 }
  0x67   : > { %1057 = vmatpush2.msra.mxu1 %v20338_v52  ;;  %21166 = vst [vmem:[#allocation30_spill] sm:$0xff] %v15010_v6  ;;  %889 = vmatprep.subr.mxu0 %v20342_v49  ;;  %v20354_v52 = vunpack.c.h.bf16 %v14983_v17  ;;  %v15027_v49 = vld [vmem:[%s21145_s2 + $0xd0] sm:$0xff]  ;;  %v20362_v28 = vunpack.c.l.bf16 %v15010_v6 }
  0x68   : > { %1058 = vmatprep.subr.mxu1 %v20343_v43  ;;  %890 = vmatpush2.msra.mxu0 %v20345_v48  ;;  %v15032_v43 = vld [vmem:[%s21145_s2 + $0x1d0] sm:$0xff]  ;;  %v20361_v48 = vunpack.c.h.bf16 %v15010_v6  ;;  %v20369_v24 = vunpack.c.l.bf16 %v15027_v49 }
  0x69   : > { %1059 = vmatpush2.msra.mxu1 %v20344_v46  ;;  %21167 = vst [vmem:[#allocation31_spill] sm:$0xff] %v15032_v43  ;;  %891 = vmatprep.subr.mxu0 %v20348_v58  ;;  %v20360_v46 = vunpack.c.h.bf16 %v15005_v4  ;;  %v15049_v58 = vld [vmem:[%s21145_s2 + $0xc8] sm:$0xff]  ;;  %v20368_v22 = vunpack.c.l.bf16 %v15032_v43 }
  0x6a   : > { %1060 = vmatprep.subr.mxu1 %v20349_v60  ;;  %892 = vmatpush2.msra.mxu0 %v20351_v42  ;;  %v15054_v60 = vld [vmem:[%s21145_s2 + $0x1c8] sm:$0xff]  ;;  %v20367_v42 = vunpack.c.h.bf16 %v15032_v43  ;;  %v20375_v18 = vunpack.c.l.bf16 %v15049_v58 }
  0x6b   : > { %1061 = vmatpush2.msra.mxu1 %v20350_v40  ;;  %21168 = vst [vmem:[#allocation32_spill] sm:$0xff] %v15054_v60  ;;  %893 = vmatprep.subr.mxu0 %v20354_v52  ;;  %v20366_v40 = vunpack.c.h.bf16 %v15027_v49  ;;  %v15071_v52 = vld [vmem:[%s21145_s2 + $0xc0] sm:$0xff]  ;;  %v20374_v16 = vunpack.c.l.bf16 %v15054_v60 }
  0x6c   : > { %1062 = vmatprep.subr.mxu1 %v20355_v54  ;;  %894 = vmatpush2.msra.mxu0 %v20357_v36  ;;  %v15076_v54 = vld [vmem:[%s21145_s2 + $0x1c0] sm:$0xff]  ;;  %v20373_v36 = vunpack.c.h.bf16 %v15054_v60  ;;  %v20379_v12 = vunpack.c.l.bf16 %v15071_v52 }
  0x6d   : > { %1063 = vmatpush2.msra.mxu1 %v20356_v34  ;;  %21169 = vst [vmem:[#allocation33_spill] sm:$0xff] %v15076_v54  ;;  %895 = vmatprep.subr.mxu0 %v20360_v46  ;;  %v20372_v34 = vunpack.c.h.bf16 %v15049_v58  ;;  %v15093_v46 = vld [vmem:[%s21145_s2 + $0xb8] sm:$0xff]  ;;  %v20378_v10 = vunpack.c.l.bf16 %v15076_v54 }
  0x6e   : > { %1064 = vmatprep.subr.mxu1 %v20361_v48  ;;  %896 = vmatpush2.msra.mxu0 %v20363_v30  ;;  %v15098_v48 = vld [vmem:[%s21145_s2 + $0x1b8] sm:$0xff]  ;;  %v20377_v30 = vunpack.c.h.bf16 %v15076_v54  ;;  %v20382_v5 = vunpack.c.l.bf16 %v15093_v46 }
  0x6f   : > { %1065 = vmatpush2.msra.mxu1 %v20362_v28  ;;  %21170 = vst [vmem:[#allocation34_spill] sm:$0xff] %v15098_v48  ;;  %897 = vmatprep.subr.mxu0 %v20366_v40  ;;  %v20376_v28 = vunpack.c.h.bf16 %v15071_v52  ;;  %v15116_v40 = vld [vmem:[%s21145_s2 + $0xb0] sm:$0xff] }
  0x70   : > { %1066 = vmatprep.subr.mxu1 %v20367_v42  ;;  %898 = vmatpush2.msra.mxu0 %v20369_v24  ;;  %v15121_v42 = vld [vmem:[%s21145_s2 + $0x1b0] sm:$0xff]  ;;  %v20381_v24 = vunpack.c.h.bf16 %v15098_v48  ;;  %v21178_v3 = vunpack.c.l.bf16 %v15116_v40 }
  0x71   : > { %1067 = vmatpush2.msra.mxu1 %v20368_v22  ;;  %21171 = vst [vmem:[#allocation35_spill] sm:$0xff] %v15121_v42  ;;  %899 = vmatprep.subr.mxu0 %v20372_v34  ;;  %v20380_v22 = vunpack.c.h.bf16 %v15093_v46  ;;  %v15138_v34 = vld [vmem:[%s21145_s2 + $0xa8] sm:$0xff] }
  0x72   : > { %1068 = vmatprep.subr.mxu1 %v20373_v36  ;;  %900 = vmatpush2.msra.mxu0 %v20375_v18  ;;  %v15143_v36 = vld [vmem:[%s21145_s2 + $0x1a8] sm:$0xff]  ;;  %v15170_v18 = vld [vmem:[%s21145_s2 + $0x1a0] sm:$0xff] }
  0x73   : > { %1069 = vmatpush2.msra.mxu1 %v20374_v16  ;;  %21172 = vst [vmem:[#allocation36_spill] sm:$0xff] %v15143_v36  ;;  %901 = vmatprep.subr.mxu0 %v20376_v28  ;;  %21173 = vst [vmem:[#allocation37_spill] sm:$0xff] %v15170_v18  ;;  %v21174_v28 = vunpack.c.l.bf16 %v15098_v48  ;;  %v21181_v16 = vunpack.c.h.bf16 %v15138_v34  ;;  %v21183_v48 = vunpack.c.l.bf16 %v15138_v34 }
  0x74   : > { %1070 = vmatprep.subr.mxu1 %v20377_v30  ;;  %902 = vmatpush2.msra.mxu0 %v20379_v12  ;;  %v15165_v30 = vld [vmem:[%s21145_s2 + $0xa0] sm:$0xff]  ;;  %v21176_v12 = vunpack.c.h.bf16 %v15116_v40 }
  0x75   : > { %1071 = vmatpush2.msra.mxu1 %v20378_v10  ;;  %903 = vmatprep.subr.mxu0 %v20380_v22  ;;  %v15187_v22 = vld [vmem:[%s21145_s2 + $0x98] sm:$0xff]  ;;  %v21179_v10 = vunpack.c.l.bf16 %v15121_v42  ;;  %v21190_v54 = vunpack.c.l.bf16 %v15165_v30 }
  0x76   : > { %1072 = vmatprep.subr.mxu1 %v20381_v24  ;;  %904 = vmatpush2.msra.mxu0 %v20382_v5  ;;  %v15192_v24 = vld [vmem:[%s21145_s2 + $0x198] sm:$0xff]  ;;  %v21177_v5 = vunpack.c.h.bf16 %v15121_v42  ;;  %v21194_v42 = vunpack.c.h.bf16 %v15187_v22  ;;  %v21196_v60 = vunpack.c.l.bf16 %v15187_v22 }
  0x77   : > { %1073 = vmatpush2.msra.mxu1 %v21174_v28  ;;  %21175 = vst [vmem:[#allocation38_spill] sm:$0xff] %v15192_v24  ;;  %905 = vmatprep.subr.mxu0 %v21176_v12  ;;  %v15210_v12 = vld [vmem:[%s21145_s2 + $0x90] sm:$0xff]  ;;  %v21184_v28 = vunpack.c.l.bf16 %v15143_v36 }
  0x78   : > { %1074 = vmatprep.subr.mxu1 %v21177_v5  ;;  %906 = vmatpush2.msra.mxu0 %v21178_v3  ;;  %v15215_v5 = vld [vmem:[%s21145_s2 + $0x190] sm:$0xff]  ;;  %v21182_v3 = vunpack.c.h.bf16 %v15143_v36  ;;  %v15273_v36 = vld [vmem:[%s15242_s0] sm:$0xff]  ;;  %v21200_v31 = vunpack.c.l.bf16 %v15210_v12 }
  0x79   : > { %1075 = vmatpush2.msra.mxu1 %v21179_v10  ;;  %21180 = vst [vmem:[#allocation39_spill] sm:$0xff] %v15215_v5  ;;  %907 = vmatprep.subr.mxu0 %v21181_v16  ;;  %v15232_v16 = vld [vmem:[%s21145_s2 + $0x88] sm:$0xff]  ;;  %v21191_v10 = vunpack.c.l.bf16 %v15170_v18  ;;  %v15294_v19 = vcombine.high %v15273_v36, %v15273_v36 }
  0x7a   : > { %1076 = vmatprep.subr.mxu1 %v21182_v3  ;;  %908 = vmatpush2.msra.mxu0 %v21183_v48  ;;  %21185 = vst [vmem:[#allocation40_spill] sm:$0xff] %v15232_v16  ;;  %v15237_v3 = vld [vmem:[%s21145_s2 + $0x188] sm:$0xff]  ;;  %v21188_v48 = vunpack.c.h.bf16 %v15165_v30  ;;  %v20406_v6 = vunpack.c.l.bf16 %v15232_v16 }
  0x7b   : > { %1077 = vmatpush2.msra.mxu1 %v21184_v28  ;;  %21186 = vst [vmem:[#allocation41_spill] sm:$0xff] %v15237_v3  ;;  %v21189_v28 = vunpack.c.h.bf16 %v15170_v18  ;;  %v21197_v18 = vunpack.c.l.bf16 %v15192_v24  ;;  %919 = vmatprep.mubr.f32.mxu0 %v15294_v19 }
  0x7c   : > { %909 = vmatprep.subr.mxu0 %v21188_v48  ;;  %v15259_v48 = vld [vmem:[%s21145_s2 + $0x80] sm:$0xff]  ;;  %1088 = vmatprep.mubr.f32.mxu1 %v15294_v19 }
  0x7d   : > { %1078 = vmatprep.subr.mxu1 %v21189_v28  ;;  %910 = vmatpush2.msra.mxu0 %v21190_v54  ;;  %21192 = vst [vmem:[#allocation42_spill] sm:$0xff] %v15259_v48  ;;  %v15264_v28 = vld [vmem:[%s21145_s2 + $0x180] sm:$0xff]  ;;  %v21195_v54 = vunpack.c.h.bf16 %v15192_v24  ;;  %v20405_v43 = vunpack.c.h.bf16 %v15259_v48 }
  0x7e   : > { %1079 = vmatpush2.msra.mxu1 %v21191_v10  ;;  %21193 = vst [vmem:[#allocation43_spill] sm:$0xff] %v15264_v28  ;;  %911 = vmatprep.subr.mxu0 %v21194_v42  ;;  %v21198_v42 = vunpack.c.h.bf16 %v15210_v12  ;;  %v20403_v10 = vunpack.c.l.bf16 %v15264_v28 }
  0x7f   : > { %1080 = vmatprep.subr.mxu1 %v21195_v54  ;;  %912 = vmatpush2.msra.mxu0 %v21196_v60  ;;  %v21199_v54 = vunpack.c.h.bf16 %v15215_v5  ;;  %v21201_v60 = vunpack.c.l.bf16 %v15215_v5  ;;  %v15342_v5 = vld [vmem:[%s21145_s2 + $0x268] sm:$0xff] }
  0x80   : > { %1081 = vmatpush2.msra.mxu1 %v21197_v18  ;;  %913 = vmatprep.subr.mxu0 %v21198_v42  ;;  %v20404_v18 = vunpack.c.l.bf16 %v15259_v48  ;;  %v21202_v42 = vunpack.c.h.bf16 %v15232_v16  ;;  %21209 = vst [vmem:[#allocation46_spill] sm:$0xff] %v15342_v5  ;;  %v21215_v11 = vunpack.c.l.bf16 %v15342_v5 }
  0x81   : > { %1082 = vmatprep.subr.mxu1 %v21199_v54  ;;  %914 = vmatpush2.msra.mxu0 %v21200_v31  ;;  %v21203_v54 = vunpack.c.h.bf16 %v15237_v3  ;;  %v21204_v31 = vunpack.c.l.bf16 %v15237_v3 }
  0x82   : > { %1083 = vmatpush2.msra.mxu1 %v21201_v60  ;;  %915 = vmatprep.subr.mxu0 %v21202_v42  ;;  %v21205_v60 = vunpack.c.h.bf16 %v15264_v28  ;;  %v20407_v42 = vmov 0.0  }
  0x83   : > { %1084 = vmatprep.subr.mxu1 %v21203_v54  ;;  %916 = vmatpush2.msra.mxu0 %v20406_v6  ;;  %v15322_v54 = vld [vmem:[%s21145_s2 + $0x278] sm:$0xff]  ;;  %v11298_v6 = vld [vmem:[%s21208_s5 + $0x8] sm:$0xff] }
  0x84   : > { %1085 = vmatpush2.msra.mxu1 %v21204_v31  ;;  %917 = vmatprep.subr.mxu0 %v20405_v43  ;;  %21206 = vst [vmem:[#allocation44_spill] sm:$0xff] %v15322_v54  ;;  %v20417_v28 = vunpack.c.h.bf16 %v15322_v54  ;;  %v20418_v3 = vunpack.c.l.bf16 %v15322_v54 }
  0x85   : > { %1086 = vmatprep.subr.mxu1 %v21205_v60  ;;  %918 = vmatpush2.msra.mxu0 %v20404_v18 }
  0x86   : > { %1087 = vmatpush2.msra.mxu1 %v20403_v10  ;;  %920 = vmatmul.mubr.f32.vlgmr.msra.gmra.mxu0 %v15273_v36  ;;  %v15327_v10 = vld [vmem:[%s21145_s2 + $0x270] sm:$0xff] }
  0x87   : > { %1089 = vmatmul.mubr.f32.vlgmr.msra.gmra.mxu1 %v15273_v36  ;;  %1172 = vmatprep.mubr.f32.mxu0 %v20407_v42  ;;  %21207 = vst [vmem:[#allocation45_spill] sm:$0xff] %v15327_v10  ;;  %v20423_v24 = vunpack.c.h.bf16 %v15327_v10 }
  0x88   : > { %1252 = vmatprep.mubr.f32.mxu1 %v20407_v42  ;;  %v926_v42 = vld [vmem:[%s21208_s5] sm:$0xff] }
 0x146   : > { %v921_v31 = vpop.f32.mrf.mxu0 }
 0x147   : > { %v1090_v60 = vpop.f32.mrf.mxu1 }
 0x148   : > { %v923_v18 = vpop.f32.mrf.mxu0 }
 0x149   : > { %v1092_v43 = vpop.f32.mrf.mxu1  ;;  %11302 = vmatprep.subr.msk.mxu1 %vm1101_vm0, %v923_v18  ;;  %v15353_v18 = vld [vmem:[%s21145_s2 + $0x260] sm:$0xff] }
 0x14a   : > { %11299 = vmatprep.subr.msk.mxu0 %vm1101_vm0, %v1092_v43  ;;  %11303 = vmatpush1.msk.msra.mxu1 %vm1101_vm0, %v921_v31  ;;  %v20424_v43 = vunpack.c.l.bf16 %v15327_v10  ;;  %21210 = vst [vmem:[#allocation47_spill] sm:$0xff] %v15353_v18  ;;  %v21212_v31 = vmov 0.0   ;;  %v21217_v10 = vunpack.c.l.bf16 %v15353_v18 }
 0x14b   : > { %11300 = vmatpush1.msk.msra.mxu0 %vm1101_vm0, %v1090_v60  ;;  %11304 = vmatmul.mubr.msk.f32.vlgmr.msra.gmra.mxu1 %vm1097_vm1, %v926_v42  ;;  %v15365_v42 = vld [vmem:[%s21145_s2 + $0x258] sm:$0xff] }
 0x14c   : > { %11301 = vmatmul.mubr.msk.f32.vlgmr.msra.gmra.mxu0 %vm1097_vm1, %v11298_v6  ;;  %1356 = vmatprep.subr.mxu0 %v20417_v28  ;;  %21211 = vst [vmem:[#allocation48_spill] sm:$0xff] %v15365_v42  ;;  %v20429_v28 = vunpack.c.h.bf16 %v15353_v18  ;;  %v21214_v6 = vunpack.c.h.bf16 %v15342_v5  ;;  %v20432_v54 = vunpack.c.h.bf16 %v15365_v42  ;;  %v21219_v5 = vunpack.c.l.bf16 %v15365_v42 }
 0x14d   : > { %1420 = vmatprep.mubr.f32.mxu0 %v15294_v19  ;;  %1357 = vmatpush1.msra.mxu0 %v20418_v3  ;;  %v15377_v3 = vld [vmem:[%s21145_s2 + $0x250] sm:$0xff] }
 0x14e   : > { %1502 = vmatprep.mubr.f32.mxu1 %v21212_v31  ;;  %1358 = vmatprep.subr.mxu0 %v20423_v24  ;;  %21213 = vst [vmem:[#allocation49_spill] sm:$0xff] %v15377_v3  ;;  %v20435_v60 = vunpack.c.h.bf16 %v15377_v3  ;;  %v21221_v18 = vunpack.c.l.bf16 %v15377_v3 }
 0x14f   : > { %1359 = vmatpush1.msra.mxu0 %v20424_v43  ;;  %v15388_v43 = vld [vmem:[%s21145_s2 + $0x248] sm:$0xff] }
 0x150   : > { %1360 = vmatprep.subr.mxu0 %v21214_v6  ;;  %21216 = vst [vmem:[#allocation50_spill] sm:$0xff] %v15388_v43  ;;  %v20438_v24 = vunpack.c.h.bf16 %v15388_v43  ;;  %v21223_v42 = vunpack.c.l.bf16 %v15388_v43 }
 0x151   : > { %1361 = vmatpush1.msra.mxu0 %v21215_v11  ;;  %v15399_v11 = vld [vmem:[%s21145_s2 + $0x240] sm:$0xff] }
 0x152   : > { %1362 = vmatprep.subr.mxu0 %v20429_v28  ;;  %21218 = vst [vmem:[#allocation51_spill] sm:$0xff] %v15399_v11  ;;  %v20441_v6 = vunpack.c.h.bf16 %v15399_v11  ;;  %v21225_v3 = vunpack.c.l.bf16 %v15399_v11 }
 0x153   : > { %1363 = vmatpush1.msra.mxu0 %v21217_v10  ;;  %v15410_v10 = vld [vmem:[%s21145_s2 + $0x238] sm:$0xff] }
 0x154   : > { %1364 = vmatprep.subr.mxu0 %v20432_v54  ;;  %21220 = vst [vmem:[#allocation52_spill] sm:$0xff] %v15410_v10  ;;  %v20444_v28 = vunpack.c.h.bf16 %v15410_v10  ;;  %v21227_v43 = vunpack.c.l.bf16 %v15410_v10 }
 0x155   : > { %1365 = vmatpush1.msra.mxu0 %v21219_v5  ;;  %v15421_v5 = vld [vmem:[%s21145_s2 + $0x230] sm:$0xff] }
 0x156   : > { %1366 = vmatprep.subr.mxu0 %v20435_v60  ;;  %21222 = vst [vmem:[#allocation53_spill] sm:$0xff] %v15421_v5  ;;  %v20447_v54 = vunpack.c.h.bf16 %v15421_v5  ;;  %v21229_v11 = vunpack.c.l.bf16 %v15421_v5 }
 0x157   : > { %1367 = vmatpush1.msra.mxu0 %v21221_v18  ;;  %v15432_v18 = vld [vmem:[%s21145_s2 + $0x228] sm:$0xff] }
 0x158   : > { %1368 = vmatprep.subr.mxu0 %v20438_v24  ;;  %21224 = vst [vmem:[#allocation54_spill] sm:$0xff] %v15432_v18  ;;  %v20450_v60 = vunpack.c.h.bf16 %v15432_v18  ;;  %v21231_v10 = vunpack.c.l.bf16 %v15432_v18 }
 0x159   : > { %1369 = vmatpush1.msra.mxu0 %v21223_v42  ;;  %v15443_v42 = vld [vmem:[%s21145_s2 + $0x220] sm:$0xff] }
 0x15a   : > { %1370 = vmatprep.subr.mxu0 %v20441_v6  ;;  %21226 = vst [vmem:[#allocation55_spill] sm:$0xff] %v15443_v42  ;;  %v20453_v24 = vunpack.c.h.bf16 %v15443_v42  ;;  %v21233_v5 = vunpack.c.l.bf16 %v15443_v42 }
 0x15b   : > { %1371 = vmatpush1.msra.mxu0 %v21225_v3  ;;  %v15454_v3 = vld [vmem:[%s21145_s2 + $0x218] sm:$0xff] }
 0x15c   : > { %1372 = vmatprep.subr.mxu0 %v20444_v28  ;;  %21228 = vst [vmem:[#allocation56_spill] sm:$0xff] %v15454_v3  ;;  %v20456_v6 = vunpack.c.h.bf16 %v15454_v3  ;;  %v21235_v18 = vunpack.c.l.bf16 %v15454_v3 }
 0x15d   : > { %1373 = vmatpush1.msra.mxu0 %v21227_v43  ;;  %v15465_v43 = vld [vmem:[%s21145_s2 + $0x210] sm:$0xff] }
 0x15e   : > { %1374 = vmatprep.subr.mxu0 %v20447_v54  ;;  %21230 = vst [vmem:[#allocation57_spill] sm:$0xff] %v15465_v43  ;;  %v20459_v28 = vunpack.c.h.bf16 %v15465_v43  ;;  %v21237_v42 = vunpack.c.l.bf16 %v15465_v43 }
 0x15f   : > { %1375 = vmatpush1.msra.mxu0 %v21229_v11  ;;  %v15476_v11 = vld [vmem:[%s21145_s2 + $0x208] sm:$0xff] }
 0x160   : > { %1376 = vmatprep.subr.mxu0 %v20450_v60  ;;  %21232 = vst [vmem:[#allocation58_spill] sm:$0xff] %v15476_v11  ;;  %v20462_v54 = vunpack.c.h.bf16 %v15476_v11  ;;  %v21239_v3 = vunpack.c.l.bf16 %v15476_v11 }
 0x161   : > { %1377 = vmatpush1.msra.mxu0 %v21231_v10  ;;  %v15487_v10 = vld [vmem:[%s21145_s2 + $0x200] sm:$0xff] }
 0x162   : > { %1378 = vmatprep.subr.mxu0 %v20453_v24  ;;  %21234 = vst [vmem:[#allocation59_spill] sm:$0xff] %v15487_v10  ;;  %v20465_v60 = vunpack.c.h.bf16 %v15487_v10  ;;  %v21241_v43 = vunpack.c.l.bf16 %v15487_v10 }
 0x163   : > { %1379 = vmatpush1.msra.mxu0 %v21233_v5  ;;  %v15498_v5 = vld [vmem:[%s21145_s2 + $0x2f8] sm:$0xff] }
 0x164   : > { %1380 = vmatprep.subr.mxu0 %v20456_v6  ;;  %21236 = vst [vmem:[#allocation60_spill] sm:$0xff] %v15498_v5  ;;  %v20468_v24 = vunpack.c.h.bf16 %v15498_v5  ;;  %v21243_v11 = vunpack.c.l.bf16 %v15498_v5 }
 0x165   : > { %1381 = vmatpush1.msra.mxu0 %v21235_v18  ;;  %v15509_v18 = vld [vmem:[%s21145_s2 + $0x2f0] sm:$0xff] }
 0x166   : > { %1382 = vmatprep.subr.mxu0 %v20459_v28  ;;  %21238 = vst [vmem:[#allocation61_spill] sm:$0xff] %v15509_v18  ;;  %v20471_v6 = vunpack.c.h.bf16 %v15509_v18  ;;  %v21245_v10 = vunpack.c.l.bf16 %v15509_v18 }
 0x167   : > { %1383 = vmatpush1.msra.mxu0 %v21237_v42  ;;  %v15520_v42 = vld [vmem:[%s21145_s2 + $0x2e8] sm:$0xff] }
 0x168   : > { %1384 = vmatprep.subr.mxu0 %v20462_v54  ;;  %21240 = vst [vmem:[#allocation62_spill] sm:$0xff] %v15520_v42  ;;  %v20474_v28 = vunpack.c.h.bf16 %v15520_v42  ;;  %v21247_v5 = vunpack.c.l.bf16 %v15520_v42 }
 0x169   : > { %1385 = vmatpush1.msra.mxu0 %v21239_v3  ;;  %v15531_v3 = vld [vmem:[%s21145_s2 + $0x2e0] sm:$0xff] }
 0x16a   : > { %1386 = vmatprep.subr.mxu0 %v20465_v60  ;;  %21242 = vst [vmem:[#allocation63_spill] sm:$0xff] %v15531_v3  ;;  %v20477_v54 = vunpack.c.h.bf16 %v15531_v3  ;;  %v21249_v18 = vunpack.c.l.bf16 %v15531_v3 }
 0x16b   : > { %1387 = vmatpush1.msra.mxu0 %v21241_v43  ;;  %v15542_v43 = vld [vmem:[%s21145_s2 + $0x2d8] sm:$0xff] }
 0x16c   : > { %1388 = vmatprep.subr.mxu0 %v20468_v24  ;;  %21244 = vst [vmem:[#allocation64_spill] sm:$0xff] %v15542_v43  ;;  %v20480_v60 = vunpack.c.h.bf16 %v15542_v43  ;;  %v21251_v42 = vunpack.c.l.bf16 %v15542_v43 }
 0x16d   : > { %1389 = vmatpush2.msra.mxu0 %v21243_v11  ;;  %v15553_v11 = vld [vmem:[%s21145_s2 + $0x2d0] sm:$0xff] }
 0x16e   : > { %1390 = vmatprep.subr.mxu0 %v20471_v6  ;;  %21246 = vst [vmem:[#allocation65_spill] sm:$0xff] %v15553_v11  ;;  %v20483_v24 = vunpack.c.h.bf16 %v15553_v11  ;;  %v21253_v3 = vunpack.c.l.bf16 %v15553_v11 }
 0x16f   : > { %1391 = vmatpush2.msra.mxu0 %v21245_v10  ;;  %v15564_v10 = vld [vmem:[%s21145_s2 + $0x2c8] sm:$0xff] }
 0x170   : > { %1392 = vmatprep.subr.mxu0 %v20474_v28  ;;  %21248 = vst [vmem:[#allocation66_spill] sm:$0xff] %v15564_v10  ;;  %v20486_v6 = vunpack.c.h.bf16 %v15564_v10  ;;  %v21255_v43 = vunpack.c.l.bf16 %v15564_v10 }
 0x171   : > { %1393 = vmatpush2.msra.mxu0 %v21247_v5  ;;  %v15575_v5 = vld [vmem:[%s21145_s2 + $0x2c0] sm:$0xff] }
 0x172   : > { %1394 = vmatprep.subr.mxu0 %v20477_v54  ;;  %21250 = vst [vmem:[#allocation67_spill] sm:$0xff] %v15575_v5  ;;  %v20489_v28 = vunpack.c.h.bf16 %v15575_v5  ;;  %v21257_v11 = vunpack.c.l.bf16 %v15575_v5 }
 0x173   : > { %1395 = vmatpush2.msra.mxu0 %v21249_v18  ;;  %v15586_v18 = vld [vmem:[%s21145_s2 + $0x2b8] sm:$0xff] }
 0x174   : > { %1396 = vmatprep.subr.mxu0 %v20480_v60  ;;  %21252 = vst [vmem:[#allocation68_spill] sm:$0xff] %v15586_v18  ;;  %v20492_v54 = vunpack.c.h.bf16 %v15586_v18  ;;  %v21259_v10 = vunpack.c.l.bf16 %v15586_v18 }
 0x175   : > { %1397 = vmatpush2.msra.mxu0 %v21251_v42  ;;  %v15597_v42 = vld [vmem:[%s21145_s2 + $0x2b0] sm:$0xff] }
 0x176   : > { %1398 = vmatprep.subr.mxu0 %v20483_v24  ;;  %21254 = vst [vmem:[#allocation69_spill] sm:$0xff] %v15597_v42  ;;  %v20495_v60 = vunpack.c.h.bf16 %v15597_v42  ;;  %v21261_v5 = vunpack.c.l.bf16 %v15597_v42 }
 0x177   : > { %1399 = vmatpush2.msra.mxu0 %v21253_v3  ;;  %v15608_v3 = vld [vmem:[%s21145_s2 + $0x2a8] sm:$0xff] }
 0x178   : > { %1400 = vmatprep.subr.mxu0 %v20486_v6  ;;  %21256 = vst [vmem:[#allocation70_spill] sm:$0xff] %v15608_v3  ;;  %v20498_v24 = vunpack.c.h.bf16 %v15608_v3  ;;  %v21263_v18 = vunpack.c.l.bf16 %v15608_v3 }
 0x179   : > { %1401 = vmatpush2.msra.mxu0 %v21255_v43  ;;  %v15619_v43 = vld [vmem:[%s21145_s2 + $0x2a0] sm:$0xff] }
 0x17a   : > { %1402 = vmatprep.subr.mxu0 %v20489_v28  ;;  %21258 = vst [vmem:[#allocation71_spill] sm:$0xff] %v15619_v43  ;;  %v20501_v6 = vunpack.c.h.bf16 %v15619_v43  ;;  %v21265_v42 = vunpack.c.l.bf16 %v15619_v43 }
 0x17b   : > { %1403 = vmatpush2.msra.mxu0 %v21257_v11  ;;  %v15630_v11 = vld [vmem:[%s21145_s2 + $0x298] sm:$0xff] }
 0x17c   : > { %1404 = vmatprep.subr.mxu0 %v20492_v54  ;;  %21260 = vst [vmem:[#allocation72_spill] sm:$0xff] %v15630_v11  ;;  %v20506_v28 = vunpack.c.h.bf16 %v15630_v11  ;;  %v21267_v3 = vunpack.c.l.bf16 %v15630_v11  ;;  %v15718_v11 = vld [vmem:[%s21145_s2 + $0x360] sm:$0xff] }
 0x17d   : > { %1405 = vmatpush2.msra.mxu0 %v21259_v10  ;;  %v15641_v10 = vld [vmem:[%s21145_s2 + $0x290] sm:$0xff]  ;;  %21271 = vst [vmem:[#allocation79_spill] sm:$0xff] %v15718_v11 }
 0x17e   : > { %1406 = vmatprep.subr.mxu0 %v20495_v60  ;;  %21262 = vst [vmem:[#allocation73_spill] sm:$0xff] %v15641_v10  ;;  %v20505_v54 = vunpack.c.h.bf16 %v15641_v10 }
 0x17f   : > { %1407 = vmatpush2.msra.mxu0 %v21261_v5  ;;  %v15652_v5 = vld [vmem:[%s21145_s2 + $0x288] sm:$0xff] }
 0x180   : > { %1408 = vmatprep.subr.mxu0 %v20498_v24  ;;  %21264 = vst [vmem:[#allocation74_spill] sm:$0xff] %v15652_v5  ;;  %v20504_v24 = vunpack.c.l.bf16 %v15641_v10  ;;  %v20508_v60 = vunpack.c.h.bf16 %v15652_v5 }
 0x181   : > { %1409 = vmatpush2.msra.mxu0 %v21263_v18  ;;  %v15663_v18 = vld [vmem:[%s21145_s2 + $0x280] sm:$0xff] }
 0x182   : > { %1410 = vmatprep.subr.mxu0 %v20501_v6  ;;  %21266 = vst [vmem:[#allocation75_spill] sm:$0xff] %v15663_v18  ;;  %v20507_v6 = vunpack.c.l.bf16 %v15652_v5  ;;  %v20509_v43 = vunpack.c.l.bf16 %v15663_v18  ;;  %v15709_v5 = vld [vmem:[%s21145_s2 + $0x368] sm:$0xff] }
 0x183   : > { %1411 = vmatpush2.msra.mxu0 %v21265_v42  ;;  %v20510_v42 = vunpack.c.h.bf16 %v15663_v18  ;;  %21270 = vst [vmem:[#allocation78_spill] sm:$0xff] %v15709_v5  ;;  %v21278_v10 = vunpack.c.h.bf16 %v15709_v5  ;;  %v21279_v35 = vunpack.c.l.bf16 %v15709_v5 }
 0x184   : > { %1412 = vmatprep.subr.mxu0 %v20506_v28 }
 0x185   : > { %1413 = vmatpush2.msra.mxu0 %v21267_v3 }
 0x186   : > { %1414 = vmatprep.subr.mxu0 %v20505_v54 }
 0x187   : > { %1415 = vmatpush2.msra.mxu0 %v20504_v24 }
 0x188   : > { %1416 = vmatprep.subr.mxu0 %v20508_v60 }
 0x189   : > { %1417 = vmatpush2.msra.mxu0 %v20507_v6  ;;  %v15694_v6 = vld [vmem:[%s21145_s2 + $0x378] sm:$0xff] }
 0x18a   : > { %1418 = vmatprep.subr.mxu0 %v20510_v42  ;;  %21268 = vst [vmem:[#allocation76_spill] sm:$0xff] %v15694_v6 }
 0x18b   : > { %1419 = vmatpush2.msra.mxu0 %v20509_v43  ;;  %v15699_v43 = vld [vmem:[%s21145_s2 + $0x370] sm:$0xff] }
 0x18c   : > { %1421 = vmatmul.mubr.f32.vlgmr.msra.gmra.mxu0 %v15273_v36  ;;  %21269 = vst [vmem:[#allocation77_spill] sm:$0xff] %v15699_v43  ;;  %v21275_v42 = vunpack.c.h.bf16 %v15699_v43 }
 0x18d   : > { %1754 = vmatprep.mubr.f32.mxu0 %v21212_v31 }
 0x20b   : > { %v1254_v24 = vpop.f32.mrf.mxu1 }
 0x20c   : > { %v1174_v3 = vpop.f32.mrf.mxu0 }
 0x20d   : > { %v15687_v54 = vadd.f32 %v1254_v24, %v1174_v3  ;;  %v11337_v24 = vld [vmem:[%s21208_s5 + $0x10] sm:$0xff]  ;;  %v21272_v3 = vunpack.c.h.bf16 %v15694_v6 }
 0x20e   : > { %v15689_v28 = vpop.f32.mrf.mxu0 }
 0x24c   : > { %v1422_v60 = vpop.f32.mrf.mxu0 }
 0x24e   : > { %v1424_v18 = vpop.f32.mrf.mxu0 }
 0x24f   : > { %11338 = vmatprep.subr.msk.mxu1 %vm1101_vm0, %v1424_v18  ;;  %v21273_v18 = vunpack.c.l.bf16 %v15694_v6 }
 0x250   : > { %11339 = vmatpush1.msk.msra.mxu1 %vm1101_vm0, %v1422_v60  ;;  %v15730_v60 = vld [vmem:[%s21145_s2 + $0x358] sm:$0xff] }
 0x251   : > { %11340 = vmatmul.mubr.msk.f32.vlgmr.msra.gmra.mxu1 %vm1097_vm1, %v11337_v24  ;;  %1608 = vmatprep.subr.mxu1 %v21272_v3  ;;  %21274 = vst [vmem:[#allocation80_spill] sm:$0xff] %v15730_v60  ;;  %v20529_v24 = vunpack.c.h.bf16 %v15718_v11  ;;  %v21276_v3 = vunpack.c.l.bf16 %v15699_v43  ;;  %v20532_v6 = vunpack.c.h.bf16 %v15730_v60  ;;  %v21281_v43 = vunpack.c.l.bf16 %v15718_v11 }
 0x252   : > { %1609 = vmatpush1.msra.mxu1 %v21273_v18  ;;  %1672 = vmatprep.mubr.f32.mxu1 %v15294_v19  ;;  %v15742_v18 = vld [vmem:[%s21145_s2 + $0x350] sm:$0xff]  ;;  %v21283_v5 = vunpack.c.l.bf16 %v15730_v60 }
 0x253   : > { %1610 = vmatprep.subr.mxu1 %v21275_v42  ;;  %21277 = vst [vmem:[#allocation81_spill] sm:$0xff] %v15742_v18  ;;  %v20535_v23 = vunpack.c.h.bf16 %v15742_v18  ;;  %v21285_v11 = vunpack.c.l.bf16 %v15742_v18 }
 0x254   : > { %1611 = vmatpush1.msra.mxu1 %v21276_v3  ;;  %v15753_v3 = vld [vmem:[%s21145_s2 + $0x348] sm:$0xff] }
 0x255   : > { %1612 = vmatprep.subr.mxu1 %v21278_v10  ;;  %21280 = vst [vmem:[#allocation82_spill] sm:$0xff] %v15753_v3  ;;  %v20538_v42 = vunpack.c.h.bf16 %v15753_v3  ;;  %v21287_v60 = vunpack.c.l.bf16 %v15753_v3 }
 0x256   : > { %1613 = vmatpush1.msra.mxu1 %v21279_v35  ;;  %v15764_v35 = vld [vmem:[%s21145_s2 + $0x340] sm:$0xff] }
 0x257   : > { %1614 = vmatprep.subr.mxu1 %v20529_v24  ;;  %21282 = vst [vmem:[#allocation83_spill] sm:$0xff] %v15764_v35  ;;  %v20541_v10 = vunpack.c.h.bf16 %v15764_v35  ;;  %v21289_v18 = vunpack.c.l.bf16 %v15764_v35 }
 0x258   : > { %1615 = vmatpush1.msra.mxu1 %v21281_v43  ;;  %v15775_v43 = vld [vmem:[%s21145_s2 + $0x338] sm:$0xff] }
 0x259   : > { %1616 = vmatprep.subr.mxu1 %v20532_v6  ;;  %21284 = vst [vmem:[#allocation84_spill] sm:$0xff] %v15775_v43  ;;  %v20544_v24 = vunpack.c.h.bf16 %v15775_v43  ;;  %v21291_v3 = vunpack.c.l.bf16 %v15775_v43 }
 0x25a   : > { %1617 = vmatpush1.msra.mxu1 %v21283_v5  ;;  %v15786_v5 = vld [vmem:[%s21145_s2 + $0x330] sm:$0xff] }
 0x25b   : > { %1618 = vmatprep.subr.mxu1 %v20535_v23  ;;  %21286 = vst [vmem:[#allocation85_spill] sm:$0xff] %v15786_v5  ;;  %v20547_v6 = vunpack.c.h.bf16 %v15786_v5  ;;  %v21293_v35 = vunpack.c.l.bf16 %v15786_v5 }
 0x25c   : > { %1619 = vmatpush1.msra.mxu1 %v21285_v11  ;;  %v15797_v11 = vld [vmem:[%s21145_s2 + $0x328] sm:$0xff] }
 0x25d   : > { %1620 = vmatprep.subr.mxu1 %v20538_v42  ;;  %21288 = vst [vmem:[#allocation86_spill] sm:$0xff] %v15797_v11  ;;  %v20550_v23 = vunpack.c.h.bf16 %v15797_v11  ;;  %v21295_v43 = vunpack.c.l.bf16 %v15797_v11 }
 0x25e   : > { %1621 = vmatpush1.msra.mxu1 %v21287_v60  ;;  %v15808_v60 = vld [vmem:[%s21145_s2 + $0x320] sm:$0xff] }
 0x25f   : > { %1622 = vmatprep.subr.mxu1 %v20541_v10  ;;  %21290 = vst [vmem:[#allocation87_spill] sm:$0xff] %v15808_v60  ;;  %v20553_v42 = vunpack.c.h.bf16 %v15808_v60  ;;  %v21297_v5 = vunpack.c.l.bf16 %v15808_v60 }
 0x260   : > { %1623 = vmatpush1.msra.mxu1 %v21289_v18  ;;  %v15819_v18 = vld [vmem:[%s21145_s2 + $0x318] sm:$0xff] }
 0x261   : > { %1624 = vmatprep.subr.mxu1 %v20544_v24  ;;  %21292 = vst [vmem:[#allocation88_spill] sm:$0xff] %v15819_v18  ;;  %v20556_v10 = vunpack.c.h.bf16 %v15819_v18  ;;  %v21299_v11 = vunpack.c.l.bf16 %v15819_v18 }
 0x262   : > { %1625 = vmatpush1.msra.mxu1 %v21291_v3  ;;  %v15830_v3 = vld [vmem:[%s21145_s2 + $0x310] sm:$0xff] }
 0x263   : > { %1626 = vmatprep.subr.mxu1 %v20547_v6  ;;  %21294 = vst [vmem:[#allocation89_spill] sm:$0xff] %v15830_v3  ;;  %v20559_v24 = vunpack.c.h.bf16 %v15830_v3  ;;  %v21301_v60 = vunpack.c.l.bf16 %v15830_v3 }
 0x264   : > { %1627 = vmatpush1.msra.mxu1 %v21293_v35  ;;  %v15841_v35 = vld [vmem:[%s21145_s2 + $0x308] sm:$0xff] }
 0x265   : > { %1628 = vmatprep.subr.mxu1 %v20550_v23  ;;  %21296 = vst [vmem:[#allocation90_spill] sm:$0xff] %v15841_v35  ;;  %v20562_v6 = vunpack.c.h.bf16 %v15841_v35  ;;  %v21303_v18 = vunpack.c.l.bf16 %v15841_v35 }
 0x266   : > { %1629 = vmatpush1.msra.mxu1 %v21295_v43  ;;  %v15852_v43 = vld [vmem:[%s21145_s2 + $0x300] sm:$0xff] }
 0x267   : > { %1630 = vmatprep.subr.mxu1 %v20553_v42  ;;  %21298 = vst [vmem:[#allocation91_spill] sm:$0xff] %v15852_v43  ;;  %v20565_v23 = vunpack.c.h.bf16 %v15852_v43  ;;  %v21305_v3 = vunpack.c.l.bf16 %v15852_v43 }
 0x268   : > { %1631 = vmatpush1.msra.mxu1 %v21297_v5  ;;  %v15863_v5 = vld [vmem:[%s21145_s2 + $0x3f8] sm:$0xff] }
 0x269   : > { %1632 = vmatprep.subr.mxu1 %v20556_v10  ;;  %21300 = vst [vmem:[#allocation92_spill] sm:$0xff] %v15863_v5  ;;  %v20568_v42 = vunpack.c.h.bf16 %v15863_v5  ;;  %v21307_v35 = vunpack.c.l.bf16 %v15863_v5 }
 0x26a   : > { %1633 = vmatpush1.msra.mxu1 %v21299_v11  ;;  %v15874_v11 = vld [vmem:[%s21145_s2 + $0x3f0] sm:$0xff] }
 0x26b   : > { %1634 = vmatprep.subr.mxu1 %v20559_v24  ;;  %21302 = vst [vmem:[#allocation93_spill] sm:$0xff] %v15874_v11  ;;  %v20571_v10 = vunpack.c.h.bf16 %v15874_v11  ;;  %v21309_v43 = vunpack.c.l.bf16 %v15874_v11 }
 0x26c   : > { %1635 = vmatpush1.msra.mxu1 %v21301_v60  ;;  %v15885_v60 = vld [vmem:[%s21145_s2 + $0x3e8] sm:$0xff] }
 0x26d   : > { %1636 = vmatprep.subr.mxu1 %v20562_v6  ;;  %21304 = vst [vmem:[#allocation94_spill] sm:$0xff] %v15885_v60  ;;  %v20574_v24 = vunpack.c.h.bf16 %v15885_v60  ;;  %v21311_v5 = vunpack.c.l.bf16 %v15885_v60 }
 0x26e   : > { %1637 = vmatpush1.msra.mxu1 %v21303_v18  ;;  %v15896_v18 = vld [vmem:[%s21145_s2 + $0x3e0] sm:$0xff] }
 0x26f   : > { %1638 = vmatprep.subr.mxu1 %v20565_v23  ;;  %21306 = vst [vmem:[#allocation95_spill] sm:$0xff] %v15896_v18  ;;  %v20577_v6 = vunpack.c.h.bf16 %v15896_v18  ;;  %v21313_v11 = vunpack.c.l.bf16 %v15896_v18 }
 0x270   : > { %1639 = vmatpush1.msra.mxu1 %v21305_v3  ;;  %v15907_v3 = vld [vmem:[%s21145_s2 + $0x3d8] sm:$0xff] }
 0x271   : > { %1640 = vmatprep.subr.mxu1 %v20568_v42  ;;  %21308 = vst [vmem:[#allocation96_spill] sm:$0xff] %v15907_v3  ;;  %v20580_v23 = vunpack.c.h.bf16 %v15907_v3  ;;  %v21315_v60 = vunpack.c.l.bf16 %v15907_v3 }
 0x272   : > { %1641 = vmatpush2.msra.mxu1 %v21307_v35  ;;  %v15918_v35 = vld [vmem:[%s21145_s2 + $0x3d0] sm:$0xff] }
 0x273   : > { %1642 = vmatprep.subr.mxu1 %v20571_v10  ;;  %21310 = vst [vmem:[#allocation97_spill] sm:$0xff] %v15918_v35  ;;  %v20583_v42 = vunpack.c.h.bf16 %v15918_v35  ;;  %v21317_v18 = vunpack.c.l.bf16 %v15918_v35 }
 0x274   : > { %1643 = vmatpush2.msra.mxu1 %v21309_v43  ;;  %v15929_v43 = vld [vmem:[%s21145_s2 + $0x3c8] sm:$0xff] }
 0x275   : > { %1644 = vmatprep.subr.mxu1 %v20574_v24  ;;  %21312 = vst [vmem:[#allocation98_spill] sm:$0xff] %v15929_v43  ;;  %v20586_v10 = vunpack.c.h.bf16 %v15929_v43  ;;  %v21319_v3 = vunpack.c.l.bf16 %v15929_v43 }
 0x276   : > { %1645 = vmatpush2.msra.mxu1 %v21311_v5  ;;  %v15940_v5 = vld [vmem:[%s21145_s2 + $0x3c0] sm:$0xff] }
 0x277   : > { %1646 = vmatprep.subr.mxu1 %v20577_v6  ;;  %21314 = vst [vmem:[#allocation99_spill] sm:$0xff] %v15940_v5  ;;  %v20589_v24 = vunpack.c.h.bf16 %v15940_v5  ;;  %v21321_v35 = vunpack.c.l.bf16 %v15940_v5 }
 0x278   : > { %1647 = vmatpush2.msra.mxu1 %v21313_v11  ;;  %v15951_v11 = vld [vmem:[%s21145_s2 + $0x3b8] sm:$0xff] }
 0x279   : > { %1648 = vmatprep.subr.mxu1 %v20580_v23  ;;  %21316 = vst [vmem:[#allocation100_spill] sm:$0xff] %v15951_v11  ;;  %v20592_v6 = vunpack.c.h.bf16 %v15951_v11  ;;  %v21323_v43 = vunpack.c.l.bf16 %v15951_v11 }
 0x27a   : > { %1649 = vmatpush2.msra.mxu1 %v21315_v60  ;;  %v15962_v60 = vld [vmem:[%s21145_s2 + $0x3b0] sm:$0xff] }
 0x27b   : > { %1650 = vmatprep.subr.mxu1 %v20583_v42  ;;  %21318 = vst [vmem:[#allocation101_spill] sm:$0xff] %v15962_v60  ;;  %v20595_v23 = vunpack.c.h.bf16 %v15962_v60  ;;  %v21325_v5 = vunpack.c.l.bf16 %v15962_v60 }
 0x27c   : > { %1651 = vmatpush2.msra.mxu1 %v21317_v18  ;;  %v15973_v18 = vld [vmem:[%s21145_s2 + $0x3a8] sm:$0xff] }
 0x27d   : > { %1652 = vmatprep.subr.mxu1 %v20586_v10  ;;  %21320 = vst [vmem:[#allocation102_spill] sm:$0xff] %v15973_v18  ;;  %v20598_v42 = vunpack.c.h.bf16 %v15973_v18  ;;  %v21327_v11 = vunpack.c.l.bf16 %v15973_v18 }
 0x27e   : > { %1653 = vmatpush2.msra.mxu1 %v21319_v3  ;;  %v15984_v3 = vld [vmem:[%s21145_s2 + $0x3a0] sm:$0xff] }
 0x27f   : > { %1654 = vmatprep.subr.mxu1 %v20589_v24  ;;  %21322 = vst [vmem:[#allocation103_spill] sm:$0xff] %v15984_v3  ;;  %v20601_v10 = vunpack.c.h.bf16 %v15984_v3  ;;  %v21329_v60 = vunpack.c.l.bf16 %v15984_v3 }
 0x280   : > { %1655 = vmatpush2.msra.mxu1 %v21321_v35  ;;  %v15995_v35 = vld [vmem:[%s21145_s2 + $0x398] sm:$0xff] }
 0x281   : > { %1656 = vmatprep.subr.mxu1 %v20592_v6  ;;  %21324 = vst [vmem:[#allocation104_spill] sm:$0xff] %v15995_v35  ;;  %v20610_v24 = vunpack.c.h.bf16 %v15995_v35  ;;  %v21331_v18 = vunpack.c.l.bf16 %v15995_v35 }
 0x282   : > { %1657 = vmatpush2.msra.mxu1 %v21323_v43  ;;  %v16006_v43 = vld [vmem:[%s21145_s2 + $0x390] sm:$0xff] }
 0x283   : > { %1658 = vmatprep.subr.mxu1 %v20595_v23  ;;  %21326 = vst [vmem:[#allocation105_spill] sm:$0xff] %v16006_v43  ;;  %v20605_v6 = vunpack.c.h.bf16 %v16006_v43 }
 0x284   : > { %1659 = vmatpush2.msra.mxu1 %v21325_v5  ;;  %v16017_v5 = vld [vmem:[%s21145_s2 + $0x388] sm:$0xff] }
 0x285   : > { %1660 = vmatprep.subr.mxu1 %v20598_v42  ;;  %21328 = vst [vmem:[#allocation106_spill] sm:$0xff] %v16017_v5  ;;  %v20604_v42 = vunpack.c.l.bf16 %v16006_v43  ;;  %v20606_v23 = vunpack.c.h.bf16 %v16017_v5  ;;  %v16086_v43 = vld [vmem:[%s21145_s2 + $0x460] sm:$0xff] }
 0x286   : > { %1661 = vmatpush2.msra.mxu1 %v21327_v11  ;;  %v16028_v11 = vld [vmem:[%s21145_s2 + $0x380] sm:$0xff]  ;;  %21335 = vst [vmem:[#allocation111_spill] sm:$0xff] %v16086_v43 }
 0x287   : > { %1662 = vmatprep.subr.mxu1 %v20601_v10  ;;  %21330 = vst [vmem:[#allocation107_spill] sm:$0xff] %v16028_v11  ;;  %v20607_v10 = vunpack.c.l.bf16 %v16017_v5  ;;  %v20609_v3 = vunpack.c.l.bf16 %v16028_v11 }
 0x288   : > { %1663 = vmatpush2.msra.mxu1 %v21329_v60  ;;  %v20608_v60 = vunpack.c.h.bf16 %v16028_v11  ;;  %v16077_v11 = vld [vmem:[%s21145_s2 + $0x468] sm:$0xff] }
 0x289   : > { %1664 = vmatprep.subr.mxu1 %v20610_v24  ;;  %21334 = vst [vmem:[#allocation110_spill] sm:$0xff] %v16077_v11  ;;  %v21342_v5 = vunpack.c.h.bf16 %v16077_v11  ;;  %v21343_v47 = vunpack.c.l.bf16 %v16077_v11 }
 0x28a   : > { %1665 = vmatpush2.msra.mxu1 %v21331_v18  ;;  %v16052_v18 = vpop.f32.mrf.mxu1 }
 0x28b   : > { %1666 = vmatprep.subr.mxu1 %v20605_v6 }
 0x28c   : > { %1667 = vmatpush2.msra.mxu1 %v20604_v42 }
 0x28d   : > { %1668 = vmatprep.subr.mxu1 %v20606_v23 }
 0x28e   : > { %1669 = vmatpush2.msra.mxu1 %v20607_v10  ;;  %v16062_v10 = vld [vmem:[%s21145_s2 + $0x478] sm:$0xff] }
 0x28f   : > { %1670 = vmatprep.subr.mxu1 %v20608_v60  ;;  %21332 = vst [vmem:[#allocation108_spill] sm:$0xff] %v16062_v10 }
 0x290   : > { %1671 = vmatpush2.msra.mxu1 %v20609_v3 }
 0x291   : > { %1673 = vmatmul.mubr.f32.vlgmr.msra.gmra.mxu1 %v15273_v36  ;;  %v16067_v36 = vld [vmem:[%s21145_s2 + $0x470] sm:$0xff] }
 0x292   : > { %2006 = vmatprep.mubr.f32.mxu1 %v21212_v31  ;;  %21333 = vst [vmem:[#allocation109_spill] sm:$0xff] %v16067_v36  ;;  %v21339_v3 = vunpack.c.h.bf16 %v16067_v36 }
 0x311   : > { %v1504_v42 = vpop.f32.mrf.mxu1 }
 0x312   : > { %v16055_v6 = vadd.f32 %v1504_v42, %v15687_v54  ;;  %v11373_v54 = vld [vmem:[%s21208_s5 + $0x18] sm:$0xff]  ;;  %v21336_v42 = vunpack.c.h.bf16 %v16062_v10 }
 0x313   : > { %v16057_v23 = vpop.f32.mrf.mxu1 }
 0x351   : > { %v1674_v60 = vpop.f32.mrf.mxu1 }
 0x353   : > { %v1676_v24 = vpop.f32.mrf.mxu1 }
 0x354   : > { %11374 = vmatprep.subr.msk.mxu0 %vm1101_vm0, %v1676_v24  ;;  %v21337_v24 = vunpack.c.l.bf16 %v16062_v10 }
 0x355   : > { %11375 = vmatpush1.msk.msra.mxu0 %vm1101_vm0, %v1674_v60  ;;  %v16098_v60 = vld [vmem:[%s21145_s2 + $0x458] sm:$0xff] }
 0x356   : > { %11376 = vmatmul.mubr.msk.f32.vlgmr.msra.gmra.mxu0 %vm1097_vm1, %v11373_v54  ;;  %1860 = vmatprep.subr.mxu0 %v21336_v42  ;;  %21338 = vst [vmem:[#allocation112_spill] sm:$0xff] %v16098_v60  ;;  %v20627_v54 = vunpack.c.h.bf16 %v16086_v43  ;;  %v21340_v42 = vunpack.c.l.bf16 %v16067_v36  ;;  %v20630_v10 = vunpack.c.h.bf16 %v16098_v60  ;;  %v21345_v36 = vunpack.c.l.bf16 %v16086_v43 }
 0x357   : > { %1861 = vmatpush1.msra.mxu0 %v21337_v24  ;;  %1924 = vmatprep.mubr.f32.mxu0 %v15294_v19  ;;  %v16110_v24 = vld [vmem:[%s21145_s2 + $0x450] sm:$0xff]  ;;  %v21347_v11 = vunpack.c.l.bf16 %v16098_v60 }
 0x358   : > { %1862 = vmatprep.subr.mxu0 %v21339_v3  ;;  %21341 = vst [vmem:[#allocation113_spill] sm:$0xff] %v16110_v24  ;;  %v20633_v35 = vunpack.c.h.bf16 %v16110_v24  ;;  %v21349_v43 = vunpack.c.l.bf16 %v16110_v24 }
 0x359   : > { %1863 = vmatpush1.msra.mxu0 %v21340_v42  ;;  %v16121_v42 = vld [vmem:[%s21145_s2 + $0x448] sm:$0xff] }
 0x35a   : > { %1864 = vmatprep.subr.mxu0 %v21342_v5  ;;  %21344 = vst [vmem:[#allocation114_spill] sm:$0xff] %v16121_v42  ;;  %v20636_v3 = vunpack.c.h.bf16 %v16121_v42  ;;  %v21351_v60 = vunpack.c.l.bf16 %v16121_v42 }
 0x35b   : > { %1865 = vmatpush1.msra.mxu0 %v21343_v47  ;;  %v16132_v47 = vld [vmem:[%s21145_s2 + $0x440] sm:$0xff] }
 0x35c   : > { %1866 = vmatprep.subr.mxu0 %v20627_v54  ;;  %21346 = vst [vmem:[#allocation115_spill] sm:$0xff] %v16132_v47  ;;  %v20639_v5 = vunpack.c.h.bf16 %v16132_v47  ;;  %v21353_v24 = vunpack.c.l.bf16 %v16132_v47 }
 0x35d   : > { %1867 = vmatpush1.msra.mxu0 %v21345_v36  ;;  %v16143_v36 = vld [vmem:[%s21145_s2 + $0x438] sm:$0xff] }
 0x35e   : > { %1868 = vmatprep.subr.mxu0 %v20630_v10  ;;  %21348 = vst [vmem:[#allocation116_spill] sm:$0xff] %v16143_v36  ;;  %v20642_v54 = vunpack.c.h.bf16 %v16143_v36  ;;  %v21355_v42 = vunpack.c.l.bf16 %v16143_v36 }
 0x35f   : > { %1869 = vmatpush1.msra.mxu0 %v21347_v11  ;;  %v16154_v11 = vld [vmem:[%s21145_s2 + $0x430] sm:$0xff] }
 0x360   : > { %1870 = vmatprep.subr.mxu0 %v20633_v35  ;;  %21350 = vst [vmem:[#allocation117_spill] sm:$0xff] %v16154_v11  ;;  %v20645_v10 = vunpack.c.h.bf16 %v16154_v11  ;;  %v21357_v47 = vunpack.c.l.bf16 %v16154_v11 }
 0x361   : > { %1871 = vmatpush1.msra.mxu0 %v21349_v43  ;;  %v16165_v43 = vld [vmem:[%s21145_s2 + $0x428] sm:$0xff] }
 0x362   : > { %1872 = vmatprep.subr.mxu0 %v20636_v3  ;;  %21352 = vst [vmem:[#allocation118_spill] sm:$0xff] %v16165_v43  ;;  %v20648_v35 = vunpack.c.h.bf16 %v16165_v43  ;;  %v21359_v36 = vunpack.c.l.bf16 %v16165_v43 }
 0x363   : > { %1873 = vmatpush1.msra.mxu0 %v21351_v60  ;;  %v16176_v60 = vld [vmem:[%s21145_s2 + $0x420] sm:$0xff] }
 0x364   : > { %1874 = vmatprep.subr.mxu0 %v20639_v5  ;;  %21354 = vst [vmem:[#allocation119_spill] sm:$0xff] %v16176_v60  ;;  %v20651_v3 = vunpack.c.h.bf16 %v16176_v60  ;;  %v21361_v11 = vunpack.c.l.bf16 %v16176_v60 }
 0x365   : > { %1875 = vmatpush1.msra.mxu0 %v21353_v24  ;;  %v16187_v24 = vld [vmem:[%s21145_s2 + $0x418] sm:$0xff] }
 0x366   : > { %1876 = vmatprep.subr.mxu0 %v20642_v54  ;;  %21356 = vst [vmem:[#allocation120_spill] sm:$0xff] %v16187_v24  ;;  %v20654_v5 = vunpack.c.h.bf16 %v16187_v24  ;;  %v21363_v43 = vunpack.c.l.bf16 %v16187_v24 }
 0x367   : > { %1877 = vmatpush1.msra.mxu0 %v21355_v42  ;;  %v16198_v42 = vld [vmem:[%s21145_s2 + $0x410] sm:$0xff] }
 0x368   : > { %1878 = vmatprep.subr.mxu0 %v20645_v10  ;;  %21358 = vst [vmem:[#allocation121_spill] sm:$0xff] %v16198_v42  ;;  %v20657_v54 = vunpack.c.h.bf16 %v16198_v42  ;;  %v21365_v60 = vunpack.c.l.bf16 %v16198_v42 }
 0x369   : > { %1879 = vmatpush1.msra.mxu0 %v21357_v47  ;;  %v16209_v47 = vld [vmem:[%s21145_s2 + $0x408] sm:$0xff] }
 0x36a   : > { %1880 = vmatprep.subr.mxu0 %v20648_v35  ;;  %21360 = vst [vmem:[#allocation122_spill] sm:$0xff] %v16209_v47  ;;  %v20660_v10 = vunpack.c.h.bf16 %v16209_v47  ;;  %v21367_v24 = vunpack.c.l.bf16 %v16209_v47 }
 0x36b   : > { %1881 = vmatpush1.msra.mxu0 %v21359_v36  ;;  %v16220_v36 = vld [vmem:[%s21145_s2 + $0x400] sm:$0xff] }
 0x36c   : > { %1882 = vmatprep.subr.mxu0 %v20651_v3  ;;  %21362 = vst [vmem:[#allocation123_spill] sm:$0xff] %v16220_v36  ;;  %v20663_v35 = vunpack.c.h.bf16 %v16220_v36  ;;  %v21369_v42 = vunpack.c.l.bf16 %v16220_v36 }
 0x36d   : > { %1883 = vmatpush1.msra.mxu0 %v21361_v11  ;;  %v16231_v11 = vld [vmem:[%s21145_s2 + $0x4f8] sm:$0xff] }
 0x36e   : > { %1884 = vmatprep.subr.mxu0 %v20654_v5  ;;  %21364 = vst [vmem:[#allocation124_spill] sm:$0xff] %v16231_v11  ;;  %v20666_v3 = vunpack.c.h.bf16 %v16231_v11  ;;  %v21371_v47 = vunpack.c.l.bf16 %v16231_v11 }
 0x36f   : > { %1885 = vmatpush1.msra.mxu0 %v21363_v43  ;;  %v16242_v43 = vld [vmem:[%s21145_s2 + $0x4f0] sm:$0xff] }
 0x370   : > { %1886 = vmatprep.subr.mxu0 %v20657_v54  ;;  %21366 = vst [vmem:[#allocation125_spill] sm:$0xff] %v16242_v43  ;;  %v20669_v5 = vunpack.c.h.bf16 %v16242_v43  ;;  %v21373_v36 = vunpack.c.l.bf16 %v16242_v43 }
 0x371   : > { %1887 = vmatpush1.msra.mxu0 %v21365_v60  ;;  %v16253_v60 = vld [vmem:[%s21145_s2 + $0x4e8] sm:$0xff] }
 0x372   : > { %1888 = vmatprep.subr.mxu0 %v20660_v10  ;;  %21368 = vst [vmem:[#allocation126_spill] sm:$0xff] %v16253_v60  ;;  %v20672_v54 = vunpack.c.h.bf16 %v16253_v60  ;;  %v21375_v11 = vunpack.c.l.bf16 %v16253_v60 }
 0x373   : > { %1889 = vmatpush1.msra.mxu0 %v21367_v24  ;;  %v16264_v24 = vld [vmem:[%s21145_s2 + $0x4e0] sm:$0xff] }
 0x374   : > { %1890 = vmatprep.subr.mxu0 %v20663_v35  ;;  %21370 = vst [vmem:[#allocation127_spill] sm:$0xff] %v16264_v24  ;;  %v20675_v10 = vunpack.c.h.bf16 %v16264_v24  ;;  %v21377_v43 = vunpack.c.l.bf16 %v16264_v24 }
 0x375   : > { %1891 = vmatpush1.msra.mxu0 %v21369_v42  ;;  %v16275_v42 = vld [vmem:[%s21145_s2 + $0x4d8] sm:$0xff] }
 0x376   : > { %1892 = vmatprep.subr.mxu0 %v20666_v3  ;;  %21372 = vst [vmem:[#allocation128_spill] sm:$0xff] %v16275_v42  ;;  %v20678_v35 = vunpack.c.h.bf16 %v16275_v42  ;;  %v21379_v60 = vunpack.c.l.bf16 %v16275_v42 }
 0x377   : > { %1893 = vmatpush2.msra.mxu0 %v21371_v47  ;;  %v16286_v47 = vld [vmem:[%s21145_s2 + $0x4d0] sm:$0xff] }
 0x378   : > { %1894 = vmatprep.subr.mxu0 %v20669_v5  ;;  %21374 = vst [vmem:[#allocation129_spill] sm:$0xff] %v16286_v47  ;;  %v20681_v3 = vunpack.c.h.bf16 %v16286_v47  ;;  %v21381_v24 = vunpack.c.l.bf16 %v16286_v47 }
 0x379   : > { %1895 = vmatpush2.msra.mxu0 %v21373_v36  ;;  %v16297_v36 = vld [vmem:[%s21145_s2 + $0x4c8] sm:$0xff] }
 0x37a   : > { %1896 = vmatprep.subr.mxu0 %v20672_v54  ;;  %21376 = vst [vmem:[#allocation130_spill] sm:$0xff] %v16297_v36  ;;  %v20684_v5 = vunpack.c.h.bf16 %v16297_v36  ;;  %v21383_v42 = vunpack.c.l.bf16 %v16297_v36 }
 0x37b   : > { %1897 = vmatpush2.msra.mxu0 %v21375_v11  ;;  %v16308_v11 = vld [vmem:[%s21145_s2 + $0x4c0] sm:$0xff] }
 0x37c   : > { %1898 = vmatprep.subr.mxu0 %v20675_v10  ;;  %21378 = vst [vmem:[#allocation131_spill] sm:$0xff] %v16308_v11  ;;  %v20687_v54 = vunpack.c.h.bf16 %v16308_v11  ;;  %v21385_v47 = vunpack.c.l.bf16 %v16308_v11 }
 0x37d   : > { %1899 = vmatpush2.msra.mxu0 %v21377_v43  ;;  %v16319_v43 = vld [vmem:[%s21145_s2 + $0x4b8] sm:$0xff] }
 0x37e   : > { %1900 = vmatprep.subr.mxu0 %v20678_v35  ;;  %21380 = vst [vmem:[#allocation132_spill] sm:$0xff] %v16319_v43  ;;  %v20690_v10 = vunpack.c.h.bf16 %v16319_v43  ;;  %v21387_v36 = vunpack.c.l.bf16 %v16319_v43 }
 0x37f   : > { %1901 = vmatpush2.msra.mxu0 %v21379_v60  ;;  %v16330_v60 = vld [vmem:[%s21145_s2 + $0x4b0] sm:$0xff] }
 0x380   : > { %1902 = vmatprep.subr.mxu0 %v20681_v3  ;;  %21382 = vst [vmem:[#allocation133_spill] sm:$0xff] %v16330_v60  ;;  %v20693_v35 = vunpack.c.h.bf16 %v16330_v60  ;;  %v21389_v11 = vunpack.c.l.bf16 %v16330_v60 }
 0x381   : > { %1903 = vmatpush2.msra.mxu0 %v21381_v24  ;;  %v16341_v24 = vld [vmem:[%s21145_s2 + $0x4a8] sm:$0xff] }
 0x382   : > { %1904 = vmatprep.subr.mxu0 %v20684_v5  ;;  %21384 = vst [vmem:[#allocation134_spill] sm:$0xff] %v16341_v24  ;;  %v20696_v3 = vunpack.c.h.bf16 %v16341_v24  ;;  %v21391_v43 = vunpack.c.l.bf16 %v16341_v24 }
 0x383   : > { %1905 = vmatpush2.msra.mxu0 %v21383_v42  ;;  %v16352_v42 = vld [vmem:[%s21145_s2 + $0x4a0] sm:$0xff] }
 0x384   : > { %1906 = vmatprep.subr.mxu0 %v20687_v54  ;;  %21386 = vst [vmem:[#allocation135_spill] sm:$0xff] %v16352_v42  ;;  %v20697_v5 = vunpack.c.h.bf16 %v16352_v42  ;;  %v21393_v60 = vunpack.c.l.bf16 %v16352_v42 }
 0x385   : > { %1907 = vmatpush2.msra.mxu0 %v21385_v47  ;;  %v16363_v47 = vld [vmem:[%s21145_s2 + $0x498] sm:$0xff] }
 0x386   : > { %1908 = vmatprep.subr.mxu0 %v20690_v10  ;;  %21388 = vst [vmem:[#allocation136_spill] sm:$0xff] %v16363_v47  ;;  %v20707_v54 = vunpack.c.h.bf16 %v16363_v47 }
 0x387   : > { %1909 = vmatpush2.msra.mxu0 %v21387_v36  ;;  %v16374_v36 = vld [vmem:[%s21145_s2 + $0x490] sm:$0xff] }
 0x388   : > { %1910 = vmatprep.subr.mxu0 %v20693_v35  ;;  %21390 = vst [vmem:[#allocation137_spill] sm:$0xff] %v16374_v36  ;;  %v21396_v42 = vunpack.c.h.bf16 %v16374_v36 }
 0x389   : > { %1911 = vmatpush2.msra.mxu0 %v21389_v11  ;;  %v16385_v11 = vld [vmem:[%s21145_s2 + $0x488] sm:$0xff] }
 0x38a   : > { %1912 = vmatprep.subr.mxu0 %v20696_v3  ;;  %21392 = vst [vmem:[#allocation138_spill] sm:$0xff] %v16385_v11  ;;  %v20702_v3 = vunpack.c.l.bf16 %v16374_v36  ;;  %v20703_v35 = vunpack.c.h.bf16 %v16385_v11  ;;  %v20704_v10 = vunpack.c.l.bf16 %v16385_v11  ;;  %v16446_v11 = vld [vmem:[%s21145_s2 + $0x568] sm:$0xff] }
 0x38b   : > { %1913 = vmatpush2.msra.mxu0 %v21391_v43  ;;  %v16396_v43 = vld [vmem:[%s21145_s2 + $0x480] sm:$0xff]  ;;  %21399 = vst [vmem:[#allocation142_spill] sm:$0xff] %v16446_v11  ;;  %v21407_v36 = vunpack.c.h.bf16 %v16446_v11  ;;  %v21408_v53 = vunpack.c.l.bf16 %v16446_v11 }
 0x38c   : > { %1914 = vmatprep.subr.mxu0 %v20697_v5  ;;  %21394 = vst [vmem:[#allocation139_spill] sm:$0xff] %v16396_v43  ;;  %v21395_v5 = vunpack.c.l.bf16 %v16363_v47  ;;  %v20706_v24 = vunpack.c.l.bf16 %v16396_v43  ;;  %v16455_v47 = vld [vmem:[%s21145_s2 + $0x560] sm:$0xff] }
 0x38d   : > { %1915 = vmatpush2.msra.mxu0 %v21393_v60  ;;  %v20705_v60 = vunpack.c.h.bf16 %v16396_v43  ;;  %21400 = vst [vmem:[#allocation143_spill] sm:$0xff] %v16455_v47 }
 0x38e   : > { %1916 = vmatprep.subr.mxu0 %v20707_v54 }
 0x38f   : > { %1917 = vmatpush2.msra.mxu0 %v21395_v5  ;;  %v16419_v5 = vld [vmem:[%s15242_s0] sm:$0xff] }
 0x390   : > { %1918 = vmatprep.subr.mxu0 %v21396_v42 }
 0x391   : > { %1919 = vmatpush2.msra.mxu0 %v20702_v3 }
 0x392   : > { %1920 = vmatprep.subr.mxu0 %v20703_v35 }
 0x393   : > { %1921 = vmatpush2.msra.mxu0 %v20704_v10  ;;  %v16431_v10 = vld [vmem:[%s21145_s2 + $0x578] sm:$0xff] }
 0x394   : > { %1922 = vmatprep.subr.mxu0 %v20705_v60  ;;  %21397 = vst [vmem:[#allocation140_spill] sm:$0xff] %v16431_v10 }
 0x395   : > { %1923 = vmatpush2.msra.mxu0 %v20706_v24  ;;  %v16436_v24 = vld [vmem:[%s21145_s2 + $0x570] sm:$0xff] }
 0x396   : > { %1925 = vmatmul.mubr.f32.vlgmr.msra.gmra.mxu0 %v16419_v5  ;;  %21398 = vst [vmem:[#allocation141_spill] sm:$0xff] %v16436_v24  ;;  %v21404_v54 = vunpack.c.h.bf16 %v16436_v24 }
 0x397   : > { %2258 = vmatprep.mubr.f32.mxu0 %v21212_v31 }
 0x416   : > { %v1756_v42 = vpop.f32.mrf.mxu0 }
 0x417   : > { %v16424_v3 = vadd.f32 %v1756_v42, %v16055_v6  ;;  %v11409_v6 = vld [vmem:[%s21208_s5 + $0x20] sm:$0xff]  ;;  %v21401_v42 = vunpack.c.h.bf16 %v16431_v10 }
 0x418   : > { %v16426_v35 = vpop.f32.mrf.mxu0 }
 0x456   : > { %v1926_v60 = vpop.f32.mrf.mxu0 }
 0x458   : > { %v1928_v43 = vpop.f32.mrf.mxu0 }
 0x459   : > { %11410 = vmatprep.subr.msk.mxu1 %vm1101_vm0, %v1928_v43  ;;  %v21402_v43 = vunpack.c.l.bf16 %v16431_v10 }
 0x45a   : > { %11411 = vmatpush1.msk.msra.mxu1 %vm1101_vm0, %v1926_v60  ;;  %v16467_v60 = vld [vmem:[%s21145_s2 + $0x558] sm:$0xff] }
 0x45b   : > { %11412 = vmatmul.mubr.msk.f32.vlgmr.msra.gmra.mxu1 %vm1097_vm1, %v11409_v6  ;;  %2112 = vmatprep.subr.mxu1 %v21401_v42  ;;  %21403 = vst [vmem:[#allocation144_spill] sm:$0xff] %v16467_v60  ;;  %v20726_v6 = vunpack.c.h.bf16 %v16455_v47  ;;  %v21405_v42 = vunpack.c.l.bf16 %v16436_v24  ;;  %v20729_v10 = vunpack.c.h.bf16 %v16467_v60  ;;  %v21410_v24 = vunpack.c.l.bf16 %v16455_v47 }
 0x45c   : > { %2113 = vmatpush1.msra.mxu1 %v21402_v43  ;;  %2176 = vmatprep.mubr.f32.mxu1 %v15294_v19  ;;  %v16479_v43 = vld [vmem:[%s21145_s2 + $0x550] sm:$0xff]  ;;  %v21412_v11 = vunpack.c.l.bf16 %v16467_v60 }
 0x45d   : > { %2114 = vmatprep.subr.mxu1 %v21404_v54  ;;  %21406 = vst [vmem:[#allocation145_spill] sm:$0xff] %v16479_v43  ;;  %v20732_v59 = vunpack.c.h.bf16 %v16479_v43  ;;  %v21414_v47 = vunpack.c.l.bf16 %v16479_v43 }
 0x45e   : > { %2115 = vmatpush1.msra.mxu1 %v21405_v42  ;;  %v16490_v42 = vld [vmem:[%s21145_s2 + $0x548] sm:$0xff] }
 0x45f   : > { %2116 = vmatprep.subr.mxu1 %v21407_v36  ;;  %21409 = vst [vmem:[#allocation146_spill] sm:$0xff] %v16490_v42  ;;  %v20735_v54 = vunpack.c.h.bf16 %v16490_v42  ;;  %v21416_v60 = vunpack.c.l.bf16 %v16490_v42 }
 0x460   : > { %2117 = vmatpush1.msra.mxu1 %v21408_v53  ;;  %v16501_v53 = vld [vmem:[%s21145_s2 + $0x540] sm:$0xff] }
 0x461   : > { %2118 = vmatprep.subr.mxu1 %v20726_v6  ;;  %21411 = vst [vmem:[#allocation147_spill] sm:$0xff] %v16501_v53  ;;  %v20738_v36 = vunpack.c.h.bf16 %v16501_v53  ;;  %v21418_v43 = vunpack.c.l.bf16 %v16501_v53 }
 0x462   : > { %2119 = vmatpush1.msra.mxu1 %v21410_v24  ;;  %v16512_v24 = vld [vmem:[%s21145_s2 + $0x538] sm:$0xff] }
 0x463   : > { %2120 = vmatprep.subr.mxu1 %v20729_v10  ;;  %21413 = vst [vmem:[#allocation148_spill] sm:$0xff] %v16512_v24  ;;  %v20741_v6 = vunpack.c.h.bf16 %v16512_v24  ;;  %v21420_v42 = vunpack.c.l.bf16 %v16512_v24 }
 0x464   : > { %2121 = vmatpush1.msra.mxu1 %v21412_v11  ;;  %v16523_v11 = vld [vmem:[%s21145_s2 + $0x530] sm:$0xff] }
 0x465   : > { %2122 = vmatprep.subr.mxu1 %v20732_v59  ;;  %21415 = vst [vmem:[#allocation149_spill] sm:$0xff] %v16523_v11  ;;  %v20744_v10 = vunpack.c.h.bf16 %v16523_v11  ;;  %v21422_v53 = vunpack.c.l.bf16 %v16523_v11 }
 0x466   : > { %2123 = vmatpush1.msra.mxu1 %v21414_v47  ;;  %v16534_v47 = vld [vmem:[%s21145_s2 + $0x528] sm:$0xff] }
 0x467   : > { %2124 = vmatprep.subr.mxu1 %v20735_v54  ;;  %21417 = vst [vmem:[#allocation150_spill] sm:$0xff] %v16534_v47  ;;  %v20747_v59 = vunpack.c.h.bf16 %v16534_v47  ;;  %v21424_v24 = vunpack.c.l.bf16 %v16534_v47 }
 0x468   : > { %2125 = vmatpush1.msra.mxu1 %v21416_v60  ;;  %v16545_v60 = vld [vmem:[%s21145_s2 + $0x520] sm:$0xff] }
 0x469   : > { %2126 = vmatprep.subr.mxu1 %v20738_v36  ;;  %21419 = vst [vmem:[#allocation151_spill] sm:$0xff] %v16545_v60  ;;  %v20750_v54 = vunpack.c.h.bf16 %v16545_v60  ;;  %v21426_v11 = vunpack.c.l.bf16 %v16545_v60 }
 0x46a   : > { %2127 = vmatpush1.msra.mxu1 %v21418_v43  ;;  %v16556_v43 = vld [vmem:[%s21145_s2 + $0x518] sm:$0xff] }
 0x46b   : > { %2128 = vmatprep.subr.mxu1 %v20741_v6  ;;  %21421 = vst [vmem:[#allocation152_spill] sm:$0xff] %v16556_v43  ;;  %v20753_v36 = vunpack.c.h.bf16 %v16556_v43  ;;  %v21428_v47 = vunpack.c.l.bf16 %v16556_v43 }
 0x46c   : > { %2129 = vmatpush1.msra.mxu1 %v21420_v42  ;;  %v16567_v42 = vld [vmem:[%s21145_s2 + $0x510] sm:$0xff] }
 0x46d   : > { %2130 = vmatprep.subr.mxu1 %v20744_v10  ;;  %21423 = vst [vmem:[#allocation153_spill] sm:$0xff] %v16567_v42  ;;  %v20756_v6 = vunpack.c.h.bf16 %v16567_v42  ;;  %v21430_v60 = vunpack.c.l.bf16 %v16567_v42 }
 0x46e   : > { %2131 = vmatpush1.msra.mxu1 %v21422_v53  ;;  %v16578_v53 = vld [vmem:[%s21145_s2 + $0x508] sm:$0xff] }
 0x46f   : > { %2132 = vmatprep.subr.mxu1 %v20747_v59  ;;  %21425 = vst [vmem:[#allocation154_spill] sm:$0xff] %v16578_v53  ;;  %v20759_v10 = vunpack.c.h.bf16 %v16578_v53  ;;  %v21432_v43 = vunpack.c.l.bf16 %v16578_v53 }
 0x470   : > { %2133 = vmatpush1.msra.mxu1 %v21424_v24  ;;  %v16589_v24 = vld [vmem:[%s21145_s2 + $0x500] sm:$0xff] }
 0x471   : > { %2134 = vmatprep.subr.mxu1 %v20750_v54  ;;  %21427 = vst [vmem:[#allocation155_spill] sm:$0xff] %v16589_v24  ;;  %v20762_v59 = vunpack.c.h.bf16 %v16589_v24  ;;  %v21434_v42 = vunpack.c.l.bf16 %v16589_v24 }
 0x472   : > { %2135 = vmatpush1.msra.mxu1 %v21426_v11  ;;  %v16600_v11 = vld [vmem:[%s21145_s2 + $0x5f8] sm:$0xff] }
 0x473   : > { %2136 = vmatprep.subr.mxu1 %v20753_v36  ;;  %21429 = vst [vmem:[#allocation156_spill] sm:$0xff] %v16600_v11  ;;  %v20765_v54 = vunpack.c.h.bf16 %v16600_v11  ;;  %v21436_v53 = vunpack.c.l.bf16 %v16600_v11 }
 0x474   : > { %2137 = vmatpush1.msra.mxu1 %v21428_v47  ;;  %v16611_v47 = vld [vmem:[%s21145_s2 + $0x5f0] sm:$0xff] }
 0x475   : > { %2138 = vmatprep.subr.mxu1 %v20756_v6  ;;  %21431 = vst [vmem:[#allocation157_spill] sm:$0xff] %v16611_v47  ;;  %v20768_v36 = vunpack.c.h.bf16 %v16611_v47  ;;  %v21438_v24 = vunpack.c.l.bf16 %v16611_v47 }
 0x476   : > { %2139 = vmatpush1.msra.mxu1 %v21430_v60  ;;  %v16622_v60 = vld [vmem:[%s21145_s2 + $0x5e8] sm:$0xff] }
 0x477   : > { %2140 = vmatprep.subr.mxu1 %v20759_v10  ;;  %21433 = vst [vmem:[#allocation158_spill] sm:$0xff] %v16622_v60  ;;  %v20771_v6 = vunpack.c.h.bf16 %v16622_v60  ;;  %v21440_v11 = vunpack.c.l.bf16 %v16622_v60 }
 0x478   : > { %2141 = vmatpush1.msra.mxu1 %v21432_v43  ;;  %v16633_v43 = vld [vmem:[%s21145_s2 + $0x5e0] sm:$0xff] }
 0x479   : > { %2142 = vmatprep.subr.mxu1 %v20762_v59  ;;  %21435 = vst [vmem:[#allocation159_spill] sm:$0xff] %v16633_v43  ;;  %v20774_v10 = vunpack.c.h.bf16 %v16633_v43  ;;  %v21442_v47 = vunpack.c.l.bf16 %v16633_v43 }
 0x47a   : > { %2143 = vmatpush1.msra.mxu1 %v21434_v42  ;;  %v16644_v42 = vld [vmem:[%s21145_s2 + $0x5d8] sm:$0xff] }
 0x47b   : > { %2144 = vmatprep.subr.mxu1 %v20765_v54  ;;  %21437 = vst [vmem:[#allocation160_spill] sm:$0xff] %v16644_v42  ;;  %v20777_v59 = vunpack.c.h.bf16 %v16644_v42  ;;  %v21444_v60 = vunpack.c.l.bf16 %v16644_v42 }
 0x47c   : > { %2145 = vmatpush2.msra.mxu1 %v21436_v53  ;;  %v16655_v53 = vld [vmem:[%s21145_s2 + $0x5d0] sm:$0xff] }
 0x47d   : > { %2146 = vmatprep.subr.mxu1 %v20768_v36  ;;  %21439 = vst [vmem:[#allocation161_spill] sm:$0xff] %v16655_v53  ;;  %v20780_v54 = vunpack.c.h.bf16 %v16655_v53  ;;  %v21446_v43 = vunpack.c.l.bf16 %v16655_v53 }
 0x47e   : > { %2147 = vmatpush2.msra.mxu1 %v21438_v24  ;;  %v16666_v24 = vld [vmem:[%s21145_s2 + $0x5c8] sm:$0xff] }
 0x47f   : > { %2148 = vmatprep.subr.mxu1 %v20771_v6  ;;  %21441 = vst [vmem:[#allocation162_spill] sm:$0xff] %v16666_v24  ;;  %v20783_v36 = vunpack.c.h.bf16 %v16666_v24  ;;  %v21448_v42 = vunpack.c.l.bf16 %v16666_v24 }
 0x480   : > { %2149 = vmatpush2.msra.mxu1 %v21440_v11  ;;  %v16677_v11 = vld [vmem:[%s21145_s2 + $0x5c0] sm:$0xff] }
 0x481   : > { %2150 = vmatprep.subr.mxu1 %v20774_v10  ;;  %21443 = vst [vmem:[#allocation163_spill] sm:$0xff] %v16677_v11  ;;  %v20786_v6 = vunpack.c.h.bf16 %v16677_v11  ;;  %v21450_v53 = vunpack.c.l.bf16 %v16677_v11 }
 0x482   : > { %2151 = vmatpush2.msra.mxu1 %v21442_v47  ;;  %v16688_v47 = vld [vmem:[%s21145_s2 + $0x5b8] sm:$0xff] }
 0x483   : > { %2152 = vmatprep.subr.mxu1 %v20777_v59  ;;  %21445 = vst [vmem:[#allocation164_spill] sm:$0xff] %v16688_v47  ;;  %v20789_v10 = vunpack.c.h.bf16 %v16688_v47  ;;  %v21452_v24 = vunpack.c.l.bf16 %v16688_v47 }
 0x484   : > { %2153 = vmatpush2.msra.mxu1 %v21444_v60  ;;  %v16699_v60 = vld [vmem:[%s21145_s2 + $0x5b0] sm:$0xff] }
 0x485   : > { %2154 = vmatprep.subr.mxu1 %v20780_v54  ;;  %21447 = vst [vmem:[#allocation165_spill] sm:$0xff] %v16699_v60  ;;  %v20792_v59 = vunpack.c.h.bf16 %v16699_v60  ;;  %v21454_v11 = vunpack.c.l.bf16 %v16699_v60 }
 0x486   : > { %2155 = vmatpush2.msra.mxu1 %v21446_v43  ;;  %v16710_v43 = vld [vmem:[%s21145_s2 + $0x5a8] sm:$0xff] }
 0x487   : > { %2156 = vmatprep.subr.mxu1 %v20783_v36  ;;  %21449 = vst [vmem:[#allocation166_spill] sm:$0xff] %v16710_v43  ;;  %v20795_v54 = vunpack.c.h.bf16 %v16710_v43  ;;  %v21456_v47 = vunpack.c.l.bf16 %v16710_v43 }
 0x488   : > { %2157 = vmatpush2.msra.mxu1 %v21448_v42  ;;  %v16721_v42 = vld [vmem:[%s21145_s2 + $0x5a0] sm:$0xff] }
 0x489   : > { %2158 = vmatprep.subr.mxu1 %v20786_v6  ;;  %21451 = vst [vmem:[#allocation167_spill] sm:$0xff] %v16721_v42  ;;  %v20798_v36 = vunpack.c.h.bf16 %v16721_v42  ;;  %v21458_v60 = vunpack.c.l.bf16 %v16721_v42 }
 0x48a   : > { %2159 = vmatpush2.msra.mxu1 %v21450_v53  ;;  %v16732_v53 = vld [vmem:[%s21145_s2 + $0x598] sm:$0xff] }
 0x48b   : > { %2160 = vmatprep.subr.mxu1 %v20789_v10  ;;  %21453 = vst [vmem:[#allocation168_spill] sm:$0xff] %v16732_v53  ;;  %v20807_v6 = vunpack.c.h.bf16 %v16732_v53  ;;  %v21460_v43 = vunpack.c.l.bf16 %v16732_v53 }
 0x48c   : > { %2161 = vmatpush2.msra.mxu1 %v21452_v24  ;;  %v16743_v24 = vld [vmem:[%s21145_s2 + $0x590] sm:$0xff] }
 0x48d   : > { %2162 = vmatprep.subr.mxu1 %v20792_v59  ;;  %21455 = vst [vmem:[#allocation169_spill] sm:$0xff] %v16743_v24  ;;  %v20802_v10 = vunpack.c.h.bf16 %v16743_v24 }
 0x48e   : > { %2163 = vmatpush2.msra.mxu1 %v21454_v11  ;;  %v16754_v11 = vld [vmem:[%s21145_s2 + $0x588] sm:$0xff] }
 0x48f   : > { %2164 = vmatprep.subr.mxu1 %v20795_v54  ;;  %21457 = vst [vmem:[#allocation170_spill] sm:$0xff] %v16754_v11  ;;  %v20801_v54 = vunpack.c.l.bf16 %v16743_v24  ;;  %v20804_v59 = vunpack.c.h.bf16 %v16754_v11  ;;  %v16821_v24 = vld [vmem:[%s21145_s2 + $0x660] sm:$0xff] }
 0x490   : > { %2165 = vmatpush2.msra.mxu1 %v21456_v47  ;;  %v16765_v47 = vld [vmem:[%s21145_s2 + $0x580] sm:$0xff]  ;;  %21464 = vst [vmem:[#allocation175_spill] sm:$0xff] %v16821_v24 }
 0x491   : > { %2166 = vmatprep.subr.mxu1 %v20798_v36  ;;  %21459 = vst [vmem:[#allocation171_spill] sm:$0xff] %v16765_v47  ;;  %v20803_v36 = vunpack.c.l.bf16 %v16754_v11  ;;  %v20805_v42 = vunpack.c.l.bf16 %v16765_v47 }
 0x492   : > { %2167 = vmatpush2.msra.mxu1 %v21458_v60  ;;  %v20806_v60 = vunpack.c.h.bf16 %v16765_v47  ;;  %v16812_v47 = vld [vmem:[%s21145_s2 + $0x668] sm:$0xff] }
 0x493   : > { %2168 = vmatprep.subr.mxu1 %v20807_v6  ;;  %21463 = vst [vmem:[#allocation174_spill] sm:$0xff] %v16812_v47  ;;  %v21471_v11 = vunpack.c.h.bf16 %v16812_v47  ;;  %v21472_v63 = vunpack.c.l.bf16 %v16812_v47 }
 0x494   : > { %2169 = vmatpush2.msra.mxu1 %v21460_v43 }
 0x495   : > { %2170 = vmatprep.subr.mxu1 %v20802_v10 }
 0x496   : > { %2171 = vmatpush2.msra.mxu1 %v20801_v54 }
 0x497   : > { %2172 = vmatprep.subr.mxu1 %v20804_v59 }
 0x498   : > { %2173 = vmatpush2.msra.mxu1 %v20803_v36  ;;  %v16797_v36 = vld [vmem:[%s21145_s2 + $0x678] sm:$0xff] }
 0x499   : > { %2174 = vmatprep.subr.mxu1 %v20806_v60  ;;  %21461 = vst [vmem:[#allocation172_spill] sm:$0xff] %v16797_v36 }
 0x49a   : > { %2175 = vmatpush2.msra.mxu1 %v20805_v42  ;;  %v16802_v42 = vld [vmem:[%s21145_s2 + $0x670] sm:$0xff] }
 0x49b   : > { %2177 = vmatmul.mubr.f32.vlgmr.msra.gmra.mxu1 %v16419_v5  ;;  %21462 = vst [vmem:[#allocation173_spill] sm:$0xff] %v16802_v42  ;;  %v21468_v60 = vunpack.c.h.bf16 %v16802_v42 }
 0x49c   : > { %2510 = vmatprep.mubr.f32.mxu1 %v21212_v31 }
 0x51b   : > { %v2008_v43 = vpop.f32.mrf.mxu1 }
 0x51c   : > { %v16790_v54 = vadd.f32 %v2008_v43, %v16424_v3  ;;  %v11445_v3 = vld [vmem:[%s21208_s5 + $0x28] sm:$0xff]  ;;  %v21465_v43 = vunpack.c.h.bf16 %v16797_v36 }
 0x51d   : > { %v16792_v10 = vpop.f32.mrf.mxu1 }
 0x55b   : > { %v2178_v59 = vpop.f32.mrf.mxu1 }
 0x55d   : > { %v2180_v6 = vpop.f32.mrf.mxu1 }
 0x55e   : > { %11446 = vmatprep.subr.msk.mxu0 %vm1101_vm0, %v2180_v6  ;;  %v21466_v6 = vunpack.c.l.bf16 %v16797_v36 }
 0x55f   : > { %11447 = vmatpush1.msk.msra.mxu0 %vm1101_vm0, %v2178_v59  ;;  %v16833_v59 = vld [vmem:[%s21145_s2 + $0x658] sm:$0xff] }
 0x560   : > { %11448 = vmatmul.mubr.msk.f32.vlgmr.msra.gmra.mxu0 %vm1097_vm1, %v11445_v3  ;;  %2364 = vmatprep.subr.mxu0 %v21465_v43  ;;  %21467 = vst [vmem:[#allocation176_spill] sm:$0xff] %v16833_v59  ;;  %v20824_v3 = vunpack.c.h.bf16 %v16821_v24  ;;  %v21469_v43 = vunpack.c.l.bf16 %v16802_v42  ;;  %v20827_v36 = vunpack.c.h.bf16 %v16833_v59  ;;  %v21474_v42 = vunpack.c.l.bf16 %v16821_v24 }
 0x561   : > { %2365 = vmatpush1.msra.mxu0 %v21466_v6  ;;  %2428 = vmatprep.mubr.f32.mxu0 %v15294_v19  ;;  %v16845_v6 = vld [vmem:[%s21145_s2 + $0x650] sm:$0xff]  ;;  %v21476_v47 = vunpack.c.l.bf16 %v16833_v59 }
 0x562   : > { %2366 = vmatprep.subr.mxu0 %v21468_v60  ;;  %21470 = vst [vmem:[#allocation177_spill] sm:$0xff] %v16845_v6  ;;  %v20830_v53 = vunpack.c.h.bf16 %v16845_v6  ;;  %v21478_v24 = vunpack.c.l.bf16 %v16845_v6 }
 0x563   : > { %2367 = vmatpush1.msra.mxu0 %v21469_v43  ;;  %v16856_v43 = vld [vmem:[%s21145_s2 + $0x648] sm:$0xff] }
 0x564   : > { %2368 = vmatprep.subr.mxu0 %v21471_v11  ;;  %21473 = vst [vmem:[#allocation178_spill] sm:$0xff] %v16856_v43  ;;  %v20833_v60 = vunpack.c.h.bf16 %v16856_v43  ;;  %v21480_v59 = vunpack.c.l.bf16 %v16856_v43 }
 0x565   : > { %2369 = vmatpush1.msra.mxu0 %v21472_v63  ;;  %v16867_v63 = vld [vmem:[%s21145_s2 + $0x640] sm:$0xff] }
 0x566   : > { %2370 = vmatprep.subr.mxu0 %v20824_v3  ;;  %21475 = vst [vmem:[#allocation179_spill] sm:$0xff] %v16867_v63  ;;  %v20836_v11 = vunpack.c.h.bf16 %v16867_v63  ;;  %v21482_v6 = vunpack.c.l.bf16 %v16867_v63 }
 0x567   : > { %2371 = vmatpush1.msra.mxu0 %v21474_v42  ;;  %v16878_v42 = vld [vmem:[%s21145_s2 + $0x638] sm:$0xff] }
 0x568   : > { %2372 = vmatprep.subr.mxu0 %v20827_v36  ;;  %21477 = vst [vmem:[#allocation180_spill] sm:$0xff] %v16878_v42  ;;  %v20839_v3 = vunpack.c.h.bf16 %v16878_v42  ;;  %v21484_v43 = vunpack.c.l.bf16 %v16878_v42 }
 0x569   : > { %2373 = vmatpush1.msra.mxu0 %v21476_v47  ;;  %v16889_v47 = vld [vmem:[%s21145_s2 + $0x630] sm:$0xff] }
 0x56a   : > { %2374 = vmatprep.subr.mxu0 %v20830_v53  ;;  %21479 = vst [vmem:[#allocation181_spill] sm:$0xff] %v16889_v47  ;;  %v20842_v36 = vunpack.c.h.bf16 %v16889_v47  ;;  %v21486_v63 = vunpack.c.l.bf16 %v16889_v47 }
 0x56b   : > { %2375 = vmatpush1.msra.mxu0 %v21478_v24  ;;  %v16900_v24 = vld [vmem:[%s21145_s2 + $0x628] sm:$0xff] }
 0x56c   : > { %2376 = vmatprep.subr.mxu0 %v20833_v60  ;;  %21481 = vst [vmem:[#allocation182_spill] sm:$0xff] %v16900_v24  ;;  %v20845_v53 = vunpack.c.h.bf16 %v16900_v24  ;;  %v21488_v42 = vunpack.c.l.bf16 %v16900_v24 }
 0x56d   : > { %2377 = vmatpush1.msra.mxu0 %v21480_v59  ;;  %v16911_v59 = vld [vmem:[%s21145_s2 + $0x620] sm:$0xff] }
 0x56e   : > { %2378 = vmatprep.subr.mxu0 %v20836_v11  ;;  %21483 = vst [vmem:[#allocation183_spill] sm:$0xff] %v16911_v59  ;;  %v20848_v60 = vunpack.c.h.bf16 %v16911_v59  ;;  %v21490_v47 = vunpack.c.l.bf16 %v16911_v59 }
 0x56f   : > { %2379 = vmatpush1.msra.mxu0 %v21482_v6  ;;  %v16922_v6 = vld [vmem:[%s21145_s2 + $0x618] sm:$0xff] }
 0x570   : > { %2380 = vmatprep.subr.mxu0 %v20839_v3  ;;  %21485 = vst [vmem:[#allocation184_spill] sm:$0xff] %v16922_v6  ;;  %v20851_v11 = vunpack.c.h.bf16 %v16922_v6  ;;  %v21492_v24 = vunpack.c.l.bf16 %v16922_v6 }
 0x571   : > { %2381 = vmatpush1.msra.mxu0 %v21484_v43  ;;  %v16933_v43 = vld [vmem:[%s21145_s2 + $0x610] sm:$0xff] }
 0x572   : > { %2382 = vmatprep.subr.mxu0 %v20842_v36  ;;  %21487 = vst [vmem:[#allocation185_spill] sm:$0xff] %v16933_v43  ;;  %v20854_v3 = vunpack.c.h.bf16 %v16933_v43  ;;  %v21494_v59 = vunpack.c.l.bf16 %v16933_v43 }
 0x573   : > { %2383 = vmatpush1.msra.mxu0 %v21486_v63  ;;  %v16944_v63 = vld [vmem:[%s21145_s2 + $0x608] sm:$0xff] }
 0x574   : > { %2384 = vmatprep.subr.mxu0 %v20845_v53  ;;  %21489 = vst [vmem:[#allocation186_spill] sm:$0xff] %v16944_v63  ;;  %v20857_v36 = vunpack.c.h.bf16 %v16944_v63  ;;  %v21496_v6 = vunpack.c.l.bf16 %v16944_v63 }
 0x575   : > { %2385 = vmatpush1.msra.mxu0 %v21488_v42  ;;  %v16955_v42 = vld [vmem:[%s21145_s2 + $0x600] sm:$0xff] }
 0x576   : > { %2386 = vmatprep.subr.mxu0 %v20848_v60  ;;  %21491 = vst [vmem:[#allocation187_spill] sm:$0xff] %v16955_v42  ;;  %v20860_v53 = vunpack.c.h.bf16 %v16955_v42  ;;  %v21498_v43 = vunpack.c.l.bf16 %v16955_v42 }
 0x577   : > { %2387 = vmatpush1.msra.mxu0 %v21490_v47  ;;  %v16966_v47 = vld [vmem:[%s21145_s2 + $0x6f8] sm:$0xff] }
 0x578   : > { %2388 = vmatprep.subr.mxu0 %v20851_v11  ;;  %21493 = vst [vmem:[#allocation188_spill] sm:$0xff] %v16966_v47  ;;  %v20863_v60 = vunpack.c.h.bf16 %v16966_v47  ;;  %v21500_v63 = vunpack.c.l.bf16 %v16966_v47 }
 0x579   : > { %2389 = vmatpush1.msra.mxu0 %v21492_v24  ;;  %v16977_v24 = vld [vmem:[%s21145_s2 + $0x6f0] sm:$0xff] }
 0x57a   : > { %2390 = vmatprep.subr.mxu0 %v20854_v3  ;;  %21495 = vst [vmem:[#allocation189_spill] sm:$0xff] %v16977_v24  ;;  %v20866_v11 = vunpack.c.h.bf16 %v16977_v24  ;;  %v21502_v42 = vunpack.c.l.bf16 %v16977_v24 }
 0x57b   : > { %2391 = vmatpush1.msra.mxu0 %v21494_v59  ;;  %v16988_v59 = vld [vmem:[%s21145_s2 + $0x6e8] sm:$0xff] }
 0x57c   : > { %2392 = vmatprep.subr.mxu0 %v20857_v36  ;;  %21497 = vst [vmem:[#allocation190_spill] sm:$0xff] %v16988_v59  ;;  %v20869_v3 = vunpack.c.h.bf16 %v16988_v59  ;;  %v21504_v47 = vunpack.c.l.bf16 %v16988_v59 }
 0x57d   : > { %2393 = vmatpush1.msra.mxu0 %v21496_v6  ;;  %v16999_v6 = vld [vmem:[%s21145_s2 + $0x6e0] sm:$0xff] }
 0x57e   : > { %2394 = vmatprep.subr.mxu0 %v20860_v53  ;;  %21499 = vst [vmem:[#allocation191_spill] sm:$0xff] %v16999_v6  ;;  %v20872_v36 = vunpack.c.h.bf16 %v16999_v6  ;;  %v21506_v24 = vunpack.c.l.bf16 %v16999_v6 }
 0x57f   : > { %2395 = vmatpush1.msra.mxu0 %v21498_v43  ;;  %v17010_v43 = vld [vmem:[%s21145_s2 + $0x6d8] sm:$0xff] }
 0x580   : > { %2396 = vmatprep.subr.mxu0 %v20863_v60  ;;  %21501 = vst [vmem:[#allocation192_spill] sm:$0xff] %v17010_v43  ;;  %v20875_v53 = vunpack.c.h.bf16 %v17010_v43  ;;  %v21508_v59 = vunpack.c.l.bf16 %v17010_v43 }
 0x581   : > { %2397 = vmatpush2.msra.mxu0 %v21500_v63  ;;  %v17021_v63 = vld [vmem:[%s21145_s2 + $0x6d0] sm:$0xff] }
 0x582   : > { %2398 = vmatprep.subr.mxu0 %v20866_v11  ;;  %21503 = vst [vmem:[#allocation193_spill] sm:$0xff] %v17021_v63  ;;  %v20878_v60 = vunpack.c.h.bf16 %v17021_v63  ;;  %v21510_v6 = vunpack.c.l.bf16 %v17021_v63 }
 0x583   : > { %2399 = vmatpush2.msra.mxu0 %v21502_v42  ;;  %v17032_v42 = vld [vmem:[%s21145_s2 + $0x6c8] sm:$0xff] }
 0x584   : > { %2400 = vmatprep.subr.mxu0 %v20869_v3  ;;  %21505 = vst [vmem:[#allocation194_spill] sm:$0xff] %v17032_v42  ;;  %v20881_v11 = vunpack.c.h.bf16 %v17032_v42  ;;  %v21512_v43 = vunpack.c.l.bf16 %v17032_v42 }
 0x585   : > { %2401 = vmatpush2.msra.mxu0 %v21504_v47  ;;  %v17043_v47 = vld [vmem:[%s21145_s2 + $0x6c0] sm:$0xff] }
 0x586   : > { %2402 = vmatprep.subr.mxu0 %v20872_v36  ;;  %21507 = vst [vmem:[#allocation195_spill] sm:$0xff] %v17043_v47  ;;  %v20884_v3 = vunpack.c.h.bf16 %v17043_v47  ;;  %v21514_v63 = vunpack.c.l.bf16 %v17043_v47 }
 0x587   : > { %2403 = vmatpush2.msra.mxu0 %v21506_v24  ;;  %v17054_v24 = vld [vmem:[%s21145_s2 + $0x6b8] sm:$0xff] }
 0x588   : > { %2404 = vmatprep.subr.mxu0 %v20875_v53  ;;  %21509 = vst [vmem:[#allocation196_spill] sm:$0xff] %v17054_v24  ;;  %v20887_v36 = vunpack.c.h.bf16 %v17054_v24  ;;  %v21516_v42 = vunpack.c.l.bf16 %v17054_v24 }
 0x589   : > { %2405 = vmatpush2.msra.mxu0 %v21508_v59  ;;  %v17065_v59 = vld [vmem:[%s21145_s2 + $0x6b0] sm:$0xff] }
 0x58a   : > { %2406 = vmatprep.subr.mxu0 %v20878_v60  ;;  %21511 = vst [vmem:[#allocation197_spill] sm:$0xff] %v17065_v59  ;;  %v20890_v53 = vunpack.c.h.bf16 %v17065_v59  ;;  %v21518_v47 = vunpack.c.l.bf16 %v17065_v59 }
 0x58b   : > { %2407 = vmatpush2.msra.mxu0 %v21510_v6  ;;  %v17076_v6 = vld [vmem:[%s21145_s2 + $0x6a8] sm:$0xff] }
 0x58c   : > { %2408 = vmatprep.subr.mxu0 %v20881_v11  ;;  %21513 = vst [vmem:[#allocation198_spill] sm:$0xff] %v17076_v6  ;;  %v20893_v60 = vunpack.c.h.bf16 %v17076_v6  ;;  %v21520_v24 = vunpack.c.l.bf16 %v17076_v6 }
 0x58d   : > { %2409 = vmatpush2.msra.mxu0 %v21512_v43  ;;  %v17087_v43 = vld [vmem:[%s21145_s2 + $0x6a0] sm:$0xff] }
 0x58e   : > { %2410 = vmatprep.subr.mxu0 %v20884_v3  ;;  %21515 = vst [vmem:[#allocation199_spill] sm:$0xff] %v17087_v43  ;;  %v20896_v11 = vunpack.c.h.bf16 %v17087_v43  ;;  %v21522_v59 = vunpack.c.l.bf16 %v17087_v43 }
 0x58f   : > { %2411 = vmatpush2.msra.mxu0 %v21514_v63  ;;  %v17098_v63 = vld [vmem:[%s21145_s2 + $0x698] sm:$0xff] }
 0x590   : > { %2412 = vmatprep.subr.mxu0 %v20887_v36  ;;  %21517 = vst [vmem:[#allocation200_spill] sm:$0xff] %v17098_v63  ;;  %v20905_v3 = vunpack.c.h.bf16 %v17098_v63  ;;  %v21524_v6 = vunpack.c.l.bf16 %v17098_v63 }
 0x591   : > { %2413 = vmatpush2.msra.mxu0 %v21516_v42  ;;  %v17109_v42 = vld [vmem:[%s21145_s2 + $0x690] sm:$0xff] }
 0x592   : > { %2414 = vmatprep.subr.mxu0 %v20890_v53  ;;  %21519 = vst [vmem:[#allocation201_spill] sm:$0xff] %v17109_v42  ;;  %v20900_v36 = vunpack.c.h.bf16 %v17109_v42 }
 0x593   : > { %2415 = vmatpush2.msra.mxu0 %v21518_v47  ;;  %v17120_v47 = vld [vmem:[%s21145_s2 + $0x688] sm:$0xff] }
 0x594   : > { %2416 = vmatprep.subr.mxu0 %v20893_v60  ;;  %21521 = vst [vmem:[#allocation202_spill] sm:$0xff] %v17120_v47  ;;  %v20899_v60 = vunpack.c.l.bf16 %v17109_v42  ;;  %v20902_v53 = vunpack.c.h.bf16 %v17120_v47 }
 0x595   : > { %2417 = vmatpush2.msra.mxu0 %v21520_v24  ;;  %v17131_v24 = vld [vmem:[%s21145_s2 + $0x680] sm:$0xff] }
 0x596   : > { %2418 = vmatprep.subr.mxu0 %v20896_v11  ;;  %21523 = vst [vmem:[#allocation203_spill] sm:$0xff] %v17131_v24  ;;  %v20901_v11 = vunpack.c.l.bf16 %v17120_v47  ;;  %v20903_v43 = vunpack.c.l.bf16 %v17131_v24  ;;  %v17187_v47 = vld [vmem:[%s21145_s2 + $0x760] sm:$0xff] }
 0x597   : > { %2419 = vmatpush2.msra.mxu0 %v21522_v59  ;;  %v20904_v59 = vunpack.c.h.bf16 %v17131_v24  ;;  %21528 = vst [vmem:[#allocation207_spill] sm:$0xff] %v17187_v47 }
 0x598   : > { %2420 = vmatprep.subr.mxu0 %v20905_v3  ;;  %v17178_v3 = vld [vmem:[%s21145_s2 + $0x768] sm:$0xff] }
 0x599   : > { %2421 = vmatpush2.msra.mxu0 %v21524_v6  ;;  %21527 = vst [vmem:[#allocation206_spill] sm:$0xff] %v17178_v3  ;;  %v21535_v24 = vunpack.c.h.bf16 %v17178_v3  ;;  %v21536_v63 = vunpack.c.l.bf16 %v17178_v3 }
 0x59a   : > { %2422 = vmatprep.subr.mxu0 %v20900_v36 }
 0x59b   : > { %2423 = vmatpush2.msra.mxu0 %v20899_v60 }
 0x59c   : > { %2424 = vmatprep.subr.mxu0 %v20902_v53 }
 0x59d   : > { %2425 = vmatpush2.msra.mxu0 %v20901_v11  ;;  %v17163_v11 = vld [vmem:[%s21145_s2 + $0x778] sm:$0xff] }
 0x59e   : > { %2426 = vmatprep.subr.mxu0 %v20904_v59  ;;  %21525 = vst [vmem:[#allocation204_spill] sm:$0xff] %v17163_v11 }
 0x59f   : > { %2427 = vmatpush2.msra.mxu0 %v20903_v43  ;;  %v17168_v43 = vld [vmem:[%s21145_s2 + $0x770] sm:$0xff] }
 0x5a0   : > { %2429 = vmatmul.mubr.f32.vlgmr.msra.gmra.mxu0 %v16419_v5  ;;  %21526 = vst [vmem:[#allocation205_spill] sm:$0xff] %v17168_v43  ;;  %v21532_v5 = vunpack.c.h.bf16 %v17168_v43 }
 0x5a1   : > { %2762 = vmatprep.mubr.f32.mxu0 %v21212_v31 }
 0x620   : > { %v2260_v6 = vpop.f32.mrf.mxu0 }
 0x621   : > { %v17156_v60 = vadd.f32 %v2260_v6, %v16790_v54  ;;  %v11481_v54 = vld [vmem:[%s21208_s5 + $0x30] sm:$0xff]  ;;  %v21529_v6 = vunpack.c.h.bf16 %v17163_v11 }
 0x622   : > { %v17158_v36 = vpop.f32.mrf.mxu0 }
 0x660   : > { %v2430_v53 = vpop.f32.mrf.mxu0 }
 0x662   : > { %v2432_v59 = vpop.f32.mrf.mxu0 }
 0x663   : > { %11482 = vmatprep.subr.msk.mxu1 %vm1101_vm0, %v2432_v59  ;;  %v21530_v59 = vunpack.c.l.bf16 %v17163_v11 }
 0x664   : > { %11483 = vmatpush1.msk.msra.mxu1 %vm1101_vm0, %v2430_v53  ;;  %v17199_v53 = vld [vmem:[%s21145_s2 + $0x758] sm:$0xff] }
 0x665   : > { %11484 = vmatmul.mubr.msk.f32.vlgmr.msra.gmra.mxu1 %vm1097_vm1, %v11481_v54  ;;  %2616 = vmatprep.subr.mxu1 %v21529_v6  ;;  %21531 = vst [vmem:[#allocation208_spill] sm:$0xff] %v17199_v53  ;;  %v20920_v54 = vunpack.c.h.bf16 %v17187_v47  ;;  %v21533_v6 = vunpack.c.l.bf16 %v17168_v43  ;;  %v20923_v11 = vunpack.c.h.bf16 %v17199_v53  ;;  %v21538_v43 = vunpack.c.l.bf16 %v17187_v47 }
 0x666   : > { %2617 = vmatpush1.msra.mxu1 %v21530_v59  ;;  %2680 = vmatprep.mubr.f32.mxu1 %v15294_v19  ;;  %v17211_v59 = vld [vmem:[%s21145_s2 + $0x750] sm:$0xff]  ;;  %v21540_v3 = vunpack.c.l.bf16 %v17199_v53 }
 0x667   : > { %2618 = vmatprep.subr.mxu1 %v21532_v5  ;;  %21534 = vst [vmem:[#allocation209_spill] sm:$0xff] %v17211_v59  ;;  %v20926_v42 = vunpack.c.h.bf16 %v17211_v59  ;;  %v21542_v47 = vunpack.c.l.bf16 %v17211_v59 }
 0x668   : > { %2619 = vmatpush1.msra.mxu1 %v21533_v6  ;;  %v17222_v6 = vld [vmem:[%s21145_s2 + $0x748] sm:$0xff] }
 0x669   : > { %2620 = vmatprep.subr.mxu1 %v21535_v24  ;;  %21537 = vst [vmem:[#allocation210_spill] sm:$0xff] %v17222_v6  ;;  %v20929_v5 = vunpack.c.h.bf16 %v17222_v6  ;;  %v21544_v53 = vunpack.c.l.bf16 %v17222_v6 }
 0x66a   : > { %2621 = vmatpush1.msra.mxu1 %v21536_v63  ;;  %v17233_v63 = vld [vmem:[%s21145_s2 + $0x740] sm:$0xff] }
 0x66b   : > { %2622 = vmatprep.subr.mxu1 %v20920_v54  ;;  %21539 = vst [vmem:[#allocation211_spill] sm:$0xff] %v17233_v63  ;;  %v20932_v24 = vunpack.c.h.bf16 %v17233_v63  ;;  %v21546_v59 = vunpack.c.l.bf16 %v17233_v63 }
 0x66c   : > { %2623 = vmatpush1.msra.mxu1 %v21538_v43  ;;  %v17244_v43 = vld [vmem:[%s21145_s2 + $0x738] sm:$0xff] }
 0x66d   : > { %2624 = vmatprep.subr.mxu1 %v20923_v11  ;;  %21541 = vst [vmem:[#allocation212_spill] sm:$0xff] %v17244_v43  ;;  %v20935_v54 = vunpack.c.h.bf16 %v17244_v43  ;;  %v21548_v6 = vunpack.c.l.bf16 %v17244_v43 }
 0x66e   : > { %2625 = vmatpush1.msra.mxu1 %v21540_v3  ;;  %v17255_v3 = vld [vmem:[%s21145_s2 + $0x730] sm:$0xff] }
 0x66f   : > { %2626 = vmatprep.subr.mxu1 %v20926_v42  ;;  %21543 = vst [vmem:[#allocation213_spill] sm:$0xff] %v17255_v3  ;;  %v20938_v11 = vunpack.c.h.bf16 %v17255_v3  ;;  %v21550_v63 = vunpack.c.l.bf16 %v17255_v3 }
 0x670   : > { %2627 = vmatpush1.msra.mxu1 %v21542_v47  ;;  %v17266_v47 = vld [vmem:[%s21145_s2 + $0x728] sm:$0xff] }
 0x671   : > { %2628 = vmatprep.subr.mxu1 %v20929_v5  ;;  %21545 = vst [vmem:[#allocation214_spill] sm:$0xff] %v17266_v47  ;;  %v20941_v42 = vunpack.c.h.bf16 %v17266_v47  ;;  %v21552_v43 = vunpack.c.l.bf16 %v17266_v47 }
 0x672   : > { %2629 = vmatpush1.msra.mxu1 %v21544_v53  ;;  %v17277_v53 = vld [vmem:[%s21145_s2 + $0x720] sm:$0xff] }
 0x673   : > { %2630 = vmatprep.subr.mxu1 %v20932_v24  ;;  %21547 = vst [vmem:[#allocation215_spill] sm:$0xff] %v17277_v53  ;;  %v20944_v5 = vunpack.c.h.bf16 %v17277_v53  ;;  %v21554_v3 = vunpack.c.l.bf16 %v17277_v53 }
 0x674   : > { %2631 = vmatpush1.msra.mxu1 %v21546_v59  ;;  %v17288_v59 = vld [vmem:[%s21145_s2 + $0x718] sm:$0xff] }
 0x675   : > { %2632 = vmatprep.subr.mxu1 %v20935_v54  ;;  %21549 = vst [vmem:[#allocation216_spill] sm:$0xff] %v17288_v59  ;;  %v20947_v24 = vunpack.c.h.bf16 %v17288_v59  ;;  %v21556_v47 = vunpack.c.l.bf16 %v17288_v59 }
 0x676   : > { %2633 = vmatpush1.msra.mxu1 %v21548_v6  ;;  %v17299_v6 = vld [vmem:[%s21145_s2 + $0x710] sm:$0xff] }
 0x677   : > { %2634 = vmatprep.subr.mxu1 %v20938_v11  ;;  %21551 = vst [vmem:[#allocation217_spill] sm:$0xff] %v17299_v6  ;;  %v20950_v54 = vunpack.c.h.bf16 %v17299_v6  ;;  %v21558_v53 = vunpack.c.l.bf16 %v17299_v6 }
 0x678   : > { %2635 = vmatpush1.msra.mxu1 %v21550_v63  ;;  %v17310_v63 = vld [vmem:[%s21145_s2 + $0x708] sm:$0xff] }
 0x679   : > { %2636 = vmatprep.subr.mxu1 %v20941_v42  ;;  %21553 = vst [vmem:[#allocation218_spill] sm:$0xff] %v17310_v63  ;;  %v20953_v11 = vunpack.c.h.bf16 %v17310_v63  ;;  %v21560_v59 = vunpack.c.l.bf16 %v17310_v63 }
 0x67a   : > { %2637 = vmatpush1.msra.mxu1 %v21552_v43  ;;  %v17321_v43 = vld [vmem:[%s21145_s2 + $0x700] sm:$0xff] }
 0x67b   : > { %2638 = vmatprep.subr.mxu1 %v20944_v5  ;;  %21555 = vst [vmem:[#allocation219_spill] sm:$0xff] %v17321_v43  ;;  %v20956_v42 = vunpack.c.h.bf16 %v17321_v43  ;;  %v21562_v6 = vunpack.c.l.bf16 %v17321_v43 }
 0x67c   : > { %2639 = vmatpush1.msra.mxu1 %v21554_v3  ;;  %v17332_v3 = vld [vmem:[%s21145_s2 + $0x7f8] sm:$0xff] }
 0x67d   : > { %2640 = vmatprep.subr.mxu1 %v20947_v24  ;;  %21557 = vst [vmem:[#allocation220_spill] sm:$0xff] %v17332_v3  ;;  %v20959_v5 = vunpack.c.h.bf16 %v17332_v3  ;;  %v21564_v63 = vunpack.c.l.bf16 %v17332_v3 }
 0x67e   : > { %2641 = vmatpush1.msra.mxu1 %v21556_v47  ;;  %v17343_v47 = vld [vmem:[%s21145_s2 + $0x7f0] sm:$0xff] }
 0x67f   : > { %2642 = vmatprep.subr.mxu1 %v20950_v54  ;;  %21559 = vst [vmem:[#allocation221_spill] sm:$0xff] %v17343_v47  ;;  %v20962_v24 = vunpack.c.h.bf16 %v17343_v47  ;;  %v21566_v43 = vunpack.c.l.bf16 %v17343_v47 }
 0x680   : > { %2643 = vmatpush1.msra.mxu1 %v21558_v53  ;;  %v17354_v53 = vld [vmem:[%s21145_s2 + $0x7e8] sm:$0xff] }
 0x681   : > { %2644 = vmatprep.subr.mxu1 %v20953_v11  ;;  %21561 = vst [vmem:[#allocation222_spill] sm:$0xff] %v17354_v53  ;;  %v20965_v54 = vunpack.c.h.bf16 %v17354_v53  ;;  %v21568_v3 = vunpack.c.l.bf16 %v17354_v53 }
 0x682   : > { %2645 = vmatpush1.msra.mxu1 %v21560_v59  ;;  %v17365_v59 = vld [vmem:[%s21145_s2 + $0x7e0] sm:$0xff] }
 0x683   : > { %2646 = vmatprep.subr.mxu1 %v20956_v42  ;;  %21563 = vst [vmem:[#allocation223_spill] sm:$0xff] %v17365_v59  ;;  %v20968_v11 = vunpack.c.h.bf16 %v17365_v59  ;;  %v21570_v47 = vunpack.c.l.bf16 %v17365_v59 }
 0x684   : > { %2647 = vmatpush1.msra.mxu1 %v21562_v6  ;;  %v17376_v6 = vld [vmem:[%s21145_s2 + $0x7d8] sm:$0xff] }
 0x685   : > { %2648 = vmatprep.subr.mxu1 %v20959_v5  ;;  %21565 = vst [vmem:[#allocation224_spill] sm:$0xff] %v17376_v6  ;;  %v20971_v42 = vunpack.c.h.bf16 %v17376_v6  ;;  %v21572_v53 = vunpack.c.l.bf16 %v17376_v6 }
 0x686   : > { %2649 = vmatpush2.msra.mxu1 %v21564_v63  ;;  %v17387_v63 = vld [vmem:[%s21145_s2 + $0x7d0] sm:$0xff] }
 0x687   : > { %2650 = vmatprep.subr.mxu1 %v20962_v24  ;;  %21567 = vst [vmem:[#allocation225_spill] sm:$0xff] %v17387_v63  ;;  %v20974_v5 = vunpack.c.h.bf16 %v17387_v63  ;;  %v21574_v59 = vunpack.c.l.bf16 %v17387_v63 }
 0x688   : > { %2651 = vmatpush2.msra.mxu1 %v21566_v43  ;;  %v17398_v43 = vld [vmem:[%s21145_s2 + $0x7c8] sm:$0xff] }
 0x689   : > { %2652 = vmatprep.subr.mxu1 %v20965_v54  ;;  %21569 = vst [vmem:[#allocation226_spill] sm:$0xff] %v17398_v43  ;;  %v20977_v24 = vunpack.c.h.bf16 %v17398_v43  ;;  %v21576_v6 = vunpack.c.l.bf16 %v17398_v43 }
 0x68a   : > { %2653 = vmatpush2.msra.mxu1 %v21568_v3  ;;  %v17409_v3 = vld [vmem:[%s21145_s2 + $0x7c0] sm:$0xff] }
 0x68b   : > { %2654 = vmatprep.subr.mxu1 %v20968_v11  ;;  %21571 = vst [vmem:[#allocation227_spill] sm:$0xff] %v17409_v3  ;;  %v20980_v54 = vunpack.c.h.bf16 %v17409_v3  ;;  %v21578_v63 = vunpack.c.l.bf16 %v17409_v3 }
 0x68c   : > { %2655 = vmatpush2.msra.mxu1 %v21570_v47  ;;  %v17420_v47 = vld [vmem:[%s21145_s2 + $0x7b8] sm:$0xff] }
 0x68d   : > { %2656 = vmatprep.subr.mxu1 %v20971_v42  ;;  %21573 = vst [vmem:[#allocation228_spill] sm:$0xff] %v17420_v47  ;;  %v20983_v11 = vunpack.c.h.bf16 %v17420_v47  ;;  %v21580_v43 = vunpack.c.l.bf16 %v17420_v47 }
 0x68e   : > { %2657 = vmatpush2.msra.mxu1 %v21572_v53  ;;  %v17431_v53 = vld [vmem:[%s21145_s2 + $0x7b0] sm:$0xff] }
 0x68f   : > { %2658 = vmatprep.subr.mxu1 %v20974_v5  ;;  %21575 = vst [vmem:[#allocation229_spill] sm:$0xff] %v17431_v53  ;;  %v20986_v42 = vunpack.c.h.bf16 %v17431_v53  ;;  %v21582_v3 = vunpack.c.l.bf16 %v17431_v53 }
 0x690   : > { %2659 = vmatpush2.msra.mxu1 %v21574_v59  ;;  %v17442_v59 = vld [vmem:[%s21145_s2 + $0x7a8] sm:$0xff] }
 0x691   : > { %2660 = vmatprep.subr.mxu1 %v20977_v24  ;;  %21577 = vst [vmem:[#allocation230_spill] sm:$0xff] %v17442_v59  ;;  %v20989_v5 = vunpack.c.h.bf16 %v17442_v59  ;;  %v21584_v47 = vunpack.c.l.bf16 %v17442_v59 }
 0x692   : > { %2661 = vmatpush2.msra.mxu1 %v21576_v6  ;;  %v17453_v6 = vld [vmem:[%s21145_s2 + $0x7a0] sm:$0xff] }
 0x693   : > { %2662 = vmatprep.subr.mxu1 %v20980_v54  ;;  %21579 = vst [vmem:[#allocation231_spill] sm:$0xff] %v17453_v6  ;;  %v20990_v24 = vunpack.c.h.bf16 %v17453_v6  ;;  %v21586_v53 = vunpack.c.l.bf16 %v17453_v6 }
 0x694   : > { %2663 = vmatpush2.msra.mxu1 %v21578_v63  ;;  %v17464_v63 = vld [vmem:[%s21145_s2 + $0x798] sm:$0xff] }
 0x695   : > { %2664 = vmatprep.subr.mxu1 %v20983_v11  ;;  %21581 = vst [vmem:[#allocation232_spill] sm:$0xff] %v17464_v63  ;;  %v21000_v54 = vunpack.c.h.bf16 %v17464_v63 }
 0x696   : > { %2665 = vmatpush2.msra.mxu1 %v21580_v43  ;;  %v17475_v43 = vld [vmem:[%s21145_s2 + $0x790] sm:$0xff] }
 0x697   : > { %2666 = vmatprep.subr.mxu1 %v20986_v42  ;;  %21583 = vst [vmem:[#allocation233_spill] sm:$0xff] %v17475_v43  ;;  %v21589_v6 = vunpack.c.h.bf16 %v17475_v43 }
 0x698   : > { %2667 = vmatpush2.msra.mxu1 %v21582_v3  ;;  %v17486_v3 = vld [vmem:[%s21145_s2 + $0x788] sm:$0xff] }
 0x699   : > { %2668 = vmatprep.subr.mxu1 %v20989_v5  ;;  %21585 = vst [vmem:[#allocation234_spill] sm:$0xff] %v17486_v3  ;;  %v20995_v5 = vunpack.c.l.bf16 %v17475_v43  ;;  %v20996_v42 = vunpack.c.h.bf16 %v17486_v3  ;;  %v20997_v11 = vunpack.c.l.bf16 %v17486_v3  ;;  %v17547_v3 = vld [vmem:[%s21145_s2 + $0x868] sm:$0xff] }
 0x69a   : > { %2669 = vmatpush2.msra.mxu1 %v21584_v47  ;;  %v17497_v47 = vld [vmem:[%s21145_s2 + $0x780] sm:$0xff]  ;;  %21592 = vst [vmem:[#allocation238_spill] sm:$0xff] %v17547_v3  ;;  %v21600_v43 = vunpack.c.h.bf16 %v17547_v3 }
 0x69b   : > { %2670 = vmatprep.subr.mxu1 %v20990_v24  ;;  %21587 = vst [vmem:[#allocation235_spill] sm:$0xff] %v17497_v47  ;;  %v21588_v24 = vunpack.c.l.bf16 %v17464_v63  ;;  %v20999_v59 = vunpack.c.l.bf16 %v17497_v47  ;;  %v17556_v63 = vld [vmem:[%s21145_s2 + $0x860] sm:$0xff] }
 0x69c   : > { %2671 = vmatpush2.msra.mxu1 %v21586_v53  ;;  %v20998_v53 = vunpack.c.h.bf16 %v17497_v47  ;;  %21593 = vst [vmem:[#allocation239_spill] sm:$0xff] %v17556_v63 }
 0x69d   : > { %2672 = vmatprep.subr.mxu1 %v21000_v54 }
 0x69e   : > { %2673 = vmatpush2.msra.mxu1 %v21588_v24  ;;  %v17520_v24 = vld [vmem:[%s15242_s0] sm:$0xff] }
 0x69f   : > { %2674 = vmatprep.subr.mxu1 %v21589_v6 }
 0x6a0   : > { %2675 = vmatpush2.msra.mxu1 %v20995_v5 }
 0x6a1   : > { %2676 = vmatprep.subr.mxu1 %v20996_v42 }
 0x6a2   : > { %2677 = vmatpush2.msra.mxu1 %v20997_v11  ;;  %v17532_v11 = vld [vmem:[%s21145_s2 + $0x878] sm:$0xff] }
 0x6a3   : > { %2678 = vmatprep.subr.mxu1 %v20998_v53  ;;  %21590 = vst [vmem:[#allocation236_spill] sm:$0xff] %v17532_v11 }
 0x6a4   : > { %2679 = vmatpush2.msra.mxu1 %v20999_v59  ;;  %v17537_v59 = vld [vmem:[%s21145_s2 + $0x870] sm:$0xff] }
 0x6a5   : > { %2681 = vmatmul.mubr.f32.vlgmr.msra.gmra.mxu1 %v17520_v24  ;;  %21591 = vst [vmem:[#allocation237_spill] sm:$0xff] %v17537_v59  ;;  %v21597_v54 = vunpack.c.h.bf16 %v17537_v59 }
 0x6a6   : > { %3014 = vmatprep.mubr.f32.mxu1 %v21212_v31 }
 0x725   : > { %v2512_v6 = vpop.f32.mrf.mxu1 }
 0x726   : > { %v17525_v5 = vadd.f32 %v2512_v6, %v17156_v60  ;;  %v11517_v60 = vld [vmem:[%s21208_s5 + $0x38] sm:$0xff]  ;;  %v21594_v6 = vunpack.c.h.bf16 %v17532_v11 }
 0x727   : > { %v17527_v42 = vpop.f32.mrf.mxu1 }
 0x765   : > { %v2682_v53 = vpop.f32.mrf.mxu1 }
 0x767   : > { %v2684_v47 = vpop.f32.mrf.mxu1 }
 0x768   : > { %11518 = vmatprep.subr.msk.mxu0 %vm1101_vm0, %v2684_v47  ;;  %v21595_v47 = vunpack.c.l.bf16 %v17532_v11  ;;  %v21601_v11 = vunpack.c.l.bf16 %v17547_v3 }
 0x769   : > { %11519 = vmatpush1.msk.msra.mxu0 %vm1101_vm0, %v2682_v53  ;;  %v17568_v53 = vld [vmem:[%s21145_s2 + $0x858] sm:$0xff] }
 0x76a   : > { %11520 = vmatmul.mubr.msk.f32.vlgmr.msra.gmra.mxu0 %vm1097_vm1, %v11517_v60  ;;  %2868 = vmatprep.subr.mxu0 %v21594_v6  ;;  %21596 = vst [vmem:[#allocation240_spill] sm:$0xff] %v17568_v53  ;;  %v21017_v60 = vunpack.c.h.bf16 %v17556_v63  ;;  %v21598_v6 = vunpack.c.l.bf16 %v17537_v59  ;;  %v21603_v59 = vunpack.c.l.bf16 %v17556_v63  ;;  %v21605_v3 = vunpack.c.l.bf16 %v17568_v53 }
 0x76b   : > { %2869 = vmatpush1.msra.mxu0 %v21595_v47  ;;  %2932 = vmatprep.mubr.f32.mxu0 %v15294_v19  ;;  %v17580_v47 = vld [vmem:[%s21145_s2 + $0x850] sm:$0xff]  ;;  %v21020_v19 = vunpack.c.h.bf16 %v17568_v53 }
 0x76c   : > { %2870 = vmatprep.subr.mxu0 %v21597_v54  ;;  %21599 = vst [vmem:[#allocation241_spill] sm:$0xff] %v17580_v47  ;;  %v21023_v57 = vunpack.c.h.bf16 %v17580_v47  ;;  %v21607_v63 = vunpack.c.l.bf16 %v17580_v47 }
 0x76d   : > { %2871 = vmatpush1.msra.mxu0 %v21598_v6  ;;  %v17591_v6 = vld [vmem:[%s21145_s2 + $0x848] sm:$0xff] }
 0x76e   : > { %2872 = vmatprep.subr.mxu0 %v21600_v43  ;;  %21602 = vst [vmem:[#allocation242_spill] sm:$0xff] %v17591_v6  ;;  %v21026_v54 = vunpack.c.h.bf16 %v17591_v6  ;;  %v21609_v53 = vunpack.c.l.bf16 %v17591_v6 }
 0x76f   : > { %2873 = vmatpush1.msra.mxu0 %v21601_v11  ;;  %v17602_v11 = vld [vmem:[%s21145_s2 + $0x840] sm:$0xff] }
 0x770   : > { %2874 = vmatprep.subr.mxu0 %v21017_v60  ;;  %21604 = vst [vmem:[#allocation243_spill] sm:$0xff] %v17602_v11  ;;  %v21029_v43 = vunpack.c.h.bf16 %v17602_v11  ;;  %v21611_v47 = vunpack.c.l.bf16 %v17602_v11 }
 0x771   : > { %2875 = vmatpush1.msra.mxu0 %v21603_v59  ;;  %v17613_v59 = vld [vmem:[%s21145_s2 + $0x838] sm:$0xff] }
 0x772   : > { %2876 = vmatprep.subr.mxu0 %v21020_v19  ;;  %21606 = vst [vmem:[#allocation244_spill] sm:$0xff] %v17613_v59  ;;  %v21032_v60 = vunpack.c.h.bf16 %v17613_v59  ;;  %v21613_v6 = vunpack.c.l.bf16 %v17613_v59 }
 0x773   : > { %2877 = vmatpush1.msra.mxu0 %v21605_v3  ;;  %v17624_v3 = vld [vmem:[%s21145_s2 + $0x830] sm:$0xff] }
 0x774   : > { %2878 = vmatprep.subr.mxu0 %v21023_v57  ;;  %21608 = vst [vmem:[#allocation245_spill] sm:$0xff] %v17624_v3  ;;  %v21035_v19 = vunpack.c.h.bf16 %v17624_v3  ;;  %v21615_v11 = vunpack.c.l.bf16 %v17624_v3 }
 0x775   : > { %2879 = vmatpush1.msra.mxu0 %v21607_v63  ;;  %v17635_v63 = vld [vmem:[%s21145_s2 + $0x828] sm:$0xff] }
 0x776   : > { %2880 = vmatprep.subr.mxu0 %v21026_v54  ;;  %21610 = vst [vmem:[#allocation246_spill] sm:$0xff] %v17635_v63  ;;  %v21038_v57 = vunpack.c.h.bf16 %v17635_v63  ;;  %v21617_v59 = vunpack.c.l.bf16 %v17635_v63 }
 0x777   : > { %2881 = vmatpush1.msra.mxu0 %v21609_v53  ;;  %v17646_v53 = vld [vmem:[%s21145_s2 + $0x820] sm:$0xff] }
 0x778   : > { %2882 = vmatprep.subr.mxu0 %v21029_v43  ;;  %21612 = vst [vmem:[#allocation247_spill] sm:$0xff] %v17646_v53  ;;  %v21041_v54 = vunpack.c.h.bf16 %v17646_v53  ;;  %v21619_v3 = vunpack.c.l.bf16 %v17646_v53 }
 0x779   : > { %2883 = vmatpush1.msra.mxu0 %v21611_v47  ;;  %v17657_v47 = vld [vmem:[%s21145_s2 + $0x818] sm:$0xff] }
 0x77a   : > { %2884 = vmatprep.subr.mxu0 %v21032_v60  ;;  %21614 = vst [vmem:[#allocation248_spill] sm:$0xff] %v17657_v47  ;;  %v21044_v43 = vunpack.c.h.bf16 %v17657_v47  ;;  %v21621_v63 = vunpack.c.l.bf16 %v17657_v47 }
 0x77b   : > { %2885 = vmatpush1.msra.mxu0 %v21613_v6  ;;  %v17668_v6 = vld [vmem:[%s21145_s2 + $0x810] sm:$0xff] }
 0x77c   : > { %2886 = vmatprep.subr.mxu0 %v21035_v19  ;;  %21616 = vst [vmem:[#allocation249_spill] sm:$0xff] %v17668_v6  ;;  %v21047_v60 = vunpack.c.h.bf16 %v17668_v6  ;;  %v21623_v53 = vunpack.c.l.bf16 %v17668_v6 }
 0x77d   : > { %2887 = vmatpush1.msra.mxu0 %v21615_v11  ;;  %v17679_v11 = vld [vmem:[%s21145_s2 + $0x808] sm:$0xff] }
 0x77e   : > { %2888 = vmatprep.subr.mxu0 %v21038_v57  ;;  %21618 = vst [vmem:[#allocation250_spill] sm:$0xff] %v17679_v11  ;;  %v21050_v19 = vunpack.c.h.bf16 %v17679_v11  ;;  %v21625_v47 = vunpack.c.l.bf16 %v17679_v11 }
 0x77f   : > { %2889 = vmatpush1.msra.mxu0 %v21617_v59  ;;  %v17690_v59 = vld [vmem:[%s21145_s2 + $0x800] sm:$0xff] }
 0x780   : > { %2890 = vmatprep.subr.mxu0 %v21041_v54  ;;  %21620 = vst [vmem:[#allocation251_spill] sm:$0xff] %v17690_v59  ;;  %v21053_v57 = vunpack.c.h.bf16 %v17690_v59  ;;  %v21627_v6 = vunpack.c.l.bf16 %v17690_v59 }
 0x781   : > { %2891 = vmatpush1.msra.mxu0 %v21619_v3  ;;  %v17701_v3 = vld [vmem:[%s21145_s2 + $0x8f8] sm:$0xff] }
 0x782   : > { %2892 = vmatprep.subr.mxu0 %v21044_v43  ;;  %21622 = vst [vmem:[#allocation252_spill] sm:$0xff] %v17701_v3  ;;  %v21056_v54 = vunpack.c.h.bf16 %v17701_v3  ;;  %v21629_v11 = vunpack.c.l.bf16 %v17701_v3 }
 0x783   : > { %2893 = vmatpush1.msra.mxu0 %v21621_v63  ;;  %v17712_v63 = vld [vmem:[%s21145_s2 + $0x8f0] sm:$0xff] }
 0x784   : > { %2894 = vmatprep.subr.mxu0 %v21047_v60  ;;  %21624 = vst [vmem:[#allocation253_spill] sm:$0xff] %v17712_v63  ;;  %v21059_v43 = vunpack.c.h.bf16 %v17712_v63  ;;  %v21631_v59 = vunpack.c.l.bf16 %v17712_v63 }
 0x785   : > { %2895 = vmatpush1.msra.mxu0 %v21623_v53  ;;  %v17723_v53 = vld [vmem:[%s21145_s2 + $0x8e8] sm:$0xff] }
 0x786   : > { %2896 = vmatprep.subr.mxu0 %v21050_v19  ;;  %21626 = vst [vmem:[#allocation254_spill] sm:$0xff] %v17723_v53  ;;  %v21062_v60 = vunpack.c.h.bf16 %v17723_v53  ;;  %v21633_v3 = vunpack.c.l.bf16 %v17723_v53 }
 0x787   : > { %2897 = vmatpush1.msra.mxu0 %v21625_v47  ;;  %v17734_v47 = vld [vmem:[%s21145_s2 + $0x8e0] sm:$0xff] }
 0x788   : > { %2898 = vmatprep.subr.mxu0 %v21053_v57  ;;  %21628 = vst [vmem:[#allocation255_spill] sm:$0xff] %v17734_v47  ;;  %v21065_v19 = vunpack.c.h.bf16 %v17734_v47  ;;  %v21635_v63 = vunpack.c.l.bf16 %v17734_v47 }
 0x789   : > { %2899 = vmatpush1.msra.mxu0 %v21627_v6  ;;  %v17745_v6 = vld [vmem:[%s21145_s2 + $0x8d8] sm:$0xff] }
 0x78a   : > { %2900 = vmatprep.subr.mxu0 %v21056_v54  ;;  %21630 = vst [vmem:[#allocation256_spill] sm:$0xff] %v17745_v6  ;;  %v21068_v57 = vunpack.c.h.bf16 %v17745_v6  ;;  %v21637_v53 = vunpack.c.l.bf16 %v17745_v6 }
 0x78b   : > { %2901 = vmatpush2.msra.mxu0 %v21629_v11  ;;  %v17756_v11 = vld [vmem:[%s21145_s2 + $0x8d0] sm:$0xff] }
 0x78c   : > { %2902 = vmatprep.subr.mxu0 %v21059_v43  ;;  %21632 = vst [vmem:[#allocation257_spill] sm:$0xff] %v17756_v11  ;;  %v21071_v54 = vunpack.c.h.bf16 %v17756_v11  ;;  %v21639_v47 = vunpack.c.l.bf16 %v17756_v11 }
 0x78d   : > { %2903 = vmatpush2.msra.mxu0 %v21631_v59  ;;  %v17767_v59 = vld [vmem:[%s21145_s2 + $0x8c8] sm:$0xff] }
 0x78e   : > { %2904 = vmatprep.subr.mxu0 %v21062_v60  ;;  %21634 = vst [vmem:[#allocation258_spill] sm:$0xff] %v17767_v59  ;;  %v21074_v43 = vunpack.c.h.bf16 %v17767_v59  ;;  %v21641_v6 = vunpack.c.l.bf16 %v17767_v59 }
 0x78f   : > { %2905 = vmatpush2.msra.mxu0 %v21633_v3  ;;  %v17778_v3 = vld [vmem:[%s21145_s2 + $0x8c0] sm:$0xff] }
 0x790   : > { %2906 = vmatprep.subr.mxu0 %v21065_v19  ;;  %21636 = vst [vmem:[#allocation259_spill] sm:$0xff] %v17778_v3  ;;  %v21077_v60 = vunpack.c.h.bf16 %v17778_v3  ;;  %v21643_v11 = vunpack.c.l.bf16 %v17778_v3 }
 0x791   : > { %2907 = vmatpush2.msra.mxu0 %v21635_v63  ;;  %v17789_v63 = vld [vmem:[%s21145_s2 + $0x8b8] sm:$0xff] }
 0x792   : > { %2908 = vmatprep.subr.mxu0 %v21068_v57  ;;  %21638 = vst [vmem:[#allocation260_spill] sm:$0xff] %v17789_v63  ;;  %v21080_v19 = vunpack.c.h.bf16 %v17789_v63  ;;  %v21645_v59 = vunpack.c.l.bf16 %v17789_v63 }
 0x793   : > { %2909 = vmatpush2.msra.mxu0 %v21637_v53  ;;  %v17800_v53 = vld [vmem:[%s21145_s2 + $0x8b0] sm:$0xff] }
 0x794   : > { %2910 = vmatprep.subr.mxu0 %v21071_v54  ;;  %21640 = vst [vmem:[#allocation261_spill] sm:$0xff] %v17800_v53  ;;  %v21083_v57 = vunpack.c.h.bf16 %v17800_v53  ;;  %v21647_v3 = vunpack.c.l.bf16 %v17800_v53 }
 0x795   : > { %2911 = vmatpush2.msra.mxu0 %v21639_v47  ;;  %v17811_v47 = vld [vmem:[%s21145_s2 + $0x8a8] sm:$0xff] }
 0x796   : > { %2912 = vmatprep.subr.mxu0 %v21074_v43  ;;  %21642 = vst [vmem:[#allocation262_spill] sm:$0xff] %v17811_v47  ;;  %v21086_v54 = vunpack.c.h.bf16 %v17811_v47  ;;  %v21649_v63 = vunpack.c.l.bf16 %v17811_v47 }
 0x797   : > { %2913 = vmatpush2.msra.mxu0 %v21641_v6  ;;  %v17822_v6 = vld [vmem:[%s21145_s2 + $0x8a0] sm:$0xff] }
 0x798   : > { %2914 = vmatprep.subr.mxu0 %v21077_v60  ;;  %21644 = vst [vmem:[#allocation263_spill] sm:$0xff] %v17822_v6  ;;  %v21089_v43 = vunpack.c.h.bf16 %v17822_v6  ;;  %v21651_v53 = vunpack.c.l.bf16 %v17822_v6 }
 0x799   : > { %2915 = vmatpush2.msra.mxu0 %v21643_v11  ;;  %v17833_v11 = vld [vmem:[%s21145_s2 + $0x898] sm:$0xff] }
 0x79a   : > { %2916 = vmatprep.subr.mxu0 %v21080_v19  ;;  %21646 = vst [vmem:[#allocation264_spill] sm:$0xff] %v17833_v11  ;;  %v21098_v60 = vunpack.c.h.bf16 %v17833_v11  ;;  %v21653_v47 = vunpack.c.l.bf16 %v17833_v11  ;;  %v12743_v11 = vld [vmem:[#allocation2 + $0x30] sm:$0xff]  }
 0x79b   : > { %2917 = vmatpush2.msra.mxu0 %v21645_v59  ;;  %v17844_v59 = vld [vmem:[%s21145_s2 + $0x890] sm:$0xff]  ;;  %v11897_v51 = vunpack.c.h.bf16 %v12743_v11  ;;  %v11896_v27 = vunpack.c.l.bf16 %v12743_v11 }
 0x79c   : > { %2918 = vmatprep.subr.mxu0 %v21083_v57  ;;  %21648 = vst [vmem:[#allocation265_spill] sm:$0xff] %v17844_v59  ;;  %v21097_v19 = vunpack.c.h.bf16 %v17844_v59 }
 0x79d   : > { %2919 = vmatpush2.msra.mxu0 %v21647_v3  ;;  %v17855_v3 = vld [vmem:[%s21145_s2 + $0x888] sm:$0xff] }
 0x79e   : > { %2920 = vmatprep.subr.mxu0 %v21086_v54  ;;  %21650 = vst [vmem:[#allocation266_spill] sm:$0xff] %v17855_v3  ;;  %v21092_v54 = vunpack.c.l.bf16 %v17844_v59  ;;  %v21096_v57 = vunpack.c.h.bf16 %v17855_v3  ;;  %v12751_v59 = vld [vmem:[#allocation2 + $0x70] sm:$0xff]  }
 0x79f   : > { %2921 = vmatpush2.msra.mxu0 %v21649_v63  ;;  %v17866_v63 = vld [vmem:[%s21145_s2 + $0x880] sm:$0xff]  ;;  %v11928_v39 = vunpack.c.l.bf16 %v12751_v59 }
 0x7a0   : > { %2922 = vmatprep.subr.mxu0 %v21089_v43  ;;  %21652 = vst [vmem:[#allocation267_spill] sm:$0xff] %v17866_v63  ;;  %v21093_v43 = vunpack.c.l.bf16 %v17855_v3  ;;  %v21095_v6 = vunpack.c.l.bf16 %v17866_v63 }
 0x7a1   : > { %2923 = vmatpush2.msra.mxu0 %v21651_v53  ;;  %v21094_v53 = vunpack.c.h.bf16 %v17866_v63 }
 0x7a2   : > { %2924 = vmatprep.subr.mxu0 %v21098_v60 }
 0x7a3   : > { %2925 = vmatpush2.msra.mxu0 %v21653_v47  ;;  %v3023_v47 = vld [vmem:[%s20264_s8] sm:$0xff] }
 0x7a4   : > { %2926 = vmatprep.subr.mxu0 %v21097_v19  ;;  %v12744_v19 = vld [vmem:[#allocation2 + $0x38] sm:$0xff]  }
 0x7a5   : > { %2927 = vmatpush2.msra.mxu0 %v21092_v54  ;;  %v14403_v54 = vmov 0   ;;  %v11901_v3 = vunpack.c.h.bf16 %v12744_v19 }
 0x7a6   : > { %2928 = vmatprep.subr.mxu0 %v21096_v57  ;;  %14298 = vset.pattern.permute.xlu0 %v14403_v54  ;;  %v12752_v57 = vld [vmem:[#allocation2 + $0x78] sm:$0xff]  }
 0x7a7   : > { %2929 = vmatpush2.msra.mxu0 %v21093_v43  ;;  %14299 = vset.pattern.permute.xlu1 %v14403_v54  ;;  %v5017_v43 = vld [vmem:[%s20266_s10] sm:$0xff]  ;;  %v6850_v54 = vld [vmem:[%s20270_s14 + $0x8] sm:$0xff] }
 0x7a8   : > { %2930 = vmatprep.subr.mxu0 %v21094_v53  ;;  %3026 = vperm.xlu0 %14298, %v3023_v47   ;;  %v6814_v53 = vld [vmem:[%s20268_s12 + $0x8] sm:$0xff]  ;;  %v6852_v47 = vld [vmem:[%s20270_s14 + $0x18] sm:$0xff] }
 0x7a9   : > { %2931 = vmatpush2.msra.mxu0 %v21095_v6 }
 0x7aa   : > { %2933 = vmatmul.mubr.f32.vlgmr.msra.gmra.mxu0 %v17520_v24  ;;  %v6816_v24 = vld [vmem:[%s20268_s12 + $0x18] sm:$0xff] }
 0x7ac   : > { %5021 = vperm.xlu0 %14298, %v5017_v43   ;;  %v8947_v43 = vld [vmem:[%s20272_s16 + $0x8] sm:$0xff] }
 0x7b0   : > { %6824 = vperm.xlu0 %14298, %v6814_v53   ;;  %v8949_v53 = vld [vmem:[%s20272_s16 + $0x18] sm:$0xff] }
 0x7b4   : > { %6834 = vperm.xlu0 %14298, %v6816_v24   ;;  %v8983_v24 = vld [vmem:[%s20274_s18 + $0x8] sm:$0xff] }
 0x7b8   : > { %6860 = vperm.xlu0 %14298, %v6850_v54   ;;  %v8985_v54 = vld [vmem:[%s20274_s18 + $0x18] sm:$0xff] }
 0x7bc   : > { %6870 = vperm.xlu0 %14298, %v6852_v47   ;;  %v11044_v47 = vld [vmem:[%s20276_s20 + $0x10] sm:$0xff] }
 0x7c0   : > { %8957 = vperm.xlu0 %14298, %v8947_v43   ;;  %v11042_v43 = vld [vmem:[%s20276_s20] sm:$0xff] }
 0x7c4   : > { %8967 = vperm.xlu0 %14298, %v8949_v53  }
 0x7c8   : > { %8993 = vperm.xlu0 %14298, %v8983_v24  }
 0x7cc   : > { %9003 = vperm.xlu0 %14298, %v8985_v54   ;;  %v11933_v54 = vunpack.c.h.bf16 %v12752_v57 }
 0x7d0   : > { %11058 = vperm.xlu0 %14298, %v11044_v47   ;;  %v11553_v47 = vld [vmem:[%s21208_s5 + $0x40] sm:$0xff] }
 0x7d4   : > { %11048 = vperm.xlu0 %14298, %v11042_v43   ;;  %v11932_v43 = vunpack.c.l.bf16 %v12752_v57  ;;  %v11893_v57 = vunpack.c.h.bf16 %v12742_v33 }
 0x82a   : > { %v2764_v53 = vpop.f32.mrf.mxu0 }
 0x82b   : > { %v17926_v6 = vadd.f32 %v2764_v53, %v17525_v5  ;;  %v11900_v5 = vunpack.c.l.bf16 %v12744_v19  ;;  %v11929_v53 = vunpack.c.h.bf16 %v12751_v59  ;;  %v12741_v19 = vld [vmem:[#allocation2 + $0x20] sm:$0xff]  }
 0x82c   : > { %v17928_v24 = vpop.f32.mrf.mxu0  ;;  %v11888_v11 = vunpack.c.l.bf16 %v12741_v19 }
 0x86a   : > { %v2934_v60 = vpop.f32.mrf.mxu0 }
 0x86c   : > { %v2936_v63 = vpop.f32.mrf.mxu0 }
 0x86d   : > { %11554 = vmatprep.subr.msk.mxu1 %vm1101_vm0, %v2936_v63  ;;  %v12749_v63 = vld [vmem:[#allocation2 + $0x60] sm:$0xff]  }
 0x86e   : > { %11555 = vmatpush1.msk.msra.mxu1 %vm1101_vm0, %v2934_v60  ;;  %v11924_v60 = vunpack.c.l.bf16 %v12750_v45  ;;  %v11920_v59 = vunpack.c.l.bf16 %v12749_v63  ;;  %v12739_v45 = vld [vmem:[#allocation2 + $0x10] sm:$0xff]  }
 0x86f   : > { %11556 = vmatmul.mubr.msk.f32.vlgmr.msra.gmra.mxu1 %vm1097_vm1, %v11553_v47  ;;  %12927 = vmatprep.subr.mxu1 %v11933_v54  ;;  %v11892_v47 = vunpack.c.l.bf16 %v12742_v33  ;;  %v11921_v54 = vunpack.c.h.bf16 %v12749_v63  ;;  %v11881_v33 = vunpack.c.h.bf16 %v12739_v45  ;;  %v11880_v63 = vunpack.c.l.bf16 %v12739_v45 }
 0x870   : > { %12928 = vmatpush3.msra.mxu1 %v11901_v3  ;;  %v11889_v3 = vunpack.c.h.bf16 %v12741_v19 }
 0x871   : > { %12929 = vmatprep.subr.mxu1 %v11932_v43  ;;  %v12740_v43 = vld [vmem:[#allocation2 + $0x18] sm:$0xff]  }
 0x872   : > { %12930 = vmatpush3.msra.mxu1 %v11900_v5  ;;  %v11917_v5 = vunpack.c.h.bf16 %v12748_v15 }
 0x873   : > { %12931 = vmatprep.subr.mxu1 %v11929_v53  ;;  %v12747_v53 = vld [vmem:[#allocation2 + $0x50] sm:$0xff]  }
 0x874   : > { %12932 = vmatpush3.msra.mxu1 %v11897_v51  ;;  %v11885_v51 = vunpack.c.h.bf16 %v12740_v43 }
 0x875   : > { %12933 = vmatprep.subr.mxu1 %v11928_v39  ;;  %v11916_v39 = vunpack.c.l.bf16 %v12748_v15 }
 0x876   : > { %12934 = vmatpush3.msra.mxu1 %v11896_v27  ;;  %v11884_v27 = vunpack.c.l.bf16 %v12740_v43 }
 0x877   : > { %12935 = vmatprep.subr.mxu1 %v11925_v21  ;;  %v11913_v21 = vunpack.c.h.bf16 %v12747_v53 }
 0x878   : > { %12936 = vmatpush3.msra.mxu1 %v11893_v57  ;;  %v11912_v57 = vunpack.c.l.bf16 %v12747_v53 }
 0x879   : > { %12937 = vmatprep.subr.mxu1 %v11924_v60  ;;  %v12746_v60 = vld [vmem:[#allocation2 + $0x48] sm:$0xff]  }
 0x87a   : > { %12938 = vmatpush3.msra.mxu1 %v11892_v47  ;;  %v11909_v19 = vunpack.c.h.bf16 %v12746_v60  ;;  %v12738_v47 = vld [vmem:[#allocation2 + $0x8] sm:$0xff]   ;;  %v11908_v15 = vunpack.c.l.bf16 %v12746_v60 }
 0x87b   : > { %12939 = vmatprep.subr.mxu1 %v11921_v54  ;;  %v11877_v54 = vunpack.c.h.bf16 %v12738_v47 }
 0x87c   : > { %12940 = vmatpush3.msra.mxu1 %v11889_v3  ;;  %v11876_v3 = vunpack.c.l.bf16 %v12738_v47 }
 0x87d   : > { %12941 = vmatprep.subr.mxu1 %v11920_v59  ;;  %v12745_v59 = vld [vmem:[#allocation2 + $0x40] sm:$0xff]  }
 0x87e   : > { %12942 = vmatpush3.msra.mxu1 %v11888_v11  ;;  %v11905_v43 = vunpack.c.h.bf16 %v12745_v59  ;;  %v11871_v11 = vld [vmem:[#allocation2] sm:$0xff]  }
 0x87f   : > { %12943 = vmatprep.subr.mxu1 %v11917_v5  ;;  %v11873_v5 = vunpack.c.h.bf16 %v11871_v11  ;;  %v11872_v53 = vunpack.c.l.bf16 %v11871_v11  ;;  %v12766_v11 = vld [vmem:[#allocation2 + $0xf0] sm:$0xff]  }
 0x880   : > { %12944 = vmatpush3.msra.mxu1 %v11885_v51  ;;  %v11904_v51 = vunpack.c.l.bf16 %v12745_v59 }
 0x881   : > { %12945 = vmatprep.subr.mxu1 %v11916_v39  ;;  %v12767_v39 = vld [vmem:[#allocation2 + $0xf8] sm:$0xff]  }
 0x882   : > { %12946 = vmatpush3.msra.mxu1 %v11884_v27  ;;  %v11997_v45 = vunpack.c.h.bf16 %v12767_v39  ;;  %v1257_v27 = vadd.f32 %v16052_v18, %v15689_v28  ;;  %v12759_v28 = vld [vmem:[#allocation2 + $0xb8] sm:$0xff]  }
 0x883   : > { %12947 = vmatprep.subr.mxu1 %v11913_v21 }
 0x884   : > { %12948 = vmatpush3.msra.mxu1 %v11881_v33  ;;  %v1510_v21 = vadd.f32 %v16057_v23, %v1257_v27 }
 0x885   : > { %12949 = vmatprep.subr.mxu1 %v11912_v57 }
 0x886   : > { %12950 = vmatpush3.msra.mxu1 %v11880_v63  ;;  %v1762_v33 = vadd.f32 %v16426_v35, %v1510_v21  ;;  %v11965_v35 = vunpack.c.h.bf16 %v12759_v28 }
 0x887   : > { %12951 = vmatprep.subr.mxu1 %v11909_v19 }
 0x888   : > { %12952 = vmatpush3.msra.mxu1 %v11877_v54  ;;  %v2014_v57 = vadd.f32 %v16792_v10, %v1762_v33  ;;  %v12764_v33 = vld [vmem:[#allocation2 + $0xe0] sm:$0xff]  }
 0x889   : > { %12953 = vmatprep.subr.mxu1 %v11908_v15 }
 0x88a   : > { %12954 = vmatpush3.msra.mxu1 %v11876_v3  ;;  %v2266_v63 = vadd.f32 %v17158_v36, %v2014_v57  ;;  %v3027_v3 = vpop.permute.xlu0 %3026  ;;  %v11996_v36 = vunpack.c.l.bf16 %v12767_v39 }
 0x88b   : > { %12955 = vmatprep.subr.mxu1 %v11905_v43 }
 0x88c   : > { %12956 = vmatpush3.msra.mxu1 %v11873_v5  ;;  %v2518_v60 = vadd.f32 %v17527_v42, %v2266_v63  ;;  %v12758_v5 = vld [vmem:[#allocation2 + $0xb0] sm:$0xff]   ;;  %v11964_v42 = vunpack.c.l.bf16 %v12759_v28  ;;  %v12756_v63 = vld [vmem:[#allocation2 + $0xa0] sm:$0xff]  }
 0x88d   : > { %12957 = vmatprep.subr.mxu1 %v11904_v51  ;;  %v12765_v51 = vld [vmem:[#allocation2 + $0xe8] sm:$0xff]   ;;  %v11960_v27 = vunpack.c.l.bf16 %v12758_v5 }
 0x88e   : > { %12958 = vmatpush3.msra.mxu1 %v11872_v53  ;;  %v2770_v47 = vadd.f32 %v17928_v24, %v2518_v60  ;;  %v11961_v24 = vunpack.c.h.bf16 %v12758_v5  ;;  %v11992_v53 = vunpack.c.l.bf16 %v12766_v11  ;;  %v11989_v21 = vunpack.c.h.bf16 %v12765_v51 }
 0x88f   : > { %12962 = vmatprep.subr.mxu1 %v11997_v45  ;;  %v12757_v45 = vld [vmem:[#allocation2 + $0xa8] sm:$0xff]   ;;  %v11988_v57 = vunpack.c.l.bf16 %v12765_v51 }
 0x890   : > { %v11957_v39 = vunpack.c.h.bf16 %v12757_v45  ;;  %v11956_v60 = vunpack.c.l.bf16 %v12757_v45  ;;  %v12753_v51 = vld [vmem:[#allocation2 + $0x88] sm:$0xff]  }
 0x92f   : > { %v3016_v19 = vpop.f32.mrf.mxu1 }
 0x930   : > { %v3021_v54 = vadd.f32 %v3016_v19, %v17926_v6  ;;  %v11993_v6 = vunpack.c.h.bf16 %v12766_v11  ;;  %v11985_v19 = vunpack.c.h.bf16 %v12764_v33  ;;  %v12754_v11 = vld [vmem:[#allocation2 + $0x90] sm:$0xff]  }
 0x931   : > { %v3018_v15 = vpop.f32.mrf.mxu1 }
 0x932   : > { %v3022_v59 = vadd.f32 %v3018_v15, %v2770_v47  ;;  %v3029_v43 = vadd.f32 %v3027_v3, %v3021_v54  ;;  %v11953_v47 = vunpack.c.h.bf16 %v12756_v63  ;;  %v12763_v54 = vld [vmem:[#allocation2 + $0xd8] sm:$0xff]   ;;  %v11984_v15 = vunpack.c.l.bf16 %v12764_v33  ;;  %v11935_v33 = vld [vmem:[#allocation2 + $0x80] sm:$0xff]  }
 0x934   : > { %v3030_v18 = vadd.f32 %v3027_v3, %v3022_v59  ;;  %v17947_v10 = vmax.f32 %v3029_v43, 0.0  ;;  %v12755_v3 = vld [vmem:[#allocation2 + $0x98] sm:$0xff]   ;;  %v11952_v59 = vunpack.c.l.bf16 %v12756_v63  ;;  %v11981_v43 = vunpack.c.h.bf16 %v12763_v54 }
 0x935   : > { %v11949_v28 = vunpack.c.h.bf16 %v12755_v3 }
 0x936   : > { %v17945_v23 = vmax.f32 %v3030_v18, 0.0  ;;  %v12762_v18 = vld [vmem:[#allocation2 + $0xd0] sm:$0xff]  }
 0x937   : > { %v11977_v5 = vunpack.c.h.bf16 %v12762_v18 }
 0x938   : > { %3161 = vmatprep.mubr.f32.mxu1 %v17945_v23 }
 0x939   : > { %3162 = vmatmul.mubr.f32.vlgmr.msra.gmra.mxu1 %v17947_v10 }
 0x93a   : > { %12963 = vmatpush3.msra.mxu1 %v11965_v35  ;;  %3298 = vmatprep.mubr.f32.mxu1 %v17945_v23  ;;  %v11980_v35 = vunpack.c.l.bf16 %v12763_v54  ;;  %v12774_v54 = vld [vmem:[#allocation2 + $0x138] sm:$0xff]  }
 0x93b   : > { %12964 = vmatprep.subr.mxu1 %v11996_v36  ;;  %v11948_v36 = vunpack.c.l.bf16 %v12755_v3 }
 0x93c   : > { %12965 = vmatpush3.msra.mxu1 %v11964_v42  ;;  %v11945_v42 = vunpack.c.h.bf16 %v12754_v11 }
 0x93d   : > { %12966 = vmatprep.subr.mxu1 %v11993_v6  ;;  %v12761_v6 = vld [vmem:[#allocation2 + $0xc8] sm:$0xff]  }
 0x93e   : > { %12967 = vmatpush3.msra.mxu1 %v11961_v24  ;;  %v11976_v24 = vunpack.c.l.bf16 %v12762_v18  ;;  %v11973_v45 = vunpack.c.h.bf16 %v12761_v6  ;;  %v12773_v18 = vld [vmem:[#allocation2 + $0x130] sm:$0xff]  }
 0x93f   : > { %12968 = vmatprep.subr.mxu1 %v11992_v53  ;;  %v11944_v53 = vunpack.c.l.bf16 %v12754_v11 }
 0x940   : > { %12969 = vmatpush3.msra.mxu1 %v11960_v27  ;;  %v11941_v27 = vunpack.c.h.bf16 %v12753_v51 }
 0x941   : > { %12970 = vmatprep.subr.mxu1 %v11989_v21  ;;  %v12760_v21 = vld [vmem:[#allocation2 + $0xc0] sm:$0xff]  }
 0x942   : > { %12971 = vmatpush3.msra.mxu1 %v11957_v39  ;;  %v11972_v39 = vunpack.c.l.bf16 %v12761_v6  ;;  %v11969_v63 = vunpack.c.h.bf16 %v12760_v21  ;;  %v12772_v6 = vld [vmem:[#allocation2 + $0x128] sm:$0xff]  }
 0x943   : > { %12972 = vmatprep.subr.mxu1 %v11988_v57  ;;  %v11940_v57 = vunpack.c.l.bf16 %v12753_v51 }
 0x944   : > { %12973 = vmatpush3.msra.mxu1 %v11956_v60  ;;  %v11937_v60 = vunpack.c.h.bf16 %v11935_v33 }
 0x945   : > { %12974 = vmatprep.subr.mxu1 %v11985_v19  ;;  %v12782_v19 = vld [vmem:[#allocation2 + $0x178] sm:$0xff]  }
 0x946   : > { %12975 = vmatpush3.msra.mxu1 %v11953_v47  ;;  %v11968_v47 = vunpack.c.l.bf16 %v12760_v21  ;;  %v12061_v3 = vunpack.c.h.bf16 %v12782_v19  ;;  %v12771_v21 = vld [vmem:[#allocation2 + $0x120] sm:$0xff]  }
 0x947   : > { %12976 = vmatprep.subr.mxu1 %v11984_v15  ;;  %v11936_v15 = vunpack.c.l.bf16 %v11935_v33 }
 0x948   : > { %12977 = vmatpush3.msra.mxu1 %v11952_v59  ;;  %v12029_v59 = vunpack.c.h.bf16 %v12774_v54 }
 0x949   : > { %12978 = vmatprep.subr.mxu1 %v11981_v43  ;;  %v12781_v43 = vld [vmem:[#allocation2 + $0x170] sm:$0xff]  }
 0x94a   : > { %12979 = vmatpush3.msra.mxu1 %v11949_v28  ;;  %v12060_v28 = vunpack.c.l.bf16 %v12782_v19  ;;  %v12057_v11 = vunpack.c.h.bf16 %v12781_v43  ;;  %v12770_v19 = vld [vmem:[#allocation2 + $0x118] sm:$0xff]  }
 0x94b   : > { %12980 = vmatprep.subr.mxu1 %v11980_v35  ;;  %v12028_v35 = vunpack.c.l.bf16 %v12774_v54 }
 0x94c   : > { %12981 = vmatpush3.msra.mxu1 %v11948_v36  ;;  %v12025_v36 = vunpack.c.h.bf16 %v12773_v18 }
 0x94d   : > { %12982 = vmatprep.subr.mxu1 %v11977_v5  ;;  %v12780_v5 = vld [vmem:[#allocation2 + $0x168] sm:$0xff]  }
 0x94e   : > { %12983 = vmatpush3.msra.mxu1 %v11945_v42  ;;  %v12056_v42 = vunpack.c.l.bf16 %v12781_v43  ;;  %v12053_v51 = vunpack.c.h.bf16 %v12780_v5  ;;  %v12769_v43 = vld [vmem:[#allocation2 + $0x110] sm:$0xff]  }
 0x94f   : > { %12984 = vmatprep.subr.mxu1 %v11976_v24  ;;  %v12024_v24 = vunpack.c.l.bf16 %v12773_v18 }
 0x950   : > { %12985 = vmatpush3.msra.mxu1 %v11944_v53  ;;  %v12021_v53 = vunpack.c.h.bf16 %v12772_v6 }
 0x951   : > { %12986 = vmatprep.subr.mxu1 %v11973_v45  ;;  %v12779_v45 = vld [vmem:[#allocation2 + $0x160] sm:$0xff]  }
 0x952   : > { %12987 = vmatpush3.msra.mxu1 %v11941_v27  ;;  %v12052_v27 = vunpack.c.l.bf16 %v12780_v5  ;;  %v12049_v33 = vunpack.c.h.bf16 %v12779_v45  ;;  %v12768_v5 = vld [vmem:[#allocation2 + $0x108] sm:$0xff]  }
 0x953   : > { %12988 = vmatprep.subr.mxu1 %v11972_v39  ;;  %v12020_v39 = vunpack.c.l.bf16 %v12772_v6 }
 0x954   : > { %12989 = vmatpush3.msra.mxu1 %v11940_v57  ;;  %v12017_v57 = vunpack.c.h.bf16 %v12771_v21 }
 0x955   : > { %12990 = vmatprep.subr.mxu1 %v11969_v63  ;;  %v12778_v63 = vld [vmem:[#allocation2 + $0x158] sm:$0xff]  }
 0x956   : > { %12991 = vmatpush3.msra.mxu1 %v11937_v60  ;;  %v12048_v60 = vunpack.c.l.bf16 %v12779_v45  ;;  %v12045_v54 = vunpack.c.h.bf16 %v12778_v63  ;;  %v11999_v45 = vld [vmem:[#allocation2 + $0x100] sm:$0xff]  }
 0x957   : > { %12992 = vmatprep.subr.mxu1 %v11968_v47  ;;  %v12016_v47 = vunpack.c.l.bf16 %v12771_v21 }
 0x958   : > { %12993 = vmatpush3.msra.mxu1 %v11936_v15  ;;  %v12013_v15 = vunpack.c.h.bf16 %v12770_v19 }
 0x959   : > { %3299 = vmatmul.mubr.f32.vlgmr.msra.gmra.mxu1 %v17947_v10  ;;  %13003 = vmatprep.subr.mxu1 %v12061_v3  ;;  %v12777_v3 = vld [vmem:[#allocation2 + $0x150] sm:$0xff]  }
 0x95a   : > { %13004 = vmatpush3.msra.mxu1 %v12029_v59  ;;  %3599 = vmatprep.mubr.f32.mxu1 %v17945_v23  ;;  %v12044_v59 = vunpack.c.l.bf16 %v12778_v63  ;;  %v12041_v18 = vunpack.c.h.bf16 %v12777_v3  ;;  %v11557_v63 = vld [vmem:[%s20265_s9 + $0x10] sm:$0xff] }
 0x95b   : > { %13005 = vmatprep.subr.mxu1 %v12060_v28  ;;  %v12012_v28 = vunpack.c.l.bf16 %v12770_v19  ;;  %13607 = vmatprep.mubr.msk.f32.mxu0 %vm3307_vm2, %v11557_v63 }
 0x95c   : > { %13006 = vmatpush3.msra.mxu1 %v12028_v35  ;;  %v12009_v35 = vunpack.c.h.bf16 %v12769_v43 }
 0x95d   : > { %13007 = vmatprep.subr.mxu1 %v12057_v11  ;;  %v12776_v11 = vld [vmem:[#allocation2 + $0x148] sm:$0xff]  }
 0x95e   : > { %13008 = vmatpush3.msra.mxu1 %v12025_v36  ;;  %v12040_v36 = vunpack.c.l.bf16 %v12777_v3  ;;  %v12037_v6 = vunpack.c.h.bf16 %v12776_v11  ;;  %v11558_v3 = vld [vmem:[%s20265_s9 + $0x18] sm:$0xff] }
 0x95f   : > { %13009 = vmatprep.subr.mxu1 %v12056_v42  ;;  %v12008_v42 = vunpack.c.l.bf16 %v12769_v43  ;;  %v3167_v43 = vld [vmem:[%s20265_s9] sm:$0xff] }
 0x960   : > { %13010 = vmatpush3.msra.mxu1 %v12024_v24  ;;  %v12005_v24 = vunpack.c.h.bf16 %v12768_v5 }
 0x961   : > { %13011 = vmatprep.subr.mxu1 %v12053_v51  ;;  %v12775_v51 = vld [vmem:[#allocation2 + $0x140] sm:$0xff]  }
 0x962   : > { %13012 = vmatpush3.msra.mxu1 %v12021_v53  ;;  %v12036_v53 = vunpack.c.l.bf16 %v12776_v11  ;;  %v12033_v21 = vunpack.c.h.bf16 %v12775_v51  ;;  %v12797_v11 = vld [vmem:[#allocation2 + $0x1f8] sm:$0xff]  }
 0x963   : > { %13013 = vmatprep.subr.mxu1 %v12052_v27  ;;  %v12004_v27 = vunpack.c.l.bf16 %v12768_v5 }
 0x964   : > { %13014 = vmatpush3.msra.mxu1 %v12020_v39  ;;  %v12001_v39 = vunpack.c.h.bf16 %v11999_v45 }
 0x965   : > { %13015 = vmatprep.subr.mxu1 %v12049_v33  ;;  %v12032_v33 = vunpack.c.l.bf16 %v12775_v51 }
 0x966   : > { %13016 = vmatpush3.msra.mxu1 %v12017_v57  ;;  %v12000_v57 = vunpack.c.l.bf16 %v11999_v45  ;;  %v12124_v45 = vunpack.c.l.bf16 %v12797_v11 }
 0x967   : > { %13017 = vmatprep.subr.mxu1 %v12048_v60 }
 0x968   : > { %13018 = vmatpush3.msra.mxu1 %v12016_v47 }
 0x969   : > { %13019 = vmatprep.subr.mxu1 %v12045_v54 }
 0x96a   : > { %13020 = vmatpush3.msra.mxu1 %v12013_v15 }
 0x96b   : > { %13021 = vmatprep.subr.mxu1 %v12044_v59 }
 0x96c   : > { %13022 = vmatpush3.msra.mxu1 %v12012_v28  ;;  %v3168_v28 = vld [vmem:[%s20265_s9 + $0x8] sm:$0xff] }
 0x96d   : > { %13023 = vmatprep.subr.mxu1 %v12041_v18  ;;  %v11563_v18 = vld [vmem:[%s20265_s9 + $0x20] sm:$0xff] }
 0x96e   : > { %13024 = vmatpush3.msra.mxu1 %v12009_v35 }
 0x96f   : > { %13025 = vmatprep.subr.mxu1 %v12040_v36  ;;  %v12789_v36 = vld [vmem:[#allocation2 + $0x1b8] sm:$0xff]  }
 0x970   : > { %13026 = vmatpush3.msra.mxu1 %v12008_v42  ;;  %v12093_v51 = vunpack.c.h.bf16 %v12789_v36 }
 0x971   : > { %13027 = vmatprep.subr.mxu1 %v12037_v6  ;;  %v12125_v6 = vunpack.c.h.bf16 %v12797_v11 }
 0x972   : > { %13028 = vmatpush3.msra.mxu1 %v12005_v24  ;;  %v11564_v24 = vld [vmem:[%s20265_s9 + $0x28] sm:$0xff] }
 0x973   : > { %13029 = vmatprep.subr.mxu1 %v12036_v53  ;;  %v12796_v53 = vld [vmem:[#allocation2 + $0x1f0] sm:$0xff]  }
 0x974   : > { %13030 = vmatpush3.msra.mxu1 %v12004_v27  ;;  %v12788_v27 = vld [vmem:[#allocation2 + $0x1b0] sm:$0xff]   ;;  %v12120_v63 = vunpack.c.l.bf16 %v12796_v53 }
 0x975   : > { %13031 = vmatprep.subr.mxu1 %v12033_v21  ;;  %v12092_v21 = vunpack.c.l.bf16 %v12789_v36  ;;  %v12785_v36 = vld [vmem:[#allocation2 + $0x198] sm:$0xff]  }
 0x976   : > { %13032 = vmatpush3.msra.mxu1 %v12001_v39  ;;  %v12121_v39 = vunpack.c.h.bf16 %v12796_v53  ;;  %v12784_v53 = vld [vmem:[#allocation2 + $0x190] sm:$0xff]  }
 0x977   : > { %13033 = vmatprep.subr.mxu1 %v12032_v33  ;;  %v12089_v33 = vunpack.c.h.bf16 %v12788_v27 }
 0x978   : > { %13034 = vmatpush3.msra.mxu1 %v12000_v57  ;;  %v12795_v57 = vld [vmem:[#allocation2 + $0x1e8] sm:$0xff]  }
 0x979   : > { %3600 = vmatmul.mubr.f32.vlgmr.msra.gmra.mxu1 %v17947_v10 }
 0x9f9   : > { %v12959_v60 = vpop.f32.mrf.mxu1 }
 0x9fb   : > { %v12960_v19 = vpop.f32.mrf.mxu1 }
 0x9fc   : > { %v12961_v59 = vadd.f32 %v12960_v19, %v12959_v60  ;;  %v12787_v60 = vld [vmem:[#allocation2 + $0x1a8] sm:$0xff]   ;;  %v12088_v19 = vunpack.c.l.bf16 %v12788_v27 }
 0xa19   : > { %v12994_v47 = vpop.f32.mrf.mxu1 }
 0xa1b   : > { %v12995_v54 = vpop.f32.mrf.mxu1 }
 0xa1c   : > { %v12996_v15 = vadd.f32 %v12995_v54, %v12994_v47  ;;  %v12117_v47 = vunpack.c.h.bf16 %v12795_v57  ;;  %v12085_v54 = vunpack.c.h.bf16 %v12787_v60 }
 0xa1e   : > { %13605 = vmatprep.subr.mxu0 %v12996_v15 }
 0xa1f   : > { %13606 = vmatpush3.msra.mxu0 %v12996_v15  ;;  %v12794_v15 = vld [vmem:[#allocation2 + $0x1e0] sm:$0xff]  }
 0xa20   : > { %13610 = vmatprep.subr.mxu0 %v12961_v59  ;;  %13608 = vmatmul.mubr.msk.f32.vlgmr.msra.gmra.mxu0 %vm3307_vm2, %v11558_v3  ;;  %v12116_v3 = vunpack.c.l.bf16 %v12795_v57  ;;  %v12112_v11 = vunpack.c.l.bf16 %v12794_v15  ;;  %v12783_v57 = vld [vmem:[#allocation2 + $0x188] sm:$0xff]  }
 0xa21   : > { %13611 = vmatpush3.msra.mxu0 %v12961_v59  ;;  %13612 = vmatprep.mubr.msk.f32.mxu0 %vm3307_vm2, %v3167_v43  ;;  %v12786_v59 = vld [vmem:[#allocation2 + $0x1a0] sm:$0xff]   ;;  %v12084_v43 = vunpack.c.l.bf16 %v12787_v60 }
 0xa24   : > { %13613 = vmatmul.mubr.msk.f32.vlgmr.msra.gmra.mxu0 %vm3307_vm2, %v3168_v28  ;;  %v12113_v28 = vunpack.c.h.bf16 %v12794_v15  ;;  %v12063_v15 = vld [vmem:[#allocation2 + $0x180] sm:$0xff]  }
 0xa25   : > { %13617 = vmatprep.mubr.msk.f32.mxu0 %vm3307_vm2, %v11563_v18  ;;  %v12081_v18 = vunpack.c.h.bf16 %v12786_v59 }
 0xa39   : > { %v13035_v35 = vpop.f32.mrf.mxu1 }
 0xa3b   : > { %v13036_v5 = vpop.f32.mrf.mxu1 }
 0xa3c   : > { %v13037_v42 = vadd.f32 %v13036_v5, %v13035_v35  ;;  %v12793_v35 = vld [vmem:[#allocation2 + $0x1d8] sm:$0xff]   ;;  %v12080_v5 = vunpack.c.l.bf16 %v12786_v59 }
 0xa3e   : > { %13615 = vmatprep.subr.mxu0 %v13037_v42 }
 0xa3f   : > { %13616 = vmatpush3.msra.mxu0 %v13037_v42  ;;  %v12109_v42 = vunpack.c.h.bf16 %v12793_v35 }
 0xa40   : > { %13618 = vmatmul.mubr.msk.f32.vlgmr.msra.gmra.mxu0 %vm3307_vm2, %v11564_v24  ;;  %13041 = vmatprep.subr.mxu0 %v12125_v6  ;;  %v12077_v6 = vunpack.c.h.bf16 %v12785_v36  ;;  %v12792_v24 = vld [vmem:[#allocation2 + $0x1d0] sm:$0xff]  }
 0xa41   : > { %13042 = vmatpush3.msra.mxu0 %v12093_v51  ;;  %3820 = vmatprep.mubr.f32.mxu0 %v17945_v23  ;;  %v12108_v51 = vunpack.c.l.bf16 %v12793_v35  ;;  %v12105_v27 = vunpack.c.h.bf16 %v12792_v24  ;;  %v11567_v35 = vld [vmem:[%s20265_s9 + $0x30] sm:$0xff] }
 0xa42   : > { %13043 = vmatprep.subr.mxu0 %v12124_v45  ;;  %v12076_v45 = vunpack.c.l.bf16 %v12785_v36  ;;  %13622 = vmatprep.mubr.msk.f32.mxu1 %vm3307_vm2, %v11567_v35 }
 0xa43   : > { %13044 = vmatpush3.msra.mxu0 %v12092_v21  ;;  %v12073_v21 = vunpack.c.h.bf16 %v12784_v53 }
 0xa44   : > { %13045 = vmatprep.subr.mxu0 %v12121_v39  ;;  %v12791_v39 = vld [vmem:[#allocation2 + $0x1c8] sm:$0xff]  }
 0xa45   : > { %13046 = vmatpush3.msra.mxu0 %v12089_v33  ;;  %v12104_v33 = vunpack.c.l.bf16 %v12792_v24  ;;  %v12101_v60 = vunpack.c.h.bf16 %v12791_v39 }
 0xa46   : > { %13047 = vmatprep.subr.mxu0 %v12120_v63  ;;  %v12072_v63 = vunpack.c.l.bf16 %v12784_v53 }
 0xa47   : > { %13048 = vmatpush3.msra.mxu0 %v12088_v19  ;;  %v12069_v19 = vunpack.c.h.bf16 %v12783_v57 }
 0xa48   : > { %13049 = vmatprep.subr.mxu0 %v12117_v47  ;;  %v12790_v47 = vld [vmem:[#allocation2 + $0x1c0] sm:$0xff]  }
 0xa49   : > { %13050 = vmatpush3.msra.mxu0 %v12085_v54  ;;  %v12100_v54 = vunpack.c.l.bf16 %v12791_v39  ;;  %v12097_v59 = vunpack.c.h.bf16 %v12790_v47 }
 0xa4a   : > { %13051 = vmatprep.subr.mxu0 %v12116_v3  ;;  %v12068_v3 = vunpack.c.l.bf16 %v12783_v57 }
 0xa4b   : > { %13052 = vmatpush3.msra.mxu0 %v12084_v43  ;;  %v12065_v43 = vunpack.c.h.bf16 %v12063_v15 }
 0xa4c   : > { %13053 = vmatprep.subr.mxu0 %v12113_v28  ;;  %v12096_v28 = vunpack.c.l.bf16 %v12790_v47 }
 0xa4d   : > { %13054 = vmatpush3.msra.mxu0 %v12081_v18  ;;  %v12064_v18 = vunpack.c.l.bf16 %v12063_v15 }
 0xa4e   : > { %13055 = vmatprep.subr.mxu0 %v12112_v11 }
 0xa4f   : > { %13056 = vmatpush3.msra.mxu0 %v12080_v5 }
 0xa50   : > { %13057 = vmatprep.subr.mxu0 %v12109_v42 }
 0xa51   : > { %13058 = vmatpush3.msra.mxu0 %v12077_v6 }
 0xa52   : > { %13059 = vmatprep.subr.mxu0 %v12108_v51 }
 0xa53   : > { %13060 = vmatpush3.msra.mxu0 %v12076_v45 }
 0xa54   : > { %13061 = vmatprep.subr.mxu0 %v12105_v27  ;;  %v12812_v27 = vld [vmem:[#allocation2 + $0x278] sm:$0xff]  }
 0xa55   : > { %13062 = vmatpush3.msra.mxu0 %v12073_v21  ;;  %v12804_v21 = vld [vmem:[#allocation2 + $0x238] sm:$0xff]   ;;  %v12189_v57 = vunpack.c.h.bf16 %v12812_v27  ;;  %v12188_v47 = vunpack.c.l.bf16 %v12812_v27 }
 0xa56   : > { %13063 = vmatprep.subr.mxu0 %v12104_v33  ;;  %v12156_v15 = vunpack.c.l.bf16 %v12804_v21 }
 0xa57   : > { %13064 = vmatpush3.msra.mxu0 %v12072_v63  ;;  %v11568_v63 = vld [vmem:[%s20265_s9 + $0x38] sm:$0xff] }
 0xa58   : > { %13065 = vmatprep.subr.mxu0 %v12101_v60  ;;  %v12157_v60 = vunpack.c.h.bf16 %v12804_v21 }
 0xa59   : > { %13066 = vmatpush3.msra.mxu0 %v12069_v19  ;;  %v12811_v19 = vld [vmem:[#allocation2 + $0x270] sm:$0xff]  }
 0xa5a   : > { %13067 = vmatprep.subr.mxu0 %v12100_v54  ;;  %v12803_v54 = vld [vmem:[#allocation2 + $0x230] sm:$0xff]  }
 0xa5b   : > { %13068 = vmatpush3.msra.mxu0 %v12068_v3  ;;  %v12185_v3 = vunpack.c.h.bf16 %v12811_v19  ;;  %v12152_v35 = vunpack.c.l.bf16 %v12803_v54 }
 0xa5c   : > { %13069 = vmatprep.subr.mxu0 %v12097_v59  ;;  %v12153_v59 = vunpack.c.h.bf16 %v12803_v54  ;;  %v12807_v54 = vld [vmem:[#allocation2 + $0x250] sm:$0xff]  }
 0xa5d   : > { %13070 = vmatpush3.msra.mxu0 %v12065_v43  ;;  %v12810_v43 = vld [vmem:[#allocation2 + $0x268] sm:$0xff]  }
 0xa5e   : > { %13071 = vmatprep.subr.mxu0 %v12096_v28  ;;  %v12184_v28 = vunpack.c.l.bf16 %v12811_v19 }
 0xa5f   : > { %13072 = vmatpush3.msra.mxu0 %v12064_v18  ;;  %v12802_v18 = vld [vmem:[#allocation2 + $0x228] sm:$0xff]  }
 0xa60   : > { %3821 = vmatmul.mubr.f32.vlgmr.msra.gmra.mxu0 %v17947_v10  ;;  %v12148_v27 = vunpack.c.l.bf16 %v12802_v18 }
 0xae0   : > { %v13609_v11 = vpop.f32.mrf.mxu0 }
 0xae2   : > { %v17985_v36 = vpop.f32.mrf.mxu0 }
 0xae4   : > { %v13614_v5 = vpop.f32.mrf.mxu0 }
 0xae5   : > { %v3467_v42 = vadd.f32 %v13614_v5, %v13609_v11  ;;  %v12181_v11 = vunpack.c.h.bf16 %v12810_v43  ;;  %v12149_v5 = vunpack.c.h.bf16 %v12802_v18  ;;  %v12806_v18 = vld [vmem:[#allocation2 + $0x248] sm:$0xff]  }
 0xae6   : > { %v17987_v6 = vpop.f32.mrf.mxu0 }
 0xb00   : > { %v13619_v24 = vpop.f32.mrf.mxu0 }
 0xb01   : > { %v17989_v51 = vadd.f32 %v13619_v24, %v3467_v42  ;;  %v12809_v42 = vld [vmem:[#allocation2 + $0x260] sm:$0xff]   ;;  %v12180_v24 = vunpack.c.l.bf16 %v12810_v43  ;;  %v12169_v43 = vunpack.c.h.bf16 %v12807_v54 }
 0xb02   : > { %v17991_v53 = vpop.f32.mrf.mxu0  ;;  %v12177_v21 = vunpack.c.h.bf16 %v12809_v42 }
 0xb20   : > { %v13073_v45 = vpop.f32.mrf.mxu0 }
 0xb22   : > { %v13074_v39 = vpop.f32.mrf.mxu0 }
 0xb23   : > { %v13075_v33 = vadd.f32 %v13074_v39, %v13073_v45  ;;  %v12801_v45 = vld [vmem:[#allocation2 + $0x220] sm:$0xff]  }
 0xb24   : > { %v12145_v39 = vunpack.c.h.bf16 %v12801_v45 }
 0xb25   : > { %13620 = vmatprep.subr.mxu1 %v13075_v33 }
 0xb26   : > { %13621 = vmatpush3.msra.mxu1 %v13075_v33  ;;  %v12808_v33 = vld [vmem:[#allocation2 + $0x258] sm:$0xff]  }
 0xb27   : > { %13623 = vmatmul.mubr.msk.f32.vlgmr.msra.gmra.mxu1 %vm3307_vm2, %v11568_v63  ;;  %13079 = vmatprep.subr.mxu1 %v12189_v57  ;;  %v12176_v57 = vunpack.c.l.bf16 %v12809_v42  ;;  %v12800_v63 = vld [vmem:[#allocation2 + $0x218] sm:$0xff]   ;;  %v12173_v19 = vunpack.c.h.bf16 %v12808_v33  ;;  %v12165_v42 = vunpack.c.h.bf16 %v12806_v18 }
 0xb28   : > { %13080 = vmatpush3.msra.mxu1 %v12157_v60  ;;  %4041 = vmatprep.mubr.f32.mxu1 %v17945_v23  ;;  %v12144_v60 = vunpack.c.l.bf16 %v12801_v45  ;;  %v12805_v45 = vld [vmem:[#allocation2 + $0x240] sm:$0xff]  }
 0xb29   : > { %13081 = vmatprep.subr.mxu1 %v12188_v47  ;;  %v12141_v47 = vunpack.c.h.bf16 %v12800_v63 }
 0xb2a   : > { %13082 = vmatpush3.msra.mxu1 %v12156_v15  ;;  %v12172_v15 = vunpack.c.l.bf16 %v12808_v33  ;;  %v12161_v33 = vunpack.c.h.bf16 %v12805_v45 }
 0xb2b   : > { %13083 = vmatprep.subr.mxu1 %v12185_v3  ;;  %v12799_v3 = vld [vmem:[#allocation2 + $0x210] sm:$0xff]  }
 0xb2c   : > { %13084 = vmatpush3.msra.mxu1 %v12153_v59  ;;  %v12140_v59 = vunpack.c.l.bf16 %v12800_v63  ;;  %v12160_v63 = vunpack.c.l.bf16 %v12805_v45  ;;  %v12818_v45 = vld [vmem:[#allocation2 + $0x2b0] sm:$0xff]  }
 0xb2d   : > { %13085 = vmatprep.subr.mxu1 %v12184_v28  ;;  %v12137_v28 = vunpack.c.h.bf16 %v12799_v3 }
 0xb2e   : > { %13086 = vmatpush3.msra.mxu1 %v12152_v35  ;;  %v12168_v35 = vunpack.c.l.bf16 %v12807_v54 }
 0xb2f   : > { %13087 = vmatprep.subr.mxu1 %v12181_v11  ;;  %v12798_v11 = vld [vmem:[#allocation2 + $0x208] sm:$0xff]  }
 0xb30   : > { %13088 = vmatpush3.msra.mxu1 %v12149_v5  ;;  %v12136_v5 = vunpack.c.l.bf16 %v12799_v3 }
 0xb31   : > { %13089 = vmatprep.subr.mxu1 %v12180_v24  ;;  %v12133_v24 = vunpack.c.h.bf16 %v12798_v11 }
 0xb32   : > { %13090 = vmatpush3.msra.mxu1 %v12148_v27  ;;  %v12164_v27 = vunpack.c.l.bf16 %v12806_v18 }
 0xb33   : > { %13091 = vmatprep.subr.mxu1 %v12177_v21  ;;  %v12127_v21 = vld [vmem:[#allocation2 + $0x200] sm:$0xff]  }
 0xb34   : > { %13092 = vmatpush3.msra.mxu1 %v12145_v39  ;;  %v12132_v39 = vunpack.c.l.bf16 %v12798_v11  ;;  %v11572_v11 = vld [vmem:[%s20265_s9 + $0x48] sm:$0xff] }
 0xb35   : > { %13093 = vmatprep.subr.mxu1 %v12176_v57  ;;  %v12129_v57 = vunpack.c.h.bf16 %v12127_v21 }
 0xb36   : > { %13094 = vmatpush3.msra.mxu1 %v12144_v60  ;;  %v12128_v60 = vunpack.c.l.bf16 %v12127_v21  ;;  %v12217_v21 = vunpack.c.h.bf16 %v12818_v45 }
 0xb37   : > { %13095 = vmatprep.subr.mxu1 %v12173_v19  ;;  %v11571_v19 = vld [vmem:[%s20265_s9 + $0x40] sm:$0xff] }
 0xb38   : > { %13096 = vmatpush3.msra.mxu1 %v12141_v47  ;;  %13627 = vmatprep.mubr.msk.f32.mxu0 %vm3307_vm2, %v11571_v19 }
 0xb39   : > { %13097 = vmatprep.subr.mxu1 %v12172_v15 }
 0xb3a   : > { %13098 = vmatpush3.msra.mxu1 %v12140_v59  ;;  %v12827_v59 = vld [vmem:[#allocation2 + $0x2f8] sm:$0xff]  }
 0xb3b   : > { %13099 = vmatprep.subr.mxu1 %v12169_v43  ;;  %v12819_v43 = vld [vmem:[#allocation2 + $0x2b8] sm:$0xff]  }
 0xb3c   : > { %13100 = vmatpush3.msra.mxu1 %v12137_v28 }
 0xb3d   : > { %13101 = vmatprep.subr.mxu1 %v12168_v35  ;;  %v12253_v35 = vunpack.c.h.bf16 %v12827_v59 }
 0xb3e   : > { %13102 = vmatpush3.msra.mxu1 %v12136_v5  ;;  %v12221_v5 = vunpack.c.h.bf16 %v12819_v43 }
 0xb3f   : > { %13103 = vmatprep.subr.mxu1 %v12165_v42  ;;  %v12826_v42 = vld [vmem:[#allocation2 + $0x2f0] sm:$0xff]  }
 0xb40   : > { %13104 = vmatpush3.msra.mxu1 %v12133_v24  ;;  %v12252_v24 = vunpack.c.l.bf16 %v12827_v59  ;;  %v12816_v59 = vld [vmem:[#allocation2 + $0x2a0] sm:$0xff]  }
 0xb41   : > { %13105 = vmatprep.subr.mxu1 %v12164_v27  ;;  %v12249_v27 = vunpack.c.h.bf16 %v12826_v42 }
 0xb42   : > { %13106 = vmatpush3.msra.mxu1 %v12132_v39  ;;  %v12825_v39 = vld [vmem:[#allocation2 + $0x2e8] sm:$0xff]  }
 0xb43   : > { %13107 = vmatprep.subr.mxu1 %v12161_v33  ;;  %v12248_v33 = vunpack.c.l.bf16 %v12826_v42  ;;  %v12208_v42 = vunpack.c.l.bf16 %v12816_v59 }
 0xb44   : > { %13108 = vmatpush3.msra.mxu1 %v12129_v57  ;;  %v12817_v57 = vld [vmem:[#allocation2 + $0x2a8] sm:$0xff]  }
 0xb45   : > { %13109 = vmatprep.subr.mxu1 %v12160_v63  ;;  %v12216_v63 = vunpack.c.l.bf16 %v12818_v45  ;;  %v12213_v19 = vunpack.c.h.bf16 %v12817_v57 }
 0xb46   : > { %13110 = vmatpush3.msra.mxu1 %v12128_v60  ;;  %v12245_v60 = vunpack.c.h.bf16 %v12825_v39 }
 0xb47   : > { %4042 = vmatmul.mubr.f32.vlgmr.msra.gmra.mxu1 %v17947_v10 }
 0xbe7   : > { %v13624_v47 = vpop.f32.mrf.mxu1 }
 0xbe8   : > { %v18004_v54 = vadd.f32 %v13624_v47, %v17989_v51  ;;  %v12220_v51 = vunpack.c.l.bf16 %v12819_v43  ;;  %v12824_v47 = vld [vmem:[#allocation2 + $0x2e0] sm:$0xff]   ;;  %v12212_v43 = vunpack.c.l.bf16 %v12817_v57 }
 0xbe9   : > { %v18006_v15 = vpop.f32.mrf.mxu1 }
 0xc07   : > { %v13111_v3 = vpop.f32.mrf.mxu1 }
 0xc09   : > { %v13112_v28 = vpop.f32.mrf.mxu1 }
 0xc0a   : > { %v13113_v18 = vadd.f32 %v13112_v28, %v13111_v3  ;;  %v12244_v3 = vunpack.c.l.bf16 %v12825_v39  ;;  %v12241_v28 = vunpack.c.h.bf16 %v12824_v47 }
 0xc0c   : > { %13625 = vmatprep.subr.mxu0 %v13113_v18 }
 0xc0d   : > { %13626 = vmatpush3.msra.mxu0 %v13113_v18  ;;  %v12209_v18 = vunpack.c.h.bf16 %v12816_v59 }
 0xc0e   : > { %13628 = vmatmul.mubr.msk.f32.vlgmr.msra.gmra.mxu0 %vm3307_vm2, %v11572_v11  ;;  %13117 = vmatprep.subr.mxu0 %v12253_v35  ;;  %v12823_v35 = vld [vmem:[#allocation2 + $0x2d8] sm:$0xff]   ;;  %v12240_v11 = vunpack.c.l.bf16 %v12824_v47 }
 0xc0f   : > { %13118 = vmatpush3.msra.mxu0 %v12221_v5  ;;  %4262 = vmatprep.mubr.f32.mxu0 %v17945_v23  ;;  %v12815_v5 = vld [vmem:[#allocation2 + $0x298] sm:$0xff]  }
 0xc10   : > { %13119 = vmatprep.subr.mxu0 %v12252_v24  ;;  %v12237_v24 = vunpack.c.h.bf16 %v12823_v35  ;;  %v12205_v45 = vunpack.c.h.bf16 %v12815_v5  ;;  %v12204_v39 = vunpack.c.l.bf16 %v12815_v5 }
 0xc11   : > { %13120 = vmatpush3.msra.mxu0 %v12220_v51  ;;  %v12822_v51 = vld [vmem:[#allocation2 + $0x2d0] sm:$0xff]  }
 0xc12   : > { %13121 = vmatprep.subr.mxu0 %v12249_v27  ;;  %v12236_v27 = vunpack.c.l.bf16 %v12823_v35 }
 0xc13   : > { %13122 = vmatpush3.msra.mxu0 %v12217_v21  ;;  %v12814_v21 = vld [vmem:[#allocation2 + $0x290] sm:$0xff]  }
 0xc14   : > { %13123 = vmatprep.subr.mxu0 %v12248_v33  ;;  %v12233_v33 = vunpack.c.h.bf16 %v12822_v51  ;;  %v12201_v57 = vunpack.c.h.bf16 %v12814_v21  ;;  %v12200_v47 = vunpack.c.l.bf16 %v12814_v21 }
 0xc15   : > { %13124 = vmatpush3.msra.mxu0 %v12216_v63  ;;  %v12821_v63 = vld [vmem:[#allocation2 + $0x2c8] sm:$0xff]  }
 0xc16   : > { %13125 = vmatprep.subr.mxu0 %v12245_v60  ;;  %v12232_v60 = vunpack.c.l.bf16 %v12822_v51 }
 0xc17   : > { %13126 = vmatpush3.msra.mxu0 %v12213_v19  ;;  %v12813_v19 = vld [vmem:[#allocation2 + $0x288] sm:$0xff]  }
 0xc18   : > { %13127 = vmatprep.subr.mxu0 %v12244_v3  ;;  %v12229_v3 = vunpack.c.h.bf16 %v12821_v63  ;;  %v12197_v59 = vunpack.c.h.bf16 %v12813_v19  ;;  %v12196_v35 = vunpack.c.l.bf16 %v12813_v19 }
 0xc19   : > { %13128 = vmatpush3.msra.mxu0 %v12212_v43  ;;  %v12820_v43 = vld [vmem:[#allocation2 + $0x2c0] sm:$0xff]  }
 0xc1a   : > { %13129 = vmatprep.subr.mxu0 %v12241_v28  ;;  %v12228_v28 = vunpack.c.l.bf16 %v12821_v63 }
 0xc1b   : > { %13130 = vmatpush3.msra.mxu0 %v12209_v18  ;;  %v12191_v18 = vld [vmem:[#allocation2 + $0x280] sm:$0xff]  }
 0xc1c   : > { %13131 = vmatprep.subr.mxu0 %v12240_v11  ;;  %v12225_v11 = vunpack.c.h.bf16 %v12820_v43  ;;  %v12193_v5 = vunpack.c.h.bf16 %v12191_v18 }
 0xc1d   : > { %13132 = vmatpush3.msra.mxu0 %v12208_v42  ;;  %v12224_v42 = vunpack.c.l.bf16 %v12820_v43 }
 0xc1e   : > { %13133 = vmatprep.subr.mxu0 %v12237_v24  ;;  %v12192_v24 = vunpack.c.l.bf16 %v12191_v18 }
 0xc1f   : > { %13134 = vmatpush3.msra.mxu0 %v12205_v45  ;;  %v11575_v45 = vld [vmem:[%s20265_s9 + $0x50] sm:$0xff] }
 0xc20   : > { %13135 = vmatprep.subr.mxu0 %v12236_v27  ;;  %13632 = vmatprep.mubr.msk.f32.mxu1 %vm3307_vm2, %v11575_v45 }
 0xc21   : > { %13136 = vmatpush3.msra.mxu0 %v12204_v39 }
 0xc22   : > { %13137 = vmatprep.subr.mxu0 %v12233_v33  ;;  %v12842_v33 = vld [vmem:[#allocation2 + $0x378] sm:$0xff]  }
 0xc23   : > { %13138 = vmatpush3.msra.mxu0 %v12201_v57  ;;  %v12834_v57 = vld [vmem:[#allocation2 + $0x338] sm:$0xff]   ;;  %v12317_v19 = vunpack.c.h.bf16 %v12842_v33  ;;  %v12316_v43 = vunpack.c.l.bf16 %v12842_v33 }
 0xc24   : > { %13139 = vmatprep.subr.mxu0 %v12232_v60 }
 0xc25   : > { %13140 = vmatpush3.msra.mxu0 %v12200_v47  ;;  %v11576_v47 = vld [vmem:[%s20265_s9 + $0x58] sm:$0xff] }
 0xc26   : > { %13141 = vmatprep.subr.mxu0 %v12229_v3  ;;  %v12285_v3 = vunpack.c.h.bf16 %v12834_v57 }
 0xc27   : > { %13142 = vmatpush3.msra.mxu0 %v12197_v59  ;;  %v12841_v59 = vld [vmem:[#allocation2 + $0x370] sm:$0xff]  }
 0xc28   : > { %13143 = vmatprep.subr.mxu0 %v12228_v28  ;;  %v12833_v28 = vld [vmem:[#allocation2 + $0x330] sm:$0xff]   ;;  %v12313_v18 = vunpack.c.h.bf16 %v12841_v59 }
 0xc29   : > { %13144 = vmatpush3.msra.mxu0 %v12196_v35  ;;  %v12281_v35 = vunpack.c.h.bf16 %v12833_v28 }
 0xc2a   : > { %13145 = vmatprep.subr.mxu0 %v12225_v11  ;;  %v12840_v11 = vld [vmem:[#allocation2 + $0x368] sm:$0xff]  }
 0xc2b   : > { %13146 = vmatpush3.msra.mxu0 %v12193_v5  ;;  %v12312_v5 = vunpack.c.l.bf16 %v12841_v59  ;;  %v12309_v45 = vunpack.c.h.bf16 %v12840_v11  ;;  %v12308_v33 = vunpack.c.l.bf16 %v12840_v11  ;;  %v12830_v59 = vld [vmem:[#allocation2 + $0x318] sm:$0xff]   ;;  %v12829_v11 = vld [vmem:[#allocation2 + $0x310] sm:$0xff]  }
 0xc2c   : > { %13147 = vmatprep.subr.mxu0 %v12224_v42  ;;  %v12832_v42 = vld [vmem:[#allocation2 + $0x328] sm:$0xff]  }
 0xc2d   : > { %13148 = vmatpush3.msra.mxu0 %v12192_v24  ;;  %v12280_v24 = vunpack.c.l.bf16 %v12833_v28 }
 0xc2e   : > { %4263 = vmatmul.mubr.f32.vlgmr.msra.gmra.mxu0 %v17947_v10 }
 0xcce   : > { %v13629_v51 = vpop.f32.mrf.mxu0 }
 0xccf   : > { %v18019_v27 = vadd.f32 %v13629_v51, %v18004_v54  ;;  %v12284_v54 = vunpack.c.l.bf16 %v12834_v57  ;;  %v12277_v51 = vunpack.c.h.bf16 %v12832_v42  ;;  %v12831_v57 = vld [vmem:[#allocation2 + $0x320] sm:$0xff]  }
 0xcd0   : > { %v18021_v21 = vpop.f32.mrf.mxu0 }
 0xcee   : > { %v13149_v39 = vpop.f32.mrf.mxu0 }
 0xcf0   : > { %v13150_v63 = vpop.f32.mrf.mxu0 }
 0xcf1   : > { %v13151_v60 = vadd.f32 %v13150_v63, %v13149_v39  ;;  %v12839_v39 = vld [vmem:[#allocation2 + $0x360] sm:$0xff]   ;;  %v12276_v63 = vunpack.c.l.bf16 %v12832_v42 }
 0xcf3   : > { %13630 = vmatprep.subr.mxu1 %v13151_v60 }
 0xcf4   : > { %13631 = vmatpush3.msra.mxu1 %v13151_v60  ;;  %v12305_v60 = vunpack.c.h.bf16 %v12839_v39 }
 0xcf5   : > { %13633 = vmatmul.mubr.msk.f32.vlgmr.msra.gmra.mxu1 %vm3307_vm2, %v11576_v47  ;;  %13155 = vmatprep.subr.mxu1 %v12317_v19  ;;  %v12273_v19 = vunpack.c.h.bf16 %v12831_v57  ;;  %v12838_v47 = vld [vmem:[#allocation2 + $0x358] sm:$0xff]  }
 0xcf6   : > { %13156 = vmatpush3.msra.mxu1 %v12285_v3  ;;  %4483 = vmatprep.mubr.f32.mxu1 %v17945_v23  ;;  %v12304_v3 = vunpack.c.l.bf16 %v12839_v39  ;;  %v12301_v28 = vunpack.c.h.bf16 %v12838_v47  ;;  %v12828_v39 = vld [vmem:[#allocation2 + $0x308] sm:$0xff]  }
 0xcf7   : > { %13157 = vmatprep.subr.mxu1 %v12316_v43  ;;  %v12272_v43 = vunpack.c.l.bf16 %v12831_v57 }
 0xcf8   : > { %13158 = vmatpush3.msra.mxu1 %v12284_v54  ;;  %v12269_v54 = vunpack.c.h.bf16 %v12830_v59 }
 0xcf9   : > { %13159 = vmatprep.subr.mxu1 %v12313_v18  ;;  %v12837_v18 = vld [vmem:[#allocation2 + $0x350] sm:$0xff]  }
 0xcfa   : > { %13160 = vmatpush3.msra.mxu1 %v12281_v35  ;;  %v12300_v35 = vunpack.c.l.bf16 %v12838_v47  ;;  %v12297_v42 = vunpack.c.h.bf16 %v12837_v18  ;;  %v12255_v47 = vld [vmem:[#allocation2 + $0x300] sm:$0xff]  }
 0xcfb   : > { %13161 = vmatprep.subr.mxu1 %v12312_v5  ;;  %v12268_v5 = vunpack.c.l.bf16 %v12830_v59 }
 0xcfc   : > { %13162 = vmatpush3.msra.mxu1 %v12280_v24  ;;  %v12265_v24 = vunpack.c.h.bf16 %v12829_v11 }
 0xcfd   : > { %13163 = vmatprep.subr.mxu1 %v12309_v45  ;;  %v12836_v45 = vld [vmem:[#allocation2 + $0x348] sm:$0xff]  }
 0xcfe   : > { %13164 = vmatpush3.msra.mxu1 %v12277_v51  ;;  %v12296_v51 = vunpack.c.l.bf16 %v12837_v18  ;;  %v12293_v57 = vunpack.c.h.bf16 %v12836_v45  ;;  %v11579_v18 = vld [vmem:[%s20265_s9 + $0x60] sm:$0xff] }
 0xcff   : > { %13165 = vmatprep.subr.mxu1 %v12308_v33  ;;  %v12264_v33 = vunpack.c.l.bf16 %v12829_v11  ;;  %13637 = vmatprep.mubr.msk.f32.mxu0 %vm3307_vm2, %v11579_v18 }
 0xd00   : > { %13166 = vmatpush3.msra.mxu1 %v12276_v63  ;;  %v12261_v63 = vunpack.c.h.bf16 %v12828_v39 }
 0xd01   : > { %13167 = vmatprep.subr.mxu1 %v12305_v60  ;;  %v12835_v60 = vld [vmem:[#allocation2 + $0x340] sm:$0xff]  }
 0xd02   : > { %13168 = vmatpush3.msra.mxu1 %v12273_v19  ;;  %v12292_v19 = vunpack.c.l.bf16 %v12836_v45  ;;  %v12289_v59 = vunpack.c.h.bf16 %v12835_v60  ;;  %v12849_v45 = vld [vmem:[#allocation2 + $0x3b8] sm:$0xff]  }
 0xd03   : > { %13169 = vmatprep.subr.mxu1 %v12304_v3  ;;  %v12260_v3 = vunpack.c.l.bf16 %v12828_v39 }
 0xd04   : > { %13170 = vmatpush3.msra.mxu1 %v12272_v43  ;;  %v12257_v43 = vunpack.c.h.bf16 %v12255_v47 }
 0xd05   : > { %13171 = vmatprep.subr.mxu1 %v12301_v28  ;;  %v12288_v28 = vunpack.c.l.bf16 %v12835_v60  ;;  %v12856_v60 = vld [vmem:[#allocation2 + $0x3f0] sm:$0xff]  }
 0xd06   : > { %13172 = vmatpush3.msra.mxu1 %v12269_v54  ;;  %v12256_v54 = vunpack.c.l.bf16 %v12255_v47  ;;  %v12848_v47 = vld [vmem:[#allocation2 + $0x3b0] sm:$0xff]  }
 0xd07   : > { %13173 = vmatprep.subr.mxu1 %v12300_v35  ;;  %v12344_v18 = vunpack.c.l.bf16 %v12848_v47 }
 0xd08   : > { %13174 = vmatpush3.msra.mxu1 %v12268_v5 }
 0xd09   : > { %13175 = vmatprep.subr.mxu1 %v12297_v42 }
 0xd0a   : > { %13176 = vmatpush3.msra.mxu1 %v12265_v24  ;;  %v12857_v24 = vld [vmem:[#allocation2 + $0x3f8] sm:$0xff]  }
 0xd0b   : > { %13177 = vmatprep.subr.mxu1 %v12296_v51 }
 0xd0c   : > { %13178 = vmatpush3.msra.mxu1 %v12264_v33  ;;  %v12381_v33 = vunpack.c.h.bf16 %v12857_v24 }
 0xd0d   : > { %13179 = vmatprep.subr.mxu1 %v12293_v57  ;;  %v11580_v57 = vld [vmem:[%s20265_s9 + $0x68] sm:$0xff] }
 0xd0e   : > { %13180 = vmatpush3.msra.mxu1 %v12261_v63  ;;  %v12349_v63 = vunpack.c.h.bf16 %v12849_v45 }
 0xd0f   : > { %13181 = vmatprep.subr.mxu1 %v12292_v19  ;;  %v12380_v19 = vunpack.c.l.bf16 %v12857_v24  ;;  %v12854_v24 = vld [vmem:[#allocation2 + $0x3e0] sm:$0xff]  }
 0xd10   : > { %13182 = vmatpush3.msra.mxu1 %v12260_v3  ;;  %v12377_v3 = vunpack.c.h.bf16 %v12856_v60 }
 0xd11   : > { %13183 = vmatprep.subr.mxu1 %v12289_v59  ;;  %v12345_v59 = vunpack.c.h.bf16 %v12848_v47 }
 0xd12   : > { %13184 = vmatpush3.msra.mxu1 %v12257_v43  ;;  %v12855_v43 = vld [vmem:[#allocation2 + $0x3e8] sm:$0xff]  }
 0xd13   : > { %13185 = vmatprep.subr.mxu1 %v12288_v28  ;;  %v12376_v28 = vunpack.c.l.bf16 %v12856_v60  ;;  %v12368_v60 = vunpack.c.l.bf16 %v12854_v24 }
 0xd14   : > { %13186 = vmatpush3.msra.mxu1 %v12256_v54  ;;  %v12847_v54 = vld [vmem:[#allocation2 + $0x3a8] sm:$0xff]  }
 0xd15   : > { %4484 = vmatmul.mubr.f32.vlgmr.msra.gmra.mxu1 %v17947_v10 }
 0xdb5   : > { %v13634_v35 = vpop.f32.mrf.mxu1 }
 0xdb6   : > { %v18034_v11 = vadd.f32 %v13634_v35, %v18019_v27  ;;  %v12348_v27 = vunpack.c.l.bf16 %v12849_v45  ;;  %v12373_v35 = vunpack.c.h.bf16 %v12855_v43  ;;  %v12372_v45 = vunpack.c.l.bf16 %v12855_v43 }
 0xdb7   : > { %v18036_v5 = vpop.f32.mrf.mxu1 }
 0xdd5   : > { %v13187_v42 = vpop.f32.mrf.mxu1 }
 0xdd7   : > { %v13188_v51 = vpop.f32.mrf.mxu1 }
 0xdd8   : > { %v13189_v39 = vadd.f32 %v13188_v51, %v13187_v42  ;;  %v12341_v42 = vunpack.c.h.bf16 %v12847_v54  ;;  %v12846_v51 = vld [vmem:[#allocation2 + $0x3a0] sm:$0xff]  }
 0xdd9   : > { %v12336_v47 = vunpack.c.l.bf16 %v12846_v51 }
 0xdda   : > { %13635 = vmatprep.subr.mxu0 %v13189_v39 }
 0xddb   : > { %13636 = vmatpush3.msra.mxu0 %v13189_v39  ;;  %v12340_v39 = vunpack.c.l.bf16 %v12847_v54 }
 0xddc   : > { %13638 = vmatmul.mubr.msk.f32.vlgmr.msra.gmra.mxu0 %vm3307_vm2, %v11580_v57  ;;  %13193 = vmatprep.subr.mxu0 %v12381_v33  ;;  %v12369_v33 = vunpack.c.h.bf16 %v12854_v24  ;;  %v12337_v57 = vunpack.c.h.bf16 %v12846_v51 }
 0xddd   : > { %13194 = vmatpush3.msra.mxu0 %v12349_v63  ;;  %4704 = vmatprep.mubr.f32.mxu0 %v17945_v23  ;;  %v12853_v63 = vld [vmem:[#allocation2 + $0x3d8] sm:$0xff]  }
 0xdde   : > { %13195 = vmatprep.subr.mxu0 %v12380_v19  ;;  %v12845_v19 = vld [vmem:[#allocation2 + $0x398] sm:$0xff]   ;;  %v12364_v43 = vunpack.c.l.bf16 %v12853_v63 }
 0xddf   : > { %13196 = vmatpush3.msra.mxu0 %v12348_v27  ;;  %v12365_v27 = vunpack.c.h.bf16 %v12853_v63  ;;  %v12332_v54 = vunpack.c.l.bf16 %v12845_v19 }
 0xde0   : > { %13197 = vmatprep.subr.mxu0 %v12377_v3  ;;  %v12333_v3 = vunpack.c.h.bf16 %v12845_v19 }
 0xde1   : > { %13198 = vmatpush3.msra.mxu0 %v12345_v59  ;;  %v12852_v59 = vld [vmem:[#allocation2 + $0x3d0] sm:$0xff]  }
 0xde2   : > { %13199 = vmatprep.subr.mxu0 %v12376_v28  ;;  %v12844_v28 = vld [vmem:[#allocation2 + $0x390] sm:$0xff]   ;;  %v12360_v24 = vunpack.c.l.bf16 %v12852_v59 }
 0xde3   : > { %13200 = vmatpush3.msra.mxu0 %v12344_v18  ;;  %v12361_v18 = vunpack.c.h.bf16 %v12852_v59  ;;  %v12328_v51 = vunpack.c.l.bf16 %v12844_v28 }
 0xde4   : > { %13201 = vmatprep.subr.mxu0 %v12373_v35  ;;  %v12329_v35 = vunpack.c.h.bf16 %v12844_v28 }
 0xde5   : > { %13202 = vmatpush3.msra.mxu0 %v12341_v42  ;;  %v12851_v42 = vld [vmem:[#allocation2 + $0x3c8] sm:$0xff]  }
 0xde6   : > { %13203 = vmatprep.subr.mxu0 %v12372_v45  ;;  %v12843_v45 = vld [vmem:[#allocation2 + $0x388] sm:$0xff]   ;;  %v12356_v63 = vunpack.c.l.bf16 %v12851_v42 }
 0xde7   : > { %13204 = vmatpush3.msra.mxu0 %v12340_v39  ;;  %v12357_v39 = vunpack.c.h.bf16 %v12851_v42  ;;  %v12324_v19 = vunpack.c.l.bf16 %v12843_v45  ;;  %v12872_v42 = vld [vmem:[#allocation2 + $0x478] sm:$0xff]  }
 0xde8   : > { %13205 = vmatprep.subr.mxu0 %v12369_v33  ;;  %v12325_v33 = vunpack.c.h.bf16 %v12843_v45 }
 0xde9   : > { %13206 = vmatpush3.msra.mxu0 %v12337_v57  ;;  %v12850_v57 = vld [vmem:[#allocation2 + $0x3c0] sm:$0xff]  }
 0xdea   : > { %13207 = vmatprep.subr.mxu0 %v12368_v60  ;;  %v12319_v60 = vld [vmem:[#allocation2 + $0x380] sm:$0xff]  }
 0xdeb   : > { %13208 = vmatpush3.msra.mxu0 %v12336_v47  ;;  %v12353_v47 = vunpack.c.h.bf16 %v12850_v57  ;;  %v12320_v59 = vunpack.c.l.bf16 %v12319_v60 }
 0xdec   : > { %13209 = vmatprep.subr.mxu0 %v12365_v27  ;;  %v12321_v27 = vunpack.c.h.bf16 %v12319_v60  ;;  %v12444_v60 = vunpack.c.l.bf16 %v12872_v42 }
 0xded   : > { %13210 = vmatpush3.msra.mxu0 %v12333_v3  ;;  %v12352_v3 = vunpack.c.l.bf16 %v12850_v57 }
 0xdee   : > { %13211 = vmatprep.subr.mxu0 %v12364_v43  ;;  %v11583_v43 = vld [vmem:[%s20265_s9 + $0x70] sm:$0xff] }
 0xdef   : > { %13212 = vmatpush3.msra.mxu0 %v12332_v54  ;;  %13642 = vmatprep.mubr.msk.f32.mxu1 %vm3307_vm2, %v11583_v43  ;;  %v12862_v43 = vld [vmem:[#allocation2 + $0x428] sm:$0xff]  }
 0xdf0   : > { %13213 = vmatprep.subr.mxu0 %v12361_v18 }
 0xdf1   : > { %13214 = vmatpush3.msra.mxu0 %v12329_v35 }
 0xdf2   : > { %13215 = vmatprep.subr.mxu0 %v12360_v24  ;;  %v12864_v24 = vld [vmem:[#allocation2 + $0x438] sm:$0xff]  }
 0xdf3   : > { %13216 = vmatpush3.msra.mxu0 %v12328_v51  ;;  %v12413_v57 = vunpack.c.h.bf16 %v12864_v24 }
 0xdf4   : > { %13217 = vmatprep.subr.mxu0 %v12357_v39  ;;  %v12445_v39 = vunpack.c.h.bf16 %v12872_v42  ;;  %v12405_v42 = vunpack.c.h.bf16 %v12862_v43 }
 0xdf5   : > { %13218 = vmatpush3.msra.mxu0 %v12325_v33  ;;  %v11584_v33 = vld [vmem:[%s20265_s9 + $0x78] sm:$0xff] }
 0xdf6   : > { %13219 = vmatprep.subr.mxu0 %v12356_v63  ;;  %v12871_v63 = vld [vmem:[#allocation2 + $0x470] sm:$0xff]  }
 0xdf7   : > { %13220 = vmatpush3.msra.mxu0 %v12324_v19  ;;  %v12863_v19 = vld [vmem:[#allocation2 + $0x430] sm:$0xff]  }
 0xdf8   : > { %13221 = vmatprep.subr.mxu0 %v12353_v47  ;;  %v12441_v47 = vunpack.c.h.bf16 %v12871_v63 }
 0xdf9   : > { %13222 = vmatpush3.msra.mxu0 %v12321_v27  ;;  %v12409_v27 = vunpack.c.h.bf16 %v12863_v19 }
 0xdfa   : > { %13223 = vmatprep.subr.mxu0 %v12352_v3  ;;  %v12870_v3 = vld [vmem:[#allocation2 + $0x468] sm:$0xff]  }
 0xdfb   : > { %13224 = vmatpush3.msra.mxu0 %v12320_v59  ;;  %v12440_v59 = vunpack.c.l.bf16 %v12871_v63 }
 0xdfc   : > { %4705 = vmatmul.mubr.f32.vlgmr.msra.gmra.mxu0 %v17947_v10 }
 0xe9c   : > { %v13639_v28 = vpop.f32.mrf.mxu0 }
 0xe9d   : > { %v18049_v54 = vadd.f32 %v13639_v28, %v18034_v11  ;;  %v12412_v11 = vunpack.c.l.bf16 %v12864_v24  ;;  %v12408_v28 = vunpack.c.l.bf16 %v12863_v19  ;;  %v12436_v24 = vunpack.c.l.bf16 %v12870_v3 }
 0xe9e   : > { %v18051_v18 = vpop.f32.mrf.mxu0 }
 0xebc   : > { %v13225_v35 = vpop.f32.mrf.mxu0 }
 0xebe   : > { %v13226_v45 = vpop.f32.mrf.mxu0 }
 0xebf   : > { %v13227_v51 = vadd.f32 %v13226_v45, %v13225_v35  ;;  %v12437_v35 = vunpack.c.h.bf16 %v12870_v3  ;;  %v12869_v45 = vld [vmem:[#allocation2 + $0x460] sm:$0xff]   ;;  %v12428_v3 = vunpack.c.l.bf16 %v12868_v9 }
 0xec0   : > { %v12432_v63 = vunpack.c.l.bf16 %v12869_v45 }
 0xec1   : > { %13640 = vmatprep.subr.mxu1 %v13227_v51 }
 0xec2   : > { %13641 = vmatpush3.msra.mxu1 %v13227_v51  ;;  %v12861_v51 = vld [vmem:[#allocation2 + $0x420] sm:$0xff]  }
 0xec3   : > { %13643 = vmatmul.mubr.msk.f32.vlgmr.msra.gmra.mxu1 %vm3307_vm2, %v11584_v33  ;;  %13231 = vmatprep.subr.mxu1 %v12445_v39  ;;  %v12404_v39 = vunpack.c.l.bf16 %v12862_v43  ;;  %v12433_v33 = vunpack.c.h.bf16 %v12869_v45  ;;  %v12400_v19 = vunpack.c.l.bf16 %v12861_v51 }
 0xec4   : > { %13232 = vmatpush3.msra.mxu1 %v12413_v57  ;;  %4925 = vmatprep.mubr.f32.mxu1 %v17945_v23  ;;  %v12401_v57 = vunpack.c.h.bf16 %v12861_v51 }
 0xec5   : > { %13233 = vmatprep.subr.mxu1 %v12444_v60  ;;  %v12860_v60 = vld [vmem:[#allocation2 + $0x418] sm:$0xff]  }
 0xec6   : > { %13234 = vmatpush3.msra.mxu1 %v12412_v11  ;;  %v12429_v11 = vunpack.c.h.bf16 %v12868_v9  ;;  %v12396_v43 = vunpack.c.l.bf16 %v12860_v60 }
 0xec7   : > { %13235 = vmatprep.subr.mxu1 %v12441_v47  ;;  %v12397_v47 = vunpack.c.h.bf16 %v12860_v60 }
 0xec8   : > { %13236 = vmatpush3.msra.mxu1 %v12409_v27  ;;  %v12867_v27 = vld [vmem:[#allocation2 + $0x450] sm:$0xff]  }
 0xec9   : > { %13237 = vmatprep.subr.mxu1 %v12440_v59  ;;  %v12859_v59 = vld [vmem:[#allocation2 + $0x410] sm:$0xff]   ;;  %v12424_v45 = vunpack.c.l.bf16 %v12867_v27 }
 0xeca   : > { %13238 = vmatpush3.msra.mxu1 %v12408_v28  ;;  %v12425_v28 = vunpack.c.h.bf16 %v12867_v27  ;;  %v12392_v51 = vunpack.c.l.bf16 %v12859_v59 }
 0xecb   : > { %13239 = vmatprep.subr.mxu1 %v12437_v35  ;;  %v12393_v35 = vunpack.c.h.bf16 %v12859_v59  ;;  %v5018_v59 = vld [vmem:[%s20266_s10 + $0x8] sm:$0xff] }
 0xecc   : > { %13240 = vmatpush3.msra.mxu1 %v12405_v42  ;;  %v12866_v42 = vld [vmem:[#allocation2 + $0x448] sm:$0xff]   ;;  %5026 = vperm.xlu1 %14299, %v5018_v59  }
 0xecd   : > { %13241 = vmatprep.subr.mxu1 %v12436_v24  ;;  %v12858_v24 = vld [vmem:[#allocation2 + $0x408] sm:$0xff]   ;;  %v12420_v9 = vunpack.c.l.bf16 %v12866_v42 }
 0xece   : > { %13242 = vmatpush3.msra.mxu1 %v12404_v39  ;;  %v12421_v39 = vunpack.c.h.bf16 %v12866_v42  ;;  %v12388_v60 = vunpack.c.l.bf16 %v12858_v24  ;;  %v6851_v42 = vld [vmem:[%s20270_s14 + $0x10] sm:$0xff] }
 0xecf   : > { %13243 = vmatprep.subr.mxu1 %v12433_v33  ;;  %v12389_v33 = vunpack.c.h.bf16 %v12858_v24  ;;  %v8948_v24 = vld [vmem:[%s20272_s16 + $0x10] sm:$0xff] }
 0xed0   : > { %13244 = vmatpush3.msra.mxu1 %v12401_v57  ;;  %v12865_v57 = vld [vmem:[#allocation2 + $0x440] sm:$0xff]  }
 0xed1   : > { %13245 = vmatprep.subr.mxu1 %v12432_v63  ;;  %v12383_v63 = vld [vmem:[#allocation2 + $0x400] sm:$0xff]  }
 0xed2   : > { %13246 = vmatpush3.msra.mxu1 %v12400_v19  ;;  %v12417_v19 = vunpack.c.h.bf16 %v12865_v57  ;;  %v12384_v27 = vunpack.c.l.bf16 %v12383_v63 }
 0xed3   : > { %13247 = vmatprep.subr.mxu1 %v12429_v11  ;;  %v12385_v11 = vunpack.c.h.bf16 %v12383_v63  ;;  %v12874_v63 = vld [vmem:[#allocation6 + $0x10] sm:$0xff]  }
 0xed4   : > { %13248 = vmatpush3.msra.mxu1 %v12397_v47  ;;  %v12416_v47 = vunpack.c.l.bf16 %v12865_v57 }
 0xed5   : > { %13249 = vmatprep.subr.mxu1 %v12428_v3  ;;  %v11587_v3 = vld [vmem:[%s20265_s9 + $0x80] sm:$0xff] }
 0xed6   : > { %13250 = vmatpush3.msra.mxu1 %v12396_v43  ;;  %13647 = vmatprep.mubr.msk.f32.mxu0 %vm3307_vm2, %v11587_v3  ;;  %v6813_v43 = vld [vmem:[%s20268_s12] sm:$0xff] }
 0xed7   : > { %13251 = vmatprep.subr.mxu1 %v12425_v28  ;;  %6819 = vperm.xlu1 %14299, %v6813_v43   ;;  %v6815_v28 = vld [vmem:[%s20268_s12 + $0x10] sm:$0xff] }
 0xed8   : > { %13252 = vmatpush3.msra.mxu1 %v12393_v35  ;;  %v6849_v35 = vld [vmem:[%s20270_s14] sm:$0xff] }
 0xed9   : > { %13253 = vmatprep.subr.mxu1 %v12424_v45  ;;  %v8946_v45 = vld [vmem:[%s20272_s16] sm:$0xff] }
 0xeda   : > { %13254 = vmatpush3.msra.mxu1 %v12392_v51  ;;  %v8982_v51 = vld [vmem:[%s20274_s18] sm:$0xff] }
 0xedb   : > { %13255 = vmatprep.subr.mxu1 %v12421_v39  ;;  %6829 = vperm.xlu1 %14299, %v6815_v28   ;;  %v12875_v39 = vld [vmem:[#allocation6 + $0x18] sm:$0xff]  }
 0xedc   : > { %13256 = vmatpush3.msra.mxu1 %v12389_v33  ;;  %v12461_v33 = vunpack.c.h.bf16 %v12875_v39  ;;  %v12460_v57 = vunpack.c.l.bf16 %v12875_v39  ;;  %v12878_v28 = vld [vmem:[#allocation6 + $0x38] sm:$0xff]  }
 0xedd   : > { %13257 = vmatprep.subr.mxu1 %v12420_v9  ;;  %v8984_v9 = vld [vmem:[%s20274_s18 + $0x10] sm:$0xff]  ;;  %v12476_v39 = vunpack.c.l.bf16 %v12878_v28 }
 0xede   : > { %13258 = vmatpush3.msra.mxu1 %v12388_v60  ;;  %v12457_v60 = vunpack.c.h.bf16 %v12874_v63 }
 0xedf   : > { %13259 = vmatprep.subr.mxu1 %v12417_v19  ;;  %6855 = vperm.xlu1 %14299, %v6849_v35   ;;  %v11045_v19 = vld [vmem:[%s20276_s20 + $0x18] sm:$0xff] }
 0xee0   : > { %13260 = vmatpush3.msra.mxu1 %v12385_v11  ;;  %v11043_v11 = vld [vmem:[%s20276_s20 + $0x8] sm:$0xff] }
 0xee1   : > { %13261 = vmatprep.subr.mxu1 %v12416_v47  ;;  %v11083_v47 = vld [vmem:[%s20278_s22] sm:$0x1f] }
 0xee2   : > { %13262 = vmatpush3.msra.mxu1 %v12384_v27 }
 0xee3   : > { %4926 = vmatmul.mubr.f32.vlgmr.msra.gmra.mxu1 %v17947_v10  ;;  %6865 = vperm.xlu1 %14299, %v6851_v42  }
 0xee4   : > { %13650 = vmatprep.subr.mxu1 %v12461_v33 }
 0xee5   : > { %13651 = vmatpush3.msra.mxu1 %v12461_v33 }
 0xee6   : > { %13652 = vmatprep.subr.mxu1 %v12460_v57 }
 0xee7   : > { %8952 = vperm.xlu1 %14299, %v8946_v45   ;;  %13653 = vmatpush3.msra.mxu1 %v12460_v57  ;;  %v12477_v45 = vunpack.c.h.bf16 %v12878_v28  ;;  %v12463_v28 = vld [vmem:[#allocation6 + $0x20] sm:$0xff]  }
 0xee8   : > { %13654 = vmatprep.subr.mxu1 %v12457_v60 }
 0xee9   : > { %13655 = vmatpush3.msra.mxu1 %v12457_v60  ;;  %v12876_v60 = vld [vmem:[#allocation6 + $0x28] sm:$0xff]  }
 0xeeb   : > { %8962 = vperm.xlu1 %14299, %v8948_v24   ;;  %v11588_v24 = vld [vmem:[%s20265_s9 + $0x88] sm:$0xff] }
 0xeef   : > { %8988 = vperm.xlu1 %14299, %v8982_v51   ;;  %v12877_v51 = vld [vmem:[#allocation6 + $0x30] sm:$0xff]  }
 0xef0   : > { %v12473_v33 = vunpack.c.h.bf16 %v12877_v51  ;;  %v12472_v57 = vunpack.c.l.bf16 %v12877_v51 }
 0xef3   : > { %8998 = vperm.xlu1 %14299, %v8984_v9   ;;  %v12873_v9 = vld [vmem:[#allocation6 + $0x8] sm:$0xff]  }
 0xef7   : > { %11063 = vperm.xlu1 %14299, %v11045_v19   ;;  %v12453_v19 = vunpack.c.h.bf16 %v12873_v9 }
 0xefb   : > { %11053 = vperm.xlu1 %14299, %v11043_v11   ;;  %v12469_v11 = vunpack.c.h.bf16 %v12876_v60 }
 0xeff   : > { %11086 = vperm.xlu1 %14299, %v11083_v47   ;;  %v12452_v47 = vunpack.c.l.bf16 %v12873_v9 }
 0xf83   : > { %v13644_v27 = vpop.f32.mrf.mxu1 }
 0xf84   : > { %v4795_v3 = vadd.f32 %v13644_v27, %v18049_v54  ;;  %v12456_v54 = vunpack.c.l.bf16 %v12874_v63  ;;  %v12468_v27 = vunpack.c.l.bf16 %v12876_v60 }
 0xf85   : > { %v4785_v59 = vpop.f32.mrf.mxu1 }
 0xf86   : > { %13656 = vmatprep.subr.mxu1 %v12456_v54 }
 0xf87   : > { %13657 = vmatpush3.msra.mxu1 %v12456_v54 }
 0xf88   : > { %13658 = vmatprep.subr.mxu1 %v12453_v19 }
 0xf89   : > { %13659 = vmatpush3.msra.mxu1 %v12453_v19 }
 0xf8a   : > { %13660 = vmatprep.subr.mxu1 %v12452_v47 }
 0xf8b   : > { %13661 = vmatpush3.msra.mxu1 %v12452_v47  ;;  %v5027_v47 = vpop.permute.xlu1 %5026 }
 0xfa3   : > { %v13263_v43 = vpop.f32.mrf.mxu1 }
 0xfa5   : > { %v13264_v35 = vpop.f32.mrf.mxu1 }
 0xfa6   : > { %v13265_v42 = vadd.f32 %v13264_v35, %v13263_v43  ;;  %v12447_v43 = vld [vmem:[#allocation6] sm:$0xff]   ;;  %v12465_v35 = vunpack.c.h.bf16 %v12463_v28 }
 0xfa7   : > { %v12449_v63 = vunpack.c.h.bf16 %v12447_v43 }
 0xfa8   : > { %13645 = vmatprep.subr.mxu0 %v13265_v42 }
 0xfa9   : > { %13646 = vmatpush3.msra.mxu0 %v13265_v42  ;;  %13662 = vmatprep.subr.mxu1 %v12449_v63  ;;  %v12448_v42 = vunpack.c.l.bf16 %v12447_v43  ;;  %v5022_v43 = vpop.permute.xlu0 %5021 }
 0xfaa   : > { %13648 = vmatmul.mubr.msk.f32.vlgmr.msra.gmra.mxu0 %vm3307_vm2, %v11588_v24  ;;  %13669 = vmatprep.subr.mxu0 %v12477_v45  ;;  %v3462_v24 = vadd.f32 %v17987_v6, %v17985_v36 }
 0xfab   : > { %13670 = vmatpush3.msra.mxu0 %v12477_v45  ;;  %v12464_v45 = vunpack.c.l.bf16 %v12463_v28  ;;  %13663 = vmatpush3.msra.mxu1 %v12449_v63 }
 0xfac   : > { %13671 = vmatprep.subr.mxu0 %v12476_v39  ;;  %13664 = vmatprep.subr.mxu1 %v12448_v42  ;;  %v3689_v51 = vadd.f32 %v17991_v53, %v3462_v24  ;;  %v11595_v53 = vld [vmem:[%s20267_s11 + $0x20] sm:$0xff]  ;;  %v11597_v24 = vld [vmem:[%s20267_s11 + $0x30] sm:$0xff] }
 0xfad   : > { %13672 = vmatpush3.msra.mxu0 %v12476_v39  ;;  %13665 = vmatpush3.msra.mxu1 %v12448_v42  ;;  %v5132_v42 = vld [vmem:[%s20267_s11 + $0x8] sm:$0xff] }
 0xfae   : > { %13673 = vmatprep.subr.mxu0 %v12473_v33  ;;  %v3910_v39 = vadd.f32 %v18006_v15, %v3689_v51  ;;  %v5131_v15 = vld [vmem:[%s20267_s11] sm:$0xff]  ;;  %v12880_v51 = vld [vmem:[#allocation6 + $0x50] sm:$0xff]  }
 0xfaf   : > { %13674 = vmatpush3.msra.mxu0 %v12473_v33 }
 0xfb0   : > { %13675 = vmatprep.subr.mxu0 %v12472_v57  ;;  %v4131_v33 = vadd.f32 %v18021_v21, %v3910_v39  ;;  %v12881_v21 = vld [vmem:[#allocation6 + $0x58] sm:$0xff]  }
 0xfb1   : > { %13676 = vmatpush3.msra.mxu0 %v12472_v57  ;;  %v12492_v39 = vunpack.c.l.bf16 %v12881_v21 }
 0xfb2   : > { %13677 = vmatprep.subr.mxu0 %v12469_v11  ;;  %v4352_v54 = vadd.f32 %v18036_v5, %v4131_v33  ;;  %v5133_v33 = vld [vmem:[%s20267_s11 + $0x10] sm:$0xff] }
 0xfb3   : > { %13678 = vmatpush3.msra.mxu0 %v12469_v11 }
 0xfb4   : > { %13679 = vmatprep.subr.mxu0 %v12468_v27  ;;  %v4573_v57 = vadd.f32 %v18051_v18, %v4352_v54  ;;  %v12489_v54 = vunpack.c.h.bf16 %v12880_v51 }
 0xfb5   : > { %13680 = vmatpush3.msra.mxu0 %v12468_v27 }
 0xfb6   : > { %13681 = vmatprep.subr.mxu0 %v12465_v35  ;;  %v4794_v60 = vadd.f32 %v4785_v59, %v4573_v57  ;;  %v5134_v57 = vld [vmem:[%s20267_s11 + $0x18] sm:$0xff] }
 0xfb7   : > { %13682 = vmatpush3.msra.mxu0 %v12465_v35  ;;  %v11596_v35 = vld [vmem:[%s20267_s11 + $0x28] sm:$0xff] }
 0xfb8   : > { %13683 = vmatprep.subr.mxu0 %v12464_v45 }
 0xfb9   : > { %13684 = vmatpush3.msra.mxu0 %v12464_v45  ;;  %v12493_v45 = vunpack.c.h.bf16 %v12881_v21 }
0x106a   : > { %v13649_v9 = vpop.f32.mrf.mxu0 }
0x106b   : > { %v5016_v19 = vadd.f32 %v13649_v9, %v4795_v3  ;;  %v11598_v9 = vld [vmem:[%s20267_s11 + $0x38] sm:$0xff] }
0x106c   : > { %v5006_v11 = vpop.f32.mrf.mxu0 }
0x106d   : > { %v5015_v27 = vadd.f32 %v5006_v11, %v4794_v60  ;;  %v5030_v28 = vadd.f32 %v5027_v47, %v5016_v19  ;;  %v12879_v60 = vld [vmem:[#allocation6 + $0x48] sm:$0xff]   ;;  %v12488_v19 = vunpack.c.l.bf16 %v12880_v51  ;;  %v12479_v47 = vld [vmem:[#allocation6 + $0x40] sm:$0xff]  }
0x106e   : > { %v12485_v11 = vunpack.c.h.bf16 %v12879_v60 }
0x106f   : > { %v5029_v63 = vadd.f32 %v5022_v43, %v5015_v27  ;;  %v18113_v6 = vmax.f32 %v5030_v28, 0.0  ;;  %v12484_v27 = vunpack.c.l.bf16 %v12879_v60  ;;  %v12481_v43 = vunpack.c.h.bf16 %v12479_v47 }
0x1070   : > { %v12480_v28 = vunpack.c.l.bf16 %v12479_v47 }
0x1071   : > { %v18111_v36 = vmax.f32 %v5029_v63, 0.0  ;;  %v11609_v63 = vld [vmem:[%s20267_s11 + $0x40] sm:$0xff] }
0x1073   : > { %13666 = vmatprep.mubr.msk.f32.mxu1 %vm5049_vm3, %v18111_v36  ;;  %13685 = vmatprep.mubr.msk.f32.mxu0 %vm5049_vm3, %v18111_v36 }
0x1074   : > { %13667 = vmatmul.mubr.msk.f32.vlgmr.msra.gmra.mxu1 %vm5049_vm3, %v18113_v6  ;;  %13686 = vmatmul.mubr.msk.f32.vlgmr.msra.gmra.mxu0 %vm5049_vm3, %v18113_v6 }
0x1075   : > { %13692 = vmatprep.mubr.msk.f32.mxu1 %vm5232_vm4, %v11595_v53  ;;  %13702 = vmatprep.mubr.msk.f32.mxu0 %vm5232_vm4, %v5131_v15 }
0x1134   : > { %v13668_v5 = vpop.f32.mrf.mxu1  ;;  %v13687_v18 = vpop.f32.mrf.mxu0 }
0x1135   : > { %13688 = vmatprep.subr.mxu1 %v13687_v18  ;;  %13698 = vmatprep.subr.mxu0 %v13668_v5 }
0x1136   : > { %v5122_v3 = vpop.f32.mrf.mxu1  ;;  %v5218_v59 = vpop.f32.mrf.mxu0  ;;  %13689 = vmatpush3.msra.mxu1 %v13687_v18  ;;  %13699 = vmatpush3.msra.mxu0 %v13668_v5 }
0x1137   : > { %13690 = vmatprep.subr.mxu1 %v5218_v59  ;;  %13700 = vmatprep.subr.mxu0 %v5122_v3 }
0x1138   : > { %13691 = vmatpush3.msra.mxu1 %v5218_v59  ;;  %13701 = vmatpush3.msra.mxu0 %v5122_v3 }
0x1139   : > { %13693 = vmatmul.mubr.msk.f32.vlgmr.msra.gmra.mxu1 %vm5232_vm4, %v11596_v35  ;;  %13703 = vmatmul.mubr.msk.f32.vlgmr.msra.gmra.mxu0 %vm5232_vm4, %v5132_v42 }
0x113a   : > { %13708 = vmatprep.subr.mxu1 %v12493_v45  ;;  %13695 = vmatprep.mubr.msk.f32.mxu1 %vm5232_vm4, %v11597_v24 }
0x113b   : > { %13709 = vmatpush3.msra.mxu1 %v12493_v45  ;;  %13705 = vmatprep.mubr.msk.f32.mxu0 %vm5232_vm4, %v5133_v33  ;;  %v12884_v45 = vld [vmem:[#allocation6 + $0x78] sm:$0xff]   ;;  %v11610_v33 = vld [vmem:[%s20267_s11 + $0x48] sm:$0xff] }
0x113c   : > { %13710 = vmatprep.subr.mxu1 %v12492_v39  ;;  %v12509_v51 = vunpack.c.h.bf16 %v12884_v45 }
0x113d   : > { %13711 = vmatpush3.msra.mxu1 %v12492_v39  ;;  %13706 = vmatmul.mubr.msk.f32.gmra.mxu0 %vm5232_vm4, %v5134_v57  ;;  %v12508_v57 = vunpack.c.l.bf16 %v12884_v45 }
0x113e   : > { %13696 = vmatmul.mubr.msk.f32.gmra.mxu1 %vm5232_vm4, %v11598_v9  ;;  %13712 = vmatprep.subr.mxu1 %v12489_v54  ;;  %v11611_v9 = vld [vmem:[%s20267_s11 + $0x50] sm:$0xff] }
0x113f   : > { %13713 = vmatpush3.msra.mxu1 %v12489_v54  ;;  %13724 = vmatprep.mubr.msk.f32.mxu1 %vm5049_vm3, %v18111_v36  ;;  %v12883_v54 = vld [vmem:[#allocation6 + $0x70] sm:$0xff]  }
0x1140   : > { %13714 = vmatprep.subr.mxu1 %v12488_v19  ;;  %13731 = vmatprep.mubr.msk.f32.mxu0 %vm5232_vm4, %v11609_v63  ;;  %v12505_v60 = vunpack.c.h.bf16 %v12883_v54  ;;  %v12504_v47 = vunpack.c.l.bf16 %v12883_v54  ;;  %v12887_v54 = vld [vmem:[#allocation6 + $0x98] sm:$0xff]  }
0x1141   : > { %13715 = vmatpush3.msra.mxu1 %v12488_v19  ;;  %v11612_v19 = vld [vmem:[%s20267_s11 + $0x58] sm:$0xff] }
0x1142   : > { %13716 = vmatprep.subr.mxu1 %v12485_v11 }
0x1143   : > { %13717 = vmatpush3.msra.mxu1 %v12485_v11  ;;  %v12882_v11 = vld [vmem:[#allocation6 + $0x68] sm:$0xff]  }
0x1144   : > { %13718 = vmatprep.subr.mxu1 %v12484_v27 }
0x1145   : > { %13719 = vmatpush3.msra.mxu1 %v12484_v27  ;;  %v12501_v27 = vunpack.c.h.bf16 %v12882_v11 }
0x1146   : > { %13720 = vmatprep.subr.mxu1 %v12481_v43 }
0x1147   : > { %13721 = vmatpush3.msra.mxu1 %v12481_v43  ;;  %v12495_v43 = vld [vmem:[#allocation6 + $0x60] sm:$0xff]  }
0x1148   : > { %13722 = vmatprep.subr.mxu1 %v12480_v28  ;;  %v12497_v63 = vunpack.c.h.bf16 %v12495_v43 }
0x1149   : > { %13723 = vmatpush3.msra.mxu1 %v12480_v28  ;;  %v12500_v28 = vunpack.c.l.bf16 %v12882_v11  ;;  %v12886_v11 = vld [vmem:[#allocation6 + $0x90] sm:$0xff]  }
0x114a   : > { %13725 = vmatmul.mubr.msk.f32.vlgmr.msra.gmra.mxu1 %vm5049_vm3, %v18113_v6 }
0x11f9   : > { %v13694_v53 = vpop.f32.mrf.mxu1  ;;  %v13704_v15 = vpop.f32.mrf.mxu0 }
0x11fa   : > { %v5414_v21 = vadd.f32 %v13704_v15, %v13694_v53  ;;  %v12496_v53 = vunpack.c.l.bf16 %v12495_v43  ;;  %v11619_v15 = vld [vmem:[%s20267_s11 + $0x60] sm:$0xff]  ;;  %v12885_v43 = vld [vmem:[#allocation6 + $0x88] sm:$0xff]  }
0x11fb   : > { %v18163_v5 = vpop.f32.mrf.mxu1  ;;  %v18165_v18 = vpop.f32.mrf.mxu0  ;;  %13760 = vmatprep.mubr.msk.f32.mxu1 %vm5232_vm4, %v11619_v15  ;;  %v12516_v15 = vunpack.c.l.bf16 %v12885_v43 }
0x11fd   : > { %v13707_v59 = vpop.f32.mrf.mxu0 }
0x11fe   : > { %v13697_v3 = vpop.f32.mrf.mxu1 }
0x11ff   : > { %v5424_v35 = vadd.f32 %v13707_v59, %v13697_v3  ;;  %v18189_v3 = vpop.f32.mrf.mxu0 }
0x1200   : > { %v18167_v42 = vpop.f32.mrf.mxu1 }
0x120a   : > { %v13726_v24 = vpop.f32.mrf.mxu1 }
0x120b   : > { %13727 = vmatprep.subr.mxu0 %v13726_v24 }
0x120c   : > { %v5510_v39 = vpop.f32.mrf.mxu1  ;;  %13728 = vmatpush3.msra.mxu0 %v13726_v24 }
0x120d   : > { %13729 = vmatprep.subr.mxu0 %v5510_v39 }
0x120e   : > { %13730 = vmatpush3.msra.mxu0 %v5510_v39 }
0x120f   : > { %13732 = vmatmul.mubr.msk.f32.vlgmr.msra.gmra.mxu0 %vm5232_vm4, %v11610_v33  ;;  %13737 = vmatprep.subr.mxu0 %v12509_v51 }
0x1210   : > { %13738 = vmatpush3.msra.mxu0 %v12509_v51  ;;  %13734 = vmatprep.mubr.msk.f32.mxu0 %vm5232_vm4, %v11611_v9  ;;  %v12525_v9 = vunpack.c.h.bf16 %v12887_v54 }
0x1211   : > { %13739 = vmatprep.subr.mxu0 %v12508_v57 }
0x1212   : > { %13740 = vmatpush3.msra.mxu0 %v12508_v57 }
0x1213   : > { %13735 = vmatmul.mubr.msk.f32.gmra.mxu0 %vm5232_vm4, %v11612_v19  ;;  %13741 = vmatprep.subr.mxu0 %v12505_v60  ;;  %v11620_v19 = vld [vmem:[%s20267_s11 + $0x68] sm:$0xff] }
0x1214   : > { %13742 = vmatpush3.msra.mxu0 %v12505_v60  ;;  %13753 = vmatprep.mubr.msk.f32.mxu0 %vm5049_vm3, %v18111_v36 }
0x1215   : > { %13743 = vmatprep.subr.mxu0 %v12504_v47 }
0x1216   : > { %13744 = vmatpush3.msra.mxu0 %v12504_v47  ;;  %v12524_v47 = vunpack.c.l.bf16 %v12887_v54  ;;  %v11629_v54 = vld [vmem:[%s20267_s11 + $0x80] sm:$0xff] }
0x1217   : > { %13745 = vmatprep.subr.mxu0 %v12501_v27 }
0x1218   : > { %13746 = vmatpush3.msra.mxu0 %v12501_v27  ;;  %v11622_v27 = vld [vmem:[%s20267_s11 + $0x78] sm:$0xff] }
0x1219   : > { %13747 = vmatprep.subr.mxu0 %v12500_v28 }
0x121a   : > { %13748 = vmatpush3.msra.mxu0 %v12500_v28  ;;  %v12520_v28 = vunpack.c.l.bf16 %v12886_v11 }
0x121b   : > { %13749 = vmatprep.subr.mxu0 %v12497_v63 }
0x121c   : > { %13750 = vmatpush3.msra.mxu0 %v12497_v63  ;;  %v12517_v63 = vunpack.c.h.bf16 %v12885_v43 }
0x121d   : > { %13751 = vmatprep.subr.mxu0 %v12496_v53 }
0x121e   : > { %13752 = vmatpush3.msra.mxu0 %v12496_v53  ;;  %v12511_v53 = vld [vmem:[#allocation6 + $0x80] sm:$0xff]  }
0x121f   : > { %13754 = vmatmul.mubr.msk.f32.vlgmr.msra.gmra.mxu0 %vm5049_vm3, %v18113_v6 }
0x1220   : > { %13789 = vmatprep.mubr.msk.f32.mxu0 %vm5232_vm4, %v11629_v54 }
0x12cf   : > { %v13733_v59 = vpop.f32.mrf.mxu0 }
0x12d0   : > { %v5622_v45 = vadd.f32 %v13733_v59, %v5414_v21  ;;  %v11621_v21 = vld [vmem:[%s20267_s11 + $0x70] sm:$0xff]  ;;  %v12513_v59 = vunpack.c.h.bf16 %v12511_v53 }
0x12d1   : > { %v18191_v24 = vpop.f32.mrf.mxu0 }
0x12d3   : > { %v13736_v51 = vpop.f32.mrf.mxu0 }
0x12d4   : > { %v5624_v39 = vadd.f32 %v13736_v51, %v5424_v35  ;;  %v12521_v35 = vunpack.c.h.bf16 %v12886_v11  ;;  %v12512_v51 = vunpack.c.l.bf16 %v12511_v53 }
0x12d5   : > { %v18193_v33 = vpop.f32.mrf.mxu0 }
0x12df   : > { %v13755_v57 = vpop.f32.mrf.mxu0 }
0x12e0   : > { %13756 = vmatprep.subr.mxu1 %v13755_v57 }
0x12e1   : > { %v5708_v60 = vpop.f32.mrf.mxu0  ;;  %13757 = vmatpush3.msra.mxu1 %v13755_v57 }
0x12e2   : > { %13758 = vmatprep.subr.mxu1 %v5708_v60 }
0x12e3   : > { %13759 = vmatpush3.msra.mxu1 %v5708_v60 }
0x12e4   : > { %13761 = vmatmul.mubr.msk.f32.vlgmr.msra.gmra.mxu1 %vm5232_vm4, %v11620_v19  ;;  %13766 = vmatprep.subr.mxu1 %v12525_v9 }
0x12e5   : > { %13767 = vmatpush3.msra.mxu1 %v12525_v9  ;;  %13763 = vmatprep.mubr.msk.f32.mxu1 %vm5232_vm4, %v11621_v21  ;;  %v12890_v21 = vld [vmem:[#allocation6 + $0xb8] sm:$0xff]  }
0x12e6   : > { %13768 = vmatprep.subr.mxu1 %v12524_v47  ;;  %v12540_v53 = vunpack.c.l.bf16 %v12890_v21 }
0x12e7   : > { %13769 = vmatpush3.msra.mxu1 %v12524_v47 }
0x12e8   : > { %13764 = vmatmul.mubr.msk.f32.gmra.mxu1 %vm5232_vm4, %v11622_v27  ;;  %13770 = vmatprep.subr.mxu1 %v12521_v35  ;;  %v12541_v27 = vunpack.c.h.bf16 %v12890_v21 }
0x12e9   : > { %13771 = vmatpush3.msra.mxu1 %v12521_v35  ;;  %13782 = vmatprep.mubr.msk.f32.mxu1 %vm5049_vm3, %v18111_v36 }
0x12ea   : > { %13772 = vmatprep.subr.mxu1 %v12520_v28 }
0x12eb   : > { %13773 = vmatpush3.msra.mxu1 %v12520_v28  ;;  %v11630_v28 = vld [vmem:[%s20267_s11 + $0x88] sm:$0xff] }
0x12ec   : > { %13774 = vmatprep.subr.mxu1 %v12517_v63 }
0x12ed   : > { %13775 = vmatpush3.msra.mxu1 %v12517_v63  ;;  %v12889_v63 = vld [vmem:[#allocation6 + $0xb0] sm:$0xff]  }
0x12ee   : > { %13776 = vmatprep.subr.mxu1 %v12516_v15 }
0x12ef   : > { %13777 = vmatpush3.msra.mxu1 %v12516_v15  ;;  %v11632_v15 = vld [vmem:[%s20267_s11 + $0x98] sm:$0xff] }
0x12f0   : > { %13778 = vmatprep.subr.mxu1 %v12513_v59 }
0x12f1   : > { %13779 = vmatpush3.msra.mxu1 %v12513_v59  ;;  %v12888_v59 = vld [vmem:[#allocation6 + $0xa8] sm:$0xff]  }
0x12f2   : > { %13780 = vmatprep.subr.mxu1 %v12512_v51  ;;  %v12533_v54 = vunpack.c.h.bf16 %v12888_v59 }
0x12f3   : > { %13781 = vmatpush3.msra.mxu1 %v12512_v51  ;;  %v12536_v51 = vunpack.c.l.bf16 %v12889_v63 }
0x12f4   : > { %13783 = vmatmul.mubr.msk.f32.vlgmr.msra.gmra.mxu1 %vm5049_vm3, %v18113_v6 }
0x13a4   : > { %v13762_v57 = vpop.f32.mrf.mxu1 }
0x13a5   : > { %v5820_v9 = vadd.f32 %v13762_v57, %v5622_v45  ;;  %v11631_v45 = vld [vmem:[%s20267_s11 + $0x90] sm:$0xff]  ;;  %v12527_v57 = vld [vmem:[#allocation6 + $0xa0] sm:$0xff]  }
0x13a6   : > { %v18215_v60 = vpop.f32.mrf.mxu1  ;;  %v12529_v21 = vunpack.c.h.bf16 %v12527_v57 }
0x13a8   : > { %v13765_v19 = vpop.f32.mrf.mxu1 }
0x13a9   : > { %v5822_v11 = vadd.f32 %v13765_v19, %v5624_v39  ;;  %v12537_v39 = vunpack.c.h.bf16 %v12889_v63  ;;  %v12532_v19 = vunpack.c.l.bf16 %v12888_v59 }
0x13aa   : > { %v18217_v47 = vpop.f32.mrf.mxu1 }
0x13b4   : > { %v13784_v35 = vpop.f32.mrf.mxu1 }
0x13b5   : > { %13785 = vmatprep.subr.mxu0 %v13784_v35 }
0x13b6   : > { %v5906_v43 = vpop.f32.mrf.mxu1  ;;  %13786 = vmatpush3.msra.mxu0 %v13784_v35  ;;  %v12528_v35 = vunpack.c.l.bf16 %v12527_v57  ;;  %v11640_v57 = vld [vmem:[%s20267_s11 + $0xa8] sm:$0xff] }
0x13b7   : > { %13787 = vmatprep.subr.mxu0 %v5906_v43 }
0x13b8   : > { %13788 = vmatpush3.msra.mxu0 %v5906_v43 }
0x13b9   : > { %13790 = vmatmul.mubr.msk.f32.vlgmr.msra.gmra.mxu0 %vm5232_vm4, %v11630_v28  ;;  %13795 = vmatprep.subr.mxu0 %v12541_v27 }
0x13ba   : > { %13796 = vmatpush3.msra.mxu0 %v12541_v27  ;;  %13792 = vmatprep.mubr.msk.f32.mxu0 %vm5232_vm4, %v11631_v45  ;;  %v11639_v27 = vld [vmem:[%s20267_s11 + $0xa0] sm:$0xff] }
0x13bb   : > { %13797 = vmatprep.subr.mxu0 %v12540_v53  ;;  %13818 = vmatprep.mubr.msk.f32.mxu1 %vm5232_vm4, %v11639_v27  ;;  %v12891_v27 = vld [vmem:[#allocation6 + $0xc8] sm:$0xff]  }
0x13bc   : > { %13798 = vmatpush3.msra.mxu0 %v12540_v53 }
0x13bd   : > { %13793 = vmatmul.mubr.msk.f32.gmra.mxu0 %vm5232_vm4, %v11632_v15  ;;  %13799 = vmatprep.subr.mxu0 %v12537_v39  ;;  %v12893_v15 = vld [vmem:[#allocation6 + $0xd8] sm:$0xff]  }
0x13be   : > { %13800 = vmatpush3.msra.mxu0 %v12537_v39  ;;  %13811 = vmatprep.mubr.msk.f32.mxu0 %vm5049_vm3, %v18111_v36 }
0x13bf   : > { %13801 = vmatprep.subr.mxu0 %v12536_v51 }
0x13c0   : > { %13802 = vmatpush3.msra.mxu0 %v12536_v51  ;;  %v12557_v51 = vunpack.c.h.bf16 %v12893_v15 }
0x13c1   : > { %13803 = vmatprep.subr.mxu0 %v12533_v54 }
0x13c2   : > { %13804 = vmatpush3.msra.mxu0 %v12533_v54 }
0x13c3   : > { %13805 = vmatprep.subr.mxu0 %v12532_v19 }
0x13c4   : > { %13806 = vmatpush3.msra.mxu0 %v12532_v19  ;;  %v12892_v19 = vld [vmem:[#allocation6 + $0xd0] sm:$0xff]  }
0x13c5   : > { %13807 = vmatprep.subr.mxu0 %v12529_v21 }
0x13c6   : > { %13808 = vmatpush3.msra.mxu0 %v12529_v21  ;;  %v12556_v21 = vunpack.c.l.bf16 %v12893_v15  ;;  %v12543_v15 = vld [vmem:[#allocation6 + $0xc0] sm:$0xff]  }
0x13c7   : > { %13809 = vmatprep.subr.mxu0 %v12528_v35 }
0x13c8   : > { %13810 = vmatpush3.msra.mxu0 %v12528_v35  ;;  %v11642_v35 = vld [vmem:[%s20267_s11 + $0xb8] sm:$0xff] }
0x13c9   : > { %13812 = vmatmul.mubr.msk.f32.vlgmr.msra.gmra.mxu0 %vm5049_vm3, %v18113_v6 }
0x1479   : > { %v13791_v43 = vpop.f32.mrf.mxu0 }
0x147a   : > { %v6018_v28 = vadd.f32 %v13791_v43, %v5820_v9  ;;  %v11641_v9 = vld [vmem:[%s20267_s11 + $0xb0] sm:$0xff]  ;;  %v12552_v43 = vunpack.c.l.bf16 %v12892_v19 }
0x147b   : > { %v18239_v63 = vpop.f32.mrf.mxu0 }
0x147d   : > { %v13794_v53 = vpop.f32.mrf.mxu0 }
0x147e   : > { %v6020_v45 = vadd.f32 %v13794_v53, %v5822_v11  ;;  %v12553_v11 = vunpack.c.h.bf16 %v12892_v19  ;;  %v12549_v53 = vunpack.c.h.bf16 %v12891_v27 }
0x147f   : > { %v18241_v39 = vpop.f32.mrf.mxu0 }
0x1489   : > { %v13813_v59 = vpop.f32.mrf.mxu0 }
0x148a   : > { %13814 = vmatprep.subr.mxu1 %v13813_v59 }
0x148b   : > { %v6104_v54 = vpop.f32.mrf.mxu0  ;;  %13815 = vmatpush3.msra.mxu1 %v13813_v59  ;;  %v12548_v59 = vunpack.c.l.bf16 %v12891_v27 }
0x148c   : > { %13816 = vmatprep.subr.mxu1 %v6104_v54 }
0x148d   : > { %13817 = vmatpush3.msra.mxu1 %v6104_v54  ;;  %v12544_v54 = vunpack.c.l.bf16 %v12543_v15 }
0x148e   : > { %13819 = vmatmul.mubr.msk.f32.vlgmr.msra.gmra.mxu1 %vm5232_vm4, %v11640_v57  ;;  %13824 = vmatprep.subr.mxu1 %v12557_v51  ;;  %v11649_v57 = vld [vmem:[%s20267_s11 + $0xc0] sm:$0xff] }
0x148f   : > { %13825 = vmatpush3.msra.mxu1 %v12557_v51  ;;  %13821 = vmatprep.mubr.msk.f32.mxu1 %vm5232_vm4, %v11641_v9  ;;  %v12545_v51 = vunpack.c.h.bf16 %v12543_v15 }
0x1490   : > { %13826 = vmatprep.subr.mxu1 %v12556_v21  ;;  %13847 = vmatprep.mubr.msk.f32.mxu0 %vm5232_vm4, %v11649_v57 }
0x1491   : > { %13827 = vmatpush3.msra.mxu1 %v12556_v21 }
0x1492   : > { %13822 = vmatmul.mubr.msk.f32.gmra.mxu1 %vm5232_vm4, %v11642_v35  ;;  %13828 = vmatprep.subr.mxu1 %v12553_v11 }
0x1493   : > { %13829 = vmatpush3.msra.mxu1 %v12553_v11  ;;  %13840 = vmatprep.mubr.msk.f32.mxu1 %vm5049_vm3, %v18111_v36 }
0x1494   : > { %13830 = vmatprep.subr.mxu1 %v12552_v43 }
0x1495   : > { %13831 = vmatpush3.msra.mxu1 %v12552_v43  ;;  %v12896_v43 = vld [vmem:[#allocation6 + $0xf8] sm:$0xff]  }
0x1496   : > { %13832 = vmatprep.subr.mxu1 %v12549_v53  ;;  %v12573_v15 = vunpack.c.h.bf16 %v12896_v43  ;;  %v12572_v57 = vunpack.c.l.bf16 %v12896_v43 }
0x1497   : > { %13833 = vmatpush3.msra.mxu1 %v12549_v53 }
0x1498   : > { %13834 = vmatprep.subr.mxu1 %v12548_v59 }
0x1499   : > { %13835 = vmatpush3.msra.mxu1 %v12548_v59 }
0x149a   : > { %13836 = vmatprep.subr.mxu1 %v12545_v51 }
0x149b   : > { %13837 = vmatpush3.msra.mxu1 %v12545_v51  ;;  %v11650_v51 = vld [vmem:[%s20267_s11 + $0xc8] sm:$0xff] }
0x149c   : > { %13838 = vmatprep.subr.mxu1 %v12544_v54 }
0x149d   : > { %13839 = vmatpush3.msra.mxu1 %v12544_v54  ;;  %v12895_v54 = vld [vmem:[#allocation6 + $0xf0] sm:$0xff]  }
0x149e   : > { %13841 = vmatmul.mubr.msk.f32.vlgmr.msra.gmra.mxu1 %vm5049_vm3, %v18113_v6 }
0x154e   : > { %v13820_v19 = vpop.f32.mrf.mxu1 }
0x154f   : > { %v6216_v21 = vadd.f32 %v13820_v19, %v6018_v28  ;;  %v11651_v28 = vld [vmem:[%s20267_s11 + $0xd0] sm:$0xff]  ;;  %v11652_v19 = vld [vmem:[%s20267_s11 + $0xd8] sm:$0xff] }
0x1550   : > { %v18263_v9 = vpop.f32.mrf.mxu1 }
0x1552   : > { %v13823_v11 = vpop.f32.mrf.mxu1 }
0x1553   : > { %v6218_v35 = vadd.f32 %v13823_v11, %v6020_v45  ;;  %v12569_v45 = vunpack.c.h.bf16 %v12895_v54  ;;  %v12894_v11 = vld [vmem:[#allocation6 + $0xe8] sm:$0xff]  }
0x1554   : > { %v18265_v27 = vpop.f32.mrf.mxu1  ;;  %v12565_v43 = vunpack.c.h.bf16 %v12894_v11 }
0x155e   : > { %v13842_v53 = vpop.f32.mrf.mxu1 }
0x155f   : > { %13843 = vmatprep.subr.mxu0 %v13842_v53 }
0x1560   : > { %v6302_v59 = vpop.f32.mrf.mxu1  ;;  %13844 = vmatpush3.msra.mxu0 %v13842_v53  ;;  %v12568_v53 = vunpack.c.l.bf16 %v12895_v54  ;;  %v11659_v54 = vld [vmem:[%s20267_s11 + $0xe0] sm:$0xff] }
0x1561   : > { %13845 = vmatprep.subr.mxu0 %v6302_v59  ;;  %13876 = vmatprep.mubr.msk.f32.mxu1 %vm5232_vm4, %v11659_v54 }
0x1562   : > { %13846 = vmatpush3.msra.mxu0 %v6302_v59  ;;  %v12559_v59 = vld [vmem:[#allocation6 + $0xe0] sm:$0xff]  }
0x1563   : > { %13848 = vmatmul.mubr.msk.f32.vlgmr.msra.gmra.mxu0 %vm5232_vm4, %v11650_v51  ;;  %13853 = vmatprep.subr.mxu0 %v12573_v15  ;;  %v12561_v51 = vunpack.c.h.bf16 %v12559_v59 }
0x1564   : > { %13854 = vmatpush3.msra.mxu0 %v12573_v15  ;;  %13850 = vmatprep.mubr.msk.f32.mxu0 %vm5232_vm4, %v11651_v28  ;;  %v12564_v15 = vunpack.c.l.bf16 %v12894_v11  ;;  %v12560_v28 = vunpack.c.l.bf16 %v12559_v59  ;;  %v12899_v59 = vld [vmem:[#allocation6 + $0x118] sm:$0xff]  }
0x1565   : > { %13855 = vmatprep.subr.mxu0 %v12572_v57  ;;  %v12588_v54 = vunpack.c.l.bf16 %v12899_v59 }
0x1566   : > { %13856 = vmatpush3.msra.mxu0 %v12572_v57 }
0x1567   : > { %13851 = vmatmul.mubr.msk.f32.gmra.mxu0 %vm5232_vm4, %v11652_v19  ;;  %13857 = vmatprep.subr.mxu0 %v12569_v45 }
0x1568   : > { %13858 = vmatpush3.msra.mxu0 %v12569_v45  ;;  %13869 = vmatprep.mubr.msk.f32.mxu0 %vm5049_vm3, %v18111_v36 }
0x1569   : > { %13859 = vmatprep.subr.mxu0 %v12568_v53 }
0x156a   : > { %13860 = vmatpush3.msra.mxu0 %v12568_v53 }
0x156b   : > { %13861 = vmatprep.subr.mxu0 %v12565_v43 }
0x156c   : > { %13862 = vmatpush3.msra.mxu0 %v12565_v43 }
0x156d   : > { %13863 = vmatprep.subr.mxu0 %v12564_v15 }
0x156e   : > { %13864 = vmatpush3.msra.mxu0 %v12564_v15 }
0x156f   : > { %13865 = vmatprep.subr.mxu0 %v12561_v51 }
0x1570   : > { %13866 = vmatpush3.msra.mxu0 %v12561_v51  ;;  %v12589_v51 = vunpack.c.h.bf16 %v12899_v59 }
0x1571   : > { %13867 = vmatprep.subr.mxu0 %v12560_v28 }
0x1572   : > { %13868 = vmatpush3.msra.mxu0 %v12560_v28 }
0x1573   : > { %13870 = vmatmul.mubr.msk.f32.vlgmr.msra.gmra.mxu0 %vm5049_vm3, %v18113_v6 }
0x1623   : > { %v13849_v57 = vpop.f32.mrf.mxu0 }
0x1624   : > { %v6414_v45 = vadd.f32 %v13849_v57, %v6216_v21  ;;  %v11661_v21 = vld [vmem:[%s20267_s11 + $0xf0] sm:$0xff]  ;;  %v11662_v57 = vld [vmem:[%s20267_s11 + $0xf8] sm:$0xff] }
0x1625   : > { %v18287_v19 = vpop.f32.mrf.mxu0 }
0x1627   : > { %v13852_v11 = vpop.f32.mrf.mxu0 }
0x1628   : > { %v6416_v53 = vadd.f32 %v13852_v11, %v6218_v35  ;;  %v12585_v35 = vunpack.c.h.bf16 %v12898_v1  ;;  %v12897_v11 = vld [vmem:[#allocation6 + $0x108] sm:$0xff]  }
0x1629   : > { %v18289_v43 = vpop.f32.mrf.mxu0  ;;  %v12581_v59 = vunpack.c.h.bf16 %v12897_v11 }
0x1633   : > { %v13871_v15 = vpop.f32.mrf.mxu0 }
0x1634   : > { %13872 = vmatprep.subr.mxu1 %v13871_v15 }
0x1635   : > { %v6500_v28 = vpop.f32.mrf.mxu0  ;;  %13873 = vmatpush3.msra.mxu1 %v13871_v15  ;;  %v12584_v15 = vunpack.c.l.bf16 %v12898_v1  ;;  %v6845_v1 = vld [vmem:[%s20269_s13] sm:$0xff] }
0x1636   : > { %13874 = vmatprep.subr.mxu1 %v6500_v28 }
0x1637   : > { %13875 = vmatpush3.msra.mxu1 %v6500_v28 }
0x1638   : > { %13877 = vmatmul.mubr.msk.f32.vlgmr.msra.gmra.mxu1 %vm5232_vm4, %v11660_v7  ;;  %13882 = vmatprep.subr.mxu1 %v12589_v51  ;;  %v12575_v7 = vld [vmem:[#allocation6 + $0x100] sm:$0xff]  }
0x1639   : > { %13883 = vmatpush3.msra.mxu1 %v12589_v51  ;;  %13879 = vmatprep.mubr.msk.f32.mxu1 %vm5232_vm4, %v11661_v21  ;;  %v12580_v51 = vunpack.c.l.bf16 %v12897_v11  ;;  %v12577_v28 = vunpack.c.h.bf16 %v12575_v7  ;;  %v12576_v21 = vunpack.c.l.bf16 %v12575_v7 }
0x163a   : > { %13884 = vmatprep.subr.mxu1 %v12588_v54 }
0x163b   : > { %13885 = vmatpush3.msra.mxu1 %v12588_v54  ;;  %v6846_v54 = vld [vmem:[%s20269_s13 + $0x8] sm:$0xff] }
0x163c   : > { %13880 = vmatmul.mubr.msk.f32.gmra.mxu1 %vm5232_vm4, %v11662_v57  ;;  %13886 = vmatprep.subr.mxu1 %v12585_v35  ;;  %v11669_v57 = vld [vmem:[%s20267_s11 + $0x100] sm:$0xff] }
0x163d   : > { %13887 = vmatpush3.msra.mxu1 %v12585_v35  ;;  %13898 = vmatprep.mubr.msk.f32.mxu1 %vm5049_vm3, %v18111_v36  ;;  %v6847_v35 = vld [vmem:[%s20269_s13 + $0x10] sm:$0xff] }
0x163e   : > { %13888 = vmatprep.subr.mxu1 %v12584_v15  ;;  %13905 = vmatprep.mubr.msk.f32.mxu0 %vm5232_vm4, %v11669_v57  ;;  %v12902_v57 = vld [vmem:[#allocation4 + $0x18] sm:$0xff]  }
0x163f   : > { %13889 = vmatpush3.msra.mxu1 %v12584_v15 }
0x1640   : > { %13890 = vmatprep.subr.mxu1 %v12581_v59 }
0x1641   : > { %13891 = vmatpush3.msra.mxu1 %v12581_v59 }
0x1642   : > { %13892 = vmatprep.subr.mxu1 %v12580_v51 }
0x1643   : > { %13893 = vmatpush3.msra.mxu1 %v12580_v51 }
0x1644   : > { %13894 = vmatprep.subr.mxu1 %v12577_v28 }
0x1645   : > { %13895 = vmatpush3.msra.mxu1 %v12577_v28 }
0x1646   : > { %13896 = vmatprep.subr.mxu1 %v12576_v21 }
0x1647   : > { %13897 = vmatpush3.msra.mxu1 %v12576_v21 }
0x1648   : > { %13899 = vmatmul.mubr.msk.f32.vlgmr.msra.gmra.mxu1 %vm5049_vm3, %v18113_v6  ;;  %13911 = vmatprep.subr.mxu1 %v18113_v6 }
0x1649   : > { %13912 = vmatpush3.msra.mxu1 %v18113_v6  ;;  %13915 = vmatprep.mubr.msk.f32.mxu1 %vm5232_vm4, %v6845_v1  ;;  %v6848_v6 = vld [vmem:[%s20269_s13 + $0x18] sm:$0xff]  ;;  %v11670_v1 = vld [vmem:[%s20267_s11 + $0x108] sm:$0xff] }
0x164a   : > { %13913 = vmatprep.subr.mxu1 %v18111_v36 }
0x164b   : > { %13914 = vmatpush3.msra.mxu1 %v18111_v36 }
0x164c   : > { %13916 = vmatmul.mubr.msk.f32.vlgmr.msra.gmra.mxu1 %vm5232_vm4, %v6846_v54  ;;  %v11671_v54 = vld [vmem:[%s20267_s11 + $0x110] sm:$0xff] }
0x164d   : > { %13918 = vmatprep.mubr.msk.f32.mxu1 %vm5232_vm4, %v6847_v35 }
0x1650   : > { %13919 = vmatmul.mubr.msk.f32.gmra.mxu1 %vm5232_vm4, %v6848_v6 }
0x16f8   : > { %v13878_v11 = vpop.f32.mrf.mxu1 }
0x16f9   : > { %v6612_v15 = vadd.f32 %v13878_v11, %v6414_v45  ;;  %v11672_v45 = vld [vmem:[%s20267_s11 + $0x118] sm:$0xff] }
0x16fa   : > { %v6592_v59 = vpop.f32.mrf.mxu1  ;;  %v18348_v11 = vld [vmem:[#allocation4 + $0x38] sm:$0xff]  }
0x16fc   : > { %v13881_v36 = vpop.f32.mrf.mxu1 }
0x16fd   : > { %v18331_v7 = vadd.f32 %v13881_v36, %v6416_v53  ;;  %v12591_v53 = vld [vmem:[%s21654_s25] sm:$0xff]   ;;  %v12901_v36 = vld [vmem:[#allocation4 + $0x10] sm:$0xff]  }
0x16fe   : > { %v6602_v51 = vpop.f32.mrf.mxu1  ;;  %v12593_v35 = vunpack.c.h.bf16 %v12591_v53  ;;  %v12592_v6 = vunpack.c.l.bf16 %v12591_v53  ;;  %v12604_v48 = vunpack.c.l.bf16 %v12901_v36 }
0x1708   : > { %v13900_v28 = vpop.f32.mrf.mxu1 }
0x1709   : > { %13901 = vmatprep.subr.mxu0 %v13900_v28 }
0x170a   : > { %v6698_v21 = vpop.f32.mrf.mxu1  ;;  %13902 = vmatpush3.msra.mxu0 %v13900_v28  ;;  %v12609_v28 = vunpack.c.h.bf16 %v12902_v57 }
0x170b   : > { %13903 = vmatprep.subr.mxu0 %v6698_v21 }
0x170c   : > { %13904 = vmatpush3.msra.mxu0 %v6698_v21  ;;  %v12625_v21 = vunpack.c.h.bf16 %v18348_v11  ;;  %13931 = vmatprep.subr.mxu1 %v12609_v28 }
0x170d   : > { %13906 = vmatmul.mubr.msk.f32.vlgmr.msra.gmra.mxu0 %vm5232_vm4, %v11670_v1  ;;  %13921 = vmatprep.subr.mxu0 %v12593_v35  ;;  %v12608_v1 = vunpack.c.l.bf16 %v12902_v57  ;;  %v5419_v57 = vadd.f32 %v18189_v3, %v18167_v42  ;;  %v6820_v3 = vpop.permute.xlu1 %6819 }
0x170e   : > { %13908 = vmatprep.mubr.msk.f32.mxu0 %vm5232_vm4, %v11671_v54  ;;  %13922 = vmatpush3.msra.mxu0 %v12593_v35  ;;  %v12605_v54 = vunpack.c.h.bf16 %v12901_v36  ;;  %v5409_v35 = vadd.f32 %v18165_v18, %v18163_v5  ;;  %v6825_v18 = vpop.permute.xlu0 %6824 }
0x170f   : > { %13923 = vmatprep.subr.mxu0 %v12592_v6  ;;  %13932 = vmatpush3.msra.mxu1 %v12609_v28  ;;  %v5623_v36 = vadd.f32 %v18193_v33, %v5419_v57 }
0x1710   : > { %13924 = vmatpush3.msra.mxu0 %v12592_v6  ;;  %13933 = vmatprep.subr.mxu1 %v12608_v1  ;;  %v5621_v6 = vadd.f32 %v18191_v24, %v5409_v35 }
0x1711   : > { %13909 = vmatmul.mubr.msk.f32.gmra.mxu0 %vm5232_vm4, %v11672_v45  ;;  %13953 = vmatprep.subr.mxu0 %v12625_v21  ;;  %v18351_v45 = vld [vmem:[#allocation4 + $0x8] sm:$0xff]  }
0x1712   : > { %13934 = vmatpush3.msra.mxu1 %v12608_v1  ;;  %v12601_v53 = vunpack.c.h.bf16 %v18351_v45  ;;  %v5819_v28 = vadd.f32 %v18215_v60, %v5621_v6 }
0x1713   : > { %13935 = vmatprep.subr.mxu1 %v12605_v54 }
0x1714   : > { %13936 = vmatpush3.msra.mxu1 %v12605_v54  ;;  %v6017_v1 = vadd.f32 %v18239_v63, %v5819_v28  ;;  %v5821_v54 = vadd.f32 %v18217_v47, %v5623_v36  ;;  %v6835_v36 = vpop.permute.xlu0 %6834 }
0x1715   : > { %13937 = vmatprep.subr.mxu1 %v12604_v48 }
0x1716   : > { %13938 = vmatpush3.msra.mxu1 %v12604_v48  ;;  %v6215_v48 = vadd.f32 %v18263_v9, %v6017_v1 }
0x1717   : > { %13939 = vmatprep.subr.mxu1 %v12601_v53 }
0x1718   : > { %13940 = vmatpush3.msra.mxu1 %v12601_v53  ;;  %v6019_v53 = vadd.f32 %v18241_v39, %v5821_v54  ;;  %v6413_v16 = vadd.f32 %v18287_v19, %v6215_v48  ;;  %v12904_v54 = vld [vmem:[#allocation4 + $0x30] sm:$0xff]   ;;  %v6830_v48 = vpop.permute.xlu1 %6829 }
0x171a   : > { %v6217_v24 = vadd.f32 %v18265_v27, %v6019_v53  ;;  %v6611_v35 = vadd.f32 %v6592_v59, %v6413_v16  ;;  %v12903_v53 = vld [vmem:[#allocation4 + $0x28] sm:$0xff]  }
0x171c   : > { %v6415_v33 = vadd.f32 %v18289_v43, %v6217_v24  ;;  %v12621_v43 = vunpack.c.h.bf16 %v12904_v54  ;;  %v12616_v24 = vunpack.c.l.bf16 %v12903_v53 }
0x171e   : > { %v6613_v47 = vadd.f32 %v6602_v51, %v6415_v33 }
0x17cd   : > { %v13907_v5 = vpop.f32.mrf.mxu0 }
0x17ce   : > { %v6810_v42 = vadd.f32 %v13907_v5, %v6612_v15  ;;  %v12624_v15 = vunpack.c.l.bf16 %v18348_v11  ;;  %v12620_v5 = vunpack.c.l.bf16 %v12904_v54  ;;  %v12600_v11 = vunpack.c.l.bf16 %v18351_v45  ;;  %v13917_v45 = vpop.f32.mrf.mxu1 }
0x17cf   : > { %v6790_v60 = vpop.f32.mrf.mxu0 }
0x17d0   : > { %v6809_v6 = vadd.f32 %v6790_v60, %v6611_v35  ;;  %v6838_v63 = vadd.f32 %v6825_v18, %v6810_v42  ;;  %v12617_v18 = vunpack.c.h.bf16 %v12903_v53  ;;  %v12611_v35 = vld [vmem:[#allocation4 + $0x20] sm:$0xff]   ;;  %13941 = vmatprep.subr.mxu1 %v12600_v11 }
0x17d1   : > { %v13910_v57 = vpop.f32.mrf.mxu0  ;;  %13942 = vmatpush3.msra.mxu1 %v12600_v11  ;;  %v12612_v33 = vunpack.c.l.bf16 %v12611_v35 }
0x17d2   : > { %v6837_v28 = vadd.f32 %v6820_v3, %v6809_v6  ;;  %v6812_v9 = vadd.f32 %v13910_v57, %v18331_v7  ;;  %v6842_v27 = vmax.f32 %v6838_v63, 0.0  ;;  %v12613_v3 = vunpack.c.h.bf16 %v12611_v35  ;;  %v6951_v6 = vpop.f32.mrf.mxu1  ;;  %v6856_v63 = vpop.permute.xlu1 %6855 }
0x17d3   : > { %v6800_v39 = vpop.f32.mrf.mxu0 }
0x17d4   : > { %v6841_v19 = vmax.f32 %v6837_v28, 0.0  ;;  %v6811_v1 = vadd.f32 %v6800_v39, %v6613_v47  ;;  %v6840_v16 = vadd.f32 %v6835_v36, %v6812_v9  ;;  %v13920_v57 = vpop.f32.mrf.mxu1  ;;  %v6861_v47 = vpop.permute.xlu0 %6860  ;;  %v6952_v9 = vadd.f32 %v6951_v6, %v6856_v63  ;;  %v7185_v6 = vld [vmem:[%s20271_s15 + $0x8] sm:$0xff] }
0x17d5   : > { %v6957_v39 = vadd.f32 %v13917_v45, %v6861_v47  ;;  %v11694_v45 = vld [vmem:[%s20271_s15 + $0x28] sm:$0xff]  ;;  %v12907_v47 = vld [vmem:[#allocation4 + $0x50] sm:$0xff]  }
0x17d6   : > { %v6839_v59 = vadd.f32 %v6830_v48, %v6811_v1  ;;  %13925 = vmatprep.mubr.msk.f32.mxu0 %vm5232_vm4, %v6841_v19  ;;  %v6844_v7 = vmax.f32 %v6840_v16, 0.0  ;;  %v6961_v36 = vpop.f32.mrf.mxu1  ;;  %v6866_v54 = vpop.permute.xlu1 %6865 }
0x17d7   : > { %13926 = vmatmul.mubr.msk.f32.vlgmr.msra.gmra.mxu0 %vm5232_vm4, %v6842_v27 }
0x17d8   : > { %v6843_v51 = vmax.f32 %v6839_v59, 0.0  ;;  %13954 = vmatpush3.msra.mxu0 %v12625_v21  ;;  %v12595_v21 = vld [vmem:[#allocation4] sm:$0xff]   ;;  %v6871_v16 = vpop.permute.xlu0 %6870 }
0x17d9   : > { %13955 = vmatprep.subr.mxu0 %v12624_v15  ;;  %v12597_v42 = vunpack.c.h.bf16 %v12595_v21  ;;  %v12596_v60 = vunpack.c.l.bf16 %v12595_v21  ;;  %v6967_v59 = vadd.f32 %v13920_v57, %v6871_v16  ;;  %v11695_v57 = vld [vmem:[%s20271_s15 + $0x30] sm:$0xff] }
0x17da   : > { %13928 = vmatprep.mubr.msk.f32.mxu0 %vm5232_vm4, %v6843_v51  ;;  %13956 = vmatpush3.msra.mxu0 %v12624_v15  ;;  %v6962_v15 = vadd.f32 %v6961_v36, %v6866_v54  ;;  %v7187_v36 = vld [vmem:[%s20271_s15 + $0x18] sm:$0xff]  ;;  %v12906_v54 = vld [vmem:[#allocation4 + $0x48] sm:$0xff]  }
0x17db   : > { %13929 = vmatmul.mubr.msk.f32.gmra.mxu0 %vm5232_vm4, %v6844_v7  ;;  %13957 = vmatprep.subr.mxu0 %v12621_v43  ;;  %v11693_v7 = vld [vmem:[%s20271_s15 + $0x20] sm:$0xff]  ;;  %v12633_v16 = vunpack.c.h.bf16 %v12906_v54 }
0x17dc   : > { %13958 = vmatpush3.msra.mxu0 %v12621_v43  ;;  %13943 = vmatprep.subr.mxu1 %v12597_v42 }
0x17dd   : > { %13959 = vmatprep.subr.mxu0 %v12620_v5  ;;  %13944 = vmatpush3.msra.mxu1 %v12597_v42 }
0x17de   : > { %13960 = vmatpush3.msra.mxu0 %v12620_v5  ;;  %13945 = vmatprep.subr.mxu1 %v12596_v60  ;;  %v7184_v5 = vld [vmem:[%s20271_s15] sm:$0xff] }
0x17df   : > { %13961 = vmatprep.subr.mxu0 %v12617_v18  ;;  %13946 = vmatpush3.msra.mxu1 %v12596_v60 }
0x17e0   : > { %13962 = vmatpush3.msra.mxu0 %v12617_v18 }
0x17e1   : > { %13963 = vmatprep.subr.mxu0 %v12616_v24 }
0x17e2   : > { %13964 = vmatpush3.msra.mxu0 %v12616_v24 }
0x17e3   : > { %13965 = vmatprep.subr.mxu0 %v12613_v3 }
0x17e4   : > { %13966 = vmatpush3.msra.mxu0 %v12613_v3 }
0x17e5   : > { %13967 = vmatprep.subr.mxu0 %v12612_v33 }
0x17e6   : > { %13968 = vmatpush3.msra.mxu0 %v12612_v33  ;;  %v12908_v33 = vld [vmem:[#allocation4 + $0x58] sm:$0xff]  }
0x17e7   : > { %v12641_v63 = vunpack.c.h.bf16 %v12908_v33 }
0x1897   : > { %v13927_v28 = vpop.f32.mrf.mxu0 }
0x1898   : > { %v18377_v48 = vadd.f32 %v13927_v28, %v6957_v39  ;;  %v12640_v28 = vunpack.c.l.bf16 %v12908_v33  ;;  %v12637_v39 = vunpack.c.h.bf16 %v12907_v47 }
0x1899   : > { %v7052_v19 = vpop.f32.mrf.mxu0 }
0x189a   : > { %v18375_v1 = vadd.f32 %v7052_v19, %v6952_v9  ;;  %v7186_v9 = vld [vmem:[%s20271_s15 + $0x10] sm:$0xff]  ;;  %v11696_v19 = vld [vmem:[%s20271_s15 + $0x38] sm:$0xff] }
0x189b   : > { %v13930_v27 = vpop.f32.mrf.mxu0 }
0x189c   : > { %13947 = vmatprep.mubr.msk.f32.mxu1 %vm5049_vm3, %v18375_v1  ;;  %13969 = vmatprep.mubr.msk.f32.mxu0 %vm5049_vm3, %v18375_v1  ;;  %v18389_v53 = vadd.f32 %v13930_v27, %v6967_v59  ;;  %v12636_v27 = vunpack.c.l.bf16 %v12907_v47  ;;  %v12632_v59 = vunpack.c.l.bf16 %v12906_v54  ;;  %v12911_v47 = vld [vmem:[#allocation4 + $0x78] sm:$0xff]  }
0x189d   : > { %v7062_v43 = vpop.f32.mrf.mxu0  ;;  %13948 = vmatmul.mubr.msk.f32.vlgmr.msra.gmra.mxu1 %vm5049_vm3, %v18377_v48  ;;  %13970 = vmatmul.mubr.msk.f32.vlgmr.msra.gmra.mxu0 %vm5049_vm3, %v18377_v48 }
0x189e   : > { %v18387_v51 = vadd.f32 %v7062_v43, %v6962_v15  ;;  %v12627_v15 = vld [vmem:[#allocation4 + $0x40] sm:$0xff]  }
0x189f   : > { %v12629_v43 = vunpack.c.h.bf16 %v12627_v15 }
0x18a0   : > { %13950 = vmatprep.mubr.msk.f32.mxu1 %vm5049_vm3, %v18387_v51  ;;  %13972 = vmatprep.mubr.msk.f32.mxu0 %vm5049_vm3, %v18387_v51 }
0x18a1   : > { %13951 = vmatmul.mubr.msk.f32.gmra.mxu1 %vm5049_vm3, %v18389_v53  ;;  %13973 = vmatmul.mubr.msk.f32.gmra.mxu0 %vm5049_vm3, %v18389_v53 }
0x18a2   : > { %13983 = vmatprep.mubr.msk.f32.mxu1 %vm7295_vm5, %v11693_v7  ;;  %13997 = vmatprep.mubr.msk.f32.mxu0 %vm7295_vm5, %v7184_v5  ;;  %v12628_v7 = vunpack.c.l.bf16 %v12627_v15  ;;  %v11709_v5 = vld [vmem:[%s20271_s15 + $0x40] sm:$0xff] }
0x195d   : > { %v13949_v18 = vpop.f32.mrf.mxu1  ;;  %v13971_v11 = vpop.f32.mrf.mxu0 }
0x195f   : > { %v7165_v24 = vpop.f32.mrf.mxu1  ;;  %v7271_v21 = vpop.f32.mrf.mxu0 }
0x1961   : > { %v13952_v35 = vpop.f32.mrf.mxu1  ;;  %v13974_v42 = vpop.f32.mrf.mxu0 }
0x1962   : > { %13975 = vmatprep.subr.mxu1 %v13974_v42  ;;  %13989 = vmatprep.subr.mxu0 %v13952_v35 }
0x1963   : > { %v7175_v3 = vpop.f32.mrf.mxu1  ;;  %v7281_v60 = vpop.f32.mrf.mxu0  ;;  %13976 = vmatpush3.msra.mxu1 %v13974_v42  ;;  %13990 = vmatpush3.msra.mxu0 %v13952_v35 }
0x1964   : > { %13977 = vmatprep.subr.mxu1 %v7281_v60  ;;  %13991 = vmatprep.subr.mxu0 %v7175_v3 }
0x1965   : > { %13978 = vmatpush3.msra.mxu1 %v7281_v60  ;;  %13992 = vmatpush3.msra.mxu0 %v7175_v3 }
0x1966   : > { %13979 = vmatprep.subr.mxu1 %v13971_v11  ;;  %13993 = vmatprep.subr.mxu0 %v13949_v18 }
0x1967   : > { %13980 = vmatpush3.msra.mxu1 %v13971_v11  ;;  %13994 = vmatpush3.msra.mxu0 %v13949_v18 }
0x1968   : > { %13981 = vmatprep.subr.mxu1 %v7271_v21  ;;  %13995 = vmatprep.subr.mxu0 %v7165_v24 }
0x1969   : > { %13982 = vmatpush3.msra.mxu1 %v7271_v21  ;;  %13996 = vmatpush3.msra.mxu0 %v7165_v24 }
0x196a   : > { %13984 = vmatmul.mubr.msk.f32.vlgmr.msra.gmra.mxu1 %vm7295_vm5, %v11694_v45  ;;  %13998 = vmatmul.mubr.msk.f32.vlgmr.msra.gmra.mxu0 %vm7295_vm5, %v7185_v6 }
0x196b   : > { %14003 = vmatprep.subr.mxu1 %v12641_v63  ;;  %13986 = vmatprep.mubr.msk.f32.mxu1 %vm7295_vm5, %v11695_v57 }
0x196c   : > { %14004 = vmatpush3.msra.mxu1 %v12641_v63  ;;  %14000 = vmatprep.mubr.msk.f32.mxu0 %vm7295_vm5, %v7186_v9  ;;  %v11710_v9 = vld [vmem:[%s20271_s15 + $0x48] sm:$0xff] }
0x196d   : > { %14005 = vmatprep.subr.mxu1 %v12640_v28 }
0x196e   : > { %14006 = vmatpush3.msra.mxu1 %v12640_v28  ;;  %14001 = vmatmul.mubr.msk.f32.gmra.mxu0 %vm7295_vm5, %v7187_v36  ;;  %v12657_v28 = vunpack.c.h.bf16 %v12911_v47  ;;  %v12656_v36 = vunpack.c.l.bf16 %v12911_v47 }
0x196f   : > { %13987 = vmatmul.mubr.msk.f32.gmra.mxu1 %vm7295_vm5, %v11696_v19  ;;  %14007 = vmatprep.subr.mxu1 %v12637_v39  ;;  %v11711_v19 = vld [vmem:[%s20271_s15 + $0x50] sm:$0xff] }
0x1970   : > { %14008 = vmatpush3.msra.mxu1 %v12637_v39  ;;  %14019 = vmatprep.mubr.msk.f32.mxu1 %vm5049_vm3, %v18375_v1  ;;  %v12910_v39 = vld [vmem:[#allocation4 + $0x70] sm:$0xff]  }
0x1971   : > { %14009 = vmatprep.subr.mxu1 %v12636_v27  ;;  %14033 = vmatprep.mubr.msk.f32.mxu0 %vm7295_vm5, %v11709_v5  ;;  %v12653_v54 = vunpack.c.h.bf16 %v12910_v39  ;;  %v12652_v15 = vunpack.c.l.bf16 %v12910_v39 }
0x1972   : > { %14010 = vmatpush3.msra.mxu1 %v12636_v27  ;;  %v11712_v27 = vld [vmem:[%s20271_s15 + $0x58] sm:$0xff] }
0x1973   : > { %14011 = vmatprep.subr.mxu1 %v12633_v16 }
0x1974   : > { %14012 = vmatpush3.msra.mxu1 %v12633_v16  ;;  %v12909_v16 = vld [vmem:[#allocation4 + $0x68] sm:$0xff]  }
0x1975   : > { %14013 = vmatprep.subr.mxu1 %v12632_v59 }
0x1976   : > { %14014 = vmatpush3.msra.mxu1 %v12632_v59  ;;  %v12649_v59 = vunpack.c.h.bf16 %v12909_v16 }
0x1977   : > { %14015 = vmatprep.subr.mxu1 %v12629_v43 }
0x1978   : > { %14016 = vmatpush3.msra.mxu1 %v12629_v43  ;;  %v12643_v43 = vld [vmem:[#allocation4 + $0x60] sm:$0xff]  }
0x1979   : > { %14017 = vmatprep.subr.mxu1 %v12628_v7  ;;  %v12645_v5 = vunpack.c.h.bf16 %v12643_v43 }
0x197a   : > { %14018 = vmatpush3.msra.mxu1 %v12628_v7  ;;  %v12648_v7 = vunpack.c.l.bf16 %v12909_v16 }
0x197b   : > { %14020 = vmatmul.mubr.msk.f32.vlgmr.msra.gmra.mxu1 %vm5049_vm3, %v18377_v48 }
0x197c   : > { %14022 = vmatprep.mubr.msk.f32.mxu1 %vm5049_vm3, %v18387_v51 }
0x197f   : > { %14023 = vmatmul.mubr.msk.f32.gmra.mxu1 %vm5049_vm3, %v18389_v53 }
0x1a2a   : > { %v13985_v18 = vpop.f32.mrf.mxu1  ;;  %v13999_v11 = vpop.f32.mrf.mxu0 }
0x1a2b   : > { %v7477_v24 = vadd.f32 %v13999_v11, %v13985_v18  ;;  %v12644_v18 = vunpack.c.l.bf16 %v12643_v43  ;;  %v11721_v11 = vld [vmem:[%s20271_s15 + $0x60] sm:$0xff]  ;;  %v11724_v43 = vld [vmem:[%s20271_s15 + $0x78] sm:$0xff] }
0x1a2c   : > { %v7374_v21 = vpop.f32.mrf.mxu1  ;;  %v7471_v35 = vpop.f32.mrf.mxu0  ;;  %14069 = vmatprep.mubr.msk.f32.mxu1 %vm7295_vm5, %v11721_v11  ;;  %v12659_v11 = vld [vmem:[#allocation4 + $0x80] sm:$0xff]  }
0x1a2e   : > { %v14002_v3 = vpop.f32.mrf.mxu0 }
0x1a2f   : > { %v13988_v42 = vpop.f32.mrf.mxu1 }
0x1a30   : > { %v7487_v60 = vadd.f32 %v14002_v3, %v13988_v42  ;;  %v7481_v42 = vpop.f32.mrf.mxu0 }
0x1a31   : > { %v7384_v33 = vpop.f32.mrf.mxu1 }
0x1a3b   : > { %v14021_v45 = vpop.f32.mrf.mxu1 }
0x1a3d   : > { %v7573_v6 = vpop.f32.mrf.mxu1 }
0x1a3f   : > { %v14024_v63 = vpop.f32.mrf.mxu1 }
0x1a40   : > { %14025 = vmatprep.subr.mxu0 %v14024_v63 }
0x1a41   : > { %v7583_v57 = vpop.f32.mrf.mxu1  ;;  %14026 = vmatpush3.msra.mxu0 %v14024_v63 }
0x1a42   : > { %14027 = vmatprep.subr.mxu0 %v7583_v57 }
0x1a43   : > { %14028 = vmatpush3.msra.mxu0 %v7583_v57 }
0x1a44   : > { %14029 = vmatprep.subr.mxu0 %v14021_v45 }
0x1a45   : > { %14030 = vmatpush3.msra.mxu0 %v14021_v45  ;;  %v7472_v45 = vadd.f32 %v7471_v35, %v7374_v21  ;;  %v12913_v21 = vld [vmem:[#allocation4 + $0x90] sm:$0xff]  }
0x1a46   : > { %14031 = vmatprep.subr.mxu0 %v7573_v6 }
0x1a47   : > { %14032 = vmatpush3.msra.mxu0 %v7573_v6 }
0x1a48   : > { %14034 = vmatmul.mubr.msk.f32.vlgmr.msra.gmra.mxu0 %vm7295_vm5, %v11710_v9  ;;  %14039 = vmatprep.subr.mxu0 %v12657_v28 }
0x1a49   : > { %14040 = vmatpush3.msra.mxu0 %v12657_v28  ;;  %14036 = vmatprep.mubr.msk.f32.mxu0 %vm7295_vm5, %v11711_v19  ;;  %v7482_v28 = vadd.f32 %v7481_v42, %v7384_v33  ;;  %v12669_v33 = vunpack.c.h.bf16 %v12913_v21 }
0x1a4a   : > { %14041 = vmatprep.subr.mxu0 %v12656_v36 }
0x1a4b   : > { %14042 = vmatpush3.msra.mxu0 %v12656_v36 }
0x1a4c   : > { %14037 = vmatmul.mubr.msk.f32.gmra.mxu0 %vm7295_vm5, %v11712_v27  ;;  %14043 = vmatprep.subr.mxu0 %v12653_v54 }
0x1a4d   : > { %14044 = vmatpush3.msra.mxu0 %v12653_v54  ;;  %14055 = vmatprep.mubr.msk.f32.mxu0 %vm5049_vm3, %v18375_v1 }
0x1a4e   : > { %14045 = vmatprep.subr.mxu0 %v12652_v15 }
0x1a4f   : > { %14046 = vmatpush3.msra.mxu0 %v12652_v15  ;;  %v12914_v15 = vld [vmem:[#allocation4 + $0x98] sm:$0xff]  }
0x1a50   : > { %14047 = vmatprep.subr.mxu0 %v12649_v59  ;;  %v12672_v35 = vunpack.c.l.bf16 %v12914_v15 }
0x1a51   : > { %14048 = vmatpush3.msra.mxu0 %v12649_v59  ;;  %v12673_v59 = vunpack.c.h.bf16 %v12914_v15 }
0x1a52   : > { %14049 = vmatprep.subr.mxu0 %v12648_v7 }
0x1a53   : > { %14050 = vmatpush3.msra.mxu0 %v12648_v7  ;;  %v12912_v7 = vld [vmem:[#allocation4 + $0x88] sm:$0xff]  }
0x1a54   : > { %14051 = vmatprep.subr.mxu0 %v12645_v5  ;;  %v12664_v42 = vunpack.c.l.bf16 %v12912_v7 }
0x1a55   : > { %14052 = vmatpush3.msra.mxu0 %v12645_v5  ;;  %v12668_v5 = vunpack.c.l.bf16 %v12913_v21 }
0x1a56   : > { %14053 = vmatprep.subr.mxu0 %v12644_v18 }
0x1a57   : > { %14054 = vmatpush3.msra.mxu0 %v12644_v18  ;;  %v12665_v18 = vunpack.c.h.bf16 %v12912_v7  ;;  %v11736_v7 = vld [vmem:[%s20271_s15 + $0x98] sm:$0xff] }
0x1a58   : > { %14056 = vmatmul.mubr.msk.f32.vlgmr.msra.gmra.mxu0 %vm5049_vm3, %v18377_v48 }
0x1a59   : > { %14058 = vmatprep.mubr.msk.f32.mxu0 %vm5049_vm3, %v18387_v51 }
0x1a5c   : > { %14059 = vmatmul.mubr.msk.f32.gmra.mxu0 %vm5049_vm3, %v18389_v53 }
0x1b08   : > { %v14035_v3 = vpop.f32.mrf.mxu0 }
0x1b09   : > { %v7695_v6 = vadd.f32 %v14035_v3, %v7477_v24  ;;  %v11722_v24 = vld [vmem:[%s20271_s15 + $0x68] sm:$0xff]  ;;  %v12661_v3 = vunpack.c.h.bf16 %v12659_v11 }
0x1b0a   : > { %v7675_v63 = vpop.f32.mrf.mxu0 }
0x1b0b   : > { %v7694_v57 = vadd.f32 %v7675_v63, %v7472_v45  ;;  %v12660_v45 = vunpack.c.l.bf16 %v12659_v11  ;;  %v11733_v63 = vld [vmem:[%s20271_s15 + $0x80] sm:$0xff] }
0x1b0c   : > { %v14038_v47 = vpop.f32.mrf.mxu0  ;;  %14105 = vmatprep.mubr.msk.f32.mxu0 %vm7295_vm5, %v11733_v63 }
0x1b0d   : > { %v7697_v9 = vadd.f32 %v14038_v47, %v7487_v60  ;;  %v11723_v60 = vld [vmem:[%s20271_s15 + $0x70] sm:$0xff] }
0x1b0e   : > { %v7685_v39 = vpop.f32.mrf.mxu0 }
0x1b0f   : > { %v7696_v36 = vadd.f32 %v7685_v39, %v7482_v28 }
0x1b18   : > { %v14057_v19 = vpop.f32.mrf.mxu0 }
0x1b1a   : > { %v7781_v54 = vpop.f32.mrf.mxu0 }
0x1b1c   : > { %v14060_v27 = vpop.f32.mrf.mxu0 }
0x1b1d   : > { %14061 = vmatprep.subr.mxu1 %v14060_v27 }
0x1b1e   : > { %v7791_v16 = vpop.f32.mrf.mxu0  ;;  %14062 = vmatpush3.msra.mxu1 %v14060_v27 }
0x1b1f   : > { %14063 = vmatprep.subr.mxu1 %v7791_v16 }
0x1b20   : > { %14064 = vmatpush3.msra.mxu1 %v7791_v16 }
0x1b21   : > { %14065 = vmatprep.subr.mxu1 %v14057_v19 }
0x1b22   : > { %14066 = vmatpush3.msra.mxu1 %v14057_v19 }
0x1b23   : > { %14067 = vmatprep.subr.mxu1 %v7781_v54 }
0x1b24   : > { %14068 = vmatpush3.msra.mxu1 %v7781_v54 }
0x1b25   : > { %14070 = vmatmul.mubr.msk.f32.vlgmr.msra.gmra.mxu1 %vm7295_vm5, %v11722_v24  ;;  %14075 = vmatprep.subr.mxu1 %v12673_v59 }
0x1b26   : > { %14076 = vmatpush3.msra.mxu1 %v12673_v59  ;;  %14072 = vmatprep.mubr.msk.f32.mxu1 %vm7295_vm5, %v11723_v60  ;;  %v12917_v60 = vld [vmem:[#allocation4 + $0xb8] sm:$0xff]  }
0x1b27   : > { %14077 = vmatprep.subr.mxu1 %v12672_v35 }
0x1b28   : > { %14078 = vmatpush3.msra.mxu1 %v12672_v35 }
0x1b29   : > { %14073 = vmatmul.mubr.msk.f32.gmra.mxu1 %vm7295_vm5, %v11724_v43  ;;  %14079 = vmatprep.subr.mxu1 %v12669_v33 }
0x1b2a   : > { %14080 = vmatpush3.msra.mxu1 %v12669_v33  ;;  %14091 = vmatprep.mubr.msk.f32.mxu1 %vm5049_vm3, %v18375_v1  ;;  %v12689_v33 = vunpack.c.h.bf16 %v12917_v60 }
0x1b2b   : > { %14081 = vmatprep.subr.mxu1 %v12668_v5 }
0x1b2c   : > { %14082 = vmatpush3.msra.mxu1 %v12668_v5  ;;  %v12915_v5 = vld [vmem:[#allocation4 + $0xa8] sm:$0xff]  }
0x1b2d   : > { %14083 = vmatprep.subr.mxu1 %v12665_v18  ;;  %v12681_v11 = vunpack.c.h.bf16 %v12915_v5 }
0x1b2e   : > { %14084 = vmatpush3.msra.mxu1 %v12665_v18 }
0x1b2f   : > { %14085 = vmatprep.subr.mxu1 %v12664_v42 }
0x1b30   : > { %14086 = vmatpush3.msra.mxu1 %v12664_v42  ;;  %v12675_v42 = vld [vmem:[#allocation4 + $0xa0] sm:$0xff]  }
0x1b31   : > { %14087 = vmatprep.subr.mxu1 %v12661_v3  ;;  %v12676_v63 = vunpack.c.l.bf16 %v12675_v42 }
0x1b32   : > { %14088 = vmatpush3.msra.mxu1 %v12661_v3  ;;  %v12680_v3 = vunpack.c.l.bf16 %v12915_v5  ;;  %v11748_v5 = vld [vmem:[%s20271_s15 + $0xb8] sm:$0xff] }
0x1b33   : > { %14089 = vmatprep.subr.mxu1 %v12660_v45 }
0x1b34   : > { %14090 = vmatpush3.msra.mxu1 %v12660_v45  ;;  %v12677_v45 = vunpack.c.h.bf16 %v12675_v42 }
0x1b35   : > { %14092 = vmatmul.mubr.msk.f32.vlgmr.msra.gmra.mxu1 %vm5049_vm3, %v18377_v48 }
0x1b36   : > { %14094 = vmatprep.mubr.msk.f32.mxu1 %vm5049_vm3, %v18387_v51 }
0x1b39   : > { %14095 = vmatmul.mubr.msk.f32.gmra.mxu1 %vm5049_vm3, %v18389_v53 }
0x1be5   : > { %v14071_v47 = vpop.f32.mrf.mxu1 }
0x1be6   : > { %v7903_v28 = vadd.f32 %v14071_v47, %v7695_v6  ;;  %v11734_v6 = vld [vmem:[%s20271_s15 + $0x88] sm:$0xff]  ;;  %v11745_v47 = vld [vmem:[%s20271_s15 + $0xa0] sm:$0xff] }
0x1be7   : > { %v7883_v39 = vpop.f32.mrf.mxu1  ;;  %14141 = vmatprep.mubr.msk.f32.mxu1 %vm7295_vm5, %v11745_v47 }
0x1be8   : > { %v7902_v19 = vadd.f32 %v7883_v39, %v7694_v57  ;;  %v12916_v57 = vld [vmem:[#allocation4 + $0xb0] sm:$0xff]  }
0x1be9   : > { %v14074_v54 = vpop.f32.mrf.mxu1  ;;  %v12685_v43 = vunpack.c.h.bf16 %v12916_v57  ;;  %v12684_v18 = vunpack.c.l.bf16 %v12916_v57 }
0x1bea   : > { %v7905_v27 = vadd.f32 %v14074_v54, %v7697_v9  ;;  %v12688_v9 = vunpack.c.l.bf16 %v12917_v60 }
0x1beb   : > { %v7893_v16 = vpop.f32.mrf.mxu1 }
0x1bec   : > { %v7904_v15 = vadd.f32 %v7893_v16, %v7696_v36  ;;  %v11735_v36 = vld [vmem:[%s20271_s15 + $0x90] sm:$0xff] }
0x1bf5   : > { %v14093_v59 = vpop.f32.mrf.mxu1 }
0x1bf7   : > { %v7989_v24 = vpop.f32.mrf.mxu1 }
0x1bf9   : > { %v14096_v21 = vpop.f32.mrf.mxu1 }
0x1bfa   : > { %14097 = vmatprep.subr.mxu0 %v14096_v21 }
0x1bfb   : > { %v7999_v35 = vpop.f32.mrf.mxu1  ;;  %14098 = vmatpush3.msra.mxu0 %v14096_v21 }
0x1bfc   : > { %14099 = vmatprep.subr.mxu0 %v7999_v35 }
0x1bfd   : > { %14100 = vmatpush3.msra.mxu0 %v7999_v35 }
0x1bfe   : > { %14101 = vmatprep.subr.mxu0 %v14093_v59 }
0x1bff   : > { %14102 = vmatpush3.msra.mxu0 %v14093_v59 }
0x1c00   : > { %14103 = vmatprep.subr.mxu0 %v7989_v24 }
0x1c01   : > { %14104 = vmatpush3.msra.mxu0 %v7989_v24 }
0x1c02   : > { %14106 = vmatmul.mubr.msk.f32.vlgmr.msra.gmra.mxu0 %vm7295_vm5, %v11734_v6  ;;  %14111 = vmatprep.subr.mxu0 %v12689_v33 }
0x1c03   : > { %14112 = vmatpush3.msra.mxu0 %v12689_v33  ;;  %14108 = vmatprep.mubr.msk.f32.mxu0 %vm7295_vm5, %v11735_v36  ;;  %v12920_v36 = vld [vmem:[#allocation4 + $0xd8] sm:$0xff]  }
0x1c04   : > { %14113 = vmatprep.subr.mxu0 %v12688_v9 }
0x1c05   : > { %14114 = vmatpush3.msra.mxu0 %v12688_v9 }
0x1c06   : > { %14109 = vmatmul.mubr.msk.f32.gmra.mxu0 %vm7295_vm5, %v11736_v7  ;;  %14115 = vmatprep.subr.mxu0 %v12685_v43 }
0x1c07   : > { %14116 = vmatpush3.msra.mxu0 %v12685_v43  ;;  %14127 = vmatprep.mubr.msk.f32.mxu0 %vm5049_vm3, %v18375_v1  ;;  %v12705_v43 = vunpack.c.h.bf16 %v12920_v36 }
0x1c08   : > { %14117 = vmatprep.subr.mxu0 %v12684_v18 }
0x1c09   : > { %14118 = vmatpush3.msra.mxu0 %v12684_v18  ;;  %v12918_v18 = vld [vmem:[#allocation4 + $0xc8] sm:$0xff]  }
0x1c0a   : > { %14119 = vmatprep.subr.mxu0 %v12681_v11  ;;  %v12697_v42 = vunpack.c.h.bf16 %v12918_v18 }
0x1c0b   : > { %14120 = vmatpush3.msra.mxu0 %v12681_v11 }
0x1c0c   : > { %14121 = vmatprep.subr.mxu0 %v12680_v3 }
0x1c0d   : > { %14122 = vmatpush3.msra.mxu0 %v12680_v3  ;;  %v12691_v3 = vld [vmem:[#allocation4 + $0xc0] sm:$0xff]  }
0x1c0e   : > { %14123 = vmatprep.subr.mxu0 %v12677_v45  ;;  %v12692_v47 = vunpack.c.l.bf16 %v12691_v3 }
0x1c0f   : > { %14124 = vmatpush3.msra.mxu0 %v12677_v45  ;;  %v12696_v45 = vunpack.c.l.bf16 %v12918_v18  ;;  %v11760_v18 = vld [vmem:[%s20271_s15 + $0xd8] sm:$0xff] }
0x1c10   : > { %14125 = vmatprep.subr.mxu0 %v12676_v63 }
0x1c11   : > { %14126 = vmatpush3.msra.mxu0 %v12676_v63  ;;  %v12693_v63 = vunpack.c.h.bf16 %v12691_v3 }
0x1c12   : > { %14128 = vmatmul.mubr.msk.f32.vlgmr.msra.gmra.mxu0 %vm5049_vm3, %v18377_v48 }
0x1c13   : > { %14130 = vmatprep.mubr.msk.f32.mxu0 %vm5049_vm3, %v18387_v51 }
0x1c16   : > { %14131 = vmatmul.mubr.msk.f32.gmra.mxu0 %vm5049_vm3, %v18389_v53 }
0x1cc2   : > { %v14107_v39 = vpop.f32.mrf.mxu0 }
0x1cc3   : > { %v8111_v54 = vadd.f32 %v14107_v39, %v7903_v28  ;;  %v11746_v28 = vld [vmem:[%s20271_s15 + $0xa8] sm:$0xff]  ;;  %v11757_v39 = vld [vmem:[%s20271_s15 + $0xc0] sm:$0xff] }
0x1cc4   : > { %v8091_v16 = vpop.f32.mrf.mxu0  ;;  %14177 = vmatprep.mubr.msk.f32.mxu0 %vm7295_vm5, %v11757_v39 }
0x1cc5   : > { %v8110_v59 = vadd.f32 %v8091_v16, %v7902_v19  ;;  %v12919_v19 = vld [vmem:[#allocation4 + $0xd0] sm:$0xff]  }
0x1cc6   : > { %v14110_v24 = vpop.f32.mrf.mxu0  ;;  %v12701_v7 = vunpack.c.h.bf16 %v12919_v19  ;;  %v12700_v11 = vunpack.c.l.bf16 %v12919_v19 }
0x1cc7   : > { %v8113_v21 = vadd.f32 %v14110_v24, %v7905_v27  ;;  %v12704_v27 = vunpack.c.l.bf16 %v12920_v36 }
0x1cc8   : > { %v8101_v35 = vpop.f32.mrf.mxu0 }
0x1cc9   : > { %v8112_v60 = vadd.f32 %v8101_v35, %v7904_v15  ;;  %v11747_v15 = vld [vmem:[%s20271_s15 + $0xb0] sm:$0xff] }
0x1cd2   : > { %v14129_v33 = vpop.f32.mrf.mxu0 }
0x1cd4   : > { %v8197_v6 = vpop.f32.mrf.mxu0 }
0x1cd6   : > { %v14132_v57 = vpop.f32.mrf.mxu0 }
0x1cd7   : > { %14133 = vmatprep.subr.mxu1 %v14132_v57 }
0x1cd8   : > { %v8207_v9 = vpop.f32.mrf.mxu0  ;;  %14134 = vmatpush3.msra.mxu1 %v14132_v57 }
0x1cd9   : > { %14135 = vmatprep.subr.mxu1 %v8207_v9 }
0x1cda   : > { %14136 = vmatpush3.msra.mxu1 %v8207_v9 }
0x1cdb   : > { %14137 = vmatprep.subr.mxu1 %v14129_v33 }
0x1cdc   : > { %14138 = vmatpush3.msra.mxu1 %v14129_v33 }
0x1cdd   : > { %14139 = vmatprep.subr.mxu1 %v8197_v6 }
0x1cde   : > { %14140 = vmatpush3.msra.mxu1 %v8197_v6 }
0x1cdf   : > { %14142 = vmatmul.mubr.msk.f32.vlgmr.msra.gmra.mxu1 %vm7295_vm5, %v11746_v28  ;;  %14147 = vmatprep.subr.mxu1 %v12705_v43 }
0x1ce0   : > { %14148 = vmatpush3.msra.mxu1 %v12705_v43  ;;  %14144 = vmatprep.mubr.msk.f32.mxu1 %vm7295_vm5, %v11747_v15  ;;  %v12923_v15 = vld [vmem:[#allocation4 + $0xf8] sm:$0xff]  }
0x1ce1   : > { %14149 = vmatprep.subr.mxu1 %v12704_v27 }
0x1ce2   : > { %14150 = vmatpush3.msra.mxu1 %v12704_v27 }
0x1ce3   : > { %14145 = vmatmul.mubr.msk.f32.gmra.mxu1 %vm7295_vm5, %v11748_v5  ;;  %14151 = vmatprep.subr.mxu1 %v12701_v7 }
0x1ce4   : > { %14152 = vmatpush3.msra.mxu1 %v12701_v7  ;;  %14163 = vmatprep.mubr.msk.f32.mxu1 %vm5049_vm3, %v18375_v1  ;;  %v12721_v7 = vunpack.c.h.bf16 %v12923_v15 }
0x1ce5   : > { %14153 = vmatprep.subr.mxu1 %v12700_v11 }
0x1ce6   : > { %14154 = vmatpush3.msra.mxu1 %v12700_v11  ;;  %v12921_v11 = vld [vmem:[#allocation4 + $0xe8] sm:$0xff]  }
0x1ce7   : > { %14155 = vmatprep.subr.mxu1 %v12697_v42  ;;  %v12713_v3 = vunpack.c.h.bf16 %v12921_v11 }
0x1ce8   : > { %14156 = vmatpush3.msra.mxu1 %v12697_v42 }
0x1ce9   : > { %14157 = vmatprep.subr.mxu1 %v12696_v45 }
0x1cea   : > { %14158 = vmatpush3.msra.mxu1 %v12696_v45  ;;  %v12707_v45 = vld [vmem:[#allocation4 + $0xe0] sm:$0xff]  }
0x1ceb   : > { %14159 = vmatprep.subr.mxu1 %v12693_v63  ;;  %v12708_v39 = vunpack.c.l.bf16 %v12707_v45 }
0x1cec   : > { %14160 = vmatpush3.msra.mxu1 %v12693_v63  ;;  %v12712_v63 = vunpack.c.l.bf16 %v12921_v11  ;;  %v11772_v11 = vld [vmem:[%s20271_s15 + $0xf8] sm:$0xff] }
0x1ced   : > { %14161 = vmatprep.subr.mxu1 %v12692_v47 }
0x1cee   : > { %14162 = vmatpush3.msra.mxu1 %v12692_v47  ;;  %v12709_v47 = vunpack.c.h.bf16 %v12707_v45 }
0x1cef   : > { %14164 = vmatmul.mubr.msk.f32.vlgmr.msra.gmra.mxu1 %vm5049_vm3, %v18377_v48 }
0x1cf0   : > { %14166 = vmatprep.mubr.msk.f32.mxu1 %vm5049_vm3, %v18387_v51 }
0x1cf3   : > { %14167 = vmatmul.mubr.msk.f32.gmra.mxu1 %vm5049_vm3, %v18389_v53 }
0x1d9f   : > { %v14143_v16 = vpop.f32.mrf.mxu1 }
0x1da0   : > { %v8319_v24 = vadd.f32 %v14143_v16, %v8111_v54  ;;  %v11758_v54 = vld [vmem:[%s20271_s15 + $0xc8] sm:$0xff]  ;;  %v11769_v16 = vld [vmem:[%s20271_s15 + $0xe0] sm:$0xff] }
0x1da1   : > { %v8299_v35 = vpop.f32.mrf.mxu1  ;;  %14213 = vmatprep.mubr.msk.f32.mxu1 %vm7295_vm5, %v11769_v16 }
0x1da2   : > { %v8318_v33 = vadd.f32 %v8299_v35, %v8110_v59  ;;  %v12922_v59 = vld [vmem:[#allocation4 + $0xf0] sm:$0xff]  }
0x1da3   : > { %v14146_v6 = vpop.f32.mrf.mxu1  ;;  %v12717_v5 = vunpack.c.h.bf16 %v12922_v59  ;;  %v12716_v42 = vunpack.c.l.bf16 %v12922_v59 }
0x1da4   : > { %v8321_v57 = vadd.f32 %v14146_v6, %v8113_v21  ;;  %v12720_v21 = vunpack.c.l.bf16 %v12923_v15 }
0x1da5   : > { %v8309_v9 = vpop.f32.mrf.mxu1 }
0x1da6   : > { %v8320_v36 = vadd.f32 %v8309_v9, %v8112_v60  ;;  %v11759_v60 = vld [vmem:[%s20271_s15 + $0xd0] sm:$0xff] }
0x1daf   : > { %v14165_v43 = vpop.f32.mrf.mxu1 }
0x1db1   : > { %v8405_v28 = vpop.f32.mrf.mxu1 }
0x1db3   : > { %v14168_v19 = vpop.f32.mrf.mxu1 }
0x1db4   : > { %14169 = vmatprep.subr.mxu0 %v14168_v19 }
0x1db5   : > { %v8415_v27 = vpop.f32.mrf.mxu1  ;;  %14170 = vmatpush3.msra.mxu0 %v14168_v19 }
0x1db6   : > { %14171 = vmatprep.subr.mxu0 %v8415_v27 }
0x1db7   : > { %14172 = vmatpush3.msra.mxu0 %v8415_v27 }
0x1db8   : > { %14173 = vmatprep.subr.mxu0 %v14165_v43 }
0x1db9   : > { %14174 = vmatpush3.msra.mxu0 %v14165_v43 }
0x1dba   : > { %14175 = vmatprep.subr.mxu0 %v8405_v28 }
0x1dbb   : > { %14176 = vmatpush3.msra.mxu0 %v8405_v28 }
0x1dbc   : > { %14178 = vmatmul.mubr.msk.f32.vlgmr.msra.gmra.mxu0 %vm7295_vm5, %v11758_v54  ;;  %14183 = vmatprep.subr.mxu0 %v12721_v7 }
0x1dbd   : > { %14184 = vmatpush3.msra.mxu0 %v12721_v7  ;;  %14180 = vmatprep.mubr.msk.f32.mxu0 %vm7295_vm5, %v11759_v60  ;;  %v12926_v60 = vld [vmem:[#allocation4 + $0x118] sm:$0xff]  }
0x1dbe   : > { %14185 = vmatprep.subr.mxu0 %v12720_v21 }
0x1dbf   : > { %14186 = vmatpush3.msra.mxu0 %v12720_v21 }
0x1dc0   : > { %14181 = vmatmul.mubr.msk.f32.gmra.mxu0 %vm7295_vm5, %v11760_v18  ;;  %14187 = vmatprep.subr.mxu0 %v12717_v5 }
0x1dc1   : > { %14188 = vmatpush3.msra.mxu0 %v12717_v5  ;;  %14199 = vmatprep.mubr.msk.f32.mxu0 %vm5049_vm3, %v18375_v1  ;;  %v11771_v5 = vld [vmem:[%s20271_s15 + $0xf0] sm:$0xff] }
0x1dc2   : > { %14189 = vmatprep.subr.mxu0 %v12716_v42 }
0x1dc3   : > { %14190 = vmatpush3.msra.mxu0 %v12716_v42  ;;  %v12924_v42 = vld [vmem:[#allocation4 + $0x108] sm:$0xff]  }
0x1dc4   : > { %14191 = vmatprep.subr.mxu0 %v12713_v3  ;;  %v12729_v45 = vunpack.c.h.bf16 %v12924_v42 }
0x1dc5   : > { %14192 = vmatpush3.msra.mxu0 %v12713_v3 }
0x1dc6   : > { %14193 = vmatprep.subr.mxu0 %v12712_v63 }
0x1dc7   : > { %14194 = vmatpush3.msra.mxu0 %v12712_v63  ;;  %v12723_v63 = vld [vmem:[#allocation4 + $0x100] sm:$0xff]  }
0x1dc8   : > { %14195 = vmatprep.subr.mxu0 %v12709_v47  ;;  %v12724_v16 = vunpack.c.l.bf16 %v12723_v63 }
0x1dc9   : > { %14196 = vmatpush3.msra.mxu0 %v12709_v47  ;;  %v12728_v47 = vunpack.c.l.bf16 %v12924_v42 }
0x1dca   : > { %14197 = vmatprep.subr.mxu0 %v12708_v39 }
0x1dcb   : > { %14198 = vmatpush3.msra.mxu0 %v12708_v39  ;;  %v12725_v39 = vunpack.c.h.bf16 %v12723_v63 }
0x1dcc   : > { %14200 = vmatmul.mubr.msk.f32.vlgmr.msra.gmra.mxu0 %vm5049_vm3, %v18377_v48 }
0x1dcd   : > { %14202 = vmatprep.mubr.msk.f32.mxu0 %vm5049_vm3, %v18387_v51 }
0x1dd0   : > { %14203 = vmatmul.mubr.msk.f32.gmra.mxu0 %vm5049_vm3, %v18389_v53 }
0x1e7c   : > { %v14179_v35 = vpop.f32.mrf.mxu0 }
0x1e7d   : > { %v18563_v6 = vadd.f32 %v14179_v35, %v8319_v24  ;;  %v12737_v24 = vunpack.c.h.bf16 %v12926_v60  ;;  %v9114_v35 = vld [vmem:[%s21655_s7 + $0x38] sm:$0xff] }
0x1e7e   : > { %v8507_v9 = vpop.f32.mrf.mxu0 }
0x1e7f   : > { %v18565_v43 = vadd.f32 %v8507_v9, %v8318_v33  ;;  %v11770_v33 = vld [vmem:[%s20271_s15 + $0xe8] sm:$0xff]  ;;  %v9130_v9 = vunpack.c.h.bf16 %v9114_v35 }
0x1e80   : > { %v14182_v28 = vpop.f32.mrf.mxu0 }
0x1e81   : > { %v18567_v19 = vadd.f32 %v14182_v28, %v8321_v57  ;;  %v12925_v57 = vld [vmem:[#allocation4 + $0x110] sm:$0xff]  }
0x1e82   : > { %v8517_v27 = vpop.f32.mrf.mxu0  ;;  %v12733_v18 = vunpack.c.h.bf16 %v12925_v57  ;;  %v12732_v3 = vunpack.c.l.bf16 %v12925_v57 }
0x1e83   : > { %v18569_v15 = vadd.f32 %v8517_v27, %v8320_v36  ;;  %v12736_v36 = vunpack.c.l.bf16 %v12926_v60 }
0x1e8c   : > { %v14201_v7 = vpop.f32.mrf.mxu0 }
0x1e8e   : > { %v8613_v54 = vpop.f32.mrf.mxu0 }
0x1e90   : > { %v14204_v59 = vpop.f32.mrf.mxu0 }
0x1e91   : > { %14205 = vmatprep.subr.mxu1 %v14204_v59 }
0x1e92   : > { %v8623_v21 = vpop.f32.mrf.mxu0  ;;  %14206 = vmatpush3.msra.mxu1 %v14204_v59 }
0x1e93   : > { %14207 = vmatprep.subr.mxu1 %v8623_v21 }
0x1e94   : > { %14208 = vmatpush3.msra.mxu1 %v8623_v21 }
0x1e95   : > { %14209 = vmatprep.subr.mxu1 %v14201_v7 }
0x1e96   : > { %14210 = vmatpush3.msra.mxu1 %v14201_v7  ;;  %v9111_v7 = vld [vmem:[%s21655_s7 + $0x20] sm:$0xff] }
0x1e97   : > { %14211 = vmatprep.subr.mxu1 %v8613_v54  ;;  %v9124_v21 = vunpack.c.h.bf16 %v9111_v7  ;;  %v9123_v60 = vunpack.c.l.bf16 %v9111_v7  ;;  %v21669_v7 = vunpack.c.l.bf16 %v14697_v32 }
0x1e98   : > { %14212 = vmatpush3.msra.mxu1 %v8613_v54 }
0x1e99   : > { %14214 = vmatmul.mubr.msk.f32.vlgmr.msra.gmra.mxu1 %vm7295_vm5, %v11770_v33  ;;  %14219 = vmatprep.subr.mxu1 %v12737_v24 }
0x1e9a   : > { %14220 = vmatpush3.msra.mxu1 %v12737_v24  ;;  %14216 = vmatprep.mubr.msk.f32.mxu1 %vm7295_vm5, %v11771_v5 }
0x1e9b   : > { %14221 = vmatprep.subr.mxu1 %v12736_v36 }
0x1e9c   : > { %14222 = vmatpush3.msra.mxu1 %v12736_v36 }
0x1e9d   : > { %14217 = vmatmul.mubr.msk.f32.gmra.mxu1 %vm7295_vm5, %v11772_v11  ;;  %14223 = vmatprep.subr.mxu1 %v12733_v18 }
0x1e9e   : > { %14224 = vmatpush3.msra.mxu1 %v12733_v18  ;;  %14235 = vmatprep.mubr.msk.f32.mxu1 %vm5049_vm3, %v18375_v1  ;;  %v11781_v1 = vld [vmem:[%s20271_s15 + $0x100] sm:$0xff] }
0x1e9f   : > { %14225 = vmatprep.subr.mxu1 %v12732_v3  ;;  %14249 = vmatprep.mubr.msk.f32.mxu0 %vm7295_vm5, %v11781_v1  ;;  %v21659_v1 = vunpack.c.l.bf16 %v14603_v2 }
0x1ea0   : > { %14226 = vmatpush3.msra.mxu1 %v12732_v3 }
0x1ea1   : > { %14227 = vmatprep.subr.mxu1 %v12729_v45 }
0x1ea2   : > { %14228 = vmatpush3.msra.mxu1 %v12729_v45 }
0x1ea3   : > { %14229 = vmatprep.subr.mxu1 %v12728_v47 }
0x1ea4   : > { %14230 = vmatpush3.msra.mxu1 %v12728_v47 }
0x1ea5   : > { %14231 = vmatprep.subr.mxu1 %v12725_v39 }
0x1ea6   : > { %14232 = vmatpush3.msra.mxu1 %v12725_v39  ;;  %v8978_v39 = vld [vmem:[%s20273_s17] sm:$0xff] }
0x1ea7   : > { %14233 = vmatprep.subr.mxu1 %v12724_v16 }
0x1ea8   : > { %14234 = vmatpush3.msra.mxu1 %v12724_v16  ;;  %v21658_v16 = vunpack.c.h.bf16 %v14603_v2  ;;  %v21663_v2 = vunpack.c.l.bf16 %v14631_v14 }
0x1ea9   : > { %14236 = vmatmul.mubr.msk.f32.vlgmr.msra.gmra.mxu1 %vm5049_vm3, %v18377_v48  ;;  %v9113_v48 = vld [vmem:[%s21655_s7 + $0x30] sm:$0xff]  ;;  %9159 = vmatprep.subr.mxu1 %v9130_v9  ;;  %v8981_v9 = vld [vmem:[%s20273_s17 + $0x18] sm:$0xff] }
0x1eaa   : > { %14238 = vmatprep.mubr.msk.f32.mxu1 %vm5049_vm3, %v18387_v51  ;;  %v9112_v51 = vld [vmem:[%s21655_s7 + $0x28] sm:$0xff]  ;;  %v9128_v28 = vunpack.c.h.bf16 %v9113_v48  ;;  %v9127_v27 = vunpack.c.l.bf16 %v9113_v48  ;;  %v8980_v48 = vld [vmem:[%s20273_s17 + $0x10] sm:$0xff] }
0x1eab   : > { %v9126_v54 = vunpack.c.h.bf16 %v9112_v51  ;;  %v9125_v59 = vunpack.c.l.bf16 %v9112_v51  ;;  %v21662_v51 = vunpack.c.h.bf16 %v14631_v14  ;;  %v21667_v14 = vunpack.c.l.bf16 %v14675_v26 }
0x1ead   : > { %14239 = vmatmul.mubr.msk.f32.gmra.mxu1 %vm5049_vm3, %v18389_v53  ;;  %v9129_v53 = vunpack.c.l.bf16 %v9114_v35  ;;  %v21660_v35 = vunpack.c.h.bf16 %v14617_v8 }
0x1eae   : > { %9207 = vmatprep.mubr.f32.mxu1 %v21212_v31 }
0x1eaf   : > { %9160 = vmatpush1.msra.mxu1 %v9129_v53  ;;  %v21664_v53 = vunpack.c.h.bf16 %v14653_v20 }
0x1eb0   : > { %9161 = vmatprep.subr.mxu1 %v9128_v28  ;;  %v21666_v28 = vunpack.c.h.bf16 %v14675_v26  ;;  %v21673_v26 = vunpack.c.l.bf16 %v14741_v44 }
0x1eb1   : > { %9162 = vmatpush1.msra.mxu1 %v9127_v27  ;;  %v21668_v27 = vunpack.c.h.bf16 %v14697_v32  ;;  %v21676_v32 = vunpack.c.h.bf16 %v14785_v56 }
0x1eb2   : > { %9163 = vmatprep.subr.mxu1 %v9126_v54  ;;  %v21670_v54 = vunpack.c.h.bf16 %v14719_v38 }
0x1eb3   : > { %9164 = vmatpush1.msra.mxu1 %v9125_v59  ;;  %v21672_v59 = vunpack.c.h.bf16 %v14741_v44  ;;  %v21680_v44 = vunpack.c.h.bf16 %v14829_v37 }
0x1eb4   : > { %9165 = vmatprep.subr.mxu1 %v9124_v21  ;;  %v21674_v21 = vunpack.c.h.bf16 %v14763_v50 }
0x1eb5   : > { %9166 = vmatpush1.msra.mxu1 %v9123_v60  ;;  %v21675_v60 = vunpack.c.l.bf16 %v14763_v50  ;;  %v21682_v50 = vunpack.c.h.bf16 %v14851_v25 }
0x1f59   : > { %v14215_v24 = vpop.f32.mrf.mxu1 }
0x1f5a   : > { %v18609_v33 = vadd.f32 %v14215_v24, %v18563_v6  ;;  %v11782_v6 = vld [vmem:[%s20271_s15 + $0x108] sm:$0xff]  ;;  %v21677_v24 = vunpack.c.l.bf16 %v14785_v56  ;;  %v21684_v56 = vunpack.c.h.bf16 %v14873_v13 }
0x1f5b   : > { %v8715_v57 = vpop.f32.mrf.mxu1 }
0x1f5c   : > { %v18612_v36 = vadd.f32 %v8715_v57, %v18565_v43  ;;  %v11783_v43 = vld [vmem:[%s20271_s15 + $0x110] sm:$0xff]  ;;  %v21679_v57 = vunpack.c.l.bf16 %v14807_v62 }
0x1f5d   : > { %v14218_v5 = vpop.f32.mrf.mxu1 }
0x1f5e   : > { %v18615_v18 = vadd.f32 %v14218_v5, %v18567_v19  ;;  %v11784_v19 = vld [vmem:[%s20271_s15 + $0x118] sm:$0xff]  ;;  %v21681_v5 = vunpack.c.l.bf16 %v14829_v37  ;;  %v21688_v37 = vunpack.c.h.bf16 %v14917_v61 }
0x1f5f   : > { %v8725_v11 = vpop.f32.mrf.mxu1 }
0x1f60   : > { %v18618_v42 = vadd.f32 %v8725_v11, %v18569_v15  ;;  %v21656_v15 = vunpack.c.h.bf16 %v14593_v0  ;;  %v21683_v11 = vunpack.c.l.bf16 %v14851_v25  ;;  %v21690_v25 = vunpack.c.h.bf16 %v14939_v41 }
0x1f69   : > { %v14237_v3 = vpop.f32.mrf.mxu1 }
0x1f6b   : > { %v8821_v45 = vpop.f32.mrf.mxu1 }
0x1f6d   : > { %v14240_v63 = vpop.f32.mrf.mxu1 }
0x1f6e   : > { %14241 = vmatprep.subr.mxu0 %v14240_v63 }
0x1f6f   : > { %v8831_v47 = vpop.f32.mrf.mxu1  ;;  %14242 = vmatpush3.msra.mxu0 %v14240_v63  ;;  %v21689_v63 = vunpack.c.l.bf16 %v14917_v61  ;;  %v21696_v61 = vunpack.c.h.bf16 %v15005_v4 }
0x1f70   : > { %14243 = vmatprep.subr.mxu0 %v8831_v47 }
0x1f71   : > { %14244 = vmatpush3.msra.mxu0 %v8831_v47  ;;  %v21691_v47 = vunpack.c.l.bf16 %v14939_v41  ;;  %v21698_v41 = vunpack.c.h.bf16 %v15027_v49 }
0x1f72   : > { %14245 = vmatprep.subr.mxu0 %v14237_v3 }
0x1f73   : > { %14246 = vmatpush3.msra.mxu0 %v14237_v3  ;;  %v21685_v3 = vunpack.c.l.bf16 %v14873_v13  ;;  %v21692_v13 = vunpack.c.h.bf16 %v14961_v29 }
0x1f74   : > { %14247 = vmatprep.subr.mxu0 %v8821_v45 }
0x1f75   : > { %14248 = vmatpush3.msra.mxu0 %v8821_v45  ;;  %v21687_v45 = vunpack.c.l.bf16 %v14895_v55 }
0x1f76   : > { %14250 = vmatmul.mubr.msk.f32.vlgmr.msra.gmra.mxu0 %vm7295_vm5, %v11782_v6  ;;  %9048 = vmatprep.subr.mxu0 %v17945_v23  ;;  %v8979_v23 = vld [vmem:[%s20273_s17 + $0x8] sm:$0xff]  ;;  %v21693_v6 = vunpack.c.l.bf16 %v14961_v29  ;;  %v21700_v29 = vunpack.c.h.bf16 %v15049_v58 }
0x1f77   : > { %9049 = vmatpush1.msra.mxu0 %v17947_v10  ;;  %14252 = vmatprep.mubr.msk.f32.mxu0 %vm7295_vm5, %v11783_v43  ;;  %v21657_v10 = vunpack.c.l.bf16 %v14593_v0  ;;  %v21661_v0 = vunpack.c.l.bf16 %v14617_v8  ;;  %v21665_v8 = vunpack.c.l.bf16 %v14653_v20  ;;  %v21671_v20 = vunpack.c.l.bf16 %v14719_v38 }
0x1f78   : > { %9232 = vmatprep.subr.mxu0 %v21656_v15  ;;  %v21678_v38 = vunpack.c.h.bf16 %v14807_v62  ;;  %v21686_v62 = vunpack.c.h.bf16 %v14895_v55  ;;  %v21694_v55 = vunpack.c.h.bf16 %v14983_v17  ;;  %v21695_v43 = vunpack.c.l.bf16 %v14983_v17 }
0x1f79   : > { %v21699_v15 = vunpack.c.l.bf16 %v15027_v49  ;;  %v21702_v17 = vunpack.c.h.bf16 %v15071_v52  ;;  %v21706_v49 = vunpack.c.h.bf16 %v15116_v40 }
0x1f7a   : > { %14253 = vmatmul.mubr.msk.f32.gmra.mxu0 %vm7295_vm5, %v11784_v19  ;;  %v21697_v19 = vunpack.c.l.bf16 %v15005_v4  ;;  %v21704_v4 = vunpack.c.h.bf16 %v15093_v46 }
0x1f7b   : > { %9082 = vmatprep.mubr.f32.mxu0 %v21212_v31 }
0x1f7e   : > { %11789 = vmatmul.mubr.msk.f32.vlgmr.msra.gmra.mxu0 %vm3307_vm2, %v8978_v39  ;;  %v21701_v39 = vunpack.c.l.bf16 %v15049_v58  ;;  %v21708_v58 = vunpack.c.h.bf16 %v15138_v34 }
0x1f7f   : > { %9088 = vmatprep.mubr.f32.mxu0 %v21212_v31  ;;  %9233 = vmatpush1.msra.mxu0 %v21657_v10  ;;  %v21705_v10 = vunpack.c.l.bf16 %v15093_v46 }
0x1f80   : > { %9234 = vmatprep.subr.mxu0 %v21658_v16  ;;  %v21707_v16 = vunpack.c.l.bf16 %v15116_v40  ;;  %v9109_v40 = vld [vmem:[%s21655_s7 + $0x10] sm:$0xff] }
0x1f81   : > { %9235 = vmatpush1.msra.mxu0 %v21659_v1  ;;  %v21709_v1 = vunpack.c.l.bf16 %v15138_v34  ;;  %v9120_v34 = vunpack.c.h.bf16 %v9109_v40 }
0x1f82   : > { %11790 = vmatmul.mubr.msk.f32.gmra.mxu0 %vm3307_vm2, %v8979_v23  ;;  %9236 = vmatprep.subr.mxu0 %v21660_v35  ;;  %v21703_v23 = vunpack.c.l.bf16 %v15071_v52  ;;  %v9110_v52 = vld [vmem:[%s21655_s7 + $0x18] sm:$0xff]  ;;  %v21710_v35 = vunpack.c.h.bf16 %v15165_v30 }
0x1f83   : > { %9094 = vmatprep.mubr.f32.mxu0 %v21212_v31  ;;  %9237 = vmatpush1.msra.mxu0 %v21661_v0  ;;  %v9122_v46 = vunpack.c.h.bf16 %v9110_v52  ;;  %v9121_v0 = vunpack.c.l.bf16 %v9110_v52 }
0x1f84   : > { %9238 = vmatprep.subr.mxu0 %v21662_v51  ;;  %v21712_v51 = vunpack.c.h.bf16 %v15187_v22 }
0x1f85   : > { %9239 = vmatpush1.msra.mxu0 %v21663_v2  ;;  %9167 = vmatprep.subr.mxu1 %v9122_v46  ;;  %v21713_v2 = vunpack.c.l.bf16 %v15187_v22  ;;  %v9107_v22 = vld [vmem:[%s21655_s7] sm:$0xff]  ;;  %v21743_v46 = vld [vmem:[#allocation17_spill] sm:$0xff] }
0x1f86   : > { %11791 = vmatmul.mubr.msk.f32.gmra.mxu0 %vm3307_vm2, %v8980_v48  ;;  %9240 = vmatprep.subr.mxu0 %v21664_v53  ;;  %v21711_v48 = vunpack.c.l.bf16 %v15165_v30  ;;  %v9119_v53 = vunpack.c.l.bf16 %v9109_v40  ;;  %v9108_v30 = vld [vmem:[%s21655_s7 + $0x8] sm:$0xff]  ;;  %v21746_v40 = vld [vmem:[#allocation18_spill] sm:$0xff] }
0x1f87   : > { %9100 = vmatprep.mubr.f32.mxu0 %v21212_v31  ;;  %9241 = vmatpush1.msra.mxu0 %v21665_v8  ;;  %v9118_v8 = vunpack.c.h.bf16 %v9108_v30 }
0x1f88   : > { %9242 = vmatprep.subr.mxu0 %v21666_v28  ;;  %9168 = vmatpush1.msra.mxu1 %v9121_v0  ;;  %v21715_v28 = vunpack.c.l.bf16 %v15210_v12  ;;  %v21745_v0 = vunpack.c.l.bf16 %v21743_v46 }
0x1f89   : > { %9243 = vmatpush1.msra.mxu0 %v21667_v14  ;;  %9169 = vmatprep.subr.mxu1 %v9120_v34  ;;  %v9117_v14 = vunpack.c.l.bf16 %v9108_v30  ;;  %v21748_v34 = vunpack.c.l.bf16 %v21746_v40 }
0x1f8a   : > { %11792 = vmatmul.mubr.msk.f32.gmra.mxu0 %vm3307_vm2, %v8981_v9  ;;  %9244 = vmatprep.subr.mxu0 %v21668_v27  ;;  %v21714_v9 = vunpack.c.h.bf16 %v15210_v12  ;;  %v21716_v27 = vld [vmem:[#allocation40_spill] sm:$0xff] }
0x1f8b   : > { %9245 = vmatpush1.msra.mxu0 %v21669_v7  ;;  %9170 = vmatpush1.msra.mxu1 %v9119_v53  ;;  %v21717_v7 = vunpack.c.h.bf16 %v21716_v27 }
0x1f8c   : > { %9246 = vmatprep.subr.mxu0 %v21670_v54  ;;  %9171 = vmatprep.subr.mxu1 %v9118_v8  ;;  %v9116_v54 = vunpack.c.h.bf16 %v9107_v22 }
0x1f8d   : > { %9247 = vmatpush1.msra.mxu0 %v21671_v20  ;;  %v21718_v20 = vunpack.c.l.bf16 %v21716_v27  ;;  %9172 = vmatpush1.msra.mxu1 %v9117_v14  ;;  %v21755_v14 = vld [vmem:[#allocation21_spill] sm:$0xff] }
0x1f8e   : > { %9248 = vmatprep.subr.mxu0 %v21672_v59  ;;  %v9115_v59 = vunpack.c.l.bf16 %v9107_v22  ;;  %9173 = vmatprep.subr.mxu1 %v9116_v54  ;;  %v21756_v22 = vunpack.c.h.bf16 %v21755_v14  ;;  %v21757_v27 = vunpack.c.l.bf16 %v21755_v14 }
0x1f8f   : > { %9249 = vmatpush1.msra.mxu0 %v21673_v26  ;;  %v21719_v26 = vld [vmem:[#allocation42_spill] sm:$0xff] }
0x1f90   : > { %9250 = vmatprep.subr.mxu0 %v21674_v21  ;;  %v21720_v21 = vunpack.c.h.bf16 %v21719_v26  ;;  %v21721_v12 = vunpack.c.l.bf16 %v21719_v26  ;;  %9174 = vmatpush1.msra.mxu1 %v9115_v59  ;;  %v21761_v59 = vld [vmem:[#allocation23_spill] sm:$0xff] }
0x1f91   : > { %9251 = vmatpush1.msra.mxu0 %v21675_v60  ;;  %v21722_v60 = vld [vmem:[#allocation10_spill] sm:$0xff]  ;;  %v21762_v26 = vunpack.c.h.bf16 %v21761_v59 }
0x1f92   : > { %9252 = vmatprep.subr.mxu0 %v21676_v32  ;;  %v21723_v32 = vunpack.c.h.bf16 %v21722_v60 }
0x1f93   : > { %9253 = vmatpush1.msra.mxu0 %v21677_v24 }
0x1f94   : > { %9254 = vmatprep.subr.mxu0 %v21678_v38  ;;  %9325 = vmatprep.subr.mxu1 %v21723_v32 }
0x1f95   : > { %9255 = vmatpush1.msra.mxu0 %v21679_v57 }
0x1f96   : > { %9256 = vmatprep.subr.mxu0 %v21680_v44 }
0x1f97   : > { %9257 = vmatpush1.msra.mxu0 %v21681_v5  ;;  %v8953_v5 = vpop.permute.xlu1 %8952 }
0x1f98   : > { %9258 = vmatprep.subr.mxu0 %v21682_v50 }
0x1f99   : > { %9259 = vmatpush1.msra.mxu0 %v21683_v11 }
0x1f9a   : > { %9260 = vmatprep.subr.mxu0 %v21684_v56  ;;  %v8958_v56 = vpop.permute.xlu0 %8957 }
0x1f9b   : > { %9261 = vmatpush1.msra.mxu0 %v21685_v3 }
0x1f9c   : > { %9262 = vmatprep.subr.mxu0 %v21686_v62 }
0x1f9d   : > { %9263 = vmatpush1.msra.mxu0 %v21687_v45 }
0x1f9e   : > { %9264 = vmatprep.subr.mxu0 %v21688_v37 }
0x1f9f   : > { %9265 = vmatpush2.msra.mxu0 %v21689_v63  ;;  %v8963_v63 = vpop.permute.xlu1 %8962 }
0x1fa0   : > { %9266 = vmatprep.subr.mxu0 %v21690_v25  ;;  %v21724_v25 = vunpack.c.l.bf16 %v21722_v60 }
0x1fa1   : > { %9267 = vmatpush2.msra.mxu0 %v21691_v47 }
0x1fa2   : > { %9268 = vmatprep.subr.mxu0 %v21692_v13  ;;  %v21725_v13 = vld [vmem:[#allocation11_spill] sm:$0xff] }
0x1fa3   : > { %9269 = vmatpush2.msra.mxu0 %v21693_v6  ;;  %v21726_v6 = vunpack.c.h.bf16 %v21725_v13 }
0x1fa4   : > { %9270 = vmatprep.subr.mxu0 %v21694_v55  ;;  %v21727_v55 = vunpack.c.l.bf16 %v21725_v13 }
0x1fa5   : > { %9271 = vmatpush2.msra.mxu0 %v21695_v43 }
0x1fa6   : > { %9272 = vmatprep.subr.mxu0 %v21696_v61  ;;  %v8968_v61 = vpop.permute.xlu0 %8967 }
0x1fa7   : > { %9273 = vmatpush2.msra.mxu0 %v21697_v19 }
0x1fa8   : > { %9274 = vmatprep.subr.mxu0 %v21698_v41 }
0x1fa9   : > { %9275 = vmatpush2.msra.mxu0 %v21699_v15  ;;  %v21731_v15 = vld [vmem:[#allocation13_spill] sm:$0xff] }
0x1faa   : > { %9276 = vmatprep.subr.mxu0 %v21700_v29  ;;  %v21732_v29 = vunpack.c.h.bf16 %v21731_v15 }
0x1fab   : > { %9277 = vmatpush2.msra.mxu0 %v21701_v39  ;;  %v21733_v39 = vunpack.c.l.bf16 %v21731_v15 }
0x1fac   : > { %9278 = vmatprep.subr.mxu0 %v21702_v17  ;;  %v21734_v17 = vld [vmem:[#allocation14_spill] sm:$0xff] }
0x1fad   : > { %9279 = vmatpush2.msra.mxu0 %v21703_v23  ;;  %v21735_v23 = vunpack.c.h.bf16 %v21734_v17 }
0x1fae   : > { %9280 = vmatprep.subr.mxu0 %v21704_v4  ;;  %v21736_v4 = vunpack.c.l.bf16 %v21734_v17 }
0x1faf   : > { %9281 = vmatpush2.msra.mxu0 %v21705_v10 }
0x1fb0   : > { %9282 = vmatprep.subr.mxu0 %v21706_v49  ;;  %v21737_v49 = vld [vmem:[#allocation15_spill] sm:$0xff] }
0x1fb1   : > { %9283 = vmatpush2.msra.mxu0 %v21707_v16  ;;  %v21738_v16 = vunpack.c.h.bf16 %v21737_v49 }
0x1fb2   : > { %9284 = vmatprep.subr.mxu0 %v21708_v58  ;;  %v21739_v58 = vunpack.c.l.bf16 %v21737_v49  ;;  %v21800_v49 = vld [vmem:[#allocation36_spill] sm:$0xff] }
0x1fb3   : > { %9285 = vmatpush2.msra.mxu0 %v21709_v1  ;;  %v21740_v1 = vld [vmem:[#allocation16_spill] sm:$0xff] }
0x1fb4   : > { %9286 = vmatprep.subr.mxu0 %v21710_v35  ;;  %v21741_v52 = vunpack.c.h.bf16 %v21740_v1  ;;  %v21742_v35 = vunpack.c.l.bf16 %v21740_v1  ;;  %v21803_v1 = vld [vmem:[#allocation37_spill] sm:$0xff] }
0x1fb5   : > { %9287 = vmatpush2.msra.mxu0 %v21711_v48  ;;  %v21744_v48 = vunpack.c.h.bf16 %v21743_v46  ;;  %v21806_v46 = vld [vmem:[#allocation38_spill] sm:$0xff] }
0x1fb6   : > { %9288 = vmatprep.subr.mxu0 %v21712_v51  ;;  %v21747_v51 = vunpack.c.h.bf16 %v21746_v40  ;;  %v21809_v40 = vld [vmem:[#allocation39_spill] sm:$0xff] }
0x1fb7   : > { %9289 = vmatpush2.msra.mxu0 %v21713_v2  ;;  %v21749_v2 = vld [vmem:[#allocation19_spill] sm:$0xff] }
0x1fb8   : > { %9290 = vmatprep.subr.mxu0 %v21714_v9  ;;  %v21750_v53 = vunpack.c.h.bf16 %v21749_v2  ;;  %v21751_v30 = vunpack.c.l.bf16 %v21749_v2  ;;  %v21752_v9 = vld [vmem:[#allocation20_spill] sm:$0xff]  ;;  %v21812_v2 = vld [vmem:[#allocation41_spill] sm:$0xff] }
0x1fb9   : > { %9291 = vmatpush2.msra.mxu0 %v21715_v28  ;;  %v21753_v8 = vunpack.c.h.bf16 %v21752_v9  ;;  %v21754_v28 = vunpack.c.l.bf16 %v21752_v9  ;;  %v21815_v9 = vld [vmem:[#allocation43_spill] sm:$0xff] }
0x1fba   : > { %9292 = vmatprep.subr.mxu0 %v21717_v7  ;;  %v21758_v7 = vld [vmem:[#allocation22_spill] sm:$0xff] }
0x1fbb   : > { %9293 = vmatpush2.msra.mxu0 %v21718_v20  ;;  %v21759_v54 = vunpack.c.h.bf16 %v21758_v7  ;;  %v21760_v20 = vunpack.c.l.bf16 %v21758_v7 }
0x1fbc   : > { %9294 = vmatprep.subr.mxu0 %v21720_v21  ;;  %v21763_v21 = vunpack.c.l.bf16 %v21761_v59 }
0x1fbd   : > { %9295 = vmatpush2.msra.mxu0 %v21721_v12  ;;  %v21764_v12 = vld [vmem:[#allocation24_spill] sm:$0xff] }
0x1fbe   : > { %v21765_v60 = vunpack.c.h.bf16 %v21764_v12  ;;  %v21766_v32 = vunpack.c.l.bf16 %v21764_v12 }
0x2036   : > { %v14251_v24 = vpop.f32.mrf.mxu0 }
0x2037   : > { %v8943_v57 = vadd.f32 %v14251_v24, %v18609_v33  ;;  %v21767_v24 = vld [vmem:[#allocation25_spill] sm:$0xff] }
0x2038   : > { %v8923_v38 = vpop.f32.mrf.mxu0 }
0x2039   : > { %v8942_v44 = vadd.f32 %v8923_v38, %v18612_v36  ;;  %v8971_v62 = vadd.f32 %v8958_v56, %v8943_v57  ;;  %v21768_v38 = vunpack.c.h.bf16 %v21767_v24  ;;  %v21769_v57 = vunpack.c.l.bf16 %v21767_v24  ;;  %v8994_v24 = vpop.permute.xlu0 %8993 }
0x203a   : > { %v14254_v50 = vpop.f32.mrf.mxu0 }
0x203b   : > { %v8970_v11 = vadd.f32 %v8953_v5, %v8942_v44  ;;  %v8975_v33 = vmax.f32 %v8971_v62, 0.0  ;;  %v8945_v36 = vadd.f32 %v14254_v50, %v18615_v18  ;;  %v21770_v44 = vld [vmem:[#allocation26_spill] sm:$0xff]  ;;  %v21776_v62 = vld [vmem:[#allocation28_spill] sm:$0xff] }
0x203c   : > { %v8933_v3 = vpop.f32.mrf.mxu0  ;;  %v21771_v5 = vunpack.c.h.bf16 %v21770_v44  ;;  %v21772_v50 = vunpack.c.l.bf16 %v21770_v44 }
0x203d   : > { %v8974_v45 = vmax.f32 %v8970_v11, 0.0  ;;  %v8944_v37 = vadd.f32 %v8933_v3, %v18618_v42  ;;  %v21728_v42 = vld [vmem:[#allocation12_spill] sm:$0xff]  ;;  %v8973_v41 = vadd.f32 %v8968_v61, %v8945_v36  ;;  %v21773_v11 = vld [vmem:[#allocation27_spill] sm:$0xff]  ;;  %v21782_v36 = vld [vmem:[#allocation30_spill] sm:$0xff] }
0x203e   : > { %v21729_v43 = vunpack.c.h.bf16 %v21728_v42  ;;  %v21730_v19 = vunpack.c.l.bf16 %v21728_v42  ;;  %v21774_v56 = vunpack.c.h.bf16 %v21773_v11  ;;  %v21775_v3 = vunpack.c.l.bf16 %v21773_v11  ;;  %v9084_v14 = vpop.f32.mrf.mxu0 }
0x203f   : > { %11793 = vmatmul.mubr.msk.f32.vlgmr.msra.gmra.mxu1 %vm5049_vm3, %v8974_v45  ;;  %v8972_v47 = vadd.f32 %v8963_v63, %v8944_v37  ;;  %v8977_v10 = vmax.f32 %v8973_v41, 0.0  ;;  %v21777_v45 = vunpack.c.h.bf16 %v21776_v62  ;;  %v21778_v37 = vunpack.c.l.bf16 %v21776_v62  ;;  %v21779_v63 = vld [vmem:[#allocation29_spill] sm:$0xff] }
0x2040   : > { %9213 = vmatprep.mubr.f32.mxu1 %v21212_v31  ;;  %9326 = vmatpush1.msra.mxu1 %v21724_v25  ;;  %v21780_v25 = vunpack.c.h.bf16 %v21779_v63  ;;  %v21784_v13 = vunpack.c.l.bf16 %v21782_v36  ;;  %v21791_v41 = vld [vmem:[#allocation33_spill] sm:$0xff] }
0x2041   : > { %9327 = vmatprep.subr.mxu1 %v21726_v6  ;;  %v8976_v18 = vmax.f32 %v8972_v47, 0.0  ;;  %v21783_v47 = vunpack.c.h.bf16 %v21782_v36  ;;  %v21785_v6 = vld [vmem:[#allocation31_spill] sm:$0xff]  ;;  %v21793_v15 = vunpack.c.l.bf16 %v21791_v41 }
0x2042   : > { %9328 = vmatpush1.msra.mxu1 %v21727_v55  ;;  %v21786_v55 = vunpack.c.h.bf16 %v21785_v6  ;;  %v21787_v42 = vunpack.c.l.bf16 %v21785_v6 }
0x2043   : > { %11794 = vmatmul.mubr.msk.f32.gmra.mxu1 %vm5049_vm3, %v8975_v33  ;;  %9329 = vmatprep.subr.mxu1 %v21729_v43  ;;  %v21781_v33 = vunpack.c.l.bf16 %v21779_v63  ;;  %v21788_v43 = vld [vmem:[#allocation32_spill] sm:$0xff] }
0x2044   : > { %9219 = vmatprep.mubr.f32.mxu1 %v21212_v31  ;;  %9330 = vmatpush1.msra.mxu1 %v21730_v19  ;;  %v21789_v61 = vunpack.c.h.bf16 %v21788_v43  ;;  %v21790_v19 = vunpack.c.l.bf16 %v21788_v43 }
0x2045   : > { %9331 = vmatprep.subr.mxu1 %v21732_v29  ;;  %v21794_v29 = vld [vmem:[#allocation34_spill] sm:$0xff] }
0x2046   : > { %9332 = vmatpush1.msra.mxu1 %v21733_v39  ;;  %v21795_v39 = vunpack.c.h.bf16 %v21794_v29  ;;  %v21796_v17 = vunpack.c.l.bf16 %v21794_v29 }
0x2047   : > { %11795 = vmatmul.mubr.msk.f32.gmra.mxu1 %vm5049_vm3, %v8976_v18  ;;  %9333 = vmatprep.subr.mxu1 %v21735_v23  ;;  %v21792_v18 = vunpack.c.h.bf16 %v21791_v41  ;;  %v21797_v23 = vld [vmem:[#allocation35_spill] sm:$0xff] }
0x2048   : > { %9225 = vmatprep.mubr.f32.mxu1 %v21212_v31  ;;  %9334 = vmatpush1.msra.mxu1 %v21736_v4  ;;  %v21798_v4 = vunpack.c.h.bf16 %v21797_v23 }
0x2049   : > { %9335 = vmatprep.subr.mxu1 %v21738_v16  ;;  %v21801_v16 = vunpack.c.h.bf16 %v21800_v49 }
0x204a   : > { %9336 = vmatpush1.msra.mxu1 %v21739_v58  ;;  %v21802_v58 = vunpack.c.l.bf16 %v21800_v49 }
0x204b   : > { %11796 = vmatmul.mubr.msk.f32.gmra.mxu1 %vm5049_vm3, %v8977_v10  ;;  %9337 = vmatprep.subr.mxu1 %v21741_v52  ;;  %v21799_v10 = vunpack.c.l.bf16 %v21797_v23  ;;  %v21804_v52 = vunpack.c.h.bf16 %v21803_v1 }
0x204c   : > { %9338 = vmatpush1.msra.mxu1 %v21742_v35  ;;  %v21805_v35 = vunpack.c.l.bf16 %v21803_v1 }
0x204d   : > { %9339 = vmatprep.subr.mxu1 %v21744_v48  ;;  %v21807_v48 = vunpack.c.h.bf16 %v21806_v46 }
0x204e   : > { %9340 = vmatpush1.msra.mxu1 %v21745_v0  ;;  %v21808_v0 = vunpack.c.l.bf16 %v21806_v46 }
0x204f   : > { %9341 = vmatprep.subr.mxu1 %v21747_v51  ;;  %v21810_v51 = vunpack.c.h.bf16 %v21809_v40 }
0x2050   : > { %9342 = vmatpush1.msra.mxu1 %v21748_v34  ;;  %v21811_v34 = vunpack.c.l.bf16 %v21809_v40  ;;  %v21818_v40 = vld [vmem:[#allocation44_spill] sm:$0xff] }
0x2051   : > { %9343 = vmatprep.subr.mxu1 %v21750_v53  ;;  %v21813_v53 = vunpack.c.h.bf16 %v21812_v2 }
0x2052   : > { %9344 = vmatpush1.msra.mxu1 %v21751_v30  ;;  %v21814_v30 = vunpack.c.l.bf16 %v21812_v2  ;;  %v21820_v2 = vunpack.c.l.bf16 %v21818_v40 }
0x2053   : > { %9345 = vmatprep.subr.mxu1 %v21753_v8  ;;  %v21816_v8 = vunpack.c.h.bf16 %v21815_v9 }
0x2054   : > { %9346 = vmatpush1.msra.mxu1 %v21754_v28  ;;  %v21817_v28 = vunpack.c.l.bf16 %v21815_v9 }
0x2055   : > { %9347 = vmatprep.subr.mxu1 %v21756_v22  ;;  %v9086_v22 = vpop.f32.mrf.mxu0 }
0x2056   : > { %9348 = vmatpush1.msra.mxu1 %v21757_v27 }
0x2057   : > { %9349 = vmatprep.subr.mxu1 %v21759_v54  ;;  %v9090_v27 = vpop.f32.mrf.mxu0 }
0x2058   : > { %9350 = vmatpush1.msra.mxu1 %v21760_v20  ;;  %v8989_v20 = vpop.permute.xlu1 %8988 }
0x2059   : > { %9351 = vmatprep.subr.mxu1 %v21762_v26  ;;  %v9092_v7 = vpop.f32.mrf.mxu0  ;;  %v9087_v26 = vadd.f32 %v9086_v22, %v8989_v20  ;;  %v9323_v22 = vld [vmem:[%s20275_s19 + $0x10] sm:$0xff] }
0x205a   : > { %9352 = vmatpush1.msra.mxu1 %v21763_v21  ;;  %v9085_v21 = vadd.f32 %v9084_v14, %v8989_v20  ;;  %v9093_v44 = vadd.f32 %v9092_v7, %v8994_v24  ;;  %v11799_v7 = vld [vmem:[%s20275_s19 + $0x30] sm:$0xff] }
0x205b   : > { %9353 = vmatprep.subr.mxu1 %v21765_v60  ;;  %v9096_v54 = vpop.f32.mrf.mxu0 }
0x205c   : > { %9354 = vmatpush1.msra.mxu1 %v21766_v32 }
0x205d   : > { %9355 = vmatprep.subr.mxu1 %v21768_v38  ;;  %v9098_v12 = vpop.f32.mrf.mxu0 }
0x205e   : > { %9356 = vmatpush1.msra.mxu1 %v21769_v57 }
0x205f   : > { %9357 = vmatprep.subr.mxu1 %v21771_v5  ;;  %v9091_v5 = vadd.f32 %v9090_v27, %v8994_v24  ;;  %v11800_v24 = vld [vmem:[%s20275_s19 + $0x38] sm:$0xff] }
0x2060   : > { %9358 = vmatpush2.msra.mxu1 %v21772_v50  ;;  %v9102_v50 = vpop.f32.mrf.mxu0 }
0x2061   : > { %9359 = vmatprep.subr.mxu1 %v21774_v56 }
0x2062   : > { %9360 = vmatpush2.msra.mxu1 %v21775_v3  ;;  %v8999_v3 = vpop.permute.xlu1 %8998 }
0x2063   : > { %9361 = vmatprep.subr.mxu1 %v21777_v45  ;;  %v9097_v63 = vadd.f32 %v9096_v54, %v8999_v3  ;;  %v21827_v54 = vld [vmem:[#allocation47_spill] sm:$0xff] }
0x2064   : > { %9362 = vmatpush2.msra.mxu1 %v21778_v37  ;;  %v9099_v37 = vadd.f32 %v9098_v12, %v8999_v3  ;;  %v21828_v20 = vunpack.c.h.bf16 %v21827_v54  ;;  %v9324_v12 = vld [vmem:[%s20275_s19 + $0x18] sm:$0xff] }
0x2065   : > { %9363 = vmatprep.subr.mxu1 %v21780_v25  ;;  %v9104_v25 = vpop.f32.mrf.mxu0 }
0x2066   : > { %9364 = vmatpush2.msra.mxu1 %v21781_v33 }
0x2067   : > { %9365 = vmatprep.subr.mxu1 %v21783_v47  ;;  %v9004_v47 = vpop.permute.xlu0 %9003 }
0x2068   : > { %9366 = vmatpush2.msra.mxu1 %v21784_v13 }
0x2069   : > { %9367 = vmatprep.subr.mxu1 %v21786_v55  ;;  %v9105_v55 = vadd.f32 %v9104_v25, %v9004_v47  ;;  %v21842_v25 = vld [vmem:[#allocation52_spill] sm:$0xff] }
0x206a   : > { %9368 = vmatpush2.msra.mxu1 %v21787_v42  ;;  %v9103_v42 = vadd.f32 %v9102_v50, %v9004_v47  ;;  %v21836_v50 = vld [vmem:[#allocation50_spill] sm:$0xff]  ;;  %v21844_v47 = vunpack.c.l.bf16 %v21842_v25 }
0x206b   : > { %9369 = vmatprep.subr.mxu1 %v21789_v61  ;;  %v21838_v3 = vunpack.c.l.bf16 %v21836_v50 }
0x206c   : > { %9370 = vmatpush2.msra.mxu1 %v21790_v19 }
0x206d   : > { %9371 = vmatprep.subr.mxu1 %v21792_v18 }
0x206e   : > { %9372 = vmatpush2.msra.mxu1 %v21793_v15 }
0x206f   : > { %9373 = vmatprep.subr.mxu1 %v21795_v39 }
0x2070   : > { %9374 = vmatpush2.msra.mxu1 %v21796_v17 }
0x2071   : > { %9375 = vmatprep.subr.mxu1 %v21798_v4 }
0x2072   : > { %9376 = vmatpush2.msra.mxu1 %v21799_v10 }
0x2073   : > { %9377 = vmatprep.subr.mxu1 %v21801_v16 }
0x2074   : > { %9378 = vmatpush2.msra.mxu1 %v21802_v58 }
0x2075   : > { %9379 = vmatprep.subr.mxu1 %v21804_v52 }
0x2076   : > { %9380 = vmatpush2.msra.mxu1 %v21805_v35 }
0x2077   : > { %9381 = vmatprep.subr.mxu1 %v21807_v48  ;;  %v11797_v48 = vld [vmem:[%s20275_s19 + $0x20] sm:$0xff] }
0x2078   : > { %9382 = vmatpush2.msra.mxu1 %v21808_v0  ;;  %v9321_v0 = vld [vmem:[%s20275_s19] sm:$0xff] }
0x2079   : > { %9383 = vmatprep.subr.mxu1 %v21810_v51  ;;  %v21819_v51 = vunpack.c.h.bf16 %v21818_v40 }
0x207a   : > { %9384 = vmatpush2.msra.mxu1 %v21811_v34  ;;  %v9322_v34 = vld [vmem:[%s20275_s19 + $0x8] sm:$0xff] }
0x207b   : > { %9385 = vmatprep.subr.mxu1 %v21813_v53  ;;  %v11798_v53 = vld [vmem:[%s20275_s19 + $0x28] sm:$0xff] }
0x207c   : > { %9386 = vmatpush2.msra.mxu1 %v21814_v30  ;;  %v21821_v30 = vld [vmem:[#allocation45_spill] sm:$0xff] }
0x207d   : > { %9387 = vmatprep.subr.mxu1 %v21816_v8  ;;  %v21822_v9 = vunpack.c.h.bf16 %v21821_v30  ;;  %v21823_v8 = vunpack.c.l.bf16 %v21821_v30  ;;  %v21872_v30 = vld [vmem:[#allocation62_spill] sm:$0xff] }
0x207e   : > { %9388 = vmatpush2.msra.mxu1 %v21817_v28  ;;  %v21824_v28 = vld [vmem:[#allocation46_spill] sm:$0xff] }
0x207f   : > { %v21825_v14 = vunpack.c.h.bf16 %v21824_v28  ;;  %v21826_v27 = vunpack.c.l.bf16 %v21824_v28  ;;  %v21875_v28 = vld [vmem:[#allocation63_spill] sm:$0xff] }
0x20ff   : > { %v9209_v59 = vpop.f32.mrf.mxu1 }
0x2100   : > { %v18935_v38 = vadd.f32 %v9209_v59, %v9085_v21  ;;  %v21829_v59 = vunpack.c.l.bf16 %v21827_v54 }
0x2101   : > { %v9211_v60 = vpop.f32.mrf.mxu1 }
0x2102   : > { %v18933_v32 = vadd.f32 %v9211_v60, %v9087_v26  ;;  %v21830_v26 = vld [vmem:[#allocation48_spill] sm:$0xff] }
0x2103   : > { %v9215_v57 = vpop.f32.mrf.mxu1  ;;  %v21831_v21 = vunpack.c.h.bf16 %v21830_v26  ;;  %v21832_v60 = vunpack.c.l.bf16 %v21830_v26 }
0x2104   : > { %9296 = vmatprep.mubr.f32.mxu0 %v18933_v32  ;;  %9389 = vmatprep.mubr.f32.mxu1 %v18933_v32  ;;  %v18943_v62 = vadd.f32 %v9215_v57, %v9091_v5  ;;  %v21833_v57 = vld [vmem:[#allocation49_spill] sm:$0xff] }
0x2105   : > { %v9217_v11 = vpop.f32.mrf.mxu1  ;;  %9297 = vmatmul.mubr.f32.vlgmr.msra.gmra.mxu0 %v18935_v38  ;;  %9390 = vmatmul.mubr.f32.vlgmr.msra.gmra.mxu1 %v18935_v38  ;;  %v21835_v5 = vunpack.c.l.bf16 %v21833_v57 }
0x2106   : > { %v18941_v56 = vadd.f32 %v9217_v11, %v9093_v44  ;;  %v21834_v44 = vunpack.c.h.bf16 %v21833_v57  ;;  %v21837_v11 = vunpack.c.h.bf16 %v21836_v50 }
0x2107   : > { %v9221_v45 = vpop.f32.mrf.mxu1 }
0x2108   : > { %9302 = vmatprep.mubr.f32.mxu0 %v18941_v56  ;;  %9395 = vmatprep.mubr.f32.mxu1 %v18941_v56  ;;  %v18951_v13 = vadd.f32 %v9221_v45, %v9097_v63  ;;  %v21839_v45 = vld [vmem:[#allocation51_spill] sm:$0xff] }
0x2109   : > { %v9223_v33 = vpop.f32.mrf.mxu1  ;;  %9303 = vmatmul.mubr.f32.gmra.mxu0 %v18943_v62  ;;  %9396 = vmatmul.mubr.f32.gmra.mxu1 %v18943_v62  ;;  %v21841_v63 = vunpack.c.l.bf16 %v21839_v45 }
0x210a   : > { %v18949_v36 = vadd.f32 %v9223_v33, %v9099_v37  ;;  %v21840_v37 = vunpack.c.h.bf16 %v21839_v45  ;;  %v21843_v33 = vunpack.c.h.bf16 %v21842_v25 }
0x210b   : > { %v9227_v6 = vpop.f32.mrf.mxu1 }
0x210c   : > { %9308 = vmatprep.mubr.f32.mxu0 %v18949_v36  ;;  %9401 = vmatprep.mubr.f32.mxu1 %v18949_v36  ;;  %v18959_v19 = vadd.f32 %v9227_v6, %v9103_v42  ;;  %v21845_v6 = vld [vmem:[#allocation53_spill] sm:$0xff] }
0x210d   : > { %v9229_v43 = vpop.f32.mrf.mxu1  ;;  %9309 = vmatmul.mubr.f32.gmra.mxu0 %v18951_v13  ;;  %9402 = vmatmul.mubr.f32.gmra.mxu1 %v18951_v13  ;;  %v21847_v42 = vunpack.c.l.bf16 %v21845_v6 }
0x210e   : > { %v18957_v61 = vadd.f32 %v9229_v43, %v9105_v55  ;;  %v21846_v55 = vunpack.c.h.bf16 %v21845_v6  ;;  %v21848_v43 = vld [vmem:[#allocation54_spill] sm:$0xff] }
0x2110   : > { %9314 = vmatprep.mubr.f32.mxu0 %v18957_v61  ;;  %9407 = vmatprep.mubr.f32.mxu1 %v18957_v61 }
0x2111   : > { %9315 = vmatmul.mubr.f32.gmra.mxu0 %v18959_v19  ;;  %9408 = vmatmul.mubr.f32.gmra.mxu1 %v18959_v19 }
0x2112   : > { %9495 = vmatprep.mubr.f32.mxu0 %v21212_v31  ;;  %9596 = vmatprep.mubr.f32.mxu1 %v21212_v31 }
0x21c5   : > { %v9298_v41 = vpop.f32.mrf.mxu0  ;;  %v9391_v18 = vpop.f32.mrf.mxu1 }
0x21c7   : > { %v9300_v15 = vpop.f32.mrf.mxu0  ;;  %v9393_v29 = vpop.f32.mrf.mxu1 }
0x21c9   : > { %v9304_v39 = vpop.f32.mrf.mxu0  ;;  %v9397_v17 = vpop.f32.mrf.mxu1 }
0x21cb   : > { %v9306_v23 = vpop.f32.mrf.mxu0  ;;  %v9399_v4 = vpop.f32.mrf.mxu1 }
0x21cd   : > { %v9310_v10 = vpop.f32.mrf.mxu0  ;;  %v9403_v49 = vpop.f32.mrf.mxu1 }
0x21cf   : > { %v9312_v16 = vpop.f32.mrf.mxu0  ;;  %v9405_v58 = vpop.f32.mrf.mxu1 }
0x21d1   : > { %v9316_v1 = vpop.f32.mrf.mxu0  ;;  %v9409_v52 = vpop.f32.mrf.mxu1 }
0x21d3   : > { %v9318_v35 = vpop.f32.mrf.mxu0  ;;  %v9411_v46 = vpop.f32.mrf.mxu1 }
0x21d4   : > { %9455 = vmatprep.subr.mxu0 %v9411_v46  ;;  %9556 = vmatprep.subr.mxu1 %v9318_v35  ;;  %v21863_v35 = vld [vmem:[#allocation59_spill] sm:$0xff] }
0x21d5   : > { %9456 = vmatpush1.msra.mxu0 %v9409_v52  ;;  %9557 = vmatpush1.msra.mxu1 %v9316_v1  ;;  %v21864_v46 = vunpack.c.h.bf16 %v21863_v35 }
0x21d6   : > { %9457 = vmatprep.subr.mxu0 %v9405_v58  ;;  %9558 = vmatprep.subr.mxu1 %v9312_v16  ;;  %v21860_v58 = vld [vmem:[#allocation58_spill] sm:$0xff] }
0x21d7   : > { %9458 = vmatpush1.msra.mxu0 %v9403_v49  ;;  %9559 = vmatpush1.msra.mxu1 %v9310_v10  ;;  %v21857_v10 = vld [vmem:[#allocation57_spill] sm:$0xff]  ;;  %v21861_v1 = vunpack.c.h.bf16 %v21860_v58  ;;  %v21862_v52 = vunpack.c.l.bf16 %v21860_v58 }
0x21d8   : > { %9459 = vmatprep.subr.mxu0 %v9399_v4  ;;  %9560 = vmatprep.subr.mxu1 %v9306_v23  ;;  %v21858_v49 = vunpack.c.h.bf16 %v21857_v10  ;;  %v21859_v16 = vunpack.c.l.bf16 %v21857_v10 }
0x21d9   : > { %9460 = vmatpush1.msra.mxu0 %v9397_v17  ;;  %9561 = vmatpush1.msra.mxu1 %v9304_v39  ;;  %v21854_v17 = vld [vmem:[#allocation56_spill] sm:$0xff] }
0x21da   : > { %9461 = vmatprep.subr.mxu0 %v9393_v29  ;;  %9562 = vmatprep.subr.mxu1 %v9300_v15  ;;  %v21851_v15 = vld [vmem:[#allocation55_spill] sm:$0xff]  ;;  %v21855_v23 = vunpack.c.h.bf16 %v21854_v17  ;;  %v21856_v4 = vunpack.c.l.bf16 %v21854_v17 }
0x21db   : > { %9462 = vmatpush1.msra.mxu0 %v9391_v18  ;;  %9563 = vmatpush1.msra.mxu1 %v9298_v41  ;;  %v21849_v41 = vunpack.c.h.bf16 %v21848_v43  ;;  %v21850_v18 = vunpack.c.l.bf16 %v21848_v43  ;;  %v21852_v29 = vunpack.c.h.bf16 %v21851_v15  ;;  %v21853_v39 = vunpack.c.l.bf16 %v21851_v15 }
0x21dc   : > { %11801 = vmatmul.mubr.msk.f32.vlgmr.msra.gmra.mxu0 %vm7295_vm5, %v11797_v48  ;;  %11805 = vmatmul.mubr.msk.f32.vlgmr.msra.gmra.mxu1 %vm7295_vm5, %v9321_v0  ;;  %v21865_v48 = vunpack.c.l.bf16 %v21863_v35  ;;  %v21866_v0 = vld [vmem:[#allocation60_spill] sm:$0xff] }
0x21dd   : > { %9621 = vmatprep.subr.mxu0 %v21819_v51  ;;  %9501 = vmatprep.mubr.f32.mxu0 %v21212_v31  ;;  %v21867_v40 = vunpack.c.h.bf16 %v21866_v0  ;;  %v21868_v51 = vunpack.c.l.bf16 %v21866_v0 }
0x21de   : > { %9622 = vmatpush1.msra.mxu0 %v21820_v2  ;;  %9602 = vmatprep.mubr.f32.mxu1 %v21212_v31 }
0x21df   : > { %9623 = vmatprep.subr.mxu0 %v21822_v9  ;;  %v21873_v9 = vunpack.c.h.bf16 %v21872_v30 }
0x21e0   : > { %9624 = vmatpush1.msra.mxu0 %v21823_v8  ;;  %11806 = vmatmul.mubr.msk.f32.gmra.mxu1 %vm7295_vm5, %v9322_v34  ;;  %v21869_v34 = vld [vmem:[#allocation61_spill] sm:$0xff]  ;;  %v21874_v8 = vunpack.c.l.bf16 %v21872_v30 }
0x21e1   : > { %11802 = vmatmul.mubr.msk.f32.gmra.mxu0 %vm7295_vm5, %v11798_v53  ;;  %9625 = vmatprep.subr.mxu0 %v21825_v14  ;;  %v21870_v2 = vunpack.c.h.bf16 %v21869_v34  ;;  %v21871_v53 = vunpack.c.l.bf16 %v21869_v34  ;;  %v21876_v14 = vunpack.c.h.bf16 %v21875_v28 }
0x21e2   : > { %9626 = vmatpush1.msra.mxu0 %v21826_v27  ;;  %9507 = vmatprep.mubr.f32.mxu0 %v21212_v31  ;;  %v21878_v27 = vld [vmem:[#allocation64_spill] sm:$0xff] }
0x21e3   : > { %9627 = vmatprep.subr.mxu0 %v21828_v20  ;;  %9608 = vmatprep.mubr.f32.mxu1 %v21212_v31  ;;  %v21880_v54 = vunpack.c.l.bf16 %v21878_v27  ;;  %v21881_v20 = vld [vmem:[#allocation65_spill] sm:$0xff] }
0x21e4   : > { %9628 = vmatpush1.msra.mxu0 %v21829_v59  ;;  %11807 = vmatmul.mubr.msk.f32.gmra.mxu1 %vm7295_vm5, %v9323_v22  ;;  %v21877_v22 = vunpack.c.l.bf16 %v21875_v28  ;;  %v21882_v59 = vunpack.c.h.bf16 %v21881_v20  ;;  %v21883_v26 = vunpack.c.l.bf16 %v21881_v20 }
0x21e5   : > { %11803 = vmatmul.mubr.msk.f32.gmra.mxu0 %vm7295_vm5, %v11799_v7  ;;  %9629 = vmatprep.subr.mxu0 %v21831_v21  ;;  %v21879_v7 = vunpack.c.h.bf16 %v21878_v27  ;;  %v21884_v21 = vld [vmem:[#allocation66_spill] sm:$0xff] }
0x21e6   : > { %9630 = vmatpush1.msra.mxu0 %v21832_v60  ;;  %9513 = vmatprep.mubr.f32.mxu0 %v21212_v31  ;;  %v21886_v60 = vunpack.c.l.bf16 %v21884_v21 }
0x21e7   : > { %9631 = vmatprep.subr.mxu0 %v21834_v44  ;;  %9614 = vmatprep.mubr.f32.mxu1 %v21212_v31 }
0x21e8   : > { %9632 = vmatpush1.msra.mxu0 %v21835_v5  ;;  %11808 = vmatmul.mubr.msk.f32.gmra.mxu1 %vm7295_vm5, %v9324_v12  ;;  %v21885_v12 = vunpack.c.h.bf16 %v21884_v21  ;;  %v21890_v5 = vld [vmem:[#allocation68_spill] sm:$0xff] }
0x21e9   : > { %11804 = vmatmul.mubr.msk.f32.gmra.mxu0 %vm7295_vm5, %v11800_v24  ;;  %9633 = vmatprep.subr.mxu0 %v21837_v11  ;;  %v21887_v24 = vld [vmem:[#allocation67_spill] sm:$0xff]  ;;  %v21891_v50 = vunpack.c.h.bf16 %v21890_v5  ;;  %v21892_v11 = vunpack.c.l.bf16 %v21890_v5  ;;  %v21914_v5 = vld [vmem:[#allocation76_spill] sm:$0xff] }
0x21ea   : > { %9634 = vmatpush1.msra.mxu0 %v21838_v3  ;;  %9685 = vmatprep.mubr.f32.mxu0 %v18933_v32  ;;  %v21888_v57 = vunpack.c.h.bf16 %v21887_v24  ;;  %v21889_v44 = vunpack.c.l.bf16 %v21887_v24  ;;  %v21893_v3 = vld [vmem:[#allocation69_spill] sm:$0xff] }
0x21eb   : > { %9635 = vmatprep.subr.mxu0 %v21840_v37  ;;  %9791 = vmatprep.mubr.f32.mxu1 %v21212_v31  ;;  %v21894_v45 = vunpack.c.h.bf16 %v21893_v3  ;;  %v21895_v37 = vunpack.c.l.bf16 %v21893_v3  ;;  %v11810_v3 = vld [vmem:[%s20275_s19 + $0x48] sm:$0xff] }
0x21ec   : > { %9636 = vmatpush1.msra.mxu0 %v21841_v63  ;;  %v21896_v63 = vld [vmem:[#allocation70_spill] sm:$0xff] }
0x21ed   : > { %9637 = vmatprep.subr.mxu0 %v21843_v33  ;;  %v21897_v25 = vunpack.c.h.bf16 %v21896_v63  ;;  %v21898_v33 = vunpack.c.l.bf16 %v21896_v63 }
0x21ee   : > { %9638 = vmatpush1.msra.mxu0 %v21844_v47  ;;  %v21899_v47 = vld [vmem:[#allocation71_spill] sm:$0xff] }
0x21ef   : > { %9639 = vmatprep.subr.mxu0 %v21846_v55  ;;  %v21900_v6 = vunpack.c.h.bf16 %v21899_v47  ;;  %v21901_v55 = vunpack.c.l.bf16 %v21899_v47 }
0x21f0   : > { %9640 = vmatpush1.msra.mxu0 %v21847_v42  ;;  %v21902_v42 = vld [vmem:[#allocation72_spill] sm:$0xff] }
0x21f1   : > { %9641 = vmatprep.subr.mxu0 %v21849_v41  ;;  %v21903_v43 = vunpack.c.h.bf16 %v21902_v42  ;;  %v21904_v41 = vunpack.c.l.bf16 %v21902_v42 }
0x21f2   : > { %9642 = vmatpush1.msra.mxu0 %v21850_v18  ;;  %v21905_v18 = vld [vmem:[#allocation73_spill] sm:$0xff] }
0x21f3   : > { %9643 = vmatprep.subr.mxu0 %v21852_v29  ;;  %v21906_v15 = vunpack.c.h.bf16 %v21905_v18  ;;  %v21907_v29 = vunpack.c.l.bf16 %v21905_v18 }
0x21f4   : > { %9644 = vmatpush1.msra.mxu0 %v21853_v39  ;;  %v21908_v39 = vld [vmem:[#allocation74_spill] sm:$0xff] }
0x21f5   : > { %9645 = vmatprep.subr.mxu0 %v21855_v23  ;;  %v21909_v17 = vunpack.c.h.bf16 %v21908_v39  ;;  %v21910_v23 = vunpack.c.l.bf16 %v21908_v39  ;;  %v21929_v39 = vld [vmem:[#allocation81_spill] sm:$0xff] }
0x21f6   : > { %9646 = vmatpush1.msra.mxu0 %v21856_v4  ;;  %v21911_v4 = vld [vmem:[#allocation75_spill] sm:$0xff] }
0x21f7   : > { %9647 = vmatprep.subr.mxu0 %v21858_v49  ;;  %v21912_v10 = vunpack.c.h.bf16 %v21911_v4  ;;  %v21913_v49 = vunpack.c.l.bf16 %v21911_v4  ;;  %v21932_v4 = vld [vmem:[#allocation82_spill] sm:$0xff] }
0x21f8   : > { %9648 = vmatpush1.msra.mxu0 %v21859_v16 }
0x21f9   : > { %9649 = vmatprep.subr.mxu0 %v21861_v1 }
0x21fa   : > { %9650 = vmatpush1.msra.mxu0 %v21862_v52 }
0x21fb   : > { %9651 = vmatprep.subr.mxu0 %v21864_v46 }
0x21fc   : > { %9652 = vmatpush1.msra.mxu0 %v21865_v48 }
0x21fd   : > { %9653 = vmatprep.subr.mxu0 %v21867_v40 }
0x21fe   : > { %9654 = vmatpush2.msra.mxu0 %v21868_v51 }
0x21ff   : > { %9655 = vmatprep.subr.mxu0 %v21870_v2 }
0x2200   : > { %9656 = vmatpush2.msra.mxu0 %v21871_v53 }
0x2201   : > { %9657 = vmatprep.subr.mxu0 %v21873_v9 }
0x2202   : > { %9658 = vmatpush2.msra.mxu0 %v21874_v8 }
0x2203   : > { %9659 = vmatprep.subr.mxu0 %v21876_v14 }
0x2204   : > { %9660 = vmatpush2.msra.mxu0 %v21877_v22 }
0x2205   : > { %9661 = vmatprep.subr.mxu0 %v21879_v7 }
0x2206   : > { %9662 = vmatpush2.msra.mxu0 %v21880_v54 }
0x2207   : > { %9663 = vmatprep.subr.mxu0 %v21882_v59 }
0x2208   : > { %9664 = vmatpush2.msra.mxu0 %v21883_v26 }
0x2209   : > { %9665 = vmatprep.subr.mxu0 %v21885_v12 }
0x220a   : > { %9666 = vmatpush2.msra.mxu0 %v21886_v60 }
0x220b   : > { %9667 = vmatprep.subr.mxu0 %v21888_v57 }
0x220c   : > { %9668 = vmatpush2.msra.mxu0 %v21889_v44  ;;  %v11809_v44 = vld [vmem:[%s20275_s19 + $0x40] sm:$0xff] }
0x220d   : > { %9669 = vmatprep.subr.mxu0 %v21891_v50  ;;  %v21915_v50 = vunpack.c.h.bf16 %v21914_v5 }
0x220e   : > { %9670 = vmatpush2.msra.mxu0 %v21892_v11  ;;  %v21916_v11 = vunpack.c.l.bf16 %v21914_v5 }
0x220f   : > { %9671 = vmatprep.subr.mxu0 %v21894_v45  ;;  %v21917_v45 = vld [vmem:[#allocation77_spill] sm:$0xff] }
0x2210   : > { %9672 = vmatpush2.msra.mxu0 %v21895_v37  ;;  %v21918_v37 = vunpack.c.h.bf16 %v21917_v45  ;;  %v21919_v63 = vunpack.c.l.bf16 %v21917_v45  ;;  %v21962_v45 = vld [vmem:[#allocation92_spill] sm:$0xff] }
0x2211   : > { %9673 = vmatprep.subr.mxu0 %v21897_v25  ;;  %v21920_v25 = vld [vmem:[#allocation78_spill] sm:$0xff] }
0x2212   : > { %9674 = vmatpush2.msra.mxu0 %v21898_v33  ;;  %v21921_v33 = vunpack.c.h.bf16 %v21920_v25  ;;  %v21922_v47 = vunpack.c.l.bf16 %v21920_v25  ;;  %v21965_v25 = vld [vmem:[#allocation93_spill] sm:$0xff] }
0x2213   : > { %9675 = vmatprep.subr.mxu0 %v21900_v6  ;;  %v11811_v6 = vld [vmem:[%s20275_s19 + $0x50] sm:$0xff] }
0x2214   : > { %9676 = vmatpush2.msra.mxu0 %v21901_v55  ;;  %v21923_v55 = vld [vmem:[#allocation79_spill] sm:$0xff] }
0x2215   : > { %9677 = vmatprep.subr.mxu0 %v21903_v43  ;;  %v21924_v42 = vunpack.c.h.bf16 %v21923_v55  ;;  %v21925_v43 = vunpack.c.l.bf16 %v21923_v55 }
0x2216   : > { %9678 = vmatpush2.msra.mxu0 %v21904_v41  ;;  %v21926_v41 = vld [vmem:[#allocation80_spill] sm:$0xff] }
0x2217   : > { %9679 = vmatprep.subr.mxu0 %v21906_v15  ;;  %v21927_v18 = vunpack.c.h.bf16 %v21926_v41  ;;  %v21928_v15 = vunpack.c.l.bf16 %v21926_v41 }
0x2218   : > { %9680 = vmatpush2.msra.mxu0 %v21907_v29  ;;  %v11812_v29 = vld [vmem:[%s20275_s19 + $0x58] sm:$0xff] }
0x2219   : > { %9681 = vmatprep.subr.mxu0 %v21909_v17  ;;  %v21930_v17 = vunpack.c.h.bf16 %v21929_v39 }
0x221a   : > { %9682 = vmatpush2.msra.mxu0 %v21910_v23  ;;  %v21931_v23 = vunpack.c.l.bf16 %v21929_v39 }
0x221b   : > { %9683 = vmatprep.subr.mxu0 %v21912_v10  ;;  %v21933_v10 = vunpack.c.h.bf16 %v21932_v4 }
0x221c   : > { %9684 = vmatpush2.msra.mxu0 %v21913_v49  ;;  %v21934_v49 = vunpack.c.l.bf16 %v21932_v4 }
0x221d   : > { %9686 = vmatmul.mubr.f32.vlgmr.msra.gmra.mxu0 %v18935_v38 }
0x221e   : > { %9691 = vmatprep.mubr.f32.mxu0 %v18941_v56 }
0x2221   : > { %9692 = vmatmul.mubr.f32.gmra.mxu0 %v18943_v62 }
0x2222   : > { %9697 = vmatprep.mubr.f32.mxu0 %v18949_v36 }
0x2225   : > { %9698 = vmatmul.mubr.f32.gmra.mxu0 %v18951_v13 }
0x2226   : > { %9703 = vmatprep.mubr.f32.mxu0 %v18957_v61 }
0x2229   : > { %9704 = vmatmul.mubr.f32.gmra.mxu0 %v18959_v19 }
0x222a   : > { %9994 = vmatprep.mubr.f32.mxu0 %v21212_v31 }
0x229c   : > { %v9497_v16 = vpop.f32.mrf.mxu0  ;;  %v9598_v58 = vpop.f32.mrf.mxu1 }
0x229d   : > { %v19143_v1 = vadd.f32 %v9598_v58, %v9497_v16  ;;  %v21935_v16 = vld [vmem:[#allocation83_spill] sm:$0xff] }
0x229e   : > { %v9499_v52 = vpop.f32.mrf.mxu0  ;;  %v9600_v35 = vpop.f32.mrf.mxu1  ;;  %v21936_v58 = vunpack.c.h.bf16 %v21935_v16 }
0x229f   : > { %v19145_v46 = vadd.f32 %v9600_v35, %v9499_v52  ;;  %v21937_v52 = vunpack.c.l.bf16 %v21935_v16  ;;  %v21938_v35 = vld [vmem:[#allocation84_spill] sm:$0xff] }
0x22a0   : > { %v9604_v48 = vpop.f32.mrf.mxu1 }
0x22a1   : > { %v9503_v0 = vpop.f32.mrf.mxu0 }
0x22a2   : > { %v19147_v40 = vadd.f32 %v9604_v48, %v9503_v0  ;;  %v9606_v51 = vpop.f32.mrf.mxu1  ;;  %v21939_v48 = vunpack.c.h.bf16 %v21938_v35  ;;  %v21940_v0 = vunpack.c.l.bf16 %v21938_v35 }
0x22a3   : > { %v9505_v34 = vpop.f32.mrf.mxu0 }
0x22a4   : > { %v19149_v2 = vadd.f32 %v9606_v51, %v9505_v34  ;;  %v9610_v53 = vpop.f32.mrf.mxu1  ;;  %v21941_v51 = vld [vmem:[#allocation85_spill] sm:$0xff] }
0x22a5   : > { %v9509_v30 = vpop.f32.mrf.mxu0  ;;  %v21942_v34 = vunpack.c.h.bf16 %v21941_v51 }
0x22a6   : > { %v19151_v9 = vadd.f32 %v9610_v53, %v9509_v30  ;;  %v9612_v8 = vpop.f32.mrf.mxu1  ;;  %v21943_v53 = vunpack.c.l.bf16 %v21941_v51  ;;  %v21944_v30 = vld [vmem:[#allocation86_spill] sm:$0xff] }
0x22a7   : > { %v9511_v28 = vpop.f32.mrf.mxu0 }
0x22a8   : > { %v19153_v14 = vadd.f32 %v9612_v8, %v9511_v28  ;;  %v9616_v27 = vpop.f32.mrf.mxu1  ;;  %v21945_v8 = vunpack.c.h.bf16 %v21944_v30  ;;  %v21946_v28 = vunpack.c.l.bf16 %v21944_v30 }
0x22a9   : > { %v9515_v22 = vpop.f32.mrf.mxu0 }
0x22aa   : > { %v19155_v7 = vadd.f32 %v9616_v27, %v9515_v22  ;;  %v21947_v22 = vld [vmem:[#allocation87_spill] sm:$0xff] }
0x22ab   : > { %v19157_v54 = vpop.f32.mrf.mxu0  ;;  %v21948_v27 = vunpack.c.h.bf16 %v21947_v22 }
0x22dd   : > { %v9687_v20 = vpop.f32.mrf.mxu0 }
0x22df   : > { %v9689_v59 = vpop.f32.mrf.mxu0 }
0x22e1   : > { %v9693_v26 = vpop.f32.mrf.mxu0 }
0x22e3   : > { %v9695_v21 = vpop.f32.mrf.mxu0 }
0x22e5   : > { %v9699_v12 = vpop.f32.mrf.mxu0 }
0x22e7   : > { %v9701_v60 = vpop.f32.mrf.mxu0 }
0x22e9   : > { %v9705_v24 = vpop.f32.mrf.mxu0 }
0x22eb   : > { %v9707_v57 = vpop.f32.mrf.mxu0 }
0x22ec   : > { %9751 = vmatprep.subr.mxu1 %v9707_v57  ;;  %v21956_v57 = vld [vmem:[#allocation90_spill] sm:$0xff] }
0x22ed   : > { %9752 = vmatpush1.msra.mxu1 %v9705_v24  ;;  %v21958_v5 = vunpack.c.l.bf16 %v21956_v57 }
0x22ee   : > { %9753 = vmatprep.subr.mxu1 %v9701_v60 }
0x22ef   : > { %9754 = vmatpush1.msra.mxu1 %v9699_v12  ;;  %v21953_v12 = vld [vmem:[#allocation89_spill] sm:$0xff] }
0x22f0   : > { %9755 = vmatprep.subr.mxu1 %v9695_v21  ;;  %v21954_v60 = vunpack.c.h.bf16 %v21953_v12  ;;  %v21955_v24 = vunpack.c.l.bf16 %v21953_v12 }
0x22f1   : > { %9756 = vmatpush1.msra.mxu1 %v9693_v26 }
0x22f2   : > { %9757 = vmatprep.subr.mxu1 %v9689_v59  ;;  %v21950_v59 = vld [vmem:[#allocation88_spill] sm:$0xff] }
0x22f3   : > { %9758 = vmatpush1.msra.mxu1 %v9687_v20  ;;  %v21949_v20 = vunpack.c.l.bf16 %v21947_v22  ;;  %v21951_v26 = vunpack.c.h.bf16 %v21950_v59  ;;  %v21952_v21 = vunpack.c.l.bf16 %v21950_v59 }
0x22f4   : > { %11813 = vmatmul.mubr.msk.f32.vlgmr.msra.gmra.mxu1 %vm7295_vm5, %v11809_v44  ;;  %9824 = vmatprep.subr.mxu1 %v21915_v50  ;;  %v21957_v44 = vunpack.c.h.bf16 %v21956_v57  ;;  %v21959_v50 = vld [vmem:[#allocation91_spill] sm:$0xff] }
0x22f5   : > { %9825 = vmatpush1.msra.mxu1 %v21916_v11  ;;  %9797 = vmatprep.mubr.f32.mxu1 %v21212_v31  ;;  %v21960_v11 = vunpack.c.h.bf16 %v21959_v50 }
0x22f6   : > { %9826 = vmatprep.subr.mxu1 %v21918_v37  ;;  %v21963_v37 = vunpack.c.h.bf16 %v21962_v45 }
0x22f7   : > { %9827 = vmatpush1.msra.mxu1 %v21919_v63  ;;  %v21964_v63 = vunpack.c.l.bf16 %v21962_v45 }
0x22f8   : > { %11814 = vmatmul.mubr.msk.f32.gmra.mxu1 %vm7295_vm5, %v11810_v3  ;;  %9828 = vmatprep.subr.mxu1 %v21921_v33  ;;  %v21961_v3 = vunpack.c.l.bf16 %v21959_v50  ;;  %v21966_v33 = vunpack.c.h.bf16 %v21965_v25 }
0x22f9   : > { %9829 = vmatpush1.msra.mxu1 %v21922_v47  ;;  %9803 = vmatprep.mubr.f32.mxu1 %v21212_v31  ;;  %v21967_v47 = vunpack.c.l.bf16 %v21965_v25 }
0x22fa   : > { %9830 = vmatprep.subr.mxu1 %v21924_v42 }
0x22fb   : > { %9831 = vmatpush1.msra.mxu1 %v21925_v43  ;;  %v21971_v43 = vld [vmem:[#allocation95_spill] sm:$0xff] }
0x22fc   : > { %11815 = vmatmul.mubr.msk.f32.gmra.mxu1 %vm7295_vm5, %v11811_v6  ;;  %9832 = vmatprep.subr.mxu1 %v21927_v18  ;;  %v21968_v6 = vld [vmem:[#allocation94_spill] sm:$0xff]  ;;  %v21972_v41 = vunpack.c.h.bf16 %v21971_v43  ;;  %v21973_v18 = vunpack.c.l.bf16 %v21971_v43 }
0x22fd   : > { %9833 = vmatpush1.msra.mxu1 %v21928_v15  ;;  %9809 = vmatprep.mubr.f32.mxu1 %v21212_v31  ;;  %v21969_v55 = vunpack.c.h.bf16 %v21968_v6  ;;  %v21970_v42 = vunpack.c.l.bf16 %v21968_v6  ;;  %v21974_v15 = vld [vmem:[#allocation96_spill] sm:$0xff] }
0x22fe   : > { %9834 = vmatprep.subr.mxu1 %v21930_v17  ;;  %v21976_v39 = vunpack.c.l.bf16 %v21974_v15  ;;  %v21977_v17 = vld [vmem:[#allocation97_spill] sm:$0xff] }
0x22ff   : > { %9835 = vmatpush1.msra.mxu1 %v21931_v23  ;;  %v21978_v23 = vunpack.c.h.bf16 %v21977_v17  ;;  %v21979_v4 = vunpack.c.l.bf16 %v21977_v17 }
0x2300   : > { %11816 = vmatmul.mubr.msk.f32.gmra.mxu1 %vm7295_vm5, %v11812_v29  ;;  %9836 = vmatprep.subr.mxu1 %v21933_v10  ;;  %v21975_v29 = vunpack.c.h.bf16 %v21974_v15  ;;  %v21980_v10 = vld [vmem:[#allocation98_spill] sm:$0xff] }
0x2301   : > { %9837 = vmatpush1.msra.mxu1 %v21934_v49  ;;  %9888 = vmatprep.mubr.f32.mxu1 %v18933_v32  ;;  %v21981_v49 = vunpack.c.h.bf16 %v21980_v10  ;;  %v21982_v16 = vunpack.c.l.bf16 %v21980_v10 }
0x2302   : > { %9838 = vmatprep.subr.mxu1 %v21936_v58  ;;  %v21983_v58 = vld [vmem:[#allocation99_spill] sm:$0xff] }
0x2303   : > { %9839 = vmatpush1.msra.mxu1 %v21937_v52  ;;  %v21984_v52 = vunpack.c.h.bf16 %v21983_v58  ;;  %v21985_v35 = vunpack.c.l.bf16 %v21983_v58 }
0x2304   : > { %9840 = vmatprep.subr.mxu1 %v21939_v48  ;;  %v21986_v48 = vld [vmem:[#allocation100_spill] sm:$0xff] }
0x2305   : > { %9841 = vmatpush1.msra.mxu1 %v21940_v0  ;;  %v21987_v0 = vunpack.c.h.bf16 %v21986_v48  ;;  %v21988_v51 = vunpack.c.l.bf16 %v21986_v48  ;;  %v22013_v48 = vld [vmem:[#allocation109_spill] sm:$0xff] }
0x2306   : > { %9842 = vmatprep.subr.mxu1 %v21942_v34  ;;  %v21989_v34 = vld [vmem:[#allocation101_spill] sm:$0xff] }
0x2307   : > { %9843 = vmatpush1.msra.mxu1 %v21943_v53  ;;  %v21990_v53 = vunpack.c.h.bf16 %v21989_v34  ;;  %v21991_v30 = vunpack.c.l.bf16 %v21989_v34  ;;  %v22016_v34 = vld [vmem:[#allocation110_spill] sm:$0xff] }
0x2308   : > { %9844 = vmatprep.subr.mxu1 %v21945_v8  ;;  %v21992_v8 = vld [vmem:[#allocation102_spill] sm:$0xff] }
0x2309   : > { %9845 = vmatpush1.msra.mxu1 %v21946_v28  ;;  %v21993_v28 = vunpack.c.h.bf16 %v21992_v8  ;;  %v21994_v22 = vunpack.c.l.bf16 %v21992_v8  ;;  %v11819_v8 = vld [vmem:[%s20275_s19 + $0x70] sm:$0xff] }
0x230a   : > { %9846 = vmatprep.subr.mxu1 %v21948_v27  ;;  %v21995_v27 = vld [vmem:[#allocation103_spill] sm:$0xff] }
0x230b   : > { %9847 = vmatpush1.msra.mxu1 %v21949_v20  ;;  %v21996_v20 = vunpack.c.h.bf16 %v21995_v27  ;;  %v21997_v59 = vunpack.c.l.bf16 %v21995_v27 }
0x230c   : > { %9848 = vmatprep.subr.mxu1 %v21951_v26  ;;  %v21998_v26 = vld [vmem:[#allocation104_spill] sm:$0xff] }
0x230d   : > { %9849 = vmatpush1.msra.mxu1 %v21952_v21  ;;  %v21999_v21 = vunpack.c.h.bf16 %v21998_v26  ;;  %v22000_v12 = vunpack.c.l.bf16 %v21998_v26 }
0x230e   : > { %9850 = vmatprep.subr.mxu1 %v21954_v60  ;;  %v22001_v60 = vld [vmem:[#allocation105_spill] sm:$0xff] }
0x230f   : > { %9851 = vmatpush1.msra.mxu1 %v21955_v24  ;;  %v22002_v24 = vunpack.c.h.bf16 %v22001_v60  ;;  %v22003_v57 = vunpack.c.l.bf16 %v22001_v60 }
0x2310   : > { %9852 = vmatprep.subr.mxu1 %v21957_v44  ;;  %v22004_v44 = vld [vmem:[#allocation106_spill] sm:$0xff] }
0x2311   : > { %9853 = vmatpush1.msra.mxu1 %v21958_v5  ;;  %v22005_v5 = vunpack.c.h.bf16 %v22004_v44  ;;  %v22006_v50 = vunpack.c.l.bf16 %v22004_v44 }
0x2312   : > { %9854 = vmatprep.subr.mxu1 %v21960_v11  ;;  %v22007_v11 = vld [vmem:[#allocation107_spill] sm:$0xff] }
0x2313   : > { %9855 = vmatpush1.msra.mxu1 %v21961_v3  ;;  %v22008_v3 = vunpack.c.h.bf16 %v22007_v11  ;;  %v22009_v45 = vunpack.c.l.bf16 %v22007_v11 }
0x2314   : > { %9856 = vmatprep.subr.mxu1 %v21963_v37  ;;  %v9618_v37 = vpop.f32.mrf.mxu1 }
0x2315   : > { %9857 = vmatpush2.msra.mxu1 %v21964_v63 }
0x2316   : > { %9858 = vmatprep.subr.mxu1 %v21966_v33 }
0x2317   : > { %9859 = vmatpush2.msra.mxu1 %v21967_v47 }
0x2318   : > { %9860 = vmatprep.subr.mxu1 %v21969_v55 }
0x2319   : > { %9861 = vmatpush2.msra.mxu1 %v21970_v42 }
0x231a   : > { %9862 = vmatprep.subr.mxu1 %v21972_v41 }
0x231b   : > { %9863 = vmatpush2.msra.mxu1 %v21973_v18 }
0x231c   : > { %9864 = vmatprep.subr.mxu1 %v21975_v29 }
0x231d   : > { %9865 = vmatpush2.msra.mxu1 %v21976_v39 }
0x231e   : > { %9866 = vmatprep.subr.mxu1 %v21978_v23 }
0x231f   : > { %9867 = vmatpush2.msra.mxu1 %v21979_v4 }
0x2320   : > { %9868 = vmatprep.subr.mxu1 %v21981_v49 }
0x2321   : > { %9869 = vmatpush2.msra.mxu1 %v21982_v16 }
0x2322   : > { %9870 = vmatprep.subr.mxu1 %v21984_v52 }
0x2323   : > { %9871 = vmatpush2.msra.mxu1 %v21985_v35  ;;  %v11818_v35 = vld [vmem:[%s20275_s19 + $0x68] sm:$0xff] }
0x2324   : > { %9872 = vmatprep.subr.mxu1 %v21987_v0  ;;  %v22014_v0 = vunpack.c.h.bf16 %v22013_v48 }
0x2325   : > { %9873 = vmatpush2.msra.mxu1 %v21988_v51  ;;  %v22015_v51 = vunpack.c.l.bf16 %v22013_v48  ;;  %v22058_v48 = vld [vmem:[#allocation124_spill] sm:$0xff] }
0x2326   : > { %9874 = vmatprep.subr.mxu1 %v21990_v53  ;;  %v22017_v53 = vunpack.c.h.bf16 %v22016_v34 }
0x2327   : > { %9875 = vmatpush2.msra.mxu1 %v21991_v30  ;;  %v22018_v30 = vunpack.c.l.bf16 %v22016_v34  ;;  %v22061_v34 = vld [vmem:[#allocation125_spill] sm:$0xff] }
0x2328   : > { %9876 = vmatprep.subr.mxu1 %v21993_v28  ;;  %v22019_v28 = vld [vmem:[#allocation111_spill] sm:$0xff] }
0x2329   : > { %9877 = vmatpush2.msra.mxu1 %v21994_v22  ;;  %v22020_v22 = vunpack.c.h.bf16 %v22019_v28  ;;  %v22021_v27 = vunpack.c.l.bf16 %v22019_v28 }
0x232a   : > { %9878 = vmatprep.subr.mxu1 %v21996_v20  ;;  %v22022_v20 = vld [vmem:[#allocation112_spill] sm:$0xff] }
0x232b   : > { %9879 = vmatpush2.msra.mxu1 %v21997_v59  ;;  %v22023_v59 = vunpack.c.h.bf16 %v22022_v20  ;;  %v22024_v26 = vunpack.c.l.bf16 %v22022_v20 }
0x232c   : > { %9880 = vmatprep.subr.mxu1 %v21999_v21  ;;  %v11820_v21 = vld [vmem:[%s20275_s19 + $0x78] sm:$0xff] }
0x232d   : > { %9881 = vmatpush2.msra.mxu1 %v22000_v12  ;;  %v22025_v12 = vld [vmem:[#allocation113_spill] sm:$0xff] }
0x232e   : > { %9882 = vmatprep.subr.mxu1 %v22002_v24  ;;  %v22026_v60 = vunpack.c.h.bf16 %v22025_v12  ;;  %v22027_v24 = vunpack.c.l.bf16 %v22025_v12 }
0x232f   : > { %9883 = vmatpush2.msra.mxu1 %v22003_v57  ;;  %v22028_v57 = vld [vmem:[#allocation114_spill] sm:$0xff] }
0x2330   : > { %9884 = vmatprep.subr.mxu1 %v22005_v5  ;;  %v22029_v44 = vunpack.c.h.bf16 %v22028_v57  ;;  %v22030_v5 = vunpack.c.l.bf16 %v22028_v57 }
0x2331   : > { %9885 = vmatpush2.msra.mxu1 %v22006_v50  ;;  %v22031_v50 = vld [vmem:[#allocation115_spill] sm:$0xff] }
0x2332   : > { %9886 = vmatprep.subr.mxu1 %v22008_v3  ;;  %v22032_v11 = vunpack.c.h.bf16 %v22031_v50  ;;  %v22033_v3 = vunpack.c.l.bf16 %v22031_v50 }
0x2333   : > { %9887 = vmatpush2.msra.mxu1 %v22009_v45  ;;  %v22034_v45 = vld [vmem:[#allocation116_spill] sm:$0xff] }
0x2334   : > { %9889 = vmatmul.mubr.f32.vlgmr.msra.gmra.mxu1 %v18935_v38 }
0x2335   : > { %9894 = vmatprep.mubr.f32.mxu1 %v18941_v56 }
0x2338   : > { %9895 = vmatmul.mubr.f32.gmra.mxu1 %v18943_v62 }
0x2339   : > { %9900 = vmatprep.mubr.f32.mxu1 %v18949_v36 }
0x233c   : > { %9901 = vmatmul.mubr.f32.gmra.mxu1 %v18951_v13 }
0x233d   : > { %9906 = vmatprep.mubr.f32.mxu1 %v18957_v61 }
0x2340   : > { %9907 = vmatmul.mubr.f32.gmra.mxu1 %v18959_v19 }
0x2341   : > { %10197 = vmatprep.mubr.f32.mxu1 %v21212_v31 }
0x23b4   : > { %v9793_v63 = vpop.f32.mrf.mxu1 }
0x23b5   : > { %v19316_v25 = vadd.f32 %v9793_v63, %v19143_v1  ;;  %v22036_v63 = vunpack.c.l.bf16 %v22034_v45 }
0x23b6   : > { %v9795_v33 = vpop.f32.mrf.mxu1 }
0x23b7   : > { %v19319_v47 = vadd.f32 %v9795_v33, %v19145_v46  ;;  %v9619_v46 = vadd.f32 %v9618_v37, %v19157_v54  ;;  %v22035_v37 = vunpack.c.h.bf16 %v22034_v45  ;;  %v22037_v33 = vld [vmem:[#allocation117_spill] sm:$0xff] }
0x23b8   : > { %v9799_v6 = vpop.f32.mrf.mxu1 }
0x23b9   : > { %v19322_v55 = vadd.f32 %v9799_v6, %v19147_v40  ;;  %v22038_v6 = vunpack.c.h.bf16 %v22037_v33 }
0x23ba   : > { %v9801_v42 = vpop.f32.mrf.mxu1 }
0x23bb   : > { %v19325_v43 = vadd.f32 %v9801_v42, %v19149_v2  ;;  %v22039_v42 = vunpack.c.l.bf16 %v22037_v33 }
0x23bc   : > { %v9805_v41 = vpop.f32.mrf.mxu1 }
0x23bd   : > { %v19328_v18 = vadd.f32 %v9805_v41, %v19151_v9  ;;  %v22040_v41 = vld [vmem:[#allocation118_spill] sm:$0xff] }
0x23be   : > { %v9807_v15 = vpop.f32.mrf.mxu1 }
0x23bf   : > { %v19331_v1 = vadd.f32 %v9807_v15, %v19153_v14  ;;  %v11817_v14 = vld [vmem:[%s20275_s19 + $0x60] sm:$0xff]  ;;  %v22041_v15 = vunpack.c.h.bf16 %v22040_v41 }
0x23c0   : > { %v9811_v29 = vpop.f32.mrf.mxu1 }
0x23c1   : > { %v19335_v39 = vadd.f32 %v9811_v29, %v19155_v7  ;;  %v22010_v7 = vld [vmem:[#allocation108_spill] sm:$0xff]  ;;  %v22042_v29 = vunpack.c.l.bf16 %v22040_v41 }
0x23c2   : > { %v9813_v40 = vpop.f32.mrf.mxu1  ;;  %v22011_v54 = vunpack.c.h.bf16 %v22010_v7  ;;  %v22012_v52 = vunpack.c.l.bf16 %v22010_v7 }
0x23c3   : > { %v19337_v17 = vadd.f32 %v9813_v40, %v9619_v46  ;;  %v22043_v46 = vld [vmem:[#allocation119_spill] sm:$0xff] }
0x23c4   : > { %v22044_v40 = vunpack.c.h.bf16 %v22043_v46 }
0x23f4   : > { %v9890_v23 = vpop.f32.mrf.mxu1 }
0x23f6   : > { %v9892_v2 = vpop.f32.mrf.mxu1 }
0x23f8   : > { %v9896_v4 = vpop.f32.mrf.mxu1 }
0x23fa   : > { %v9898_v10 = vpop.f32.mrf.mxu1 }
0x23fc   : > { %v9902_v49 = vpop.f32.mrf.mxu1 }
0x23fe   : > { %v9904_v9 = vpop.f32.mrf.mxu1 }
0x2400   : > { %v9908_v16 = vpop.f32.mrf.mxu1 }
0x2402   : > { %v9910_v58 = vpop.f32.mrf.mxu1 }
0x2403   : > { %9954 = vmatprep.subr.mxu0 %v9910_v58  ;;  %v22052_v58 = vld [vmem:[#allocation122_spill] sm:$0xff] }
0x2404   : > { %9955 = vmatpush1.msra.mxu0 %v9908_v16  ;;  %v22054_v7 = vunpack.c.l.bf16 %v22052_v58 }
0x2405   : > { %9956 = vmatprep.subr.mxu0 %v9904_v9 }
0x2406   : > { %9957 = vmatpush1.msra.mxu0 %v9902_v49  ;;  %v22049_v49 = vld [vmem:[#allocation121_spill] sm:$0xff] }
0x2407   : > { %9958 = vmatprep.subr.mxu0 %v9898_v10  ;;  %v22050_v9 = vunpack.c.h.bf16 %v22049_v49  ;;  %v22051_v16 = vunpack.c.l.bf16 %v22049_v49 }
0x2408   : > { %9959 = vmatpush1.msra.mxu0 %v9896_v4 }
0x2409   : > { %9960 = vmatprep.subr.mxu0 %v9892_v2  ;;  %v22046_v2 = vld [vmem:[#allocation120_spill] sm:$0xff] }
0x240a   : > { %9961 = vmatpush1.msra.mxu0 %v9890_v23  ;;  %v22045_v23 = vunpack.c.l.bf16 %v22043_v46  ;;  %v22047_v4 = vunpack.c.h.bf16 %v22046_v2  ;;  %v22048_v10 = vunpack.c.l.bf16 %v22046_v2 }
0x240b   : > { %11821 = vmatmul.mubr.msk.f32.vlgmr.msra.gmra.mxu0 %vm7295_vm5, %v11817_v14  ;;  %10027 = vmatprep.subr.mxu0 %v22011_v54  ;;  %v22053_v14 = vunpack.c.h.bf16 %v22052_v58  ;;  %v22055_v54 = vld [vmem:[#allocation123_spill] sm:$0xff] }
0x240c   : > { %10028 = vmatpush1.msra.mxu0 %v22012_v52  ;;  %10000 = vmatprep.mubr.f32.mxu0 %v21212_v31  ;;  %v22056_v52 = vunpack.c.h.bf16 %v22055_v54 }
0x240d   : > { %10029 = vmatprep.subr.mxu0 %v22014_v0  ;;  %v22059_v0 = vunpack.c.h.bf16 %v22058_v48 }
0x240e   : > { %10030 = vmatpush1.msra.mxu0 %v22015_v51  ;;  %v22060_v51 = vunpack.c.l.bf16 %v22058_v48 }
0x240f   : > { %11822 = vmatmul.mubr.msk.f32.gmra.mxu0 %vm7295_vm5, %v11818_v35  ;;  %10031 = vmatprep.subr.mxu0 %v22017_v53  ;;  %v22057_v35 = vunpack.c.l.bf16 %v22055_v54  ;;  %v22062_v53 = vunpack.c.h.bf16 %v22061_v34 }
0x2410   : > { %10032 = vmatpush1.msra.mxu0 %v22018_v30  ;;  %10006 = vmatprep.mubr.f32.mxu0 %v21212_v31  ;;  %v22063_v30 = vunpack.c.l.bf16 %v22061_v34 }
0x2411   : > { %10033 = vmatprep.subr.mxu0 %v22020_v22 }
0x2412   : > { %10034 = vmatpush1.msra.mxu0 %v22021_v27  ;;  %v22067_v27 = vld [vmem:[#allocation127_spill] sm:$0xff] }
0x2413   : > { %11823 = vmatmul.mubr.msk.f32.gmra.mxu0 %vm7295_vm5, %v11819_v8  ;;  %10035 = vmatprep.subr.mxu0 %v22023_v59  ;;  %v22064_v8 = vld [vmem:[#allocation126_spill] sm:$0xff]  ;;  %v22068_v20 = vunpack.c.h.bf16 %v22067_v27  ;;  %v22069_v59 = vunpack.c.l.bf16 %v22067_v27 }
0x2414   : > { %10036 = vmatpush1.msra.mxu0 %v22024_v26  ;;  %10012 = vmatprep.mubr.f32.mxu0 %v21212_v31  ;;  %v22065_v28 = vunpack.c.h.bf16 %v22064_v8  ;;  %v22066_v22 = vunpack.c.l.bf16 %v22064_v8  ;;  %v22070_v26 = vld [vmem:[#allocation128_spill] sm:$0xff] }
0x2415   : > { %10037 = vmatprep.subr.mxu0 %v22026_v60  ;;  %v22072_v12 = vunpack.c.l.bf16 %v22070_v26  ;;  %v22073_v60 = vld [vmem:[#allocation129_spill] sm:$0xff] }
0x2416   : > { %10038 = vmatpush1.msra.mxu0 %v22027_v24  ;;  %v22074_v24 = vunpack.c.h.bf16 %v22073_v60  ;;  %v22075_v57 = vunpack.c.l.bf16 %v22073_v60 }
0x2417   : > { %11824 = vmatmul.mubr.msk.f32.gmra.mxu0 %vm7295_vm5, %v11820_v21  ;;  %10039 = vmatprep.subr.mxu0 %v22029_v44  ;;  %v22071_v21 = vunpack.c.h.bf16 %v22070_v26  ;;  %v22076_v44 = vld [vmem:[#allocation130_spill] sm:$0xff] }
0x2418   : > { %10040 = vmatpush1.msra.mxu0 %v22030_v5  ;;  %10091 = vmatprep.mubr.f32.mxu0 %v18933_v32  ;;  %v22077_v5 = vunpack.c.h.bf16 %v22076_v44  ;;  %v22078_v50 = vunpack.c.l.bf16 %v22076_v44 }
0x2419   : > { %10041 = vmatprep.subr.mxu0 %v22032_v11  ;;  %v22079_v11 = vld [vmem:[#allocation131_spill] sm:$0xff] }
0x241a   : > { %10042 = vmatpush1.msra.mxu0 %v22033_v3  ;;  %v22080_v3 = vunpack.c.h.bf16 %v22079_v11  ;;  %v22081_v45 = vunpack.c.l.bf16 %v22079_v11  ;;  %v11826_v11 = vld [vmem:[%s20275_s19 + $0x88] sm:$0xff] }
0x241b   : > { %10043 = vmatprep.subr.mxu0 %v22035_v37  ;;  %v22082_v37 = vld [vmem:[#allocation132_spill] sm:$0xff] }
0x241c   : > { %10044 = vmatpush1.msra.mxu0 %v22036_v63  ;;  %v22083_v63 = vunpack.c.h.bf16 %v22082_v37  ;;  %v22084_v33 = vunpack.c.l.bf16 %v22082_v37 }
0x241d   : > { %10045 = vmatprep.subr.mxu0 %v22038_v6  ;;  %v22085_v6 = vld [vmem:[#allocation133_spill] sm:$0xff] }
0x241e   : > { %10046 = vmatpush1.msra.mxu0 %v22039_v42  ;;  %v22086_v42 = vunpack.c.h.bf16 %v22085_v6  ;;  %v22087_v41 = vunpack.c.l.bf16 %v22085_v6 }
0x241f   : > { %10047 = vmatprep.subr.mxu0 %v22041_v15  ;;  %v22088_v15 = vld [vmem:[#allocation134_spill] sm:$0xff] }
0x2420   : > { %10048 = vmatpush1.msra.mxu0 %v22042_v29  ;;  %v22089_v29 = vunpack.c.h.bf16 %v22088_v15  ;;  %v22090_v46 = vunpack.c.l.bf16 %v22088_v15 }
0x2421   : > { %10049 = vmatprep.subr.mxu0 %v22044_v40  ;;  %v22091_v40 = vld [vmem:[#allocation135_spill] sm:$0xff] }
0x2422   : > { %10050 = vmatpush1.msra.mxu0 %v22045_v23  ;;  %v22092_v23 = vunpack.c.h.bf16 %v22091_v40  ;;  %v22093_v2 = vunpack.c.l.bf16 %v22091_v40 }
0x2423   : > { %10051 = vmatprep.subr.mxu0 %v22047_v4  ;;  %v22094_v4 = vld [vmem:[#allocation136_spill] sm:$0xff] }
0x2424   : > { %10052 = vmatpush1.msra.mxu0 %v22048_v10  ;;  %v22095_v10 = vunpack.c.h.bf16 %v22094_v4  ;;  %v22096_v49 = vunpack.c.l.bf16 %v22094_v4  ;;  %v22121_v4 = vld [vmem:[#allocation145_spill] sm:$0xff] }
0x2425   : > { %10053 = vmatprep.subr.mxu0 %v22050_v9  ;;  %v22097_v9 = vld [vmem:[#allocation137_spill] sm:$0xff] }
0x2426   : > { %10054 = vmatpush1.msra.mxu0 %v22051_v16  ;;  %v22098_v16 = vunpack.c.h.bf16 %v22097_v9  ;;  %v22099_v58 = vunpack.c.l.bf16 %v22097_v9  ;;  %v22124_v9 = vld [vmem:[#allocation146_spill] sm:$0xff] }
0x2427   : > { %10055 = vmatprep.subr.mxu0 %v22053_v14  ;;  %v22100_v14 = vld [vmem:[#allocation138_spill] sm:$0xff] }
0x2428   : > { %10056 = vmatpush1.msra.mxu0 %v22054_v7  ;;  %v22101_v7 = vunpack.c.h.bf16 %v22100_v14  ;;  %v22102_v54 = vunpack.c.l.bf16 %v22100_v14  ;;  %v22127_v14 = vld [vmem:[#allocation147_spill] sm:$0xff] }
0x2429   : > { %10057 = vmatprep.subr.mxu0 %v22056_v52  ;;  %v22103_v52 = vld [vmem:[#allocation139_spill] sm:$0xff] }
0x242a   : > { %10058 = vmatpush1.msra.mxu0 %v22057_v35  ;;  %v22104_v35 = vunpack.c.h.bf16 %v22103_v52  ;;  %v22105_v48 = vunpack.c.l.bf16 %v22103_v52  ;;  %v22130_v52 = vld [vmem:[#allocation148_spill] sm:$0xff] }
0x242b   : > { %10059 = vmatprep.subr.mxu0 %v22059_v0 }
0x242c   : > { %10060 = vmatpush2.msra.mxu0 %v22060_v51 }
0x242d   : > { %10061 = vmatprep.subr.mxu0 %v22062_v53 }
0x242e   : > { %10062 = vmatpush2.msra.mxu0 %v22063_v30 }
0x242f   : > { %10063 = vmatprep.subr.mxu0 %v22065_v28 }
0x2430   : > { %10064 = vmatpush2.msra.mxu0 %v22066_v22 }
0x2431   : > { %10065 = vmatprep.subr.mxu0 %v22068_v20 }
0x2432   : > { %10066 = vmatpush2.msra.mxu0 %v22069_v59 }
0x2433   : > { %10067 = vmatprep.subr.mxu0 %v22071_v21 }
0x2434   : > { %10068 = vmatpush2.msra.mxu0 %v22072_v12 }
0x2435   : > { %10069 = vmatprep.subr.mxu0 %v22074_v24 }
0x2436   : > { %10070 = vmatpush2.msra.mxu0 %v22075_v57 }
0x2437   : > { %10071 = vmatprep.subr.mxu0 %v22077_v5 }
0x2438   : > { %10072 = vmatpush2.msra.mxu0 %v22078_v50 }
0x2439   : > { %10073 = vmatprep.subr.mxu0 %v22080_v3  ;;  %v22109_v3 = vld [vmem:[#allocation141_spill] sm:$0xff] }
0x243a   : > { %10074 = vmatpush2.msra.mxu0 %v22081_v45  ;;  %v22110_v45 = vunpack.c.h.bf16 %v22109_v3  ;;  %v22111_v37 = vunpack.c.l.bf16 %v22109_v3  ;;  %v22154_v3 = vld [vmem:[#allocation156_spill] sm:$0xff] }
0x243b   : > { %10075 = vmatprep.subr.mxu0 %v22083_v63  ;;  %v22112_v63 = vld [vmem:[#allocation142_spill] sm:$0xff] }
0x243c   : > { %10076 = vmatpush2.msra.mxu0 %v22084_v33  ;;  %v22113_v33 = vunpack.c.h.bf16 %v22112_v63  ;;  %v22114_v6 = vunpack.c.l.bf16 %v22112_v63  ;;  %v22157_v63 = vld [vmem:[#allocation157_spill] sm:$0xff] }
0x243d   : > { %10077 = vmatprep.subr.mxu0 %v22086_v42  ;;  %v11827_v42 = vld [vmem:[%s20275_s19 + $0x90] sm:$0xff] }
0x243e   : > { %10078 = vmatpush2.msra.mxu0 %v22087_v41  ;;  %v22115_v41 = vld [vmem:[#allocation143_spill] sm:$0xff] }
0x243f   : > { %10079 = vmatprep.subr.mxu0 %v22089_v29  ;;  %v22116_v15 = vunpack.c.h.bf16 %v22115_v41  ;;  %v22117_v29 = vunpack.c.l.bf16 %v22115_v41 }
0x2440   : > { %10080 = vmatpush2.msra.mxu0 %v22090_v46  ;;  %v22118_v46 = vld [vmem:[#allocation144_spill] sm:$0xff] }
0x2441   : > { %10081 = vmatprep.subr.mxu0 %v22092_v23  ;;  %v22119_v40 = vunpack.c.h.bf16 %v22118_v46  ;;  %v22120_v23 = vunpack.c.l.bf16 %v22118_v46 }
0x2442   : > { %10082 = vmatpush2.msra.mxu0 %v22093_v2  ;;  %v11828_v2 = vld [vmem:[%s20275_s19 + $0x98] sm:$0xff] }
0x2443   : > { %10083 = vmatprep.subr.mxu0 %v22095_v10  ;;  %v22122_v10 = vunpack.c.h.bf16 %v22121_v4 }
0x2444   : > { %10084 = vmatpush2.msra.mxu0 %v22096_v49  ;;  %v22123_v49 = vunpack.c.l.bf16 %v22121_v4 }
0x2445   : > { %10085 = vmatprep.subr.mxu0 %v22098_v16  ;;  %v22125_v16 = vunpack.c.h.bf16 %v22124_v9 }
0x2446   : > { %10086 = vmatpush2.msra.mxu0 %v22099_v58  ;;  %v22126_v58 = vunpack.c.l.bf16 %v22124_v9 }
0x2447   : > { %10087 = vmatprep.subr.mxu0 %v22101_v7  ;;  %v22128_v7 = vunpack.c.h.bf16 %v22127_v14 }
0x2448   : > { %10088 = vmatpush2.msra.mxu0 %v22102_v54  ;;  %v22129_v54 = vunpack.c.l.bf16 %v22127_v14 }
0x2449   : > { %10089 = vmatprep.subr.mxu0 %v22104_v35  ;;  %v22131_v35 = vunpack.c.h.bf16 %v22130_v52 }
0x244a   : > { %10090 = vmatpush2.msra.mxu0 %v22105_v48  ;;  %v22132_v48 = vunpack.c.l.bf16 %v22130_v52 }
0x244b   : > { %10092 = vmatmul.mubr.f32.vlgmr.msra.gmra.mxu0 %v18935_v38 }
0x244c   : > { %10097 = vmatprep.mubr.f32.mxu0 %v18941_v56 }
0x244f   : > { %10098 = vmatmul.mubr.f32.gmra.mxu0 %v18943_v62 }
0x2450   : > { %10103 = vmatprep.mubr.f32.mxu0 %v18949_v36 }
0x2453   : > { %10104 = vmatmul.mubr.f32.gmra.mxu0 %v18951_v13 }
0x2454   : > { %10109 = vmatprep.mubr.f32.mxu0 %v18957_v61 }
0x2457   : > { %10110 = vmatmul.mubr.f32.gmra.mxu0 %v18959_v19 }
0x2458   : > { %10400 = vmatprep.mubr.f32.mxu0 %v21212_v31 }
0x24cb   : > { %v9996_v0 = vpop.f32.mrf.mxu0 }
0x24cc   : > { %v19496_v51 = vadd.f32 %v9996_v0, %v19316_v25  ;;  %v22133_v0 = vld [vmem:[#allocation149_spill] sm:$0xff] }
0x24cd   : > { %v9998_v34 = vpop.f32.mrf.mxu0 }
0x24ce   : > { %v19499_v53 = vadd.f32 %v9998_v34, %v19319_v47  ;;  %v22134_v34 = vunpack.c.h.bf16 %v22133_v0 }
0x24cf   : > { %v10002_v30 = vpop.f32.mrf.mxu0 }
0x24d0   : > { %v19502_v8 = vadd.f32 %v10002_v30, %v19322_v55  ;;  %v22135_v30 = vunpack.c.l.bf16 %v22133_v0 }
0x24d1   : > { %v10004_v28 = vpop.f32.mrf.mxu0 }
0x24d2   : > { %v19505_v22 = vadd.f32 %v10004_v28, %v19325_v43  ;;  %v22136_v28 = vld [vmem:[#allocation150_spill] sm:$0xff] }
0x24d3   : > { %v10008_v27 = vpop.f32.mrf.mxu0 }
0x24d4   : > { %v19508_v20 = vadd.f32 %v10008_v27, %v19328_v18  ;;  %v22137_v27 = vunpack.c.h.bf16 %v22136_v28 }
0x24d5   : > { %v10010_v59 = vpop.f32.mrf.mxu0 }
0x24d6   : > { %v19511_v25 = vadd.f32 %v10010_v59, %v19331_v1  ;;  %v11825_v1 = vld [vmem:[%s20275_s19 + $0x80] sm:$0xff]  ;;  %v22138_v59 = vunpack.c.l.bf16 %v22136_v28 }
0x24d7   : > { %v10014_v26 = vpop.f32.mrf.mxu0 }
0x24d8   : > { %v19514_v47 = vadd.f32 %v10014_v26, %v19335_v39  ;;  %v22106_v39 = vld [vmem:[#allocation140_spill] sm:$0xff]  ;;  %v22139_v26 = vld [vmem:[#allocation151_spill] sm:$0xff] }
0x24d9   : > { %v10016_v21 = vpop.f32.mrf.mxu0  ;;  %v22108_v50 = vunpack.c.l.bf16 %v22106_v39 }
0x24da   : > { %v19517_v55 = vadd.f32 %v10016_v21, %v19337_v17  ;;  %v22107_v17 = vunpack.c.h.bf16 %v22106_v39  ;;  %v22140_v21 = vunpack.c.h.bf16 %v22139_v26 }
0x250b   : > { %v10093_v12 = vpop.f32.mrf.mxu0 }
0x250d   : > { %v10095_v60 = vpop.f32.mrf.mxu0 }
0x250f   : > { %v10099_v43 = vpop.f32.mrf.mxu0 }
0x2511   : > { %v10101_v24 = vpop.f32.mrf.mxu0 }
0x2513   : > { %v10105_v57 = vpop.f32.mrf.mxu0 }
0x2515   : > { %v10107_v44 = vpop.f32.mrf.mxu0 }
0x2517   : > { %v10111_v18 = vpop.f32.mrf.mxu0 }
0x2519   : > { %v10113_v5 = vpop.f32.mrf.mxu0 }
0x251a   : > { %10157 = vmatprep.subr.mxu1 %v10113_v5  ;;  %v22148_v5 = vld [vmem:[#allocation154_spill] sm:$0xff] }
0x251b   : > { %10158 = vmatpush1.msra.mxu1 %v10111_v18  ;;  %v22150_v39 = vunpack.c.l.bf16 %v22148_v5 }
0x251c   : > { %10159 = vmatprep.subr.mxu1 %v10107_v44 }
0x251d   : > { %10160 = vmatpush1.msra.mxu1 %v10105_v57  ;;  %v22145_v57 = vld [vmem:[#allocation153_spill] sm:$0xff] }
0x251e   : > { %10161 = vmatprep.subr.mxu1 %v10101_v24  ;;  %v22146_v44 = vunpack.c.h.bf16 %v22145_v57  ;;  %v22147_v18 = vunpack.c.l.bf16 %v22145_v57 }
0x251f   : > { %10162 = vmatpush1.msra.mxu1 %v10099_v43 }
0x2520   : > { %10163 = vmatprep.subr.mxu1 %v10095_v60  ;;  %v22142_v60 = vld [vmem:[#allocation152_spill] sm:$0xff] }
0x2521   : > { %10164 = vmatpush1.msra.mxu1 %v10093_v12  ;;  %v22141_v12 = vunpack.c.l.bf16 %v22139_v26  ;;  %v22143_v43 = vunpack.c.h.bf16 %v22142_v60  ;;  %v22144_v24 = vunpack.c.l.bf16 %v22142_v60 }
0x2522   : > { %11829 = vmatmul.mubr.msk.f32.vlgmr.msra.gmra.mxu1 %vm7295_vm5, %v11825_v1  ;;  %10230 = vmatprep.subr.mxu1 %v22107_v17  ;;  %v22149_v1 = vunpack.c.h.bf16 %v22148_v5  ;;  %v22151_v17 = vld [vmem:[#allocation155_spill] sm:$0xff] }
0x2523   : > { %10231 = vmatpush1.msra.mxu1 %v22108_v50  ;;  %10203 = vmatprep.mubr.f32.mxu1 %v21212_v31  ;;  %v22152_v50 = vunpack.c.h.bf16 %v22151_v17 }
0x2524   : > { %10232 = vmatprep.subr.mxu1 %v22110_v45  ;;  %v22155_v45 = vunpack.c.h.bf16 %v22154_v3 }
0x2525   : > { %10233 = vmatpush1.msra.mxu1 %v22111_v37  ;;  %v22156_v37 = vunpack.c.l.bf16 %v22154_v3 }
0x2526   : > { %11830 = vmatmul.mubr.msk.f32.gmra.mxu1 %vm7295_vm5, %v11826_v11  ;;  %10234 = vmatprep.subr.mxu1 %v22113_v33  ;;  %v22153_v11 = vunpack.c.l.bf16 %v22151_v17  ;;  %v22158_v33 = vunpack.c.h.bf16 %v22157_v63 }
0x2527   : > { %10235 = vmatpush1.msra.mxu1 %v22114_v6  ;;  %10209 = vmatprep.mubr.f32.mxu1 %v21212_v31  ;;  %v22159_v6 = vunpack.c.l.bf16 %v22157_v63 }
0x2528   : > { %10236 = vmatprep.subr.mxu1 %v22116_v15 }
0x2529   : > { %10237 = vmatpush1.msra.mxu1 %v22117_v29  ;;  %v22163_v29 = vld [vmem:[#allocation159_spill] sm:$0xff] }
0x252a   : > { %11831 = vmatmul.mubr.msk.f32.gmra.mxu1 %vm7295_vm5, %v11827_v42  ;;  %10238 = vmatprep.subr.mxu1 %v22119_v40  ;;  %v22160_v42 = vld [vmem:[#allocation158_spill] sm:$0xff]  ;;  %v22164_v46 = vunpack.c.h.bf16 %v22163_v29  ;;  %v22165_v40 = vunpack.c.l.bf16 %v22163_v29 }
0x252b   : > { %10239 = vmatpush1.msra.mxu1 %v22120_v23  ;;  %10215 = vmatprep.mubr.f32.mxu1 %v21212_v31  ;;  %v22161_v41 = vunpack.c.h.bf16 %v22160_v42  ;;  %v22162_v15 = vunpack.c.l.bf16 %v22160_v42  ;;  %v22166_v23 = vld [vmem:[#allocation160_spill] sm:$0xff] }
0x252c   : > { %10240 = vmatprep.subr.mxu1 %v22122_v10  ;;  %v22168_v4 = vunpack.c.l.bf16 %v22166_v23  ;;  %v22169_v10 = vld [vmem:[#allocation161_spill] sm:$0xff] }
0x252d   : > { %10241 = vmatpush1.msra.mxu1 %v22123_v49  ;;  %v22170_v49 = vunpack.c.h.bf16 %v22169_v10  ;;  %v22171_v9 = vunpack.c.l.bf16 %v22169_v10 }
0x252e   : > { %11832 = vmatmul.mubr.msk.f32.gmra.mxu1 %vm7295_vm5, %v11828_v2  ;;  %10242 = vmatprep.subr.mxu1 %v22125_v16  ;;  %v22167_v2 = vunpack.c.h.bf16 %v22166_v23  ;;  %v22172_v16 = vld [vmem:[#allocation162_spill] sm:$0xff] }
0x252f   : > { %10243 = vmatpush1.msra.mxu1 %v22126_v58  ;;  %10294 = vmatprep.mubr.f32.mxu1 %v18933_v32  ;;  %v22173_v58 = vunpack.c.h.bf16 %v22172_v16  ;;  %v22174_v14 = vunpack.c.l.bf16 %v22172_v16 }
0x2530   : > { %10244 = vmatprep.subr.mxu1 %v22128_v7  ;;  %v22175_v7 = vld [vmem:[#allocation163_spill] sm:$0xff] }
0x2531   : > { %10245 = vmatpush1.msra.mxu1 %v22129_v54  ;;  %v22176_v54 = vunpack.c.h.bf16 %v22175_v7  ;;  %v22177_v52 = vunpack.c.l.bf16 %v22175_v7  ;;  %v11834_v7 = vld [vmem:[%s20275_s19 + $0xa8] sm:$0xff] }
0x2532   : > { %10246 = vmatprep.subr.mxu1 %v22131_v35  ;;  %v22178_v35 = vld [vmem:[#allocation164_spill] sm:$0xff] }
0x2533   : > { %10247 = vmatpush1.msra.mxu1 %v22132_v48  ;;  %v22179_v48 = vunpack.c.h.bf16 %v22178_v35  ;;  %v22180_v0 = vunpack.c.l.bf16 %v22178_v35 }
0x2534   : > { %10248 = vmatprep.subr.mxu1 %v22134_v34  ;;  %v22181_v34 = vld [vmem:[#allocation165_spill] sm:$0xff] }
0x2535   : > { %10249 = vmatpush1.msra.mxu1 %v22135_v30  ;;  %v22182_v30 = vunpack.c.h.bf16 %v22181_v34  ;;  %v22183_v28 = vunpack.c.l.bf16 %v22181_v34 }
0x2536   : > { %10250 = vmatprep.subr.mxu1 %v22137_v27  ;;  %v22184_v27 = vld [vmem:[#allocation166_spill] sm:$0xff] }
0x2537   : > { %10251 = vmatpush1.msra.mxu1 %v22138_v59  ;;  %v22185_v59 = vunpack.c.h.bf16 %v22184_v27  ;;  %v22186_v26 = vunpack.c.l.bf16 %v22184_v27 }
0x2538   : > { %10252 = vmatprep.subr.mxu1 %v22140_v21  ;;  %v22187_v21 = vld [vmem:[#allocation167_spill] sm:$0xff] }
0x2539   : > { %10253 = vmatpush1.msra.mxu1 %v22141_v12  ;;  %v22188_v12 = vunpack.c.h.bf16 %v22187_v21  ;;  %v22189_v60 = vunpack.c.l.bf16 %v22187_v21 }
0x253a   : > { %10254 = vmatprep.subr.mxu1 %v22143_v43  ;;  %v22190_v43 = vld [vmem:[#allocation168_spill] sm:$0xff] }
0x253b   : > { %10255 = vmatpush1.msra.mxu1 %v22144_v24  ;;  %v22191_v24 = vunpack.c.h.bf16 %v22190_v43  ;;  %v22192_v57 = vunpack.c.l.bf16 %v22190_v43  ;;  %v22217_v43 = vld [vmem:[#allocation177_spill] sm:$0xff] }
0x253c   : > { %10256 = vmatprep.subr.mxu1 %v22146_v44  ;;  %v22193_v44 = vld [vmem:[#allocation169_spill] sm:$0xff] }
0x253d   : > { %10257 = vmatpush1.msra.mxu1 %v22147_v18  ;;  %v22194_v18 = vunpack.c.h.bf16 %v22193_v44  ;;  %v22195_v5 = vunpack.c.l.bf16 %v22193_v44  ;;  %v22220_v44 = vld [vmem:[#allocation178_spill] sm:$0xff] }
0x253e   : > { %10258 = vmatprep.subr.mxu1 %v22149_v1  ;;  %v22196_v1 = vld [vmem:[#allocation170_spill] sm:$0xff] }
0x253f   : > { %10259 = vmatpush1.msra.mxu1 %v22150_v39  ;;  %v22197_v39 = vunpack.c.h.bf16 %v22196_v1  ;;  %v22198_v17 = vunpack.c.l.bf16 %v22196_v1  ;;  %v22223_v1 = vld [vmem:[#allocation179_spill] sm:$0xff] }
0x2540   : > { %10260 = vmatprep.subr.mxu1 %v22152_v50  ;;  %v22199_v50 = vld [vmem:[#allocation171_spill] sm:$0xff] }
0x2541   : > { %10261 = vmatpush1.msra.mxu1 %v22153_v11  ;;  %v22200_v11 = vunpack.c.h.bf16 %v22199_v50  ;;  %v22201_v3 = vunpack.c.l.bf16 %v22199_v50  ;;  %v22226_v50 = vld [vmem:[#allocation180_spill] sm:$0xff] }
0x2542   : > { %10262 = vmatprep.subr.mxu1 %v22155_v45 }
0x2543   : > { %10263 = vmatpush2.msra.mxu1 %v22156_v37 }
0x2544   : > { %10264 = vmatprep.subr.mxu1 %v22158_v33 }
0x2545   : > { %10265 = vmatpush2.msra.mxu1 %v22159_v6 }
0x2546   : > { %10266 = vmatprep.subr.mxu1 %v22161_v41 }
0x2547   : > { %10267 = vmatpush2.msra.mxu1 %v22162_v15 }
0x2548   : > { %10268 = vmatprep.subr.mxu1 %v22164_v46 }
0x2549   : > { %10269 = vmatpush2.msra.mxu1 %v22165_v40 }
0x254a   : > { %10270 = vmatprep.subr.mxu1 %v22167_v2 }
0x254b   : > { %10271 = vmatpush2.msra.mxu1 %v22168_v4 }
0x254c   : > { %10272 = vmatprep.subr.mxu1 %v22170_v49 }
0x254d   : > { %10273 = vmatpush2.msra.mxu1 %v22171_v9 }
0x254e   : > { %10274 = vmatprep.subr.mxu1 %v22173_v58 }
0x254f   : > { %10275 = vmatpush2.msra.mxu1 %v22174_v14 }
0x2550   : > { %10276 = vmatprep.subr.mxu1 %v22176_v54  ;;  %v22205_v54 = vld [vmem:[#allocation173_spill] sm:$0xff] }
0x2551   : > { %10277 = vmatpush2.msra.mxu1 %v22177_v52  ;;  %v22206_v52 = vunpack.c.h.bf16 %v22205_v54  ;;  %v22207_v35 = vunpack.c.l.bf16 %v22205_v54  ;;  %v22250_v54 = vld [vmem:[#allocation188_spill] sm:$0xff] }
0x2552   : > { %10278 = vmatprep.subr.mxu1 %v22179_v48  ;;  %v22208_v48 = vld [vmem:[#allocation174_spill] sm:$0xff] }
0x2553   : > { %10279 = vmatpush2.msra.mxu1 %v22180_v0  ;;  %v22209_v0 = vunpack.c.h.bf16 %v22208_v48  ;;  %v22210_v34 = vunpack.c.l.bf16 %v22208_v48  ;;  %v22253_v48 = vld [vmem:[#allocation189_spill] sm:$0xff] }
0x2554   : > { %10280 = vmatprep.subr.mxu1 %v22182_v30  ;;  %v11835_v30 = vld [vmem:[%s20275_s19 + $0xb0] sm:$0xff] }
0x2555   : > { %10281 = vmatpush2.msra.mxu1 %v22183_v28  ;;  %v22211_v28 = vld [vmem:[#allocation175_spill] sm:$0xff] }
0x2556   : > { %10282 = vmatprep.subr.mxu1 %v22185_v59  ;;  %v22212_v27 = vunpack.c.h.bf16 %v22211_v28  ;;  %v22213_v59 = vunpack.c.l.bf16 %v22211_v28 }
0x2557   : > { %10283 = vmatpush2.msra.mxu1 %v22186_v26  ;;  %v22214_v26 = vld [vmem:[#allocation176_spill] sm:$0xff] }
0x2558   : > { %10284 = vmatprep.subr.mxu1 %v22188_v12  ;;  %v22215_v21 = vunpack.c.h.bf16 %v22214_v26  ;;  %v22216_v12 = vunpack.c.l.bf16 %v22214_v26 }
0x2559   : > { %10285 = vmatpush2.msra.mxu1 %v22189_v60  ;;  %v11836_v60 = vld [vmem:[%s20275_s19 + $0xb8] sm:$0xff] }
0x255a   : > { %10286 = vmatprep.subr.mxu1 %v22191_v24  ;;  %v22218_v24 = vunpack.c.h.bf16 %v22217_v43 }
0x255b   : > { %10287 = vmatpush2.msra.mxu1 %v22192_v57  ;;  %v22219_v57 = vunpack.c.l.bf16 %v22217_v43 }
0x255c   : > { %10288 = vmatprep.subr.mxu1 %v22194_v18  ;;  %v22221_v18 = vunpack.c.h.bf16 %v22220_v44 }
0x255d   : > { %10289 = vmatpush2.msra.mxu1 %v22195_v5  ;;  %v22222_v5 = vunpack.c.l.bf16 %v22220_v44 }
0x255e   : > { %10290 = vmatprep.subr.mxu1 %v22197_v39  ;;  %v22224_v39 = vunpack.c.h.bf16 %v22223_v1 }
0x255f   : > { %10291 = vmatpush2.msra.mxu1 %v22198_v17  ;;  %v22225_v17 = vunpack.c.l.bf16 %v22223_v1 }
0x2560   : > { %10292 = vmatprep.subr.mxu1 %v22200_v11  ;;  %v22227_v11 = vunpack.c.h.bf16 %v22226_v50 }
0x2561   : > { %10293 = vmatpush2.msra.mxu1 %v22201_v3  ;;  %v22228_v3 = vunpack.c.l.bf16 %v22226_v50 }
0x2562   : > { %10295 = vmatmul.mubr.f32.vlgmr.msra.gmra.mxu1 %v18935_v38 }
0x2563   : > { %10300 = vmatprep.mubr.f32.mxu1 %v18941_v56 }
0x2566   : > { %10301 = vmatmul.mubr.f32.gmra.mxu1 %v18943_v62 }
0x2567   : > { %10306 = vmatprep.mubr.f32.mxu1 %v18949_v36 }
0x256a   : > { %10307 = vmatmul.mubr.f32.gmra.mxu1 %v18951_v13 }
0x256b   : > { %10312 = vmatprep.mubr.f32.mxu1 %v18957_v61 }
0x256e   : > { %10313 = vmatmul.mubr.f32.gmra.mxu1 %v18959_v19 }
0x256f   : > { %10603 = vmatprep.mubr.f32.mxu1 %v21212_v31 }
0x25e2   : > { %v10199_v45 = vpop.f32.mrf.mxu1 }
0x25e3   : > { %v19676_v37 = vadd.f32 %v10199_v45, %v19496_v51  ;;  %v22229_v45 = vld [vmem:[#allocation181_spill] sm:$0xff] }
0x25e4   : > { %v10201_v63 = vpop.f32.mrf.mxu1 }
0x25e5   : > { %v19679_v33 = vadd.f32 %v10201_v63, %v19499_v53  ;;  %v22230_v63 = vunpack.c.h.bf16 %v22229_v45 }
0x25e6   : > { %v10205_v6 = vpop.f32.mrf.mxu1 }
0x25e7   : > { %v19682_v42 = vadd.f32 %v10205_v6, %v19502_v8  ;;  %v22231_v6 = vunpack.c.l.bf16 %v22229_v45 }
0x25e8   : > { %v10207_v41 = vpop.f32.mrf.mxu1 }
0x25e9   : > { %v19685_v15 = vadd.f32 %v10207_v41, %v19505_v22  ;;  %v22232_v41 = vld [vmem:[#allocation182_spill] sm:$0xff] }
0x25ea   : > { %v10211_v29 = vpop.f32.mrf.mxu1 }
0x25eb   : > { %v19688_v46 = vadd.f32 %v10211_v29, %v19508_v20  ;;  %v22233_v29 = vunpack.c.h.bf16 %v22232_v41 }
0x25ec   : > { %v10213_v40 = vpop.f32.mrf.mxu1 }
0x25ed   : > { %v19691_v51 = vadd.f32 %v10213_v40, %v19511_v25  ;;  %v11833_v25 = vld [vmem:[%s20275_s19 + $0xa0] sm:$0xff]  ;;  %v22234_v40 = vunpack.c.l.bf16 %v22232_v41 }
0x25ee   : > { %v10217_v23 = vpop.f32.mrf.mxu1 }
0x25ef   : > { %v19694_v53 = vadd.f32 %v10217_v23, %v19514_v47  ;;  %v22202_v47 = vld [vmem:[#allocation172_spill] sm:$0xff]  ;;  %v22235_v23 = vld [vmem:[#allocation183_spill] sm:$0xff] }
0x25f0   : > { %v10219_v2 = vpop.f32.mrf.mxu1  ;;  %v22204_v14 = vunpack.c.l.bf16 %v22202_v47 }
0x25f1   : > { %v19697_v8 = vadd.f32 %v10219_v2, %v19517_v55  ;;  %v22203_v55 = vunpack.c.h.bf16 %v22202_v47  ;;  %v22236_v2 = vunpack.c.h.bf16 %v22235_v23 }
0x2622   : > { %v10296_v4 = vpop.f32.mrf.mxu1 }
0x2624   : > { %v10298_v10 = vpop.f32.mrf.mxu1 }
0x2626   : > { %v10302_v22 = vpop.f32.mrf.mxu1 }
0x2628   : > { %v10304_v49 = vpop.f32.mrf.mxu1 }
0x262a   : > { %v10308_v9 = vpop.f32.mrf.mxu1 }
0x262c   : > { %v10310_v16 = vpop.f32.mrf.mxu1 }
0x262e   : > { %v10314_v20 = vpop.f32.mrf.mxu1 }
0x2630   : > { %v10316_v58 = vpop.f32.mrf.mxu1 }
0x2631   : > { %10360 = vmatprep.subr.mxu0 %v10316_v58  ;;  %v22244_v58 = vld [vmem:[#allocation186_spill] sm:$0xff] }
0x2632   : > { %10361 = vmatpush1.msra.mxu0 %v10314_v20  ;;  %v22246_v47 = vunpack.c.l.bf16 %v22244_v58 }
0x2633   : > { %10362 = vmatprep.subr.mxu0 %v10310_v16 }
0x2634   : > { %10363 = vmatpush1.msra.mxu0 %v10308_v9  ;;  %v22241_v9 = vld [vmem:[#allocation185_spill] sm:$0xff] }
0x2635   : > { %10364 = vmatprep.subr.mxu0 %v10304_v49  ;;  %v22242_v16 = vunpack.c.h.bf16 %v22241_v9  ;;  %v22243_v20 = vunpack.c.l.bf16 %v22241_v9 }
0x2636   : > { %10365 = vmatpush1.msra.mxu0 %v10302_v22 }
0x2637   : > { %10366 = vmatprep.subr.mxu0 %v10298_v10  ;;  %v22238_v10 = vld [vmem:[#allocation184_spill] sm:$0xff] }
0x2638   : > { %10367 = vmatpush1.msra.mxu0 %v10296_v4  ;;  %v22237_v4 = vunpack.c.l.bf16 %v22235_v23  ;;  %v22239_v22 = vunpack.c.h.bf16 %v22238_v10  ;;  %v22240_v49 = vunpack.c.l.bf16 %v22238_v10 }
0x2639   : > { %11837 = vmatmul.mubr.msk.f32.vlgmr.msra.gmra.mxu0 %vm7295_vm5, %v11833_v25  ;;  %10433 = vmatprep.subr.mxu0 %v22203_v55  ;;  %v22245_v25 = vunpack.c.h.bf16 %v22244_v58  ;;  %v22247_v55 = vld [vmem:[#allocation187_spill] sm:$0xff] }
0x263a   : > { %10434 = vmatpush1.msra.mxu0 %v22204_v14  ;;  %10406 = vmatprep.mubr.f32.mxu0 %v21212_v31  ;;  %v22248_v14 = vunpack.c.h.bf16 %v22247_v55 }
0x263b   : > { %10435 = vmatprep.subr.mxu0 %v22206_v52  ;;  %v22251_v52 = vunpack.c.h.bf16 %v22250_v54 }
0x263c   : > { %10436 = vmatpush1.msra.mxu0 %v22207_v35  ;;  %v22252_v35 = vunpack.c.l.bf16 %v22250_v54 }
0x263d   : > { %11838 = vmatmul.mubr.msk.f32.gmra.mxu0 %vm7295_vm5, %v11834_v7  ;;  %10437 = vmatprep.subr.mxu0 %v22209_v0  ;;  %v22249_v7 = vunpack.c.l.bf16 %v22247_v55  ;;  %v22254_v0 = vunpack.c.h.bf16 %v22253_v48 }
0x263e   : > { %10438 = vmatpush1.msra.mxu0 %v22210_v34  ;;  %10412 = vmatprep.mubr.f32.mxu0 %v21212_v31  ;;  %v22255_v34 = vunpack.c.l.bf16 %v22253_v48 }
0x263f   : > { %10439 = vmatprep.subr.mxu0 %v22212_v27 }
0x2640   : > { %10440 = vmatpush1.msra.mxu0 %v22213_v59  ;;  %v22259_v59 = vld [vmem:[#allocation191_spill] sm:$0xff] }
0x2641   : > { %11839 = vmatmul.mubr.msk.f32.gmra.mxu0 %vm7295_vm5, %v11835_v30  ;;  %10441 = vmatprep.subr.mxu0 %v22215_v21  ;;  %v22256_v30 = vld [vmem:[#allocation190_spill] sm:$0xff]  ;;  %v22260_v26 = vunpack.c.h.bf16 %v22259_v59  ;;  %v22261_v21 = vunpack.c.l.bf16 %v22259_v59 }
0x2642   : > { %10442 = vmatpush1.msra.mxu0 %v22216_v12  ;;  %10418 = vmatprep.mubr.f32.mxu0 %v21212_v31  ;;  %v22257_v28 = vunpack.c.h.bf16 %v22256_v30  ;;  %v22258_v27 = vunpack.c.l.bf16 %v22256_v30  ;;  %v22262_v12 = vld [vmem:[#allocation192_spill] sm:$0xff] }
0x2643   : > { %10443 = vmatprep.subr.mxu0 %v22218_v24  ;;  %v22264_v43 = vunpack.c.l.bf16 %v22262_v12  ;;  %v22265_v24 = vld [vmem:[#allocation193_spill] sm:$0xff] }
0x2644   : > { %10444 = vmatpush1.msra.mxu0 %v22219_v57  ;;  %v22266_v57 = vunpack.c.h.bf16 %v22265_v24  ;;  %v22267_v44 = vunpack.c.l.bf16 %v22265_v24 }
0x2645   : > { %11840 = vmatmul.mubr.msk.f32.gmra.mxu0 %vm7295_vm5, %v11836_v60  ;;  %10445 = vmatprep.subr.mxu0 %v22221_v18  ;;  %v22263_v60 = vunpack.c.h.bf16 %v22262_v12  ;;  %v22268_v18 = vld [vmem:[#allocation194_spill] sm:$0xff] }
0x2646   : > { %10446 = vmatpush1.msra.mxu0 %v22222_v5  ;;  %10497 = vmatprep.mubr.f32.mxu0 %v18933_v32  ;;  %v22269_v5 = vunpack.c.h.bf16 %v22268_v18  ;;  %v22270_v1 = vunpack.c.l.bf16 %v22268_v18 }
0x2647   : > { %10447 = vmatprep.subr.mxu0 %v22224_v39  ;;  %v22271_v39 = vld [vmem:[#allocation195_spill] sm:$0xff] }
0x2648   : > { %10448 = vmatpush1.msra.mxu0 %v22225_v17  ;;  %v22272_v17 = vunpack.c.h.bf16 %v22271_v39  ;;  %v22273_v50 = vunpack.c.l.bf16 %v22271_v39  ;;  %v11842_v39 = vld [vmem:[%s20275_s19 + $0xc8] sm:$0xff] }
0x2649   : > { %10449 = vmatprep.subr.mxu0 %v22227_v11  ;;  %v22274_v11 = vld [vmem:[#allocation196_spill] sm:$0xff] }
0x264a   : > { %10450 = vmatpush1.msra.mxu0 %v22228_v3  ;;  %v22275_v3 = vunpack.c.h.bf16 %v22274_v11  ;;  %v22276_v45 = vunpack.c.l.bf16 %v22274_v11 }
0x264b   : > { %10451 = vmatprep.subr.mxu0 %v22230_v63  ;;  %v22277_v63 = vld [vmem:[#allocation197_spill] sm:$0xff] }
0x264c   : > { %10452 = vmatpush1.msra.mxu0 %v22231_v6  ;;  %v22278_v6 = vunpack.c.h.bf16 %v22277_v63  ;;  %v22279_v41 = vunpack.c.l.bf16 %v22277_v63 }
0x264d   : > { %10453 = vmatprep.subr.mxu0 %v22233_v29  ;;  %v22280_v29 = vld [vmem:[#allocation198_spill] sm:$0xff] }
0x264e   : > { %10454 = vmatpush1.msra.mxu0 %v22234_v40  ;;  %v22281_v40 = vunpack.c.h.bf16 %v22280_v29  ;;  %v22282_v23 = vunpack.c.l.bf16 %v22280_v29 }
0x264f   : > { %10455 = vmatprep.subr.mxu0 %v22236_v2  ;;  %v22283_v2 = vld [vmem:[#allocation199_spill] sm:$0xff] }
0x2650   : > { %10456 = vmatpush1.msra.mxu0 %v22237_v4  ;;  %v22284_v4 = vunpack.c.h.bf16 %v22283_v2  ;;  %v22285_v10 = vunpack.c.l.bf16 %v22283_v2 }
0x2651   : > { %10457 = vmatprep.subr.mxu0 %v22239_v22  ;;  %v22286_v22 = vld [vmem:[#allocation200_spill] sm:$0xff] }
0x2652   : > { %10458 = vmatpush1.msra.mxu0 %v22240_v49  ;;  %v22287_v49 = vunpack.c.h.bf16 %v22286_v22  ;;  %v22288_v9 = vunpack.c.l.bf16 %v22286_v22  ;;  %v22313_v22 = vld [vmem:[#allocation209_spill] sm:$0xff] }
0x2653   : > { %10459 = vmatprep.subr.mxu0 %v22242_v16  ;;  %v22289_v16 = vld [vmem:[#allocation201_spill] sm:$0xff] }
0x2654   : > { %10460 = vmatpush1.msra.mxu0 %v22243_v20  ;;  %v22290_v20 = vunpack.c.h.bf16 %v22289_v16  ;;  %v22291_v58 = vunpack.c.l.bf16 %v22289_v16  ;;  %v22316_v16 = vld [vmem:[#allocation210_spill] sm:$0xff] }
0x2655   : > { %10461 = vmatprep.subr.mxu0 %v22245_v25  ;;  %v22292_v25 = vld [vmem:[#allocation202_spill] sm:$0xff] }
0x2656   : > { %10462 = vmatpush1.msra.mxu0 %v22246_v47  ;;  %v22293_v47 = vunpack.c.h.bf16 %v22292_v25  ;;  %v22294_v55 = vunpack.c.l.bf16 %v22292_v25  ;;  %v22319_v25 = vld [vmem:[#allocation211_spill] sm:$0xff] }
0x2657   : > { %10463 = vmatprep.subr.mxu0 %v22248_v14  ;;  %v22295_v14 = vld [vmem:[#allocation203_spill] sm:$0xff] }
0x2658   : > { %10464 = vmatpush1.msra.mxu0 %v22249_v7  ;;  %v22296_v7 = vunpack.c.h.bf16 %v22295_v14  ;;  %v22297_v54 = vunpack.c.l.bf16 %v22295_v14  ;;  %v22322_v14 = vld [vmem:[#allocation212_spill] sm:$0xff] }
0x2659   : > { %10465 = vmatprep.subr.mxu0 %v22251_v52 }
0x265a   : > { %10466 = vmatpush2.msra.mxu0 %v22252_v35 }
0x265b   : > { %10467 = vmatprep.subr.mxu0 %v22254_v0 }
0x265c   : > { %10468 = vmatpush2.msra.mxu0 %v22255_v34 }
0x265d   : > { %10469 = vmatprep.subr.mxu0 %v22257_v28 }
0x265e   : > { %10470 = vmatpush2.msra.mxu0 %v22258_v27 }
0x265f   : > { %10471 = vmatprep.subr.mxu0 %v22260_v26 }
0x2660   : > { %10472 = vmatpush2.msra.mxu0 %v22261_v21 }
0x2661   : > { %10473 = vmatprep.subr.mxu0 %v22263_v60 }
0x2662   : > { %10474 = vmatpush2.msra.mxu0 %v22264_v43 }
0x2663   : > { %10475 = vmatprep.subr.mxu0 %v22266_v57 }
0x2664   : > { %10476 = vmatpush2.msra.mxu0 %v22267_v44 }
0x2665   : > { %10477 = vmatprep.subr.mxu0 %v22269_v5 }
0x2666   : > { %10478 = vmatpush2.msra.mxu0 %v22270_v1 }
0x2667   : > { %10479 = vmatprep.subr.mxu0 %v22272_v17  ;;  %v22301_v17 = vld [vmem:[#allocation205_spill] sm:$0xff] }
0x2668   : > { %10480 = vmatpush2.msra.mxu0 %v22273_v50  ;;  %v22302_v50 = vunpack.c.h.bf16 %v22301_v17  ;;  %v22303_v11 = vunpack.c.l.bf16 %v22301_v17  ;;  %v22346_v17 = vld [vmem:[#allocation220_spill] sm:$0xff] }
0x2669   : > { %10481 = vmatprep.subr.mxu0 %v22275_v3  ;;  %v22304_v3 = vld [vmem:[#allocation206_spill] sm:$0xff] }
0x266a   : > { %10482 = vmatpush2.msra.mxu0 %v22276_v45  ;;  %v22305_v45 = vunpack.c.h.bf16 %v22304_v3  ;;  %v22306_v63 = vunpack.c.l.bf16 %v22304_v3  ;;  %v22349_v3 = vld [vmem:[#allocation221_spill] sm:$0xff] }
0x266b   : > { %10483 = vmatprep.subr.mxu0 %v22278_v6  ;;  %v11843_v6 = vld [vmem:[%s20275_s19 + $0xd0] sm:$0xff] }
0x266c   : > { %10484 = vmatpush2.msra.mxu0 %v22279_v41  ;;  %v22307_v41 = vld [vmem:[#allocation207_spill] sm:$0xff] }
0x266d   : > { %10485 = vmatprep.subr.mxu0 %v22281_v40  ;;  %v22308_v29 = vunpack.c.h.bf16 %v22307_v41  ;;  %v22309_v40 = vunpack.c.l.bf16 %v22307_v41 }
0x266e   : > { %10486 = vmatpush2.msra.mxu0 %v22282_v23  ;;  %v22310_v23 = vld [vmem:[#allocation208_spill] sm:$0xff] }
0x266f   : > { %10487 = vmatprep.subr.mxu0 %v22284_v4  ;;  %v22311_v2 = vunpack.c.h.bf16 %v22310_v23  ;;  %v22312_v4 = vunpack.c.l.bf16 %v22310_v23 }
0x2670   : > { %10488 = vmatpush2.msra.mxu0 %v22285_v10  ;;  %v11844_v10 = vld [vmem:[%s20275_s19 + $0xd8] sm:$0xff] }
0x2671   : > { %10489 = vmatprep.subr.mxu0 %v22287_v49  ;;  %v22314_v49 = vunpack.c.h.bf16 %v22313_v22 }
0x2672   : > { %10490 = vmatpush2.msra.mxu0 %v22288_v9  ;;  %v22315_v9 = vunpack.c.l.bf16 %v22313_v22 }
0x2673   : > { %10491 = vmatprep.subr.mxu0 %v22290_v20  ;;  %v22317_v20 = vunpack.c.h.bf16 %v22316_v16 }
0x2674   : > { %10492 = vmatpush2.msra.mxu0 %v22291_v58  ;;  %v22318_v58 = vunpack.c.l.bf16 %v22316_v16 }
0x2675   : > { %10493 = vmatprep.subr.mxu0 %v22293_v47  ;;  %v22320_v47 = vunpack.c.h.bf16 %v22319_v25 }
0x2676   : > { %10494 = vmatpush2.msra.mxu0 %v22294_v55  ;;  %v22321_v55 = vunpack.c.l.bf16 %v22319_v25 }
0x2677   : > { %10495 = vmatprep.subr.mxu0 %v22296_v7  ;;  %v22323_v7 = vunpack.c.h.bf16 %v22322_v14 }
0x2678   : > { %10496 = vmatpush2.msra.mxu0 %v22297_v54  ;;  %v22324_v54 = vunpack.c.l.bf16 %v22322_v14 }
0x2679   : > { %10498 = vmatmul.mubr.f32.vlgmr.msra.gmra.mxu0 %v18935_v38 }
0x267a   : > { %10503 = vmatprep.mubr.f32.mxu0 %v18941_v56 }
0x267d   : > { %10504 = vmatmul.mubr.f32.gmra.mxu0 %v18943_v62 }
0x267e   : > { %10509 = vmatprep.mubr.f32.mxu0 %v18949_v36 }
0x2681   : > { %10510 = vmatmul.mubr.f32.gmra.mxu0 %v18951_v13 }
0x2682   : > { %10515 = vmatprep.mubr.f32.mxu0 %v18957_v61 }
0x2685   : > { %10516 = vmatmul.mubr.f32.gmra.mxu0 %v18959_v19 }
0x2686   : > { %10806 = vmatprep.mubr.f32.mxu0 %v21212_v31 }
0x26f9   : > { %v10402_v52 = vpop.f32.mrf.mxu0 }
0x26fa   : > { %v19856_v35 = vadd.f32 %v10402_v52, %v19676_v37  ;;  %v22325_v52 = vld [vmem:[#allocation213_spill] sm:$0xff] }
0x26fb   : > { %v10404_v48 = vpop.f32.mrf.mxu0 }
0x26fc   : > { %v19859_v0 = vadd.f32 %v10404_v48, %v19679_v33  ;;  %v22326_v48 = vunpack.c.h.bf16 %v22325_v52 }
0x26fd   : > { %v10408_v34 = vpop.f32.mrf.mxu0 }
0x26fe   : > { %v19862_v30 = vadd.f32 %v10408_v34, %v19682_v42  ;;  %v22327_v34 = vunpack.c.l.bf16 %v22325_v52 }
0x26ff   : > { %v10410_v28 = vpop.f32.mrf.mxu0 }
0x2700   : > { %v19865_v27 = vadd.f32 %v10410_v28, %v19685_v15  ;;  %v22328_v28 = vld [vmem:[#allocation214_spill] sm:$0xff] }
0x2701   : > { %v10414_v59 = vpop.f32.mrf.mxu0 }
0x2702   : > { %v19868_v26 = vadd.f32 %v10414_v59, %v19688_v46  ;;  %v22329_v59 = vunpack.c.h.bf16 %v22328_v28 }
0x2703   : > { %v10416_v21 = vpop.f32.mrf.mxu0 }
0x2704   : > { %v19871_v37 = vadd.f32 %v10416_v21, %v19691_v51  ;;  %v11841_v51 = vld [vmem:[%s20275_s19 + $0xc0] sm:$0xff]  ;;  %v22330_v21 = vunpack.c.l.bf16 %v22328_v28 }
0x2705   : > { %v10420_v12 = vpop.f32.mrf.mxu0 }
0x2706   : > { %v19874_v33 = vadd.f32 %v10420_v12, %v19694_v53  ;;  %v22298_v53 = vld [vmem:[#allocation204_spill] sm:$0xff]  ;;  %v22331_v12 = vld [vmem:[#allocation215_spill] sm:$0xff] }
0x2707   : > { %v10422_v60 = vpop.f32.mrf.mxu0  ;;  %v22300_v1 = vunpack.c.l.bf16 %v22298_v53 }
0x2708   : > { %v19877_v42 = vadd.f32 %v10422_v60, %v19697_v8  ;;  %v22299_v8 = vunpack.c.h.bf16 %v22298_v53  ;;  %v22332_v60 = vunpack.c.h.bf16 %v22331_v12 }
0x2739   : > { %v10499_v43 = vpop.f32.mrf.mxu0 }
0x273b   : > { %v10501_v24 = vpop.f32.mrf.mxu0 }
0x273d   : > { %v10505_v15 = vpop.f32.mrf.mxu0 }
0x273f   : > { %v10507_v57 = vpop.f32.mrf.mxu0 }
0x2741   : > { %v10511_v44 = vpop.f32.mrf.mxu0 }
0x2743   : > { %v10513_v18 = vpop.f32.mrf.mxu0 }
0x2745   : > { %v10517_v46 = vpop.f32.mrf.mxu0 }
0x2747   : > { %v10519_v5 = vpop.f32.mrf.mxu0 }
0x2748   : > { %10563 = vmatprep.subr.mxu1 %v10519_v5  ;;  %v22340_v5 = vld [vmem:[#allocation218_spill] sm:$0xff] }
0x2749   : > { %10564 = vmatpush1.msra.mxu1 %v10517_v46  ;;  %v22342_v53 = vunpack.c.l.bf16 %v22340_v5 }
0x274a   : > { %10565 = vmatprep.subr.mxu1 %v10513_v18 }
0x274b   : > { %10566 = vmatpush1.msra.mxu1 %v10511_v44  ;;  %v22337_v44 = vld [vmem:[#allocation217_spill] sm:$0xff] }
0x274c   : > { %10567 = vmatprep.subr.mxu1 %v10507_v57  ;;  %v22338_v18 = vunpack.c.h.bf16 %v22337_v44  ;;  %v22339_v46 = vunpack.c.l.bf16 %v22337_v44 }
0x274d   : > { %10568 = vmatpush1.msra.mxu1 %v10505_v15 }
0x274e   : > { %10569 = vmatprep.subr.mxu1 %v10501_v24  ;;  %v22334_v24 = vld [vmem:[#allocation216_spill] sm:$0xff] }
0x274f   : > { %10570 = vmatpush1.msra.mxu1 %v10499_v43  ;;  %v22333_v43 = vunpack.c.l.bf16 %v22331_v12  ;;  %v22335_v15 = vunpack.c.h.bf16 %v22334_v24  ;;  %v22336_v57 = vunpack.c.l.bf16 %v22334_v24 }
0x2750   : > { %11845 = vmatmul.mubr.msk.f32.vlgmr.msra.gmra.mxu1 %vm7295_vm5, %v11841_v51  ;;  %10636 = vmatprep.subr.mxu1 %v22299_v8  ;;  %v22341_v51 = vunpack.c.h.bf16 %v22340_v5  ;;  %v22343_v8 = vld [vmem:[#allocation219_spill] sm:$0xff] }
0x2751   : > { %10637 = vmatpush1.msra.mxu1 %v22300_v1  ;;  %10609 = vmatprep.mubr.f32.mxu1 %v21212_v31  ;;  %v22344_v1 = vunpack.c.h.bf16 %v22343_v8 }
0x2752   : > { %10638 = vmatprep.subr.mxu1 %v22302_v50  ;;  %v22347_v50 = vunpack.c.h.bf16 %v22346_v17 }
0x2753   : > { %10639 = vmatpush1.msra.mxu1 %v22303_v11  ;;  %v22348_v11 = vunpack.c.l.bf16 %v22346_v17 }
0x2754   : > { %11846 = vmatmul.mubr.msk.f32.gmra.mxu1 %vm7295_vm5, %v11842_v39  ;;  %10640 = vmatprep.subr.mxu1 %v22305_v45  ;;  %v22345_v39 = vunpack.c.l.bf16 %v22343_v8  ;;  %v22350_v45 = vunpack.c.h.bf16 %v22349_v3 }
0x2755   : > { %10641 = vmatpush1.msra.mxu1 %v22306_v63  ;;  %10615 = vmatprep.mubr.f32.mxu1 %v21212_v31  ;;  %v22351_v63 = vunpack.c.l.bf16 %v22349_v3 }
0x2756   : > { %10642 = vmatprep.subr.mxu1 %v22308_v29 }
0x2757   : > { %10643 = vmatpush1.msra.mxu1 %v22309_v40  ;;  %v22355_v40 = vld [vmem:[#allocation223_spill] sm:$0xff] }
0x2758   : > { %11847 = vmatmul.mubr.msk.f32.gmra.mxu1 %vm7295_vm5, %v11843_v6  ;;  %10644 = vmatprep.subr.mxu1 %v22311_v2  ;;  %v22352_v6 = vld [vmem:[#allocation222_spill] sm:$0xff]  ;;  %v22356_v23 = vunpack.c.h.bf16 %v22355_v40  ;;  %v22357_v2 = vunpack.c.l.bf16 %v22355_v40 }
0x2759   : > { %10645 = vmatpush1.msra.mxu1 %v22312_v4  ;;  %10621 = vmatprep.mubr.f32.mxu1 %v21212_v31  ;;  %v22353_v41 = vunpack.c.h.bf16 %v22352_v6  ;;  %v22354_v29 = vunpack.c.l.bf16 %v22352_v6  ;;  %v22358_v4 = vld [vmem:[#allocation224_spill] sm:$0xff] }
0x275a   : > { %10646 = vmatprep.subr.mxu1 %v22314_v49  ;;  %v22360_v22 = vunpack.c.l.bf16 %v22358_v4  ;;  %v22361_v49 = vld [vmem:[#allocation225_spill] sm:$0xff] }
0x275b   : > { %10647 = vmatpush1.msra.mxu1 %v22315_v9  ;;  %v22362_v9 = vunpack.c.h.bf16 %v22361_v49  ;;  %v22363_v16 = vunpack.c.l.bf16 %v22361_v49 }
0x275c   : > { %11848 = vmatmul.mubr.msk.f32.gmra.mxu1 %vm7295_vm5, %v11844_v10  ;;  %10648 = vmatprep.subr.mxu1 %v22317_v20  ;;  %v22359_v10 = vunpack.c.h.bf16 %v22358_v4  ;;  %v22364_v20 = vld [vmem:[#allocation226_spill] sm:$0xff] }
0x275d   : > { %10649 = vmatpush1.msra.mxu1 %v22318_v58  ;;  %10700 = vmatprep.mubr.f32.mxu1 %v18933_v32  ;;  %v22365_v58 = vunpack.c.h.bf16 %v22364_v20  ;;  %v22366_v25 = vunpack.c.l.bf16 %v22364_v20 }
0x275e   : > { %10650 = vmatprep.subr.mxu1 %v22320_v47  ;;  %v22367_v47 = vld [vmem:[#allocation227_spill] sm:$0xff] }
0x275f   : > { %10651 = vmatpush1.msra.mxu1 %v22321_v55  ;;  %v22368_v55 = vunpack.c.h.bf16 %v22367_v47  ;;  %v22369_v14 = vunpack.c.l.bf16 %v22367_v47  ;;  %v11850_v47 = vld [vmem:[%s20275_s19 + $0xe8] sm:$0xff] }
0x2760   : > { %10652 = vmatprep.subr.mxu1 %v22323_v7  ;;  %v22370_v7 = vld [vmem:[#allocation228_spill] sm:$0xff] }
0x2761   : > { %10653 = vmatpush1.msra.mxu1 %v22324_v54  ;;  %v22371_v54 = vunpack.c.h.bf16 %v22370_v7  ;;  %v22372_v52 = vunpack.c.l.bf16 %v22370_v7 }
0x2762   : > { %10654 = vmatprep.subr.mxu1 %v22326_v48  ;;  %v22373_v48 = vld [vmem:[#allocation229_spill] sm:$0xff] }
0x2763   : > { %10655 = vmatpush1.msra.mxu1 %v22327_v34  ;;  %v22374_v34 = vunpack.c.h.bf16 %v22373_v48  ;;  %v22375_v28 = vunpack.c.l.bf16 %v22373_v48 }
0x2764   : > { %10656 = vmatprep.subr.mxu1 %v22329_v59  ;;  %v22376_v59 = vld [vmem:[#allocation230_spill] sm:$0xff] }
0x2765   : > { %10657 = vmatpush1.msra.mxu1 %v22330_v21  ;;  %v22377_v21 = vunpack.c.h.bf16 %v22376_v59  ;;  %v22378_v12 = vunpack.c.l.bf16 %v22376_v59 }
0x2766   : > { %10658 = vmatprep.subr.mxu1 %v22332_v60  ;;  %v22379_v60 = vld [vmem:[#allocation231_spill] sm:$0xff] }
0x2767   : > { %10659 = vmatpush1.msra.mxu1 %v22333_v43  ;;  %v22380_v43 = vunpack.c.h.bf16 %v22379_v60  ;;  %v22381_v24 = vunpack.c.l.bf16 %v22379_v60 }
0x2768   : > { %10660 = vmatprep.subr.mxu1 %v22335_v15  ;;  %v22382_v15 = vld [vmem:[#allocation232_spill] sm:$0xff] }
0x2769   : > { %10661 = vmatpush1.msra.mxu1 %v22336_v57  ;;  %v22383_v57 = vunpack.c.h.bf16 %v22382_v15  ;;  %v22384_v44 = vunpack.c.l.bf16 %v22382_v15  ;;  %v22409_v15 = vld [vmem:[#allocation241_spill] sm:$0xff] }
0x276a   : > { %10662 = vmatprep.subr.mxu1 %v22338_v18  ;;  %v22385_v18 = vld [vmem:[#allocation233_spill] sm:$0xff] }
0x276b   : > { %10663 = vmatpush1.msra.mxu1 %v22339_v46  ;;  %v22386_v46 = vunpack.c.h.bf16 %v22385_v18  ;;  %v22387_v5 = vunpack.c.l.bf16 %v22385_v18  ;;  %v22412_v18 = vld [vmem:[#allocation242_spill] sm:$0xff] }
0x276c   : > { %10664 = vmatprep.subr.mxu1 %v22341_v51  ;;  %v22388_v51 = vld [vmem:[#allocation234_spill] sm:$0xff] }
0x276d   : > { %10665 = vmatpush1.msra.mxu1 %v22342_v53  ;;  %v22389_v53 = vunpack.c.h.bf16 %v22388_v51  ;;  %v22390_v8 = vunpack.c.l.bf16 %v22388_v51  ;;  %v22415_v51 = vld [vmem:[#allocation243_spill] sm:$0xff] }
0x276e   : > { %10666 = vmatprep.subr.mxu1 %v22344_v1  ;;  %v22391_v1 = vld [vmem:[#allocation235_spill] sm:$0xff] }
0x276f   : > { %10667 = vmatpush1.msra.mxu1 %v22345_v39  ;;  %v22392_v39 = vunpack.c.h.bf16 %v22391_v1  ;;  %v22393_v17 = vunpack.c.l.bf16 %v22391_v1  ;;  %v22418_v1 = vld [vmem:[#allocation244_spill] sm:$0xff] }
0x2770   : > { %10668 = vmatprep.subr.mxu1 %v22347_v50 }
0x2771   : > { %10669 = vmatpush2.msra.mxu1 %v22348_v11 }
0x2772   : > { %10670 = vmatprep.subr.mxu1 %v22350_v45 }
0x2773   : > { %10671 = vmatpush2.msra.mxu1 %v22351_v63 }
0x2774   : > { %10672 = vmatprep.subr.mxu1 %v22353_v41 }
0x2775   : > { %10673 = vmatpush2.msra.mxu1 %v22354_v29 }
0x2776   : > { %10674 = vmatprep.subr.mxu1 %v22356_v23 }
0x2777   : > { %10675 = vmatpush2.msra.mxu1 %v22357_v2 }
0x2778   : > { %10676 = vmatprep.subr.mxu1 %v22359_v10 }
0x2779   : > { %10677 = vmatpush2.msra.mxu1 %v22360_v22 }
0x277a   : > { %10678 = vmatprep.subr.mxu1 %v22362_v9 }
0x277b   : > { %10679 = vmatpush2.msra.mxu1 %v22363_v16 }
0x277c   : > { %10680 = vmatprep.subr.mxu1 %v22365_v58 }
0x277d   : > { %10681 = vmatpush2.msra.mxu1 %v22366_v25 }
0x277e   : > { %10682 = vmatprep.subr.mxu1 %v22368_v55  ;;  %v22397_v55 = vld [vmem:[#allocation237_spill] sm:$0xff] }
0x277f   : > { %10683 = vmatpush2.msra.mxu1 %v22369_v14  ;;  %v22398_v14 = vunpack.c.h.bf16 %v22397_v55  ;;  %v22399_v7 = vunpack.c.l.bf16 %v22397_v55 }
0x2780   : > { %10684 = vmatprep.subr.mxu1 %v22371_v54  ;;  %v22400_v54 = vld [vmem:[#allocation238_spill] sm:$0xff] }
0x2781   : > { %10685 = vmatpush2.msra.mxu1 %v22372_v52  ;;  %v22401_v52 = vunpack.c.h.bf16 %v22400_v54  ;;  %v22402_v48 = vunpack.c.l.bf16 %v22400_v54 }
0x2782   : > { %10686 = vmatprep.subr.mxu1 %v22374_v34  ;;  %v11851_v34 = vld [vmem:[%s20275_s19 + $0xf0] sm:$0xff] }
0x2783   : > { %10687 = vmatpush2.msra.mxu1 %v22375_v28  ;;  %v22403_v28 = vld [vmem:[#allocation239_spill] sm:$0xff] }
0x2784   : > { %10688 = vmatprep.subr.mxu1 %v22377_v21  ;;  %v22404_v59 = vunpack.c.h.bf16 %v22403_v28  ;;  %v22405_v21 = vunpack.c.l.bf16 %v22403_v28 }
0x2785   : > { %10689 = vmatpush2.msra.mxu1 %v22378_v12  ;;  %v22406_v12 = vld [vmem:[#allocation240_spill] sm:$0xff] }
0x2786   : > { %10690 = vmatprep.subr.mxu1 %v22380_v43  ;;  %v22407_v60 = vunpack.c.h.bf16 %v22406_v12  ;;  %v22408_v43 = vunpack.c.l.bf16 %v22406_v12 }
0x2787   : > { %10691 = vmatpush2.msra.mxu1 %v22381_v24  ;;  %v11852_v24 = vld [vmem:[%s20275_s19 + $0xf8] sm:$0xff] }
0x2788   : > { %10692 = vmatprep.subr.mxu1 %v22383_v57  ;;  %v22410_v57 = vunpack.c.h.bf16 %v22409_v15 }
0x2789   : > { %10693 = vmatpush2.msra.mxu1 %v22384_v44  ;;  %v22411_v44 = vunpack.c.l.bf16 %v22409_v15  ;;  %v22457_v15 = vld [vmem:[#allocation257_spill] sm:$0xff] }
0x278a   : > { %10694 = vmatprep.subr.mxu1 %v22386_v46  ;;  %v22413_v46 = vunpack.c.h.bf16 %v22412_v18 }
0x278b   : > { %10695 = vmatpush2.msra.mxu1 %v22387_v5  ;;  %v22414_v5 = vunpack.c.l.bf16 %v22412_v18  ;;  %v22460_v18 = vld [vmem:[#allocation258_spill] sm:$0xff] }
0x278c   : > { %10696 = vmatprep.subr.mxu1 %v22389_v53  ;;  %v22416_v53 = vunpack.c.h.bf16 %v22415_v51 }
0x278d   : > { %10697 = vmatpush2.msra.mxu1 %v22390_v8  ;;  %v22417_v8 = vunpack.c.l.bf16 %v22415_v51  ;;  %v22463_v51 = vld [vmem:[#allocation259_spill] sm:$0xff] }
0x278e   : > { %10698 = vmatprep.subr.mxu1 %v22392_v39  ;;  %v22419_v39 = vunpack.c.h.bf16 %v22418_v1 }
0x278f   : > { %10699 = vmatpush2.msra.mxu1 %v22393_v17  ;;  %v22420_v17 = vunpack.c.l.bf16 %v22418_v1  ;;  %v22466_v1 = vld [vmem:[#allocation260_spill] sm:$0xff] }
0x2790   : > { %10701 = vmatmul.mubr.f32.vlgmr.msra.gmra.mxu1 %v18935_v38 }
0x2791   : > { %10706 = vmatprep.mubr.f32.mxu1 %v18941_v56 }
0x2794   : > { %10707 = vmatmul.mubr.f32.gmra.mxu1 %v18943_v62 }
0x2795   : > { %10712 = vmatprep.mubr.f32.mxu1 %v18949_v36 }
0x2798   : > { %10713 = vmatmul.mubr.f32.gmra.mxu1 %v18951_v13 }
0x2799   : > { %10718 = vmatprep.mubr.f32.mxu1 %v18957_v61 }
0x279c   : > { %10719 = vmatmul.mubr.f32.gmra.mxu1 %v18959_v19 }
0x279d   : > { %11009 = vmatprep.mubr.f32.mxu1 %v21212_v31 }
0x2810   : > { %v10605_v50 = vpop.f32.mrf.mxu1 }
0x2811   : > { %v20036_v11 = vadd.f32 %v10605_v50, %v19856_v35  ;;  %v22421_v50 = vld [vmem:[#allocation245_spill] sm:$0xff] }
0x2812   : > { %v10607_v3 = vpop.f32.mrf.mxu1 }
0x2813   : > { %v20039_v45 = vadd.f32 %v10607_v3, %v19859_v0  ;;  %v22422_v3 = vunpack.c.h.bf16 %v22421_v50 }
0x2814   : > { %v10611_v63 = vpop.f32.mrf.mxu1 }
0x2815   : > { %v20042_v6 = vadd.f32 %v10611_v63, %v19862_v30  ;;  %v22423_v63 = vunpack.c.l.bf16 %v22421_v50  ;;  %v22469_v50 = vld [vmem:[#allocation261_spill] sm:$0xff] }
0x2816   : > { %v10613_v41 = vpop.f32.mrf.mxu1 }
0x2817   : > { %v20045_v29 = vadd.f32 %v10613_v41, %v19865_v27  ;;  %v22424_v41 = vld [vmem:[#allocation246_spill] sm:$0xff] }
0x2818   : > { %v10617_v40 = vpop.f32.mrf.mxu1 }
0x2819   : > { %v20048_v23 = vadd.f32 %v10617_v40, %v19868_v26  ;;  %v22426_v40 = vunpack.c.l.bf16 %v22424_v41 }
0x281a   : > { %v10619_v2 = vpop.f32.mrf.mxu1 }
0x281b   : > { %v20051_v35 = vadd.f32 %v10619_v2, %v19871_v37  ;;  %v11849_v37 = vld [vmem:[%s20275_s19 + $0xe0] sm:$0xff]  ;;  %v22427_v2 = vld [vmem:[#allocation247_spill] sm:$0xff] }
0x281c   : > { %v10623_v4 = vpop.f32.mrf.mxu1 }
0x281d   : > { %v20054_v0 = vadd.f32 %v10623_v4, %v19874_v33  ;;  %v22394_v33 = vld [vmem:[#allocation236_spill] sm:$0xff]  ;;  %v22428_v4 = vunpack.c.h.bf16 %v22427_v2 }
0x281e   : > { %v10625_v10 = vpop.f32.mrf.mxu1  ;;  %v22396_v25 = vunpack.c.l.bf16 %v22394_v33 }
0x281f   : > { %v20057_v30 = vadd.f32 %v10625_v10, %v19877_v42  ;;  %v22395_v42 = vunpack.c.h.bf16 %v22394_v33  ;;  %v22429_v10 = vunpack.c.l.bf16 %v22427_v2  ;;  %v22439_v33 = vld [vmem:[#allocation251_spill] sm:$0xff] }
0x2820   : > { %v22475_v2 = vld [vmem:[#allocation263_spill] sm:$0xff] }
0x2850   : > { %v10702_v22 = vpop.f32.mrf.mxu1 }
0x2852   : > { %v10704_v49 = vpop.f32.mrf.mxu1 }
0x2854   : > { %v10708_v27 = vpop.f32.mrf.mxu1 }
0x2856   : > { %v10710_v9 = vpop.f32.mrf.mxu1 }
0x2858   : > { %v10714_v16 = vpop.f32.mrf.mxu1 }
0x285a   : > { %v10716_v20 = vpop.f32.mrf.mxu1 }
0x285c   : > { %v10720_v26 = vpop.f32.mrf.mxu1 }
0x285e   : > { %v10722_v58 = vpop.f32.mrf.mxu1 }
0x285f   : > { %10766 = vmatprep.subr.mxu0 %v10722_v58 }
0x2860   : > { %10767 = vmatpush1.msra.mxu0 %v10720_v26  ;;  %v22436_v26 = vld [vmem:[#allocation250_spill] sm:$0xff] }
0x2861   : > { %10768 = vmatprep.subr.mxu0 %v10716_v20  ;;  %v22437_v58 = vunpack.c.h.bf16 %v22436_v26 }
0x2862   : > { %10769 = vmatpush1.msra.mxu0 %v10714_v16 }
0x2863   : > { %10770 = vmatprep.subr.mxu0 %v10710_v9  ;;  %v22433_v9 = vld [vmem:[#allocation249_spill] sm:$0xff] }
0x2864   : > { %10771 = vmatpush1.msra.mxu0 %v10708_v27  ;;  %v22434_v16 = vunpack.c.h.bf16 %v22433_v9  ;;  %v22435_v20 = vunpack.c.l.bf16 %v22433_v9  ;;  %v22481_v9 = vld [vmem:[#allocation265_spill] sm:$0xff] }
0x2865   : > { %10772 = vmatprep.subr.mxu0 %v10704_v49 }
0x2866   : > { %10773 = vmatpush1.msra.mxu0 %v10702_v22  ;;  %v22430_v22 = vld [vmem:[#allocation248_spill] sm:$0xff] }
0x2867   : > { %11853 = vmatmul.mubr.msk.f32.vlgmr.msra.gmra.mxu0 %vm7295_vm5, %v11849_v37  ;;  %10839 = vmatprep.subr.mxu0 %v22395_v42  ;;  %v22431_v49 = vunpack.c.h.bf16 %v22430_v22  ;;  %v22432_v27 = vunpack.c.l.bf16 %v22430_v22  ;;  %v22438_v37 = vunpack.c.l.bf16 %v22436_v26  ;;  %v22440_v42 = vunpack.c.h.bf16 %v22439_v33  ;;  %v22478_v22 = vld [vmem:[#allocation264_spill] sm:$0xff]  ;;  %v22484_v26 = vld [vmem:[#allocation266_spill] sm:$0xff] }
0x2868   : > { %10840 = vmatpush1.msra.mxu0 %v22396_v25  ;;  %10812 = vmatprep.mubr.f32.mxu0 %v21212_v31  ;;  %v22441_v25 = vunpack.c.l.bf16 %v22439_v33  ;;  %v22487_v33 = vld [vmem:[#allocation267_spill] sm:$0xff] }
0x2869   : > { %10841 = vmatprep.subr.mxu0 %v22398_v14 }
0x286a   : > { %10842 = vmatpush1.msra.mxu0 %v22399_v7  ;;  %v22445_v7 = vld [vmem:[#allocation253_spill] sm:$0xff] }
0x286b   : > { %11854 = vmatmul.mubr.msk.f32.gmra.mxu0 %vm7295_vm5, %v11850_v47  ;;  %10843 = vmatprep.subr.mxu0 %v22401_v52  ;;  %v22442_v47 = vld [vmem:[#allocation252_spill] sm:$0xff]  ;;  %v22446_v54 = vunpack.c.h.bf16 %v22445_v7  ;;  %v22447_v52 = vunpack.c.l.bf16 %v22445_v7 }
0x286c   : > { %10844 = vmatpush1.msra.mxu0 %v22402_v48  ;;  %10818 = vmatprep.mubr.f32.mxu0 %v21212_v31  ;;  %v22443_v55 = vunpack.c.h.bf16 %v22442_v47  ;;  %v22444_v14 = vunpack.c.l.bf16 %v22442_v47  ;;  %v22448_v48 = vld [vmem:[#allocation254_spill] sm:$0xff] }
0x286d   : > { %10845 = vmatprep.subr.mxu0 %v22404_v59  ;;  %v22450_v28 = vunpack.c.l.bf16 %v22448_v48  ;;  %v22451_v59 = vld [vmem:[#allocation255_spill] sm:$0xff] }
0x286e   : > { %10846 = vmatpush1.msra.mxu0 %v22405_v21  ;;  %v22452_v21 = vunpack.c.h.bf16 %v22451_v59  ;;  %v22453_v12 = vunpack.c.l.bf16 %v22451_v59 }
0x286f   : > { %11855 = vmatmul.mubr.msk.f32.gmra.mxu0 %vm7295_vm5, %v11851_v34  ;;  %10847 = vmatprep.subr.mxu0 %v22407_v60  ;;  %v22449_v34 = vunpack.c.h.bf16 %v22448_v48  ;;  %v22454_v60 = vld [vmem:[#allocation256_spill] sm:$0xff] }
0x2870   : > { %10848 = vmatpush1.msra.mxu0 %v22408_v43  ;;  %10824 = vmatprep.mubr.f32.mxu0 %v21212_v31  ;;  %v22455_v43 = vunpack.c.h.bf16 %v22454_v60 }
0x2871   : > { %10849 = vmatprep.subr.mxu0 %v22410_v57  ;;  %v22458_v57 = vunpack.c.h.bf16 %v22457_v15 }
0x2872   : > { %10850 = vmatpush1.msra.mxu0 %v22411_v44  ;;  %v22459_v44 = vunpack.c.l.bf16 %v22457_v15 }
0x2873   : > { %11856 = vmatmul.mubr.msk.f32.gmra.mxu0 %vm7295_vm5, %v11852_v24  ;;  %10851 = vmatprep.subr.mxu0 %v22413_v46  ;;  %v22456_v24 = vunpack.c.l.bf16 %v22454_v60  ;;  %v22461_v46 = vunpack.c.h.bf16 %v22460_v18 }
0x2874   : > { %10852 = vmatpush1.msra.mxu0 %v22414_v5  ;;  %10903 = vmatprep.mubr.f32.mxu0 %v18933_v32  ;;  %v22425_v32 = vunpack.c.h.bf16 %v22424_v41  ;;  %v22462_v5 = vunpack.c.l.bf16 %v22460_v18  ;;  %v22472_v41 = vld [vmem:[#allocation262_spill] sm:$0xff] }
0x2875   : > { %10853 = vmatprep.subr.mxu0 %v22416_v53  ;;  %v22464_v53 = vunpack.c.h.bf16 %v22463_v51 }
0x2876   : > { %10854 = vmatpush1.msra.mxu0 %v22417_v8  ;;  %v22465_v8 = vunpack.c.l.bf16 %v22463_v51 }
0x2877   : > { %10855 = vmatprep.subr.mxu0 %v22419_v39  ;;  %v22467_v39 = vunpack.c.h.bf16 %v22466_v1 }
0x2878   : > { %10856 = vmatpush1.msra.mxu0 %v22420_v17  ;;  %v22468_v17 = vunpack.c.l.bf16 %v22466_v1 }
0x2879   : > { %10857 = vmatprep.subr.mxu0 %v22422_v3  ;;  %v22470_v3 = vunpack.c.h.bf16 %v22469_v50 }
0x287a   : > { %10858 = vmatpush1.msra.mxu0 %v22423_v63  ;;  %v22471_v63 = vunpack.c.l.bf16 %v22469_v50 }
0x287b   : > { %10859 = vmatprep.subr.mxu0 %v22425_v32  ;;  %v22473_v32 = vunpack.c.h.bf16 %v22472_v41 }
0x287c   : > { %10860 = vmatpush1.msra.mxu0 %v22426_v40  ;;  %v22474_v40 = vunpack.c.l.bf16 %v22472_v41 }
0x287d   : > { %10861 = vmatprep.subr.mxu0 %v22428_v4  ;;  %v22476_v4 = vunpack.c.h.bf16 %v22475_v2 }
0x287e   : > { %10862 = vmatpush1.msra.mxu0 %v22429_v10  ;;  %v22477_v10 = vunpack.c.l.bf16 %v22475_v2 }
0x287f   : > { %10863 = vmatprep.subr.mxu0 %v22431_v49  ;;  %v22479_v49 = vunpack.c.h.bf16 %v22478_v22 }
0x2880   : > { %10864 = vmatpush1.msra.mxu0 %v22432_v27  ;;  %v22480_v27 = vunpack.c.l.bf16 %v22478_v22 }
0x2881   : > { %10865 = vmatprep.subr.mxu0 %v22434_v16  ;;  %v22482_v16 = vunpack.c.h.bf16 %v22481_v9 }
0x2882   : > { %10866 = vmatpush1.msra.mxu0 %v22435_v20  ;;  %v22483_v20 = vunpack.c.l.bf16 %v22481_v9 }
0x2883   : > { %10867 = vmatprep.subr.mxu0 %v22437_v58  ;;  %v22485_v58 = vunpack.c.h.bf16 %v22484_v26 }
0x2884   : > { %10868 = vmatpush1.msra.mxu0 %v22438_v37  ;;  %v22486_v37 = vunpack.c.l.bf16 %v22484_v26 }
0x2885   : > { %10869 = vmatprep.subr.mxu0 %v22440_v42  ;;  %v22488_v42 = vunpack.c.h.bf16 %v22487_v33 }
0x2886   : > { %10870 = vmatpush1.msra.mxu0 %v22441_v25  ;;  %v22489_v25 = vunpack.c.l.bf16 %v22487_v33 }
0x2887   : > { %10871 = vmatprep.subr.mxu0 %v22443_v55 }
0x2888   : > { %10872 = vmatpush2.msra.mxu0 %v22444_v14 }
0x2889   : > { %10873 = vmatprep.subr.mxu0 %v22446_v54 }
0x288a   : > { %10874 = vmatpush2.msra.mxu0 %v22447_v52 }
0x288b   : > { %10875 = vmatprep.subr.mxu0 %v22449_v34 }
0x288c   : > { %10876 = vmatpush2.msra.mxu0 %v22450_v28 }
0x288d   : > { %10877 = vmatprep.subr.mxu0 %v22452_v21 }
0x288e   : > { %10878 = vmatpush2.msra.mxu0 %v22453_v12 }
0x288f   : > { %10879 = vmatprep.subr.mxu0 %v22455_v43 }
0x2890   : > { %10880 = vmatpush2.msra.mxu0 %v22456_v24 }
0x2891   : > { %10881 = vmatprep.subr.mxu0 %v22458_v57 }
0x2892   : > { %10882 = vmatpush2.msra.mxu0 %v22459_v44 }
0x2893   : > { %10883 = vmatprep.subr.mxu0 %v22461_v46  ;;  %v11064_v46 = vpop.permute.xlu1 %11063 }
0x2894   : > { %10884 = vmatpush2.msra.mxu0 %v22462_v5 }
0x2895   : > { %10885 = vmatprep.subr.mxu0 %v22464_v53 }
0x2896   : > { %10886 = vmatpush2.msra.mxu0 %v22465_v8  ;;  %v11059_v8 = vpop.permute.xlu0 %11058 }
0x2897   : > { %10887 = vmatprep.subr.mxu0 %v22467_v39 }
0x2898   : > { %10888 = vmatpush2.msra.mxu0 %v22468_v17 }
0x2899   : > { %10889 = vmatprep.subr.mxu0 %v22470_v3 }
0x289a   : > { %10890 = vmatpush2.msra.mxu0 %v22471_v63 }
0x289b   : > { %10891 = vmatprep.subr.mxu0 %v22473_v32 }
0x289c   : > { %10892 = vmatpush2.msra.mxu0 %v22474_v40  ;;  %v11054_v40 = vpop.permute.xlu1 %11053 }
0x289d   : > { %10893 = vmatprep.subr.mxu0 %v22476_v4 }
0x289e   : > { %10894 = vmatpush2.msra.mxu0 %v22477_v10 }
0x289f   : > { %10895 = vmatprep.subr.mxu0 %v22479_v49  ;;  %v11049_v49 = vpop.permute.xlu0 %11048 }
0x28a0   : > { %10896 = vmatpush2.msra.mxu0 %v22480_v27 }
0x28a1   : > { %10897 = vmatprep.subr.mxu0 %v22482_v16 }
0x28a2   : > { %10898 = vmatpush2.msra.mxu0 %v22483_v20 }
0x28a3   : > { %10899 = vmatprep.subr.mxu0 %v22485_v58 }
0x28a4   : > { %10900 = vmatpush2.msra.mxu0 %v22486_v37 }
0x28a5   : > { %10901 = vmatprep.subr.mxu0 %v22488_v42 }
0x28a6   : > { %10902 = vmatpush2.msra.mxu0 %v22489_v25 }
0x28a7   : > { %10904 = vmatmul.mubr.f32.vlgmr.msra.gmra.mxu0 %v18935_v38 }
0x28a8   : > { %10909 = vmatprep.mubr.f32.mxu0 %v18941_v56 }
0x28ab   : > { %10910 = vmatmul.mubr.f32.gmra.mxu0 %v18943_v62 }
0x28ac   : > { %10915 = vmatprep.mubr.f32.mxu0 %v18949_v36 }
0x28af   : > { %10916 = vmatmul.mubr.f32.gmra.mxu0 %v18951_v13 }
0x28b0   : > { %10921 = vmatprep.mubr.f32.mxu0 %v18957_v61 }
0x28b3   : > { %10922 = vmatmul.mubr.f32.gmra.mxu0 %v18959_v19 }
0x2927   : > { %v10808_v47 = vpop.f32.mrf.mxu0 }
0x2928   : > { %v20215_v55 = vadd.f32 %v10808_v47, %v20036_v11  ;;  %v11082_v47 = vld [vmem:[%s20277_s21] sm:$0x1f] }
0x2929   : > { %v10810_v14 = vpop.f32.mrf.mxu0 }
0x292a   : > { %v10832_v7 = vadd.f32 %v10810_v14, %v20039_v45 }
0x292b   : > { %v10814_v38 = vpop.f32.mrf.mxu0 }
0x292c   : > { %v10833_v56 = vadd.f32 %v10814_v38, %v20042_v6 }
0x292d   : > { %v10816_v54 = vpop.f32.mrf.mxu0 }
0x292e   : > { %v10834_v62 = vadd.f32 %v10816_v54, %v20045_v29 }
0x292f   : > { %v10820_v36 = vpop.f32.mrf.mxu0 }
0x2930   : > { %v10835_v13 = vadd.f32 %v10820_v36, %v20048_v23  ;;  %v11857_v23 = vld [vmem:[%s20275_s19 + $0x100] sm:$0xff] }
0x2931   : > { %v10822_v52 = vpop.f32.mrf.mxu0 }
0x2932   : > { %v10836_v61 = vadd.f32 %v10822_v52, %v20051_v35  ;;  %v11858_v35 = vld [vmem:[%s20275_s19 + $0x108] sm:$0xff] }
0x2933   : > { %v10826_v19 = vpop.f32.mrf.mxu0 }
0x2934   : > { %v10837_v48 = vadd.f32 %v10826_v19, %v20054_v0  ;;  %v11859_v0 = vld [vmem:[%s20275_s19 + $0x110] sm:$0xff] }
0x2935   : > { %v10828_v11 = vpop.f32.mrf.mxu0 }
0x2936   : > { %v10838_v34 = vadd.f32 %v10828_v11, %v20057_v30  ;;  %v11860_v30 = vld [vmem:[%s20275_s19 + $0x118] sm:$0xff] }
0x2967   : > { %v10905_v28 = vpop.f32.mrf.mxu0 }
0x2969   : > { %v10907_v45 = vpop.f32.mrf.mxu0 }
0x296b   : > { %v10911_v59 = vpop.f32.mrf.mxu0 }
0x296d   : > { %v10913_v21 = vpop.f32.mrf.mxu0 }
0x296f   : > { %v10917_v6 = vpop.f32.mrf.mxu0 }
0x2971   : > { %v10919_v12 = vpop.f32.mrf.mxu0 }
0x2973   : > { %v10923_v60 = vpop.f32.mrf.mxu0 }
0x2975   : > { %v10925_v29 = vpop.f32.mrf.mxu0 }
0x2976   : > { %10969 = vmatprep.subr.mxu1 %v10925_v29 }
0x2977   : > { %10970 = vmatpush1.msra.mxu1 %v10923_v60 }
0x2978   : > { %10971 = vmatprep.subr.mxu1 %v10919_v12 }
0x2979   : > { %10972 = vmatpush1.msra.mxu1 %v10917_v6 }
0x297a   : > { %10973 = vmatprep.subr.mxu1 %v10913_v21 }
0x297b   : > { %10974 = vmatpush1.msra.mxu1 %v10911_v59 }
0x297c   : > { %10975 = vmatprep.subr.mxu1 %v10907_v45 }
0x297d   : > { %10976 = vmatpush1.msra.mxu1 %v10905_v28 }
0x297e   : > { %11861 = vmatmul.mubr.msk.f32.vlgmr.msra.gmra.mxu1 %vm7295_vm5, %v11857_v23 }
0x297f   : > { %11015 = vmatprep.mubr.f32.mxu1 %v21212_v31 }
0x2982   : > { %11862 = vmatmul.mubr.msk.f32.gmra.mxu1 %vm7295_vm5, %v11858_v35 }
0x2983   : > { %11021 = vmatprep.mubr.f32.mxu1 %v21212_v31 }
0x2986   : > { %11863 = vmatmul.mubr.msk.f32.gmra.mxu1 %vm7295_vm5, %v11859_v0 }
0x2987   : > { %11027 = vmatprep.mubr.f32.mxu1 %v21212_v31 }
0x298a   : > { %11864 = vmatmul.mubr.msk.f32.gmra.mxu1 %vm7295_vm5, %v11860_v30 }
0x298b   : > { %11156 = vmatprep.mubr.f32.mxu1 %v21212_v31 }
0x2a3e   : > { %v11011_v43 = vpop.f32.mrf.mxu1 }
0x2a3f   : > { %v11034_v2 = vadd.f32 %v11011_v43, %v20215_v55  ;;  %v11087_v55 = vpop.permute.xlu1 %11086 }
0x2a40   : > { %v11013_v24 = vpop.f32.mrf.mxu1 }
0x2a41   : > { %v11035_v41 = vadd.f32 %v11013_v24, %v10832_v7  ;;  %v11066_v26 = vadd.f32 %v11049_v49, %v11034_v2 }
0x2a42   : > { %v11017_v15 = vpop.f32.mrf.mxu1 }
0x2a43   : > { %v11036_v3 = vadd.f32 %v11017_v15, %v10833_v56  ;;  %v11067_v16 = vadd.f32 %v11049_v49, %v11035_v41  ;;  %v11074_v25 = vmax.f32 %v11066_v26, 0.0 }
0x2a44   : > { %v11019_v57 = vpop.f32.mrf.mxu1 }
0x2a45   : > { %v11037_v17 = vadd.f32 %v11019_v57, %v10834_v62  ;;  %v11068_v27 = vadd.f32 %v11054_v40, %v11036_v3  ;;  %v11075_v42 = vmax.f32 %v11067_v16, 0.0 }
0x2a46   : > { %v11023_v44 = vpop.f32.mrf.mxu1 }
0x2a47   : > { %v11038_v1 = vadd.f32 %v11023_v44, %v10835_v13  ;;  %v11069_v10 = vadd.f32 %v11054_v40, %v11037_v17  ;;  %v11076_v33 = vmax.f32 %v11068_v27, 0.0 }
0x2a48   : > { %v11025_v18 = vpop.f32.mrf.mxu1 }
0x2a49   : > { %v11039_v51 = vadd.f32 %v11025_v18, %v10836_v61  ;;  %v11070_v4 = vadd.f32 %v11059_v8, %v11038_v1  ;;  %v11077_v37 = vmax.f32 %v11069_v10, 0.0 }
0x2a4a   : > { %v11029_v5 = vpop.f32.mrf.mxu1 }
0x2a4b   : > { %v11040_v53 = vadd.f32 %v11029_v5, %v10837_v48  ;;  %v11071_v32 = vadd.f32 %v11059_v8, %v11039_v51  ;;  %v11078_v58 = vmax.f32 %v11070_v4, 0.0 }
0x2a4c   : > { %v11031_v39 = vpop.f32.mrf.mxu1 }
0x2a4d   : > { %v11041_v50 = vadd.f32 %v11031_v39, %v10838_v34  ;;  %v11072_v63 = vadd.f32 %v11064_v46, %v11040_v53  ;;  %v11079_v20 = vmax.f32 %v11071_v32, 0.0 }
0x2a4f   : > { %v11073_v31 = vadd.f32 %v11064_v46, %v11041_v50  ;;  %v11080_v9 = vmax.f32 %v11072_v63, 0.0 }
0x2a51   : > { %v11081_v22 = vmax.f32 %v11073_v31, 0.0 }
0x2a53   : > { %11116 = vmatprep.subr.mxu1 %v11081_v22 }
0x2a54   : > { %11117 = vmatpush1.msra.mxu1 %v11080_v9 }
0x2a55   : > { %11118 = vmatprep.subr.mxu1 %v11079_v20 }
0x2a56   : > { %11119 = vmatpush1.msra.mxu1 %v11078_v58 }
0x2a57   : > { %11120 = vmatprep.subr.mxu1 %v11077_v37 }
0x2a58   : > { %11121 = vmatpush1.msra.mxu1 %v11076_v33 }
0x2a59   : > { %11122 = vmatprep.subr.mxu1 %v11075_v42 }
0x2a5a   : > { %11123 = vmatpush1.msra.mxu1 %v11074_v25 }
0x2a5b   : > { %11865 = vmatmul.mubr.msk.f32.vlgmr.msra.gmra.mxu1 %vm7295_vm5, %v11082_v47 }
0x2b1b   : > { %v11158_v14 = vpop.f32.mrf.mxu1 }
0x2b1c   : > { %v11159_v7 = vadd.f32 %v11158_v14, %v11087_v55 }
0x2b1d   : > { %v11160_v38 = vpop.f32.mrf.mxu1 }
0x2b1e   : > { %11163 = vst [vmem:[%s754_s24] sm:$0x1f] %v11159_v7  ;;  %v11161_v56 = vadd.f32 %v11160_v38, %v11087_v55 }
0x2b20   : > { %11164 = vst [vmem:[%s754_s24 + $0x8] sm:$0x1f] %v11161_v56 }
0x2b21 PF: > { %s22490_s28 = sld [smem:[#allocation9_spill]] }
0x2b27   : > { %s35_s4 = sadd.s32 1, %s22490_s28  }
0x2b28   : > { %p32_p3 = scmp.ge.s32.totalorder %s35_s4, 4  }
0x2b2a   :  { %34 = sbr.rel (!%p32_p3) target bundleno = 11 (0xb), region = 227 }
0x2b2f   :  { %11186 = vsyncpa [#allocation3], 1 }
0x2b30   :  { %11188 = vsyncpa [#allocation3 + $0x1], 1 }
0x2b31   :  { %11189 = vsyncpa [#allocation5], 1 }

</bundles_post_ra>
